<compile_context>
chip_gen: v7x
topology: tpu7x:2x2x1
jax: 0.10.0
libtpu: 0.0.40
codegen_flags: <defaults>
</compile_context>

<pallas_src>
import functools

import jax
import jax.numpy as jnp
from jax import lax
from jax.experimental import pallas as pl
from jax.experimental.pallas import tpu as pltpu


def _layer_norm(x, gamma, beta, eps=1e-5):
    mu = jnp.mean(x, axis=-1, keepdims=True)
    var = jnp.mean((x - mu) ** 2, axis=-1, keepdims=True)
    return (x - mu) * jax.lax.rsqrt(var + eps) * gamma + beta


# ------------------------------- fused block kernel --------------------------
def block_kernel(x_ref,
                 g1_ref, b1_ref,
                 wqkv_ref,
                 wp_ref, bp_ref,
                 g2_ref, b2_ref,
                 wfc1_ref, bfc1_ref,
                 wfc2_ref, bfc2_ref,
                 o_ref,
                 *, num_heads, batch_tile, seq_len, mlp_tile):
    f32 = jnp.float32
    bf16 = jnp.bfloat16

    rows, C = x_ref.shape                 # rows == batch_tile * seq_len
    d = C // num_heads

    x = x_ref[...].astype(f32)            # bf16 activation carry -> f32 math

    # ---------------- attention branch: x + proj(MHSA(LN1(x))) ----------------
    xn = _layer_norm(x, g1_ref[...], b1_ref[...]).astype(bf16)
    # softmax scale is pre-folded into the Q columns of wqkv (see prepare_block_params)
    qkv = jnp.dot(xn, wqkv_ref[...], preferred_element_type=f32)    # (rows, 3C)
    q = qkv[:, :C]
    k = qkv[:, C:2 * C]
    v = qkv[:, 2 * C:]

    bp = bp_ref[...]
    for b in range(batch_tile):                        # static, Bt is small
        r0 = b * seq_len
        attn = None
        for h in range(num_heads):                     # static head loop, all 2-D ops
            c0 = h * d
            qh = q[r0:r0 + seq_len, c0:c0 + d].astype(bf16)        # (N, d)
            kh = k[r0:r0 + seq_len, c0:c0 + d].astype(bf16)
            vh = v[r0:r0 + seq_len, c0:c0 + d].astype(bf16)
            # scores = q @ k^T  (contract the head dim of both operands)
            s = lax.dot_general(qh, kh, (((1,), (1,)), ((), ())),
                                preferred_element_type=f32)        # (N, N)
            s = s - jnp.max(s, axis=-1, keepdims=True)
            p = jnp.exp(s)
            p = p * pl.reciprocal(jnp.sum(p, axis=-1, keepdims=True), approx=True)
            ov = jnp.dot(p.astype(bf16), vh, preferred_element_type=f32)   # (N, d)
            # head-concat fused into the projection: o_h @ Wp[h*d:(h+1)*d, :]
            ph = jnp.dot(ov.astype(bf16), wp_ref[h], preferred_element_type=f32)
            attn = ph if attn is None else attn + ph
        xr = x[r0:r0 + seq_len, :]
        o_ref[r0:r0 + seq_len, :] = (xr + attn + bp).astype(o_ref.dtype)

    # -------- MLP branch, row-tiled over o_ref: x + fc2(GELU(fc1(LN2(x)))) ----
    g2 = g2_ref[...]
    b2 = b2_ref[...]
    bfc1 = bfc1_ref[...]
    bfc2 = bfc2_ref[...]
    n_tiles = rows // mlp_tile

    def mlp_body(i, carry):
        start = pl.multiple_of(i * mlp_tile, mlp_tile)
        xr = o_ref[pl.ds(start, mlp_tile), :].astype(f32)          # post-attn rows
        xn2 = _layer_norm(xr, g2, b2).astype(bf16)
        h1 = jnp.dot(xn2, wfc1_ref[...], preferred_element_type=f32) + bfc1
        # exact erf GELU (matches torch.nn.GELU default)
        h1 = 0.5 * h1 * (1.0 + lax.erf(h1 * jnp.float32(0.7071067811865476)))
        h2 = jnp.dot(h1.astype(bf16), wfc2_ref[...], preferred_element_type=f32) + bfc2
        o_ref[pl.ds(start, mlp_tile), :] = (xr + h2).astype(o_ref.dtype)
        return carry

    lax.fori_loop(0, n_tiles, mlp_body, 0, unroll=True)


# ------------------------------- wrapper --------------------------------------
def _pick_batch_tile(batch, seq, target_rows=256):
    # largest divisor of `batch` keeping the flattened row count near the MXU
    # row depth (256 on v6e/v7x) without inflating the x/o VMEM blocks.
    bt = 1
    for cand in range(1, batch + 1):
        if batch % cand == 0 and cand * seq <= max(target_rows, seq):
            bt = cand
    return bt


def _pick_row_tile(rows, target=256):
    if rows <= target:
        return rows
    tile = target
    while tile > 8 and rows % tile:
        tile //= 2
    return tile if rows % tile == 0 else rows


def _vmem_limit_bytes():
    try:
        cap = getattr(pltpu.get_tpu_info(), "vmem_capacity_bytes", 64 * 2**20)
    except Exception:
        cap = 64 * 2**20
    # ~96 MiB on v5e/v6e (128 MiB physical), ~48 MiB on v7x (64 MiB physical)
    return int(min(96 * 2**20, (cap * 3) // 4))


def block_forward(x2d, params, num_heads, batch, seq):
    rows_total, C = x2d.shape
    assert rows_total == batch * seq
    hidden = params["wfc1"].shape[1]
    d = C // num_heads

    bt = _pick_batch_tile(batch, seq)
    rows = bt * seq
    mlp_tile = _pick_row_tile(rows)

    kernel = functools.partial(block_kernel, num_heads=num_heads,
                               batch_tile=bt, seq_len=seq, mlp_tile=mlp_tile)

    def run(single_buffer_weights):
        wmode = {"pipeline_mode": pl.Buffered(1)} if single_buffer_weights else {}

        def rep(shape):
            # grid-invariant block: constant index_map (fetched once);
            # Buffered(1) additionally single-buffers it (halves its VMEM).
            return pl.BlockSpec(shape, lambda g, _n=len(shape): (0,) * _n, **wmode)

        return pl.pallas_call(
            kernel,
            out_shape=jax.ShapeDtypeStruct((rows_total, C), x2d.dtype),
            grid=(batch // bt,),
            in_specs=[
                pl.BlockSpec((rows, C), lambda g: (g, 0)),       # x rows (bf16)
                rep((1, C)), rep((1, C)),                        # norm1 gamma/beta
                rep((C, 3 * C)),                                 # fused Wqkv (bf16, Q pre-scaled)
                rep((num_heads, d, C)), rep((1, C)),             # Wp (H,d,C) bf16, bp
                rep((1, C)), rep((1, C)),                        # norm2 gamma/beta
                rep((C, hidden)), rep((1, hidden)),              # fc1 W (bf16), b
                rep((hidden, C)), rep((1, C)),                   # fc2 W (bf16), b
            ],
            out_specs=pl.BlockSpec((rows, C), lambda g: (g, 0)),
            compiler_params=pltpu.CompilerParams(
                dimension_semantics=("parallel",),
                vmem_limit_bytes=_vmem_limit_bytes()),
        )(x2d,
          params["g1"], params["b1"],
          params["wqkv"],
          params["wp"], params["bp"],
          params["g2"], params["b2"],
          params["wfc1"], params["bfc1"],
          params["wfc2"], params["bfc2"])

    try:
        return run(True)
    except Exception:
        # TODO(synk): pl.Buffered(1) single-buffering rejected by this jax/Mosaic
        #             version; fall back to default double-buffered weight blocks.
        return run(False)


def transformer_forward(context, emb_table, blocks_params, num_heads):
    """Transformer.forward: emb(arange(patch_num)) repeated over batch, then blocks."""
    B = context.shape[0]                       # context only supplies the batch size
    N, C = emb_table.shape
    x = jnp.broadcast_to(emb_table.astype(jnp.bfloat16)[None], (B, N, C))
    x = x.reshape(B * N, C)                    # batch-major row layout fed to kernels
    for p in blocks_params:
        x = block_forward(x, p, num_heads, batch=B, seq=N)
    return x.reshape(B, N, C).astype(jnp.float32)


# ------------------------------- parameters -----------------------------------
def init_raw_params(key, dim, hidden):
    """f32 parameters in the PyTorch module's layout (reference path uses these)."""
    ks = jax.random.split(key, 8)
    std = 0.02
    f32 = jnp.float32
    n = lambda k, s: std * jax.random.normal(k, s, f32)
    return {
        "g1": jnp.ones((1, dim), f32), "b1": jnp.zeros((1, dim), f32),
        "wq": n(ks[0], (dim, dim)), "wk": n(ks[1], (dim, dim)), "wv": n(ks[2], (dim, dim)),
        "wp": n(ks[3], (dim, dim)), "bp": n(ks[4], (1, dim)),
        "g2": jnp.ones((1, dim), f32), "b2": jnp.zeros((1, dim), f32),
        "wfc1": n(ks[5], (dim, hidden)), "bfc1": n(ks[6], (1, hidden)),
        "wfc2": n(ks[7], (hidden, dim)), "bfc2": jnp.zeros((1, dim), f32),
    }


def prepare_block_params(raw, num_heads):
    """Host-side prep for the kernel: fused+scaled Wqkv, head-major (H,d,C) Wp, bf16."""
    C = raw["wq"].shape[0]
    d = C // num_heads
    scale = jnp.float32(d ** -0.5)
    bf16 = jnp.bfloat16
    wqkv = jnp.concatenate([raw["wq"] * scale, raw["wk"], raw["wv"]], axis=1)
    return {
        "g1": raw["g1"], "b1": raw["b1"],
        "wqkv": wqkv.astype(bf16),
        "wp": raw["wp"].reshape(num_heads, d, C).astype(bf16),
        "bp": raw["bp"],
        "g2": raw["g2"], "b2": raw["b2"],
        "wfc1": raw["wfc1"].astype(bf16), "bfc1": raw["bfc1"],
        "wfc2": raw["wfc2"].astype(bf16), "bfc2": raw["bfc2"],
    }


# --------------------------- pure-JAX f32 reference ---------------------------
def reference_block(x, raw, num_heads):
    B, N, C = x.shape
    d = C // num_heads
    scale = d ** -0.5

    def ln(t, g, b):
        mu = jnp.mean(t, -1, keepdims=True)
        var = jnp.mean((t - mu) ** 2, -1, keepdims=True)
        return (t - mu) * jax.lax.rsqrt(var + 1e-5) * g + b

    xn = ln(x, raw["g1"], raw["b1"])
    q, k, v = (xn @ raw[w] for w in ("wq", "wk", "wv"))
    q, k, v = (t.reshape(B, N, num_heads, d).transpose(0, 2, 1, 3) for t in (q, k, v))
    attn = jax.nn.softmax((q @ k.transpose(0, 1, 3, 2)) * scale, axis=-1)
    a = (attn @ v).transpose(0, 2, 1, 3).reshape(B, N, C)
    x = x + a @ raw["wp"] + raw["bp"]
    xn2 = ln(x, raw["g2"], raw["b2"])
    h1 = xn2 @ raw["wfc1"] + raw["bfc1"]
    h1 = 0.5 * h1 * (1.0 + jax.lax.erf(h1 * jnp.float32(0.7071067811865476)))
    return x + h1 @ raw["wfc2"] + raw["bfc2"]


def reference_transformer(context, emb_table, raw_blocks, num_heads):
    B = context.shape[0]
    N, C = emb_table.shape
    x = jnp.broadcast_to(emb_table[None], (B, N, C))
    for raw in raw_blocks:
        x = reference_block(x, raw, num_heads)
    return x


if __name__ == "__main__":
    # small but TPU-friendly shapes consistent with the module:
    # patch_num = 4**3 = 64 tokens, embed_dim = 128 (lane-dense), 4 heads, mlp x4
    B = 2
    patch_num = 64
    embed_dim = 128
    num_heads = 4
    mlp_ratio = 4
    hidden = embed_dim * mlp_ratio

    key = jax.random.PRNGKey(0)
    k_ctx, k_emb, k_p = jax.random.split(key, 3)
    # context: only its batch dimension is used (see TODO at top of file)
    context = jax.random.normal(k_ctx, (B, 8, 32), jnp.float32)
    emb_table = jax.random.normal(k_emb, (patch_num, embed_dim), jnp.float32)
    raw = init_raw_params(k_p, embed_dim, hidden)
    blocks = [prepare_block_params(raw, num_heads)]

    out = transformer_forward(context, emb_table, blocks, num_heads)
    out = jax.block_until_ready(out)

    ref = reference_transformer(context, emb_table, [raw], num_heads)
    assert out.shape == (B, patch_num, embed_dim)
    max_err = float(jnp.max(jnp.abs(out - ref)))
    # tolerance accounts for bf16 weights + bf16 activation carry vs. f32 reference
    assert jnp.allclose(out, ref, atol=3e-2, rtol=3e-2), \
        f"mismatch vs reference (max abs err {max_err})"

    print("KERNEL_OK")
</pallas_src>

<mosaic_0001>
module attributes {stable_mosaic.version = 11 : i64} {
  func.func @block_kernel(%arg0: i32, %arg1: memref<128x128xbf16, #tpu.memory_space<vmem>>, %arg2: memref<1x128xf32, #tpu.memory_space<vmem>>, %arg3: memref<1x128xf32, #tpu.memory_space<vmem>>, %arg4: memref<128x384xbf16, #tpu.memory_space<vmem>>, %arg5: memref<4x32x128xbf16, #tpu.memory_space<vmem>>, %arg6: memref<1x128xf32, #tpu.memory_space<vmem>>, %arg7: memref<1x128xf32, #tpu.memory_space<vmem>>, %arg8: memref<1x128xf32, #tpu.memory_space<vmem>>, %arg9: memref<128x512xbf16, #tpu.memory_space<vmem>>, %arg10: memref<1x512xf32, #tpu.memory_space<vmem>>, %arg11: memref<512x128xbf16, #tpu.memory_space<vmem>>, %arg12: memref<1x128xf32, #tpu.memory_space<vmem>>, %arg13: memref<128x128xbf16, #tpu.memory_space<vmem>>) attributes {dimension_semantics = [#tpu.dimension_semantics<parallel>], iteration_bounds = array<i64: 1>, scalar_prefetch = 0 : i64, scratch_operands = 0 : i64, tpu.core_type = #tpu.core_type<tc>, window_params = [{transform_indices = @transform_0, window_bounds = array<i64: 128, 128>}, {pipeline_mode = #tpu.pipeline_mode<synchronous>, transform_indices = @transform_1, window_bounds = array<i64: 1, 128>}, {pipeline_mode = #tpu.pipeline_mode<synchronous>, transform_indices = @transform_2, window_bounds = array<i64: 1, 128>}, {pipeline_mode = #tpu.pipeline_mode<synchronous>, transform_indices = @transform_3, window_bounds = array<i64: 128, 384>}, {pipeline_mode = #tpu.pipeline_mode<synchronous>, transform_indices = @transform_4, window_bounds = array<i64: 4, 32, 128>}, {pipeline_mode = #tpu.pipeline_mode<synchronous>, transform_indices = @transform_5, window_bounds = array<i64: 1, 128>}, {pipeline_mode = #tpu.pipeline_mode<synchronous>, transform_indices = @transform_6, window_bounds = array<i64: 1, 128>}, {pipeline_mode = #tpu.pipeline_mode<synchronous>, transform_indices = @transform_7, window_bounds = array<i64: 1, 128>}, {pipeline_mode = #tpu.pipeline_mode<synchronous>, transform_indices = @transform_8, window_bounds = array<i64: 128, 512>}, {pipeline_mode = #tpu.pipeline_mode<synchronous>, transform_indices = @transform_9, window_bounds = array<i64: 1, 512>}, {pipeline_mode = #tpu.pipeline_mode<synchronous>, transform_indices = @transform_10, window_bounds = array<i64: 512, 128>}, {pipeline_mode = #tpu.pipeline_mode<synchronous>, transform_indices = @transform_11, window_bounds = array<i64: 1, 128>}, {transform_indices = @transform_12, window_bounds = array<i64: 128, 128>}]} {
    %c0 = arith.constant 0 : index
    %c0_0 = arith.constant 0 : index
    %0 = vector.load %arg1[%c0, %c0_0] : memref<128x128xbf16, #tpu.memory_space<vmem>>, vector<128x128xbf16>
    %1 = arith.extf %0 : vector<128x128xbf16> to vector<128x128xf32>
    %c0_1 = arith.constant 0 : index
    %c0_2 = arith.constant 0 : index
    %2 = vector.load %arg2[%c0_1, %c0_2] : memref<1x128xf32, #tpu.memory_space<vmem>>, vector<1x128xf32>
    %c0_3 = arith.constant 0 : index
    %c0_4 = arith.constant 0 : index
    %3 = vector.load %arg3[%c0_3, %c0_4] : memref<1x128xf32, #tpu.memory_space<vmem>>, vector<1x128xf32>
    %cst = arith.constant dense<0.000000e+00> : vector<128xf32>
    %4 = vector.multi_reduction <add>, %1, %cst [1] : vector<128x128xf32> to vector<128xf32>
    %5 = vector.shape_cast %4 : vector<128xf32> to vector<128x1xf32>
    %cst_5 = arith.constant 1.280000e+02 : f32
    %6 = vector.broadcast %cst_5 : f32 to vector<128x1xf32>
    %7 = arith.divf %5, %6 : vector<128x1xf32>
    %8 = vector.broadcast %7 : vector<128x1xf32> to vector<128x128xf32>
    %9 = arith.subf %1, %8 : vector<128x128xf32>
    %10 = arith.mulf %9, %9 : vector<128x128xf32>
    %cst_6 = arith.constant dense<0.000000e+00> : vector<128xf32>
    %11 = vector.multi_reduction <add>, %10, %cst_6 [1] : vector<128x128xf32> to vector<128xf32>
    %12 = vector.shape_cast %11 : vector<128xf32> to vector<128x1xf32>
    %cst_7 = arith.constant 1.280000e+02 : f32
    %13 = vector.broadcast %cst_7 : f32 to vector<128x1xf32>
    %14 = arith.divf %12, %13 : vector<128x1xf32>
    %15 = vector.broadcast %7 : vector<128x1xf32> to vector<128x128xf32>
    %16 = arith.subf %1, %15 : vector<128x128xf32>
    %cst_8 = arith.constant 9.99999974E-6 : f32
    %17 = vector.broadcast %cst_8 : f32 to vector<128x1xf32>
    %18 = arith.addf %14, %17 : vector<128x1xf32>
    %19 = math.rsqrt %18 : vector<128x1xf32>
    %20 = vector.broadcast %19 : vector<128x1xf32> to vector<128x128xf32>
    %21 = arith.mulf %16, %20 : vector<128x128xf32>
    %22 = vector.broadcast %2 : vector<1x128xf32> to vector<128x128xf32>
    %23 = arith.mulf %21, %22 : vector<128x128xf32>
    %24 = vector.broadcast %3 : vector<1x128xf32> to vector<128x128xf32>
    %25 = arith.addf %23, %24 : vector<128x128xf32>
    %26 = arith.truncf %25 : vector<128x128xf32> to vector<128x128xbf16>
    %c0_9 = arith.constant 0 : index
    %c0_10 = arith.constant 0 : index
    %27 = vector.load %arg4[%c0_9, %c0_10] : memref<128x384xbf16, #tpu.memory_space<vmem>>, vector<128x384xbf16>
    %cst_11 = arith.constant dense<0.000000e+00> : vector<128x384xf32>
    %28 = tpu.matmul %26, %27, %cst_11 {dimension_numbers = #tpu.dot_dimension_numbers<[1], [0], [0], [1], [0, 0, 1, 1], [], []>} : vector<128x128xbf16>, vector<128x384xbf16>, vector<128x384xf32> -> vector<128x384xf32>
    %29 = vector.extract_strided_slice %28 {offsets = [0, 0], sizes = [128, 128], strides = [1, 1]} : vector<128x384xf32> to vector<128x128xf32>
    %30 = vector.extract_strided_slice %28 {offsets = [0, 128], sizes = [128, 128], strides = [1, 1]} : vector<128x384xf32> to vector<128x128xf32>
    %31 = vector.extract_strided_slice %28 {offsets = [0, 256], sizes = [128, 128], strides = [1, 1]} : vector<128x384xf32> to vector<128x128xf32>
    %c0_12 = arith.constant 0 : index
    %c0_13 = arith.constant 0 : index
    %32 = vector.load %arg6[%c0_12, %c0_13] : memref<1x128xf32, #tpu.memory_space<vmem>>, vector<1x128xf32>
    %33 = vector.extract_strided_slice %29 {offsets = [0, 0], sizes = [64, 32], strides = [1, 1]} : vector<128x128xf32> to vector<64x32xf32>
    %34 = arith.truncf %33 : vector<64x32xf32> to vector<64x32xbf16>
    %35 = vector.extract_strided_slice %30 {offsets = [0, 0], sizes = [64, 32], strides = [1, 1]} : vector<128x128xf32> to vector<64x32xf32>
    %36 = arith.truncf %35 : vector<64x32xf32> to vector<64x32xbf16>
    %37 = vector.extract_strided_slice %31 {offsets = [0, 0], sizes = [64, 32], strides = [1, 1]} : vector<128x128xf32> to vector<64x32xf32>
    %38 = arith.truncf %37 : vector<64x32xf32> to vector<64x32xbf16>
    %cst_14 = arith.constant dense<0.000000e+00> : vector<64x64xf32>
    %39 = tpu.matmul %34, %36, %cst_14 {dimension_numbers = #tpu.dot_dimension_numbers<[1], [1], [0], [0], [0, 0, 1, 0], [], []>} : vector<64x32xbf16>, vector<64x32xbf16>, vector<64x64xf32> -> vector<64x64xf32>
    %cst_15 = arith.constant dense<0xFF800000> : vector<64xf32>
    %40 = vector.multi_reduction <maximumf>, %39, %cst_15 [1] : vector<64x64xf32> to vector<64xf32>
    %41 = vector.shape_cast %40 : vector<64xf32> to vector<64x1xf32>
    %42 = vector.broadcast %41 : vector<64x1xf32> to vector<64x64xf32>
    %43 = arith.subf %39, %42 : vector<64x64xf32>
    %44 = math.exp %43 : vector<64x64xf32>
    %cst_16 = arith.constant dense<0.000000e+00> : vector<64xf32>
    %45 = vector.multi_reduction <add>, %44, %cst_16 [1] : vector<64x64xf32> to vector<64xf32>
    %46 = vector.shape_cast %45 : vector<64xf32> to vector<64x1xf32>
    %47 = tpu.reciprocal %46 {approx = true} : vector<64x1xf32> -> vector<64x1xf32>
    %48 = vector.broadcast %47 : vector<64x1xf32> to vector<64x64xf32>
    %49 = arith.mulf %44, %48 : vector<64x64xf32>
    %50 = arith.truncf %49 : vector<64x64xf32> to vector<64x64xbf16>
    %cst_17 = arith.constant dense<0.000000e+00> : vector<64x32xf32>
    %51 = tpu.matmul %50, %38, %cst_17 {dimension_numbers = #tpu.dot_dimension_numbers<[1], [0], [0], [1], [0, 0, 1, 1], [], []>} : vector<64x64xbf16>, vector<64x32xbf16>, vector<64x32xf32> -> vector<64x32xf32>
    %52 = arith.truncf %51 : vector<64x32xf32> to vector<64x32xbf16>
    %c0_18 = arith.constant 0 : index
    %c0_19 = arith.constant 0 : index
    %c0_20 = arith.constant 0 : index
    %53 = vector.load %arg5[%c0_18, %c0_19, %c0_20] : memref<4x32x128xbf16, #tpu.memory_space<vmem>>, vector<1x32x128xbf16>
    %54 = vector.shape_cast %53 : vector<1x32x128xbf16> to vector<32x128xbf16>
    %cst_21 = arith.constant dense<0.000000e+00> : vector<64x128xf32>
    %55 = tpu.matmul %52, %54, %cst_21 {dimension_numbers = #tpu.dot_dimension_numbers<[1], [0], [0], [1], [0, 0, 1, 1], [], []>} : vector<64x32xbf16>, vector<32x128xbf16>, vector<64x128xf32> -> vector<64x128xf32>
    %56 = vector.extract_strided_slice %29 {offsets = [0, 32], sizes = [64, 32], strides = [1, 1]} : vector<128x128xf32> to vector<64x32xf32>
    %57 = arith.truncf %56 : vector<64x32xf32> to vector<64x32xbf16>
    %58 = vector.extract_strided_slice %30 {offsets = [0, 32], sizes = [64, 32], strides = [1, 1]} : vector<128x128xf32> to vector<64x32xf32>
    %59 = arith.truncf %58 : vector<64x32xf32> to vector<64x32xbf16>
    %60 = vector.extract_strided_slice %31 {offsets = [0, 32], sizes = [64, 32], strides = [1, 1]} : vector<128x128xf32> to vector<64x32xf32>
    %61 = arith.truncf %60 : vector<64x32xf32> to vector<64x32xbf16>
    %cst_22 = arith.constant dense<0.000000e+00> : vector<64x64xf32>
    %62 = tpu.matmul %57, %59, %cst_22 {dimension_numbers = #tpu.dot_dimension_numbers<[1], [1], [0], [0], [0, 0, 1, 0], [], []>} : vector<64x32xbf16>, vector<64x32xbf16>, vector<64x64xf32> -> vector<64x64xf32>
    %cst_23 = arith.constant dense<0xFF800000> : vector<64xf32>
    %63 = vector.multi_reduction <maximumf>, %62, %cst_23 [1] : vector<64x64xf32> to vector<64xf32>
    %64 = vector.shape_cast %63 : vector<64xf32> to vector<64x1xf32>
    %65 = vector.broadcast %64 : vector<64x1xf32> to vector<64x64xf32>
    %66 = arith.subf %62, %65 : vector<64x64xf32>
    %67 = math.exp %66 : vector<64x64xf32>
    %cst_24 = arith.constant dense<0.000000e+00> : vector<64xf32>
    %68 = vector.multi_reduction <add>, %67, %cst_24 [1] : vector<64x64xf32> to vector<64xf32>
    %69 = vector.shape_cast %68 : vector<64xf32> to vector<64x1xf32>
    %70 = tpu.reciprocal %69 {approx = true} : vector<64x1xf32> -> vector<64x1xf32>
    %71 = vector.broadcast %70 : vector<64x1xf32> to vector<64x64xf32>
    %72 = arith.mulf %67, %71 : vector<64x64xf32>
    %73 = arith.truncf %72 : vector<64x64xf32> to vector<64x64xbf16>
    %cst_25 = arith.constant dense<0.000000e+00> : vector<64x32xf32>
    %74 = tpu.matmul %73, %61, %cst_25 {dimension_numbers = #tpu.dot_dimension_numbers<[1], [0], [0], [1], [0, 0, 1, 1], [], []>} : vector<64x64xbf16>, vector<64x32xbf16>, vector<64x32xf32> -> vector<64x32xf32>
    %75 = arith.truncf %74 : vector<64x32xf32> to vector<64x32xbf16>
    %c1 = arith.constant 1 : index
    %c0_26 = arith.constant 0 : index
    %c0_27 = arith.constant 0 : index
    %76 = vector.load %arg5[%c1, %c0_26, %c0_27] : memref<4x32x128xbf16, #tpu.memory_space<vmem>>, vector<1x32x128xbf16>
    %77 = vector.shape_cast %76 : vector<1x32x128xbf16> to vector<32x128xbf16>
    %cst_28 = arith.constant dense<0.000000e+00> : vector<64x128xf32>
    %78 = tpu.matmul %75, %77, %cst_28 {dimension_numbers = #tpu.dot_dimension_numbers<[1], [0], [0], [1], [0, 0, 1, 1], [], []>} : vector<64x32xbf16>, vector<32x128xbf16>, vector<64x128xf32> -> vector<64x128xf32>
    %79 = arith.addf %55, %78 : vector<64x128xf32>
    %80 = vector.extract_strided_slice %29 {offsets = [0, 64], sizes = [64, 32], strides = [1, 1]} : vector<128x128xf32> to vector<64x32xf32>
    %81 = arith.truncf %80 : vector<64x32xf32> to vector<64x32xbf16>
    %82 = vector.extract_strided_slice %30 {offsets = [0, 64], sizes = [64, 32], strides = [1, 1]} : vector<128x128xf32> to vector<64x32xf32>
    %83 = arith.truncf %82 : vector<64x32xf32> to vector<64x32xbf16>
    %84 = vector.extract_strided_slice %31 {offsets = [0, 64], sizes = [64, 32], strides = [1, 1]} : vector<128x128xf32> to vector<64x32xf32>
    %85 = arith.truncf %84 : vector<64x32xf32> to vector<64x32xbf16>
    %cst_29 = arith.constant dense<0.000000e+00> : vector<64x64xf32>
    %86 = tpu.matmul %81, %83, %cst_29 {dimension_numbers = #tpu.dot_dimension_numbers<[1], [1], [0], [0], [0, 0, 1, 0], [], []>} : vector<64x32xbf16>, vector<64x32xbf16>, vector<64x64xf32> -> vector<64x64xf32>
    %cst_30 = arith.constant dense<0xFF800000> : vector<64xf32>
    %87 = vector.multi_reduction <maximumf>, %86, %cst_30 [1] : vector<64x64xf32> to vector<64xf32>
    %88 = vector.shape_cast %87 : vector<64xf32> to vector<64x1xf32>
    %89 = vector.broadcast %88 : vector<64x1xf32> to vector<64x64xf32>
    %90 = arith.subf %86, %89 : vector<64x64xf32>
    %91 = math.exp %90 : vector<64x64xf32>
    %cst_31 = arith.constant dense<0.000000e+00> : vector<64xf32>
    %92 = vector.multi_reduction <add>, %91, %cst_31 [1] : vector<64x64xf32> to vector<64xf32>
    %93 = vector.shape_cast %92 : vector<64xf32> to vector<64x1xf32>
    %94 = tpu.reciprocal %93 {approx = true} : vector<64x1xf32> -> vector<64x1xf32>
    %95 = vector.broadcast %94 : vector<64x1xf32> to vector<64x64xf32>
    %96 = arith.mulf %91, %95 : vector<64x64xf32>
    %97 = arith.truncf %96 : vector<64x64xf32> to vector<64x64xbf16>
    %cst_32 = arith.constant dense<0.000000e+00> : vector<64x32xf32>
    %98 = tpu.matmul %97, %85, %cst_32 {dimension_numbers = #tpu.dot_dimension_numbers<[1], [0], [0], [1], [0, 0, 1, 1], [], []>} : vector<64x64xbf16>, vector<64x32xbf16>, vector<64x32xf32> -> vector<64x32xf32>
    %99 = arith.truncf %98 : vector<64x32xf32> to vector<64x32xbf16>
    %c2 = arith.constant 2 : index
    %c0_33 = arith.constant 0 : index
    %c0_34 = arith.constant 0 : index
    %100 = vector.load %arg5[%c2, %c0_33, %c0_34] : memref<4x32x128xbf16, #tpu.memory_space<vmem>>, vector<1x32x128xbf16>
    %101 = vector.shape_cast %100 : vector<1x32x128xbf16> to vector<32x128xbf16>
    %cst_35 = arith.constant dense<0.000000e+00> : vector<64x128xf32>
    %102 = tpu.matmul %99, %101, %cst_35 {dimension_numbers = #tpu.dot_dimension_numbers<[1], [0], [0], [1], [0, 0, 1, 1], [], []>} : vector<64x32xbf16>, vector<32x128xbf16>, vector<64x128xf32> -> vector<64x128xf32>
    %103 = arith.addf %79, %102 : vector<64x128xf32>
    %104 = vector.extract_strided_slice %29 {offsets = [0, 96], sizes = [64, 32], strides = [1, 1]} : vector<128x128xf32> to vector<64x32xf32>
    %105 = arith.truncf %104 : vector<64x32xf32> to vector<64x32xbf16>
    %106 = vector.extract_strided_slice %30 {offsets = [0, 96], sizes = [64, 32], strides = [1, 1]} : vector<128x128xf32> to vector<64x32xf32>
    %107 = arith.truncf %106 : vector<64x32xf32> to vector<64x32xbf16>
    %108 = vector.extract_strided_slice %31 {offsets = [0, 96], sizes = [64, 32], strides = [1, 1]} : vector<128x128xf32> to vector<64x32xf32>
    %109 = arith.truncf %108 : vector<64x32xf32> to vector<64x32xbf16>
    %cst_36 = arith.constant dense<0.000000e+00> : vector<64x64xf32>
    %110 = tpu.matmul %105, %107, %cst_36 {dimension_numbers = #tpu.dot_dimension_numbers<[1], [1], [0], [0], [0, 0, 1, 0], [], []>} : vector<64x32xbf16>, vector<64x32xbf16>, vector<64x64xf32> -> vector<64x64xf32>
    %cst_37 = arith.constant dense<0xFF800000> : vector<64xf32>
    %111 = vector.multi_reduction <maximumf>, %110, %cst_37 [1] : vector<64x64xf32> to vector<64xf32>
    %112 = vector.shape_cast %111 : vector<64xf32> to vector<64x1xf32>
    %113 = vector.broadcast %112 : vector<64x1xf32> to vector<64x64xf32>
    %114 = arith.subf %110, %113 : vector<64x64xf32>
    %115 = math.exp %114 : vector<64x64xf32>
    %cst_38 = arith.constant dense<0.000000e+00> : vector<64xf32>
    %116 = vector.multi_reduction <add>, %115, %cst_38 [1] : vector<64x64xf32> to vector<64xf32>
    %117 = vector.shape_cast %116 : vector<64xf32> to vector<64x1xf32>
    %118 = tpu.reciprocal %117 {approx = true} : vector<64x1xf32> -> vector<64x1xf32>
    %119 = vector.broadcast %118 : vector<64x1xf32> to vector<64x64xf32>
    %120 = arith.mulf %115, %119 : vector<64x64xf32>
    %121 = arith.truncf %120 : vector<64x64xf32> to vector<64x64xbf16>
    %cst_39 = arith.constant dense<0.000000e+00> : vector<64x32xf32>
    %122 = tpu.matmul %121, %109, %cst_39 {dimension_numbers = #tpu.dot_dimension_numbers<[1], [0], [0], [1], [0, 0, 1, 1], [], []>} : vector<64x64xbf16>, vector<64x32xbf16>, vector<64x32xf32> -> vector<64x32xf32>
    %123 = arith.truncf %122 : vector<64x32xf32> to vector<64x32xbf16>
    %c3 = arith.constant 3 : index
    %c0_40 = arith.constant 0 : index
    %c0_41 = arith.constant 0 : index
    %124 = vector.load %arg5[%c3, %c0_40, %c0_41] : memref<4x32x128xbf16, #tpu.memory_space<vmem>>, vector<1x32x128xbf16>
    %125 = vector.shape_cast %124 : vector<1x32x128xbf16> to vector<32x128xbf16>
    %cst_42 = arith.constant dense<0.000000e+00> : vector<64x128xf32>
    %126 = tpu.matmul %123, %125, %cst_42 {dimension_numbers = #tpu.dot_dimension_numbers<[1], [0], [0], [1], [0, 0, 1, 1], [], []>} : vector<64x32xbf16>, vector<32x128xbf16>, vector<64x128xf32> -> vector<64x128xf32>
    %127 = arith.addf %103, %126 : vector<64x128xf32>
    %128 = vector.extract_strided_slice %1 {offsets = [0, 0], sizes = [64, 128], strides = [1, 1]} : vector<128x128xf32> to vector<64x128xf32>
    %129 = arith.addf %128, %127 : vector<64x128xf32>
    %130 = vector.broadcast %32 : vector<1x128xf32> to vector<64x128xf32>
    %131 = arith.addf %129, %130 : vector<64x128xf32>
    %132 = arith.truncf %131 : vector<64x128xf32> to vector<64x128xbf16>
    %c0_43 = arith.constant 0 : index
    %c0_44 = arith.constant 0 : index
    %133 = vector.load %arg13[%c0_43, %c0_44] : memref<128x128xbf16, #tpu.memory_space<vmem>>, vector<64x128xbf16>
    tpu.vector_store %arg13[%c0_43, %c0_44], %132 {strides = array<i32>} : memref<128x128xbf16, #tpu.memory_space<vmem>>, vector<64x128xbf16>,
    %134 = vector.extract_strided_slice %29 {offsets = [64, 0], sizes = [64, 32], strides = [1, 1]} : vector<128x128xf32> to vector<64x32xf32>
    %135 = arith.truncf %134 : vector<64x32xf32> to vector<64x32xbf16>
    %136 = vector.extract_strided_slice %30 {offsets = [64, 0], sizes = [64, 32], strides = [1, 1]} : vector<128x128xf32> to vector<64x32xf32>
    %137 = arith.truncf %136 : vector<64x32xf32> to vector<64x32xbf16>
    %138 = vector.extract_strided_slice %31 {offsets = [64, 0], sizes = [64, 32], strides = [1, 1]} : vector<128x128xf32> to vector<64x32xf32>
    %139 = arith.truncf %138 : vector<64x32xf32> to vector<64x32xbf16>
    %cst_45 = arith.constant dense<0.000000e+00> : vector<64x64xf32>
    %140 = tpu.matmul %135, %137, %cst_45 {dimension_numbers = #tpu.dot_dimension_numbers<[1], [1], [0], [0], [0, 0, 1, 0], [], []>} : vector<64x32xbf16>, vector<64x32xbf16>, vector<64x64xf32> -> vector<64x64xf32>
    %cst_46 = arith.constant dense<0xFF800000> : vector<64xf32>
    %141 = vector.multi_reduction <maximumf>, %140, %cst_46 [1] : vector<64x64xf32> to vector<64xf32>
    %142 = vector.shape_cast %141 : vector<64xf32> to vector<64x1xf32>
    %143 = vector.broadcast %142 : vector<64x1xf32> to vector<64x64xf32>
    %144 = arith.subf %140, %143 : vector<64x64xf32>
    %145 = math.exp %144 : vector<64x64xf32>
    %cst_47 = arith.constant dense<0.000000e+00> : vector<64xf32>
    %146 = vector.multi_reduction <add>, %145, %cst_47 [1] : vector<64x64xf32> to vector<64xf32>
    %147 = vector.shape_cast %146 : vector<64xf32> to vector<64x1xf32>
    %148 = tpu.reciprocal %147 {approx = true} : vector<64x1xf32> -> vector<64x1xf32>
    %149 = vector.broadcast %148 : vector<64x1xf32> to vector<64x64xf32>
    %150 = arith.mulf %145, %149 : vector<64x64xf32>
    %151 = arith.truncf %150 : vector<64x64xf32> to vector<64x64xbf16>
    %cst_48 = arith.constant dense<0.000000e+00> : vector<64x32xf32>
    %152 = tpu.matmul %151, %139, %cst_48 {dimension_numbers = #tpu.dot_dimension_numbers<[1], [0], [0], [1], [0, 0, 1, 1], [], []>} : vector<64x64xbf16>, vector<64x32xbf16>, vector<64x32xf32> -> vector<64x32xf32>
    %153 = arith.truncf %152 : vector<64x32xf32> to vector<64x32xbf16>
    %c0_49 = arith.constant 0 : index
    %c0_50 = arith.constant 0 : index
    %c0_51 = arith.constant 0 : index
    %154 = vector.load %arg5[%c0_49, %c0_50, %c0_51] : memref<4x32x128xbf16, #tpu.memory_space<vmem>>, vector<1x32x128xbf16>
    %155 = vector.shape_cast %154 : vector<1x32x128xbf16> to vector<32x128xbf16>
    %cst_52 = arith.constant dense<0.000000e+00> : vector<64x128xf32>
    %156 = tpu.matmul %153, %155, %cst_52 {dimension_numbers = #tpu.dot_dimension_numbers<[1], [0], [0], [1], [0, 0, 1, 1], [], []>} : vector<64x32xbf16>, vector<32x128xbf16>, vector<64x128xf32> -> vector<64x128xf32>
    %157 = vector.extract_strided_slice %29 {offsets = [64, 32], sizes = [64, 32], strides = [1, 1]} : vector<128x128xf32> to vector<64x32xf32>
    %158 = arith.truncf %157 : vector<64x32xf32> to vector<64x32xbf16>
    %159 = vector.extract_strided_slice %30 {offsets = [64, 32], sizes = [64, 32], strides = [1, 1]} : vector<128x128xf32> to vector<64x32xf32>
    %160 = arith.truncf %159 : vector<64x32xf32> to vector<64x32xbf16>
    %161 = vector.extract_strided_slice %31 {offsets = [64, 32], sizes = [64, 32], strides = [1, 1]} : vector<128x128xf32> to vector<64x32xf32>
    %162 = arith.truncf %161 : vector<64x32xf32> to vector<64x32xbf16>
    %cst_53 = arith.constant dense<0.000000e+00> : vector<64x64xf32>
    %163 = tpu.matmul %158, %160, %cst_53 {dimension_numbers = #tpu.dot_dimension_numbers<[1], [1], [0], [0], [0, 0, 1, 0], [], []>} : vector<64x32xbf16>, vector<64x32xbf16>, vector<64x64xf32> -> vector<64x64xf32>
    %cst_54 = arith.constant dense<0xFF800000> : vector<64xf32>
    %164 = vector.multi_reduction <maximumf>, %163, %cst_54 [1] : vector<64x64xf32> to vector<64xf32>
    %165 = vector.shape_cast %164 : vector<64xf32> to vector<64x1xf32>
    %166 = vector.broadcast %165 : vector<64x1xf32> to vector<64x64xf32>
    %167 = arith.subf %163, %166 : vector<64x64xf32>
    %168 = math.exp %167 : vector<64x64xf32>
    %cst_55 = arith.constant dense<0.000000e+00> : vector<64xf32>
    %169 = vector.multi_reduction <add>, %168, %cst_55 [1] : vector<64x64xf32> to vector<64xf32>
    %170 = vector.shape_cast %169 : vector<64xf32> to vector<64x1xf32>
    %171 = tpu.reciprocal %170 {approx = true} : vector<64x1xf32> -> vector<64x1xf32>
    %172 = vector.broadcast %171 : vector<64x1xf32> to vector<64x64xf32>
    %173 = arith.mulf %168, %172 : vector<64x64xf32>
    %174 = arith.truncf %173 : vector<64x64xf32> to vector<64x64xbf16>
    %cst_56 = arith.constant dense<0.000000e+00> : vector<64x32xf32>
    %175 = tpu.matmul %174, %162, %cst_56 {dimension_numbers = #tpu.dot_dimension_numbers<[1], [0], [0], [1], [0, 0, 1, 1], [], []>} : vector<64x64xbf16>, vector<64x32xbf16>, vector<64x32xf32> -> vector<64x32xf32>
    %176 = arith.truncf %175 : vector<64x32xf32> to vector<64x32xbf16>
    %c1_57 = arith.constant 1 : index
    %c0_58 = arith.constant 0 : index
    %c0_59 = arith.constant 0 : index
    %177 = vector.load %arg5[%c1_57, %c0_58, %c0_59] : memref<4x32x128xbf16, #tpu.memory_space<vmem>>, vector<1x32x128xbf16>
    %178 = vector.shape_cast %177 : vector<1x32x128xbf16> to vector<32x128xbf16>
    %cst_60 = arith.constant dense<0.000000e+00> : vector<64x128xf32>
    %179 = tpu.matmul %176, %178, %cst_60 {dimension_numbers = #tpu.dot_dimension_numbers<[1], [0], [0], [1], [0, 0, 1, 1], [], []>} : vector<64x32xbf16>, vector<32x128xbf16>, vector<64x128xf32> -> vector<64x128xf32>
    %180 = arith.addf %156, %179 : vector<64x128xf32>
    %181 = vector.extract_strided_slice %29 {offsets = [64, 64], sizes = [64, 32], strides = [1, 1]} : vector<128x128xf32> to vector<64x32xf32>
    %182 = arith.truncf %181 : vector<64x32xf32> to vector<64x32xbf16>
    %183 = vector.extract_strided_slice %30 {offsets = [64, 64], sizes = [64, 32], strides = [1, 1]} : vector<128x128xf32> to vector<64x32xf32>
    %184 = arith.truncf %183 : vector<64x32xf32> to vector<64x32xbf16>
    %185 = vector.extract_strided_slice %31 {offsets = [64, 64], sizes = [64, 32], strides = [1, 1]} : vector<128x128xf32> to vector<64x32xf32>
    %186 = arith.truncf %185 : vector<64x32xf32> to vector<64x32xbf16>
    %cst_61 = arith.constant dense<0.000000e+00> : vector<64x64xf32>
    %187 = tpu.matmul %182, %184, %cst_61 {dimension_numbers = #tpu.dot_dimension_numbers<[1], [1], [0], [0], [0, 0, 1, 0], [], []>} : vector<64x32xbf16>, vector<64x32xbf16>, vector<64x64xf32> -> vector<64x64xf32>
    %cst_62 = arith.constant dense<0xFF800000> : vector<64xf32>
    %188 = vector.multi_reduction <maximumf>, %187, %cst_62 [1] : vector<64x64xf32> to vector<64xf32>
    %189 = vector.shape_cast %188 : vector<64xf32> to vector<64x1xf32>
    %190 = vector.broadcast %189 : vector<64x1xf32> to vector<64x64xf32>
    %191 = arith.subf %187, %190 : vector<64x64xf32>
    %192 = math.exp %191 : vector<64x64xf32>
    %cst_63 = arith.constant dense<0.000000e+00> : vector<64xf32>
    %193 = vector.multi_reduction <add>, %192, %cst_63 [1] : vector<64x64xf32> to vector<64xf32>
    %194 = vector.shape_cast %193 : vector<64xf32> to vector<64x1xf32>
    %195 = tpu.reciprocal %194 {approx = true} : vector<64x1xf32> -> vector<64x1xf32>
    %196 = vector.broadcast %195 : vector<64x1xf32> to vector<64x64xf32>
    %197 = arith.mulf %192, %196 : vector<64x64xf32>
    %198 = arith.truncf %197 : vector<64x64xf32> to vector<64x64xbf16>
    %cst_64 = arith.constant dense<0.000000e+00> : vector<64x32xf32>
    %199 = tpu.matmul %198, %186, %cst_64 {dimension_numbers = #tpu.dot_dimension_numbers<[1], [0], [0], [1], [0, 0, 1, 1], [], []>} : vector<64x64xbf16>, vector<64x32xbf16>, vector<64x32xf32> -> vector<64x32xf32>
    %200 = arith.truncf %199 : vector<64x32xf32> to vector<64x32xbf16>
    %c2_65 = arith.constant 2 : index
    %c0_66 = arith.constant 0 : index
    %c0_67 = arith.constant 0 : index
    %201 = vector.load %arg5[%c2_65, %c0_66, %c0_67] : memref<4x32x128xbf16, #tpu.memory_space<vmem>>, vector<1x32x128xbf16>
    %202 = vector.shape_cast %201 : vector<1x32x128xbf16> to vector<32x128xbf16>
    %cst_68 = arith.constant dense<0.000000e+00> : vector<64x128xf32>
    %203 = tpu.matmul %200, %202, %cst_68 {dimension_numbers = #tpu.dot_dimension_numbers<[1], [0], [0], [1], [0, 0, 1, 1], [], []>} : vector<64x32xbf16>, vector<32x128xbf16>, vector<64x128xf32> -> vector<64x128xf32>
    %204 = arith.addf %180, %203 : vector<64x128xf32>
    %205 = vector.extract_strided_slice %29 {offsets = [64, 96], sizes = [64, 32], strides = [1, 1]} : vector<128x128xf32> to vector<64x32xf32>
    %206 = arith.truncf %205 : vector<64x32xf32> to vector<64x32xbf16>
    %207 = vector.extract_strided_slice %30 {offsets = [64, 96], sizes = [64, 32], strides = [1, 1]} : vector<128x128xf32> to vector<64x32xf32>
    %208 = arith.truncf %207 : vector<64x32xf32> to vector<64x32xbf16>
    %209 = vector.extract_strided_slice %31 {offsets = [64, 96], sizes = [64, 32], strides = [1, 1]} : vector<128x128xf32> to vector<64x32xf32>
    %210 = arith.truncf %209 : vector<64x32xf32> to vector<64x32xbf16>
    %cst_69 = arith.constant dense<0.000000e+00> : vector<64x64xf32>
    %211 = tpu.matmul %206, %208, %cst_69 {dimension_numbers = #tpu.dot_dimension_numbers<[1], [1], [0], [0], [0, 0, 1, 0], [], []>} : vector<64x32xbf16>, vector<64x32xbf16>, vector<64x64xf32> -> vector<64x64xf32>
    %cst_70 = arith.constant dense<0xFF800000> : vector<64xf32>
    %212 = vector.multi_reduction <maximumf>, %211, %cst_70 [1] : vector<64x64xf32> to vector<64xf32>
    %213 = vector.shape_cast %212 : vector<64xf32> to vector<64x1xf32>
    %214 = vector.broadcast %213 : vector<64x1xf32> to vector<64x64xf32>
    %215 = arith.subf %211, %214 : vector<64x64xf32>
    %216 = math.exp %215 : vector<64x64xf32>
    %cst_71 = arith.constant dense<0.000000e+00> : vector<64xf32>
    %217 = vector.multi_reduction <add>, %216, %cst_71 [1] : vector<64x64xf32> to vector<64xf32>
    %218 = vector.shape_cast %217 : vector<64xf32> to vector<64x1xf32>
    %219 = tpu.reciprocal %218 {approx = true} : vector<64x1xf32> -> vector<64x1xf32>
    %220 = vector.broadcast %219 : vector<64x1xf32> to vector<64x64xf32>
    %221 = arith.mulf %216, %220 : vector<64x64xf32>
    %222 = arith.truncf %221 : vector<64x64xf32> to vector<64x64xbf16>
    %cst_72 = arith.constant dense<0.000000e+00> : vector<64x32xf32>
    %223 = tpu.matmul %222, %210, %cst_72 {dimension_numbers = #tpu.dot_dimension_numbers<[1], [0], [0], [1], [0, 0, 1, 1], [], []>} : vector<64x64xbf16>, vector<64x32xbf16>, vector<64x32xf32> -> vector<64x32xf32>
    %224 = arith.truncf %223 : vector<64x32xf32> to vector<64x32xbf16>
    %c3_73 = arith.constant 3 : index
    %c0_74 = arith.constant 0 : index
    %c0_75 = arith.constant 0 : index
    %225 = vector.load %arg5[%c3_73, %c0_74, %c0_75] : memref<4x32x128xbf16, #tpu.memory_space<vmem>>, vector<1x32x128xbf16>
    %226 = vector.shape_cast %225 : vector<1x32x128xbf16> to vector<32x128xbf16>
    %cst_76 = arith.constant dense<0.000000e+00> : vector<64x128xf32>
    %227 = tpu.matmul %224, %226, %cst_76 {dimension_numbers = #tpu.dot_dimension_numbers<[1], [0], [0], [1], [0, 0, 1, 1], [], []>} : vector<64x32xbf16>, vector<32x128xbf16>, vector<64x128xf32> -> vector<64x128xf32>
    %228 = arith.addf %204, %227 : vector<64x128xf32>
    %229 = vector.extract_strided_slice %1 {offsets = [64, 0], sizes = [64, 128], strides = [1, 1]} : vector<128x128xf32> to vector<64x128xf32>
    %230 = arith.addf %229, %228 : vector<64x128xf32>
    %231 = vector.broadcast %32 : vector<1x128xf32> to vector<64x128xf32>
    %232 = arith.addf %230, %231 : vector<64x128xf32>
    %233 = arith.truncf %232 : vector<64x128xf32> to vector<64x128xbf16>
    %c64 = arith.constant 64 : index
    %c0_77 = arith.constant 0 : index
    %234 = vector.load %arg13[%c64, %c0_77] : memref<128x128xbf16, #tpu.memory_space<vmem>>, vector<64x128xbf16>
    tpu.vector_store %arg13[%c64, %c0_77], %233 {strides = array<i32>} : memref<128x128xbf16, #tpu.memory_space<vmem>>, vector<64x128xbf16>,
    %c0_78 = arith.constant 0 : index
    %c0_79 = arith.constant 0 : index
    %235 = vector.load %arg7[%c0_78, %c0_79] : memref<1x128xf32, #tpu.memory_space<vmem>>, vector<1x128xf32>
    %c0_80 = arith.constant 0 : index
    %c0_81 = arith.constant 0 : index
    %236 = vector.load %arg8[%c0_80, %c0_81] : memref<1x128xf32, #tpu.memory_space<vmem>>, vector<1x128xf32>
    %c0_82 = arith.constant 0 : index
    %c0_83 = arith.constant 0 : index
    %237 = vector.load %arg10[%c0_82, %c0_83] : memref<1x512xf32, #tpu.memory_space<vmem>>, vector<1x512xf32>
    %c0_84 = arith.constant 0 : index
    %c0_85 = arith.constant 0 : index
    %238 = vector.load %arg12[%c0_84, %c0_85] : memref<1x128xf32, #tpu.memory_space<vmem>>, vector<1x128xf32>
    %c0_i32 = arith.constant 0 : i32
    %c128_i32 = arith.constant 128 : i32
    %239 = arith.muli %c0_i32, %c128_i32 : i32
    %240 = tpu.assume_multiple %239, 128 : i32
    %241 = arith.index_cast %240 : i32 to index
    %c0_86 = arith.constant 0 : index
    %242 = vector.load %arg13[%241, %c0_86] : memref<128x128xbf16, #tpu.memory_space<vmem>>, vector<128x128xbf16>
    %243 = arith.extf %242 : vector<128x128xbf16> to vector<128x128xf32>
    %cst_87 = arith.constant dense<0.000000e+00> : vector<128xf32>
    %244 = vector.multi_reduction <add>, %243, %cst_87 [1] : vector<128x128xf32> to vector<128xf32>
    %245 = vector.shape_cast %244 : vector<128xf32> to vector<128x1xf32>
    %cst_88 = arith.constant 1.280000e+02 : f32
    %246 = vector.broadcast %cst_88 : f32 to vector<128x1xf32>
    %247 = arith.divf %245, %246 : vector<128x1xf32>
    %248 = vector.broadcast %247 : vector<128x1xf32> to vector<128x128xf32>
    %249 = arith.subf %243, %248 : vector<128x128xf32>
    %250 = arith.mulf %249, %249 : vector<128x128xf32>
    %cst_89 = arith.constant dense<0.000000e+00> : vector<128xf32>
    %251 = vector.multi_reduction <add>, %250, %cst_89 [1] : vector<128x128xf32> to vector<128xf32>
    %252 = vector.shape_cast %251 : vector<128xf32> to vector<128x1xf32>
    %cst_90 = arith.constant 1.280000e+02 : f32
    %253 = vector.broadcast %cst_90 : f32 to vector<128x1xf32>
    %254 = arith.divf %252, %253 : vector<128x1xf32>
    %255 = vector.broadcast %247 : vector<128x1xf32> to vector<128x128xf32>
    %256 = arith.subf %243, %255 : vector<128x128xf32>
    %cst_91 = arith.constant 9.99999974E-6 : f32
    %257 = vector.broadcast %cst_91 : f32 to vector<128x1xf32>
    %258 = arith.addf %254, %257 : vector<128x1xf32>
    %259 = math.rsqrt %258 : vector<128x1xf32>
    %260 = vector.broadcast %259 : vector<128x1xf32> to vector<128x128xf32>
    %261 = arith.mulf %256, %260 : vector<128x128xf32>
    %262 = vector.broadcast %235 : vector<1x128xf32> to vector<128x128xf32>
    %263 = arith.mulf %261, %262 : vector<128x128xf32>
    %264 = vector.broadcast %236 : vector<1x128xf32> to vector<128x128xf32>
    %265 = arith.addf %263, %264 : vector<128x128xf32>
    %266 = arith.truncf %265 : vector<128x128xf32> to vector<128x128xbf16>
    %c0_92 = arith.constant 0 : index
    %c0_93 = arith.constant 0 : index
    %267 = vector.load %arg9[%c0_92, %c0_93] : memref<128x512xbf16, #tpu.memory_space<vmem>>, vector<128x512xbf16>
    %cst_94 = arith.constant dense<0.000000e+00> : vector<128x512xf32>
    %268 = tpu.matmul %266, %267, %cst_94 {dimension_numbers = #tpu.dot_dimension_numbers<[1], [0], [0], [1], [0, 0, 1, 1], [], []>} : vector<128x128xbf16>, vector<128x512xbf16>, vector<128x512xf32> -> vector<128x512xf32>
    %269 = vector.broadcast %237 : vector<1x512xf32> to vector<128x512xf32>
    %270 = arith.addf %268, %269 : vector<128x512xf32>
    %cst_95 = arith.constant 5.000000e-01 : f32
    %271 = vector.broadcast %cst_95 : f32 to vector<128x512xf32>
    %272 = arith.mulf %271, %270 : vector<128x512xf32>
    %cst_96 = arith.constant 0.707106769 : f32
    %273 = vector.broadcast %cst_96 : f32 to vector<128x512xf32>
    %274 = arith.mulf %270, %273 : vector<128x512xf32>
    %275 = math.erf %274 : vector<128x512xf32>
    %cst_97 = arith.constant 1.000000e+00 : f32
    %276 = vector.broadcast %cst_97 : f32 to vector<128x512xf32>
    %277 = arith.addf %276, %275 : vector<128x512xf32>
    %278 = arith.mulf %272, %277 : vector<128x512xf32>
    %279 = arith.truncf %278 : vector<128x512xf32> to vector<128x512xbf16>
    %c0_98 = arith.constant 0 : index
    %c0_99 = arith.constant 0 : index
    %280 = vector.load %arg11[%c0_98, %c0_99] : memref<512x128xbf16, #tpu.memory_space<vmem>>, vector<512x128xbf16>
    %cst_100 = arith.constant dense<0.000000e+00> : vector<128x128xf32>
    %281 = tpu.matmul %279, %280, %cst_100 {dimension_numbers = #tpu.dot_dimension_numbers<[1], [0], [0], [1], [0, 0, 1, 1], [], []>} : vector<128x512xbf16>, vector<512x128xbf16>, vector<128x128xf32> -> vector<128x128xf32>
    %282 = vector.broadcast %238 : vector<1x128xf32> to vector<128x128xf32>
    %283 = arith.addf %281, %282 : vector<128x128xf32>
    %284 = arith.addf %243, %283 : vector<128x128xf32>
    %285 = arith.truncf %284 : vector<128x128xf32> to vector<128x128xbf16>
    %286 = arith.index_cast %240 : i32 to index
    %c0_101 = arith.constant 0 : index
    %287 = vector.load %arg13[%286, %c0_101] : memref<128x128xbf16, #tpu.memory_space<vmem>>, vector<128x128xbf16>
    tpu.vector_store %arg13[%286, %c0_101], %285 {strides = array<i32>} : memref<128x128xbf16, #tpu.memory_space<vmem>>, vector<128x128xbf16>,
    %c1_i32 = arith.constant 1 : i32
    return
  }
  func.func @transform_0(%arg0: i32) -> (i32, i32) {
    %c0_i32 = arith.constant 0 : i32
    %c0_i32_0 = arith.constant 0 : i32
    return %arg0, %c0_i32 : i32, i32
  }
  func.func @transform_1(%arg0: i32) -> (i32, i32) {
    %c0_i32 = arith.constant 0 : i32
    %c0_i32_0 = arith.constant 0 : i32
    %c0_i32_1 = arith.constant 0 : i32
    return %c0_i32, %c0_i32_0 : i32, i32
  }
  func.func @transform_2(%arg0: i32) -> (i32, i32) {
    %c0_i32 = arith.constant 0 : i32
    %c0_i32_0 = arith.constant 0 : i32
    %c0_i32_1 = arith.constant 0 : i32
    return %c0_i32, %c0_i32_0 : i32, i32
  }
  func.func @transform_3(%arg0: i32) -> (i32, i32) {
    %c0_i32 = arith.constant 0 : i32
    %c0_i32_0 = arith.constant 0 : i32
    %c0_i32_1 = arith.constant 0 : i32
    return %c0_i32, %c0_i32_0 : i32, i32
  }
  func.func @transform_4(%arg0: i32) -> (i32, i32, i32) {
    %c0_i32 = arith.constant 0 : i32
    %c0_i32_0 = arith.constant 0 : i32
    %c0_i32_1 = arith.constant 0 : i32
    %c0_i32_2 = arith.constant 0 : i32
    return %c0_i32, %c0_i32_0, %c0_i32_1 : i32, i32, i32
  }
  func.func @transform_5(%arg0: i32) -> (i32, i32) {
    %c0_i32 = arith.constant 0 : i32
    %c0_i32_0 = arith.constant 0 : i32
    %c0_i32_1 = arith.constant 0 : i32
    return %c0_i32, %c0_i32_0 : i32, i32
  }
  func.func @transform_6(%arg0: i32) -> (i32, i32) {
    %c0_i32 = arith.constant 0 : i32
    %c0_i32_0 = arith.constant 0 : i32
    %c0_i32_1 = arith.constant 0 : i32
    return %c0_i32, %c0_i32_0 : i32, i32
  }
  func.func @transform_7(%arg0: i32) -> (i32, i32) {
    %c0_i32 = arith.constant 0 : i32
    %c0_i32_0 = arith.constant 0 : i32
    %c0_i32_1 = arith.constant 0 : i32
    return %c0_i32, %c0_i32_0 : i32, i32
  }
  func.func @transform_8(%arg0: i32) -> (i32, i32) {
    %c0_i32 = arith.constant 0 : i32
    %c0_i32_0 = arith.constant 0 : i32
    %c0_i32_1 = arith.constant 0 : i32
    return %c0_i32, %c0_i32_0 : i32, i32
  }
  func.func @transform_9(%arg0: i32) -> (i32, i32) {
    %c0_i32 = arith.constant 0 : i32
    %c0_i32_0 = arith.constant 0 : i32
    %c0_i32_1 = arith.constant 0 : i32
    return %c0_i32, %c0_i32_0 : i32, i32
  }
  func.func @transform_10(%arg0: i32) -> (i32, i32) {
    %c0_i32 = arith.constant 0 : i32
    %c0_i32_0 = arith.constant 0 : i32
    %c0_i32_1 = arith.constant 0 : i32
    return %c0_i32, %c0_i32_0 : i32, i32
  }
  func.func @transform_11(%arg0: i32) -> (i32, i32) {
    %c0_i32 = arith.constant 0 : i32
    %c0_i32_0 = arith.constant 0 : i32
    %c0_i32_1 = arith.constant 0 : i32
    return %c0_i32, %c0_i32_0 : i32, i32
  }
  func.func @transform_12(%arg0: i32) -> (i32, i32) {
    %c0_i32 = arith.constant 0 : i32
    %c0_i32_0 = arith.constant 0 : i32
    return %arg0, %c0_i32 : i32, i32
  }
}

module attributes {stable_mosaic.version = 11 : i64} {
  func.func @block_kernel(%arg0: i32, %arg1: memref<128x128xbf16, #tpu.memory_space<vmem>>, %arg2: memref<1x128xf32, #tpu.memory_space<vmem>>, %arg3: memref<1x128xf32, #tpu.memory_space<vmem>>, %arg4: memref<128x384xbf16, #tpu.memory_space<vmem>>, %arg5: memref<4x32x128xbf16, #tpu.memory_space<vmem>>, %arg6: memref<1x128xf32, #tpu.memory_space<vmem>>, %arg7: memref<1x128xf32, #tpu.memory_space<vmem>>, %arg8: memref<1x128xf32, #tpu.memory_space<vmem>>, %arg9: memref<128x512xbf16, #tpu.memory_space<vmem>>, %arg10: memref<1x512xf32, #tpu.memory_space<vmem>>, %arg11: memref<512x128xbf16, #tpu.memory_space<vmem>>, %arg12: memref<1x128xf32, #tpu.memory_space<vmem>>, %arg13: memref<128x128xbf16, #tpu.memory_space<vmem>>) attributes {dimension_semantics = [#tpu.dimension_semantics<parallel>], iteration_bounds = array<i64: 1>, scalar_prefetch = 0 : i64, scratch_operands = 0 : i64, tpu.core_type = #tpu.core_type<tc>, window_params = [{transform_indices = @transform_0, window_bounds = array<i64: 128, 128>}, {pipeline_mode = #tpu.pipeline_mode<synchronous>, transform_indices = @transform_1, window_bounds = array<i64: 1, 128>}, {pipeline_mode = #tpu.pipeline_mode<synchronous>, transform_indices = @transform_2, window_bounds = array<i64: 1, 128>}, {pipeline_mode = #tpu.pipeline_mode<synchronous>, transform_indices = @transform_3, window_bounds = array<i64: 128, 384>}, {pipeline_mode = #tpu.pipeline_mode<synchronous>, transform_indices = @transform_4, window_bounds = array<i64: 4, 32, 128>}, {pipeline_mode = #tpu.pipeline_mode<synchronous>, transform_indices = @transform_5, window_bounds = array<i64: 1, 128>}, {pipeline_mode = #tpu.pipeline_mode<synchronous>, transform_indices = @transform_6, window_bounds = array<i64: 1, 128>}, {pipeline_mode = #tpu.pipeline_mode<synchronous>, transform_indices = @transform_7, window_bounds = array<i64: 1, 128>}, {pipeline_mode = #tpu.pipeline_mode<synchronous>, transform_indices = @transform_8, window_bounds = array<i64: 128, 512>}, {pipeline_mode = #tpu.pipeline_mode<synchronous>, transform_indices = @transform_9, window_bounds = array<i64: 1, 512>}, {pipeline_mode = #tpu.pipeline_mode<synchronous>, transform_indices = @transform_10, window_bounds = array<i64: 512, 128>}, {pipeline_mode = #tpu.pipeline_mode<synchronous>, transform_indices = @transform_11, window_bounds = array<i64: 1, 128>}, {transform_indices = @transform_12, window_bounds = array<i64: 128, 128>}]} {
    %c0 = arith.constant 0 : index
    %c0_0 = arith.constant 0 : index
    %0 = vector.load %arg1[%c0, %c0_0] : memref<128x128xbf16, #tpu.memory_space<vmem>>, vector<128x128xbf16>
    %1 = arith.extf %0 : vector<128x128xbf16> to vector<128x128xf32>
    %c0_1 = arith.constant 0 : index
    %c0_2 = arith.constant 0 : index
    %2 = vector.load %arg2[%c0_1, %c0_2] : memref<1x128xf32, #tpu.memory_space<vmem>>, vector<1x128xf32>
    %c0_3 = arith.constant 0 : index
    %c0_4 = arith.constant 0 : index
    %3 = vector.load %arg3[%c0_3, %c0_4] : memref<1x128xf32, #tpu.memory_space<vmem>>, vector<1x128xf32>
    %cst = arith.constant dense<0.000000e+00> : vector<128xf32>
    %4 = vector.multi_reduction <add>, %1, %cst [1] : vector<128x128xf32> to vector<128xf32>
    %5 = vector.shape_cast %4 : vector<128xf32> to vector<128x1xf32>
    %cst_5 = arith.constant 1.280000e+02 : f32
    %6 = vector.broadcast %cst_5 : f32 to vector<128x1xf32>
    %7 = arith.divf %5, %6 : vector<128x1xf32>
    %8 = vector.broadcast %7 : vector<128x1xf32> to vector<128x128xf32>
    %9 = arith.subf %1, %8 : vector<128x128xf32>
    %10 = arith.mulf %9, %9 : vector<128x128xf32>
    %cst_6 = arith.constant dense<0.000000e+00> : vector<128xf32>
    %11 = vector.multi_reduction <add>, %10, %cst_6 [1] : vector<128x128xf32> to vector<128xf32>
    %12 = vector.shape_cast %11 : vector<128xf32> to vector<128x1xf32>
    %cst_7 = arith.constant 1.280000e+02 : f32
    %13 = vector.broadcast %cst_7 : f32 to vector<128x1xf32>
    %14 = arith.divf %12, %13 : vector<128x1xf32>
    %15 = vector.broadcast %7 : vector<128x1xf32> to vector<128x128xf32>
    %16 = arith.subf %1, %15 : vector<128x128xf32>
    %cst_8 = arith.constant 9.99999974E-6 : f32
    %17 = vector.broadcast %cst_8 : f32 to vector<128x1xf32>
    %18 = arith.addf %14, %17 : vector<128x1xf32>
    %19 = math.rsqrt %18 : vector<128x1xf32>
    %20 = vector.broadcast %19 : vector<128x1xf32> to vector<128x128xf32>
    %21 = arith.mulf %16, %20 : vector<128x128xf32>
    %22 = vector.broadcast %2 : vector<1x128xf32> to vector<128x128xf32>
    %23 = arith.mulf %21, %22 : vector<128x128xf32>
    %24 = vector.broadcast %3 : vector<1x128xf32> to vector<128x128xf32>
    %25 = arith.addf %23, %24 : vector<128x128xf32>
    %26 = arith.truncf %25 : vector<128x128xf32> to vector<128x128xbf16>
    %c0_9 = arith.constant 0 : index
    %c0_10 = arith.constant 0 : index
    %27 = vector.load %arg4[%c0_9, %c0_10] : memref<128x384xbf16, #tpu.memory_space<vmem>>, vector<128x384xbf16>
    %cst_11 = arith.constant dense<0.000000e+00> : vector<128x384xf32>
    %28 = tpu.matmul %26, %27, %cst_11 {dimension_numbers = #tpu.dot_dimension_numbers<[1], [0], [0], [1], [0, 0, 1, 1], [], []>} : vector<128x128xbf16>, vector<128x384xbf16>, vector<128x384xf32> -> vector<128x384xf32>
    %29 = vector.extract_strided_slice %28 {offsets = [0, 0], sizes = [128, 128], strides = [1, 1]} : vector<128x384xf32> to vector<128x128xf32>
    %30 = vector.extract_strided_slice %28 {offsets = [0, 128], sizes = [128, 128], strides = [1, 1]} : vector<128x384xf32> to vector<128x128xf32>
    %31 = vector.extract_strided_slice %28 {offsets = [0, 256], sizes = [128, 128], strides = [1, 1]} : vector<128x384xf32> to vector<128x128xf32>
    %c0_12 = arith.constant 0 : index
    %c0_13 = arith.constant 0 : index
    %32 = vector.load %arg6[%c0_12, %c0_13] : memref<1x128xf32, #tpu.memory_space<vmem>>, vector<1x128xf32>
    %33 = vector.extract_strided_slice %29 {offsets = [0, 0], sizes = [64, 32], strides = [1, 1]} : vector<128x128xf32> to vector<64x32xf32>
    %34 = arith.truncf %33 : vector<64x32xf32> to vector<64x32xbf16>
    %35 = vector.extract_strided_slice %30 {offsets = [0, 0], sizes = [64, 32], strides = [1, 1]} : vector<128x128xf32> to vector<64x32xf32>
    %36 = arith.truncf %35 : vector<64x32xf32> to vector<64x32xbf16>
    %37 = vector.extract_strided_slice %31 {offsets = [0, 0], sizes = [64, 32], strides = [1, 1]} : vector<128x128xf32> to vector<64x32xf32>
    %38 = arith.truncf %37 : vector<64x32xf32> to vector<64x32xbf16>
    %cst_14 = arith.constant dense<0.000000e+00> : vector<64x64xf32>
    %39 = tpu.matmul %34, %36, %cst_14 {dimension_numbers = #tpu.dot_dimension_numbers<[1], [1], [0], [0], [0, 0, 1, 0], [], []>} : vector<64x32xbf16>, vector<64x32xbf16>, vector<64x64xf32> -> vector<64x64xf32>
    %cst_15 = arith.constant dense<0xFF800000> : vector<64xf32>
    %40 = vector.multi_reduction <maximumf>, %39, %cst_15 [1] : vector<64x64xf32> to vector<64xf32>
    %41 = vector.shape_cast %40 : vector<64xf32> to vector<64x1xf32>
    %42 = vector.broadcast %41 : vector<64x1xf32> to vector<64x64xf32>
    %43 = arith.subf %39, %42 : vector<64x64xf32>
    %44 = math.exp %43 : vector<64x64xf32>
    %cst_16 = arith.constant dense<0.000000e+00> : vector<64xf32>
    %45 = vector.multi_reduction <add>, %44, %cst_16 [1] : vector<64x64xf32> to vector<64xf32>
    %46 = vector.shape_cast %45 : vector<64xf32> to vector<64x1xf32>
    %47 = tpu.reciprocal %46 {approx = true} : vector<64x1xf32> -> vector<64x1xf32>
    %48 = vector.broadcast %47 : vector<64x1xf32> to vector<64x64xf32>
    %49 = arith.mulf %44, %48 : vector<64x64xf32>
    %50 = arith.truncf %49 : vector<64x64xf32> to vector<64x64xbf16>
    %cst_17 = arith.constant dense<0.000000e+00> : vector<64x32xf32>
    %51 = tpu.matmul %50, %38, %cst_17 {dimension_numbers = #tpu.dot_dimension_numbers<[1], [0], [0], [1], [0, 0, 1, 1], [], []>} : vector<64x64xbf16>, vector<64x32xbf16>, vector<64x32xf32> -> vector<64x32xf32>
    %52 = arith.truncf %51 : vector<64x32xf32> to vector<64x32xbf16>
    %c0_18 = arith.constant 0 : index
    %c0_19 = arith.constant 0 : index
    %c0_20 = arith.constant 0 : index
    %53 = vector.load %arg5[%c0_18, %c0_19, %c0_20] : memref<4x32x128xbf16, #tpu.memory_space<vmem>>, vector<1x32x128xbf16>
    %54 = vector.shape_cast %53 : vector<1x32x128xbf16> to vector<32x128xbf16>
    %cst_21 = arith.constant dense<0.000000e+00> : vector<64x128xf32>
    %55 = tpu.matmul %52, %54, %cst_21 {dimension_numbers = #tpu.dot_dimension_numbers<[1], [0], [0], [1], [0, 0, 1, 1], [], []>} : vector<64x32xbf16>, vector<32x128xbf16>, vector<64x128xf32> -> vector<64x128xf32>
    %56 = vector.extract_strided_slice %29 {offsets = [0, 32], sizes = [64, 32], strides = [1, 1]} : vector<128x128xf32> to vector<64x32xf32>
    %57 = arith.truncf %56 : vector<64x32xf32> to vector<64x32xbf16>
    %58 = vector.extract_strided_slice %30 {offsets = [0, 32], sizes = [64, 32], strides = [1, 1]} : vector<128x128xf32> to vector<64x32xf32>
    %59 = arith.truncf %58 : vector<64x32xf32> to vector<64x32xbf16>
    %60 = vector.extract_strided_slice %31 {offsets = [0, 32], sizes = [64, 32], strides = [1, 1]} : vector<128x128xf32> to vector<64x32xf32>
    %61 = arith.truncf %60 : vector<64x32xf32> to vector<64x32xbf16>
    %cst_22 = arith.constant dense<0.000000e+00> : vector<64x64xf32>
    %62 = tpu.matmul %57, %59, %cst_22 {dimension_numbers = #tpu.dot_dimension_numbers<[1], [1], [0], [0], [0, 0, 1, 0], [], []>} : vector<64x32xbf16>, vector<64x32xbf16>, vector<64x64xf32> -> vector<64x64xf32>
    %cst_23 = arith.constant dense<0xFF800000> : vector<64xf32>
    %63 = vector.multi_reduction <maximumf>, %62, %cst_23 [1] : vector<64x64xf32> to vector<64xf32>
    %64 = vector.shape_cast %63 : vector<64xf32> to vector<64x1xf32>
    %65 = vector.broadcast %64 : vector<64x1xf32> to vector<64x64xf32>
    %66 = arith.subf %62, %65 : vector<64x64xf32>
    %67 = math.exp %66 : vector<64x64xf32>
    %cst_24 = arith.constant dense<0.000000e+00> : vector<64xf32>
    %68 = vector.multi_reduction <add>, %67, %cst_24 [1] : vector<64x64xf32> to vector<64xf32>
    %69 = vector.shape_cast %68 : vector<64xf32> to vector<64x1xf32>
    %70 = tpu.reciprocal %69 {approx = true} : vector<64x1xf32> -> vector<64x1xf32>
    %71 = vector.broadcast %70 : vector<64x1xf32> to vector<64x64xf32>
    %72 = arith.mulf %67, %71 : vector<64x64xf32>
    %73 = arith.truncf %72 : vector<64x64xf32> to vector<64x64xbf16>
    %cst_25 = arith.constant dense<0.000000e+00> : vector<64x32xf32>
    %74 = tpu.matmul %73, %61, %cst_25 {dimension_numbers = #tpu.dot_dimension_numbers<[1], [0], [0], [1], [0, 0, 1, 1], [], []>} : vector<64x64xbf16>, vector<64x32xbf16>, vector<64x32xf32> -> vector<64x32xf32>
    %75 = arith.truncf %74 : vector<64x32xf32> to vector<64x32xbf16>
    %c1 = arith.constant 1 : index
    %c0_26 = arith.constant 0 : index
    %c0_27 = arith.constant 0 : index
    %76 = vector.load %arg5[%c1, %c0_26, %c0_27] : memref<4x32x128xbf16, #tpu.memory_space<vmem>>, vector<1x32x128xbf16>
    %77 = vector.shape_cast %76 : vector<1x32x128xbf16> to vector<32x128xbf16>
    %cst_28 = arith.constant dense<0.000000e+00> : vector<64x128xf32>
    %78 = tpu.matmul %75, %77, %cst_28 {dimension_numbers = #tpu.dot_dimension_numbers<[1], [0], [0], [1], [0, 0, 1, 1], [], []>} : vector<64x32xbf16>, vector<32x128xbf16>, vector<64x128xf32> -> vector<64x128xf32>
    %79 = arith.addf %55, %78 : vector<64x128xf32>
    %80 = vector.extract_strided_slice %29 {offsets = [0, 64], sizes = [64, 32], strides = [1, 1]} : vector<128x128xf32> to vector<64x32xf32>
    %81 = arith.truncf %80 : vector<64x32xf32> to vector<64x32xbf16>
    %82 = vector.extract_strided_slice %30 {offsets = [0, 64], sizes = [64, 32], strides = [1, 1]} : vector<128x128xf32> to vector<64x32xf32>
    %83 = arith.truncf %82 : vector<64x32xf32> to vector<64x32xbf16>
    %84 = vector.extract_strided_slice %31 {offsets = [0, 64], sizes = [64, 32], strides = [1, 1]} : vector<128x128xf32> to vector<64x32xf32>
    %85 = arith.truncf %84 : vector<64x32xf32> to vector<64x32xbf16>
    %cst_29 = arith.constant dense<0.000000e+00> : vector<64x64xf32>
    %86 = tpu.matmul %81, %83, %cst_29 {dimension_numbers = #tpu.dot_dimension_numbers<[1], [1], [0], [0], [0, 0, 1, 0], [], []>} : vector<64x32xbf16>, vector<64x32xbf16>, vector<64x64xf32> -> vector<64x64xf32>
    %cst_30 = arith.constant dense<0xFF800000> : vector<64xf32>
    %87 = vector.multi_reduction <maximumf>, %86, %cst_30 [1] : vector<64x64xf32> to vector<64xf32>
    %88 = vector.shape_cast %87 : vector<64xf32> to vector<64x1xf32>
    %89 = vector.broadcast %88 : vector<64x1xf32> to vector<64x64xf32>
    %90 = arith.subf %86, %89 : vector<64x64xf32>
    %91 = math.exp %90 : vector<64x64xf32>
    %cst_31 = arith.constant dense<0.000000e+00> : vector<64xf32>
    %92 = vector.multi_reduction <add>, %91, %cst_31 [1] : vector<64x64xf32> to vector<64xf32>
    %93 = vector.shape_cast %92 : vector<64xf32> to vector<64x1xf32>
    %94 = tpu.reciprocal %93 {approx = true} : vector<64x1xf32> -> vector<64x1xf32>
    %95 = vector.broadcast %94 : vector<64x1xf32> to vector<64x64xf32>
    %96 = arith.mulf %91, %95 : vector<64x64xf32>
    %97 = arith.truncf %96 : vector<64x64xf32> to vector<64x64xbf16>
    %cst_32 = arith.constant dense<0.000000e+00> : vector<64x32xf32>
    %98 = tpu.matmul %97, %85, %cst_32 {dimension_numbers = #tpu.dot_dimension_numbers<[1], [0], [0], [1], [0, 0, 1, 1], [], []>} : vector<64x64xbf16>, vector<64x32xbf16>, vector<64x32xf32> -> vector<64x32xf32>
    %99 = arith.truncf %98 : vector<64x32xf32> to vector<64x32xbf16>
    %c2 = arith.constant 2 : index
    %c0_33 = arith.constant 0 : index
    %c0_34 = arith.constant 0 : index
    %100 = vector.load %arg5[%c2, %c0_33, %c0_34] : memref<4x32x128xbf16, #tpu.memory_space<vmem>>, vector<1x32x128xbf16>
    %101 = vector.shape_cast %100 : vector<1x32x128xbf16> to vector<32x128xbf16>
    %cst_35 = arith.constant dense<0.000000e+00> : vector<64x128xf32>
    %102 = tpu.matmul %99, %101, %cst_35 {dimension_numbers = #tpu.dot_dimension_numbers<[1], [0], [0], [1], [0, 0, 1, 1], [], []>} : vector<64x32xbf16>, vector<32x128xbf16>, vector<64x128xf32> -> vector<64x128xf32>
    %103 = arith.addf %79, %102 : vector<64x128xf32>
    %104 = vector.extract_strided_slice %29 {offsets = [0, 96], sizes = [64, 32], strides = [1, 1]} : vector<128x128xf32> to vector<64x32xf32>
    %105 = arith.truncf %104 : vector<64x32xf32> to vector<64x32xbf16>
    %106 = vector.extract_strided_slice %30 {offsets = [0, 96], sizes = [64, 32], strides = [1, 1]} : vector<128x128xf32> to vector<64x32xf32>
    %107 = arith.truncf %106 : vector<64x32xf32> to vector<64x32xbf16>
    %108 = vector.extract_strided_slice %31 {offsets = [0, 96], sizes = [64, 32], strides = [1, 1]} : vector<128x128xf32> to vector<64x32xf32>
    %109 = arith.truncf %108 : vector<64x32xf32> to vector<64x32xbf16>
    %cst_36 = arith.constant dense<0.000000e+00> : vector<64x64xf32>
    %110 = tpu.matmul %105, %107, %cst_36 {dimension_numbers = #tpu.dot_dimension_numbers<[1], [1], [0], [0], [0, 0, 1, 0], [], []>} : vector<64x32xbf16>, vector<64x32xbf16>, vector<64x64xf32> -> vector<64x64xf32>
    %cst_37 = arith.constant dense<0xFF800000> : vector<64xf32>
    %111 = vector.multi_reduction <maximumf>, %110, %cst_37 [1] : vector<64x64xf32> to vector<64xf32>
    %112 = vector.shape_cast %111 : vector<64xf32> to vector<64x1xf32>
    %113 = vector.broadcast %112 : vector<64x1xf32> to vector<64x64xf32>
    %114 = arith.subf %110, %113 : vector<64x64xf32>
    %115 = math.exp %114 : vector<64x64xf32>
    %cst_38 = arith.constant dense<0.000000e+00> : vector<64xf32>
    %116 = vector.multi_reduction <add>, %115, %cst_38 [1] : vector<64x64xf32> to vector<64xf32>
    %117 = vector.shape_cast %116 : vector<64xf32> to vector<64x1xf32>
    %118 = tpu.reciprocal %117 {approx = true} : vector<64x1xf32> -> vector<64x1xf32>
    %119 = vector.broadcast %118 : vector<64x1xf32> to vector<64x64xf32>
    %120 = arith.mulf %115, %119 : vector<64x64xf32>
    %121 = arith.truncf %120 : vector<64x64xf32> to vector<64x64xbf16>
    %cst_39 = arith.constant dense<0.000000e+00> : vector<64x32xf32>
    %122 = tpu.matmul %121, %109, %cst_39 {dimension_numbers = #tpu.dot_dimension_numbers<[1], [0], [0], [1], [0, 0, 1, 1], [], []>} : vector<64x64xbf16>, vector<64x32xbf16>, vector<64x32xf32> -> vector<64x32xf32>
    %123 = arith.truncf %122 : vector<64x32xf32> to vector<64x32xbf16>
    %c3 = arith.constant 3 : index
    %c0_40 = arith.constant 0 : index
    %c0_41 = arith.constant 0 : index
    %124 = vector.load %arg5[%c3, %c0_40, %c0_41] : memref<4x32x128xbf16, #tpu.memory_space<vmem>>, vector<1x32x128xbf16>
    %125 = vector.shape_cast %124 : vector<1x32x128xbf16> to vector<32x128xbf16>
    %cst_42 = arith.constant dense<0.000000e+00> : vector<64x128xf32>
    %126 = tpu.matmul %123, %125, %cst_42 {dimension_numbers = #tpu.dot_dimension_numbers<[1], [0], [0], [1], [0, 0, 1, 1], [], []>} : vector<64x32xbf16>, vector<32x128xbf16>, vector<64x128xf32> -> vector<64x128xf32>
    %127 = arith.addf %103, %126 : vector<64x128xf32>
    %128 = vector.extract_strided_slice %1 {offsets = [0, 0], sizes = [64, 128], strides = [1, 1]} : vector<128x128xf32> to vector<64x128xf32>
    %129 = arith.addf %128, %127 : vector<64x128xf32>
    %130 = vector.broadcast %32 : vector<1x128xf32> to vector<64x128xf32>
    %131 = arith.addf %129, %130 : vector<64x128xf32>
    %132 = arith.truncf %131 : vector<64x128xf32> to vector<64x128xbf16>
    %c0_43 = arith.constant 0 : index
    %c0_44 = arith.constant 0 : index
    %133 = vector.load %arg13[%c0_43, %c0_44] : memref<128x128xbf16, #tpu.memory_space<vmem>>, vector<64x128xbf16>
    tpu.vector_store %arg13[%c0_43, %c0_44], %132 {strides = array<i32>} : memref<128x128xbf16, #tpu.memory_space<vmem>>, vector<64x128xbf16>,
    %134 = vector.extract_strided_slice %29 {offsets = [64, 0], sizes = [64, 32], strides = [1, 1]} : vector<128x128xf32> to vector<64x32xf32>
    %135 = arith.truncf %134 : vector<64x32xf32> to vector<64x32xbf16>
    %136 = vector.extract_strided_slice %30 {offsets = [64, 0], sizes = [64, 32], strides = [1, 1]} : vector<128x128xf32> to vector<64x32xf32>
    %137 = arith.truncf %136 : vector<64x32xf32> to vector<64x32xbf16>
    %138 = vector.extract_strided_slice %31 {offsets = [64, 0], sizes = [64, 32], strides = [1, 1]} : vector<128x128xf32> to vector<64x32xf32>
    %139 = arith.truncf %138 : vector<64x32xf32> to vector<64x32xbf16>
    %cst_45 = arith.constant dense<0.000000e+00> : vector<64x64xf32>
    %140 = tpu.matmul %135, %137, %cst_45 {dimension_numbers = #tpu.dot_dimension_numbers<[1], [1], [0], [0], [0, 0, 1, 0], [], []>} : vector<64x32xbf16>, vector<64x32xbf16>, vector<64x64xf32> -> vector<64x64xf32>
    %cst_46 = arith.constant dense<0xFF800000> : vector<64xf32>
    %141 = vector.multi_reduction <maximumf>, %140, %cst_46 [1] : vector<64x64xf32> to vector<64xf32>
    %142 = vector.shape_cast %141 : vector<64xf32> to vector<64x1xf32>
    %143 = vector.broadcast %142 : vector<64x1xf32> to vector<64x64xf32>
    %144 = arith.subf %140, %143 : vector<64x64xf32>
    %145 = math.exp %144 : vector<64x64xf32>
    %cst_47 = arith.constant dense<0.000000e+00> : vector<64xf32>
    %146 = vector.multi_reduction <add>, %145, %cst_47 [1] : vector<64x64xf32> to vector<64xf32>
    %147 = vector.shape_cast %146 : vector<64xf32> to vector<64x1xf32>
    %148 = tpu.reciprocal %147 {approx = true} : vector<64x1xf32> -> vector<64x1xf32>
    %149 = vector.broadcast %148 : vector<64x1xf32> to vector<64x64xf32>
    %150 = arith.mulf %145, %149 : vector<64x64xf32>
    %151 = arith.truncf %150 : vector<64x64xf32> to vector<64x64xbf16>
    %cst_48 = arith.constant dense<0.000000e+00> : vector<64x32xf32>
    %152 = tpu.matmul %151, %139, %cst_48 {dimension_numbers = #tpu.dot_dimension_numbers<[1], [0], [0], [1], [0, 0, 1, 1], [], []>} : vector<64x64xbf16>, vector<64x32xbf16>, vector<64x32xf32> -> vector<64x32xf32>
    %153 = arith.truncf %152 : vector<64x32xf32> to vector<64x32xbf16>
    %c0_49 = arith.constant 0 : index
    %c0_50 = arith.constant 0 : index
    %c0_51 = arith.constant 0 : index
    %154 = vector.load %arg5[%c0_49, %c0_50, %c0_51] : memref<4x32x128xbf16, #tpu.memory_space<vmem>>, vector<1x32x128xbf16>
    %155 = vector.shape_cast %154 : vector<1x32x128xbf16> to vector<32x128xbf16>
    %cst_52 = arith.constant dense<0.000000e+00> : vector<64x128xf32>
    %156 = tpu.matmul %153, %155, %cst_52 {dimension_numbers = #tpu.dot_dimension_numbers<[1], [0], [0], [1], [0, 0, 1, 1], [], []>} : vector<64x32xbf16>, vector<32x128xbf16>, vector<64x128xf32> -> vector<64x128xf32>
    %157 = vector.extract_strided_slice %29 {offsets = [64, 32], sizes = [64, 32], strides = [1, 1]} : vector<128x128xf32> to vector<64x32xf32>
    %158 = arith.truncf %157 : vector<64x32xf32> to vector<64x32xbf16>
    %159 = vector.extract_strided_slice %30 {offsets = [64, 32], sizes = [64, 32], strides = [1, 1]} : vector<128x128xf32> to vector<64x32xf32>
    %160 = arith.truncf %159 : vector<64x32xf32> to vector<64x32xbf16>
    %161 = vector.extract_strided_slice %31 {offsets = [64, 32], sizes = [64, 32], strides = [1, 1]} : vector<128x128xf32> to vector<64x32xf32>
    %162 = arith.truncf %161 : vector<64x32xf32> to vector<64x32xbf16>
    %cst_53 = arith.constant dense<0.000000e+00> : vector<64x64xf32>
    %163 = tpu.matmul %158, %160, %cst_53 {dimension_numbers = #tpu.dot_dimension_numbers<[1], [1], [0], [0], [0, 0, 1, 0], [], []>} : vector<64x32xbf16>, vector<64x32xbf16>, vector<64x64xf32> -> vector<64x64xf32>
    %cst_54 = arith.constant dense<0xFF800000> : vector<64xf32>
    %164 = vector.multi_reduction <maximumf>, %163, %cst_54 [1] : vector<64x64xf32> to vector<64xf32>
    %165 = vector.shape_cast %164 : vector<64xf32> to vector<64x1xf32>
    %166 = vector.broadcast %165 : vector<64x1xf32> to vector<64x64xf32>
    %167 = arith.subf %163, %166 : vector<64x64xf32>
    %168 = math.exp %167 : vector<64x64xf32>
    %cst_55 = arith.constant dense<0.000000e+00> : vector<64xf32>
    %169 = vector.multi_reduction <add>, %168, %cst_55 [1] : vector<64x64xf32> to vector<64xf32>
    %170 = vector.shape_cast %169 : vector<64xf32> to vector<64x1xf32>
    %171 = tpu.reciprocal %170 {approx = true} : vector<64x1xf32> -> vector<64x1xf32>
    %172 = vector.broadcast %171 : vector<64x1xf32> to vector<64x64xf32>
    %173 = arith.mulf %168, %172 : vector<64x64xf32>
    %174 = arith.truncf %173 : vector<64x64xf32> to vector<64x64xbf16>
    %cst_56 = arith.constant dense<0.000000e+00> : vector<64x32xf32>
    %175 = tpu.matmul %174, %162, %cst_56 {dimension_numbers = #tpu.dot_dimension_numbers<[1], [0], [0], [1], [0, 0, 1, 1], [], []>} : vector<64x64xbf16>, vector<64x32xbf16>, vector<64x32xf32> -> vector<64x32xf32>
    %176 = arith.truncf %175 : vector<64x32xf32> to vector<64x32xbf16>
    %c1_57 = arith.constant 1 : index
    %c0_58 = arith.constant 0 : index
    %c0_59 = arith.constant 0 : index
    %177 = vector.load %arg5[%c1_57, %c0_58, %c0_59] : memref<4x32x128xbf16, #tpu.memory_space<vmem>>, vector<1x32x128xbf16>
    %178 = vector.shape_cast %177 : vector<1x32x128xbf16> to vector<32x128xbf16>
    %cst_60 = arith.constant dense<0.000000e+00> : vector<64x128xf32>
    %179 = tpu.matmul %176, %178, %cst_60 {dimension_numbers = #tpu.dot_dimension_numbers<[1], [0], [0], [1], [0, 0, 1, 1], [], []>} : vector<64x32xbf16>, vector<32x128xbf16>, vector<64x128xf32> -> vector<64x128xf32>
    %180 = arith.addf %156, %179 : vector<64x128xf32>
    %181 = vector.extract_strided_slice %29 {offsets = [64, 64], sizes = [64, 32], strides = [1, 1]} : vector<128x128xf32> to vector<64x32xf32>
    %182 = arith.truncf %181 : vector<64x32xf32> to vector<64x32xbf16>
    %183 = vector.extract_strided_slice %30 {offsets = [64, 64], sizes = [64, 32], strides = [1, 1]} : vector<128x128xf32> to vector<64x32xf32>
    %184 = arith.truncf %183 : vector<64x32xf32> to vector<64x32xbf16>
    %185 = vector.extract_strided_slice %31 {offsets = [64, 64], sizes = [64, 32], strides = [1, 1]} : vector<128x128xf32> to vector<64x32xf32>
    %186 = arith.truncf %185 : vector<64x32xf32> to vector<64x32xbf16>
    %cst_61 = arith.constant dense<0.000000e+00> : vector<64x64xf32>
    %187 = tpu.matmul %182, %184, %cst_61 {dimension_numbers = #tpu.dot_dimension_numbers<[1], [1], [0], [0], [0, 0, 1, 0], [], []>} : vector<64x32xbf16>, vector<64x32xbf16>, vector<64x64xf32> -> vector<64x64xf32>
    %cst_62 = arith.constant dense<0xFF800000> : vector<64xf32>
    %188 = vector.multi_reduction <maximumf>, %187, %cst_62 [1] : vector<64x64xf32> to vector<64xf32>
    %189 = vector.shape_cast %188 : vector<64xf32> to vector<64x1xf32>
    %190 = vector.broadcast %189 : vector<64x1xf32> to vector<64x64xf32>
    %191 = arith.subf %187, %190 : vector<64x64xf32>
    %192 = math.exp %191 : vector<64x64xf32>
    %cst_63 = arith.constant dense<0.000000e+00> : vector<64xf32>
    %193 = vector.multi_reduction <add>, %192, %cst_63 [1] : vector<64x64xf32> to vector<64xf32>
    %194 = vector.shape_cast %193 : vector<64xf32> to vector<64x1xf32>
    %195 = tpu.reciprocal %194 {approx = true} : vector<64x1xf32> -> vector<64x1xf32>
    %196 = vector.broadcast %195 : vector<64x1xf32> to vector<64x64xf32>
    %197 = arith.mulf %192, %196 : vector<64x64xf32>
    %198 = arith.truncf %197 : vector<64x64xf32> to vector<64x64xbf16>
    %cst_64 = arith.constant dense<0.000000e+00> : vector<64x32xf32>
    %199 = tpu.matmul %198, %186, %cst_64 {dimension_numbers = #tpu.dot_dimension_numbers<[1], [0], [0], [1], [0, 0, 1, 1], [], []>} : vector<64x64xbf16>, vector<64x32xbf16>, vector<64x32xf32> -> vector<64x32xf32>
    %200 = arith.truncf %199 : vector<64x32xf32> to vector<64x32xbf16>
    %c2_65 = arith.constant 2 : index
    %c0_66 = arith.constant 0 : index
    %c0_67 = arith.constant 0 : index
    %201 = vector.load %arg5[%c2_65, %c0_66, %c0_67] : memref<4x32x128xbf16, #tpu.memory_space<vmem>>, vector<1x32x128xbf16>
    %202 = vector.shape_cast %201 : vector<1x32x128xbf16> to vector<32x128xbf16>
    %cst_68 = arith.constant dense<0.000000e+00> : vector<64x128xf32>
    %203 = tpu.matmul %200, %202, %cst_68 {dimension_numbers = #tpu.dot_dimension_numbers<[1], [0], [0], [1], [0, 0, 1, 1], [], []>} : vector<64x32xbf16>, vector<32x128xbf16>, vector<64x128xf32> -> vector<64x128xf32>
    %204 = arith.addf %180, %203 : vector<64x128xf32>
    %205 = vector.extract_strided_slice %29 {offsets = [64, 96], sizes = [64, 32], strides = [1, 1]} : vector<128x128xf32> to vector<64x32xf32>
    %206 = arith.truncf %205 : vector<64x32xf32> to vector<64x32xbf16>
    %207 = vector.extract_strided_slice %30 {offsets = [64, 96], sizes = [64, 32], strides = [1, 1]} : vector<128x128xf32> to vector<64x32xf32>
    %208 = arith.truncf %207 : vector<64x32xf32> to vector<64x32xbf16>
    %209 = vector.extract_strided_slice %31 {offsets = [64, 96], sizes = [64, 32], strides = [1, 1]} : vector<128x128xf32> to vector<64x32xf32>
    %210 = arith.truncf %209 : vector<64x32xf32> to vector<64x32xbf16>
    %cst_69 = arith.constant dense<0.000000e+00> : vector<64x64xf32>
    %211 = tpu.matmul %206, %208, %cst_69 {dimension_numbers = #tpu.dot_dimension_numbers<[1], [1], [0], [0], [0, 0, 1, 0], [], []>} : vector<64x32xbf16>, vector<64x32xbf16>, vector<64x64xf32> -> vector<64x64xf32>
    %cst_70 = arith.constant dense<0xFF800000> : vector<64xf32>
    %212 = vector.multi_reduction <maximumf>, %211, %cst_70 [1] : vector<64x64xf32> to vector<64xf32>
    %213 = vector.shape_cast %212 : vector<64xf32> to vector<64x1xf32>
    %214 = vector.broadcast %213 : vector<64x1xf32> to vector<64x64xf32>
    %215 = arith.subf %211, %214 : vector<64x64xf32>
    %216 = math.exp %215 : vector<64x64xf32>
    %cst_71 = arith.constant dense<0.000000e+00> : vector<64xf32>
    %217 = vector.multi_reduction <add>, %216, %cst_71 [1] : vector<64x64xf32> to vector<64xf32>
    %218 = vector.shape_cast %217 : vector<64xf32> to vector<64x1xf32>
    %219 = tpu.reciprocal %218 {approx = true} : vector<64x1xf32> -> vector<64x1xf32>
    %220 = vector.broadcast %219 : vector<64x1xf32> to vector<64x64xf32>
    %221 = arith.mulf %216, %220 : vector<64x64xf32>
    %222 = arith.truncf %221 : vector<64x64xf32> to vector<64x64xbf16>
    %cst_72 = arith.constant dense<0.000000e+00> : vector<64x32xf32>
    %223 = tpu.matmul %222, %210, %cst_72 {dimension_numbers = #tpu.dot_dimension_numbers<[1], [0], [0], [1], [0, 0, 1, 1], [], []>} : vector<64x64xbf16>, vector<64x32xbf16>, vector<64x32xf32> -> vector<64x32xf32>
    %224 = arith.truncf %223 : vector<64x32xf32> to vector<64x32xbf16>
    %c3_73 = arith.constant 3 : index
    %c0_74 = arith.constant 0 : index
    %c0_75 = arith.constant 0 : index
    %225 = vector.load %arg5[%c3_73, %c0_74, %c0_75] : memref<4x32x128xbf16, #tpu.memory_space<vmem>>, vector<1x32x128xbf16>
    %226 = vector.shape_cast %225 : vector<1x32x128xbf16> to vector<32x128xbf16>
    %cst_76 = arith.constant dense<0.000000e+00> : vector<64x128xf32>
    %227 = tpu.matmul %224, %226, %cst_76 {dimension_numbers = #tpu.dot_dimension_numbers<[1], [0], [0], [1], [0, 0, 1, 1], [], []>} : vector<64x32xbf16>, vector<32x128xbf16>, vector<64x128xf32> -> vector<64x128xf32>
    %228 = arith.addf %204, %227 : vector<64x128xf32>
    %229 = vector.extract_strided_slice %1 {offsets = [64, 0], sizes = [64, 128], strides = [1, 1]} : vector<128x128xf32> to vector<64x128xf32>
    %230 = arith.addf %229, %228 : vector<64x128xf32>
    %231 = vector.broadcast %32 : vector<1x128xf32> to vector<64x128xf32>
    %232 = arith.addf %230, %231 : vector<64x128xf32>
    %233 = arith.truncf %232 : vector<64x128xf32> to vector<64x128xbf16>
    %c64 = arith.constant 64 : index
    %c0_77 = arith.constant 0 : index
    %234 = vector.load %arg13[%c64, %c0_77] : memref<128x128xbf16, #tpu.memory_space<vmem>>, vector<64x128xbf16>
    tpu.vector_store %arg13[%c64, %c0_77], %233 {strides = array<i32>} : memref<128x128xbf16, #tpu.memory_space<vmem>>, vector<64x128xbf16>,
    %c0_78 = arith.constant 0 : index
    %c0_79 = arith.constant 0 : index
    %235 = vector.load %arg7[%c0_78, %c0_79] : memref<1x128xf32, #tpu.memory_space<vmem>>, vector<1x128xf32>
    %c0_80 = arith.constant 0 : index
    %c0_81 = arith.constant 0 : index
    %236 = vector.load %arg8[%c0_80, %c0_81] : memref<1x128xf32, #tpu.memory_space<vmem>>, vector<1x128xf32>
    %c0_82 = arith.constant 0 : index
    %c0_83 = arith.constant 0 : index
    %237 = vector.load %arg10[%c0_82, %c0_83] : memref<1x512xf32, #tpu.memory_space<vmem>>, vector<1x512xf32>
    %c0_84 = arith.constant 0 : index
    %c0_85 = arith.constant 0 : index
    %238 = vector.load %arg12[%c0_84, %c0_85] : memref<1x128xf32, #tpu.memory_space<vmem>>, vector<1x128xf32>
    %c0_i32 = arith.constant 0 : i32
    %c128_i32 = arith.constant 128 : i32
    %239 = arith.muli %c0_i32, %c128_i32 : i32
    %240 = tpu.assume_multiple %239, 128 : i32
    %241 = arith.index_cast %240 : i32 to index
    %c0_86 = arith.constant 0 : index
    %242 = vector.load %arg13[%241, %c0_86] : memref<128x128xbf16, #tpu.memory_space<vmem>>, vector<128x128xbf16>
    %243 = arith.extf %242 : vector<128x128xbf16> to vector<128x128xf32>
    %cst_87 = arith.constant dense<0.000000e+00> : vector<128xf32>
    %244 = vector.multi_reduction <add>, %243, %cst_87 [1] : vector<128x128xf32> to vector<128xf32>
    %245 = vector.shape_cast %244 : vector<128xf32> to vector<128x1xf32>
    %cst_88 = arith.constant 1.280000e+02 : f32
    %246 = vector.broadcast %cst_88 : f32 to vector<128x1xf32>
    %247 = arith.divf %245, %246 : vector<128x1xf32>
    %248 = vector.broadcast %247 : vector<128x1xf32> to vector<128x128xf32>
    %249 = arith.subf %243, %248 : vector<128x128xf32>
    %250 = arith.mulf %249, %249 : vector<128x128xf32>
    %cst_89 = arith.constant dense<0.000000e+00> : vector<128xf32>
    %251 = vector.multi_reduction <add>, %250, %cst_89 [1] : vector<128x128xf32> to vector<128xf32>
    %252 = vector.shape_cast %251 : vector<128xf32> to vector<128x1xf32>
    %cst_90 = arith.constant 1.280000e+02 : f32
    %253 = vector.broadcast %cst_90 : f32 to vector<128x1xf32>
    %254 = arith.divf %252, %253 : vector<128x1xf32>
    %255 = vector.broadcast %247 : vector<128x1xf32> to vector<128x128xf32>
    %256 = arith.subf %243, %255 : vector<128x128xf32>
    %cst_91 = arith.constant 9.99999974E-6 : f32
    %257 = vector.broadcast %cst_91 : f32 to vector<128x1xf32>
    %258 = arith.addf %254, %257 : vector<128x1xf32>
    %259 = math.rsqrt %258 : vector<128x1xf32>
    %260 = vector.broadcast %259 : vector<128x1xf32> to vector<128x128xf32>
    %261 = arith.mulf %256, %260 : vector<128x128xf32>
    %262 = vector.broadcast %235 : vector<1x128xf32> to vector<128x128xf32>
    %263 = arith.mulf %261, %262 : vector<128x128xf32>
    %264 = vector.broadcast %236 : vector<1x128xf32> to vector<128x128xf32>
    %265 = arith.addf %263, %264 : vector<128x128xf32>
    %266 = arith.truncf %265 : vector<128x128xf32> to vector<128x128xbf16>
    %c0_92 = arith.constant 0 : index
    %c0_93 = arith.constant 0 : index
    %267 = vector.load %arg9[%c0_92, %c0_93] : memref<128x512xbf16, #tpu.memory_space<vmem>>, vector<128x512xbf16>
    %cst_94 = arith.constant dense<0.000000e+00> : vector<128x512xf32>
    %268 = tpu.matmul %266, %267, %cst_94 {dimension_numbers = #tpu.dot_dimension_numbers<[1], [0], [0], [1], [0, 0, 1, 1], [], []>} : vector<128x128xbf16>, vector<128x512xbf16>, vector<128x512xf32> -> vector<128x512xf32>
    %269 = vector.broadcast %237 : vector<1x512xf32> to vector<128x512xf32>
    %270 = arith.addf %268, %269 : vector<128x512xf32>
    %cst_95 = arith.constant 5.000000e-01 : f32
    %271 = vector.broadcast %cst_95 : f32 to vector<128x512xf32>
    %272 = arith.mulf %271, %270 : vector<128x512xf32>
    %cst_96 = arith.constant 0.707106769 : f32
    %273 = vector.broadcast %cst_96 : f32 to vector<128x512xf32>
    %274 = arith.mulf %270, %273 : vector<128x512xf32>
    %275 = math.erf %274 : vector<128x512xf32>
    %cst_97 = arith.constant 1.000000e+00 : f32
    %276 = vector.broadcast %cst_97 : f32 to vector<128x512xf32>
    %277 = arith.addf %276, %275 : vector<128x512xf32>
    %278 = arith.mulf %272, %277 : vector<128x512xf32>
    %279 = arith.truncf %278 : vector<128x512xf32> to vector<128x512xbf16>
    %c0_98 = arith.constant 0 : index
    %c0_99 = arith.constant 0 : index
    %280 = vector.load %arg11[%c0_98, %c0_99] : memref<512x128xbf16, #tpu.memory_space<vmem>>, vector<512x128xbf16>
    %cst_100 = arith.constant dense<0.000000e+00> : vector<128x128xf32>
    %281 = tpu.matmul %279, %280, %cst_100 {dimension_numbers = #tpu.dot_dimension_numbers<[1], [0], [0], [1], [0, 0, 1, 1], [], []>} : vector<128x512xbf16>, vector<512x128xbf16>, vector<128x128xf32> -> vector<128x128xf32>
    %282 = vector.broadcast %238 : vector<1x128xf32> to vector<128x128xf32>
    %283 = arith.addf %281, %282 : vector<128x128xf32>
    %284 = arith.addf %243, %283 : vector<128x128xf32>
    %285 = arith.truncf %284 : vector<128x128xf32> to vector<128x128xbf16>
    %286 = arith.index_cast %240 : i32 to index
    %c0_101 = arith.constant 0 : index
    %287 = vector.load %arg13[%286, %c0_101] : memref<128x128xbf16, #tpu.memory_space<vmem>>, vector<128x128xbf16>
    tpu.vector_store %arg13[%286, %c0_101], %285 {strides = array<i32>} : memref<128x128xbf16, #tpu.memory_space<vmem>>, vector<128x128xbf16>,
    %c1_i32 = arith.constant 1 : i32
    return
  }
  func.func @transform_0(%arg0: i32) -> (i32, i32) {
    %c0_i32 = arith.constant 0 : i32
    %c0_i32_0 = arith.constant 0 : i32
    return %arg0, %c0_i32 : i32, i32
  }
  func.func @transform_1(%arg0: i32) -> (i32, i32) {
    %c0_i32 = arith.constant 0 : i32
    %c0_i32_0 = arith.constant 0 : i32
    %c0_i32_1 = arith.constant 0 : i32
    return %c0_i32, %c0_i32_0 : i32, i32
  }
  func.func @transform_2(%arg0: i32) -> (i32, i32) {
    %c0_i32 = arith.constant 0 : i32
    %c0_i32_0 = arith.constant 0 : i32
    %c0_i32_1 = arith.constant 0 : i32
    return %c0_i32, %c0_i32_0 : i32, i32
  }
  func.func @transform_3(%arg0: i32) -> (i32, i32) {
    %c0_i32 = arith.constant 0 : i32
    %c0_i32_0 = arith.constant 0 : i32
    %c0_i32_1 = arith.constant 0 : i32
    return %c0_i32, %c0_i32_0 : i32, i32
  }
  func.func @transform_4(%arg0: i32) -> (i32, i32, i32) {
    %c0_i32 = arith.constant 0 : i32
    %c0_i32_0 = arith.constant 0 : i32
    %c0_i32_1 = arith.constant 0 : i32
    %c0_i32_2 = arith.constant 0 : i32
    return %c0_i32, %c0_i32_0, %c0_i32_1 : i32, i32, i32
  }
  func.func @transform_5(%arg0: i32) -> (i32, i32) {
    %c0_i32 = arith.constant 0 : i32
    %c0_i32_0 = arith.constant 0 : i32
    %c0_i32_1 = arith.constant 0 : i32
    return %c0_i32, %c0_i32_0 : i32, i32
  }
  func.func @transform_6(%arg0: i32) -> (i32, i32) {
    %c0_i32 = arith.constant 0 : i32
    %c0_i32_0 = arith.constant 0 : i32
    %c0_i32_1 = arith.constant 0 : i32
    return %c0_i32, %c0_i32_0 : i32, i32
  }
  func.func @transform_7(%arg0: i32) -> (i32, i32) {
    %c0_i32 = arith.constant 0 : i32
    %c0_i32_0 = arith.constant 0 : i32
    %c0_i32_1 = arith.constant 0 : i32
    return %c0_i32, %c0_i32_0 : i32, i32
  }
  func.func @transform_8(%arg0: i32) -> (i32, i32) {
    %c0_i32 = arith.constant 0 : i32
    %c0_i32_0 = arith.constant 0 : i32
    %c0_i32_1 = arith.constant 0 : i32
    return %c0_i32, %c0_i32_0 : i32, i32
  }
  func.func @transform_9(%arg0: i32) -> (i32, i32) {
    %c0_i32 = arith.constant 0 : i32
    %c0_i32_0 = arith.constant 0 : i32
    %c0_i32_1 = arith.constant 0 : i32
    return %c0_i32, %c0_i32_0 : i32, i32
  }
  func.func @transform_10(%arg0: i32) -> (i32, i32) {
    %c0_i32 = arith.constant 0 : i32
    %c0_i32_0 = arith.constant 0 : i32
    %c0_i32_1 = arith.constant 0 : i32
    return %c0_i32, %c0_i32_0 : i32, i32
  }
  func.func @transform_11(%arg0: i32) -> (i32, i32) {
    %c0_i32 = arith.constant 0 : i32
    %c0_i32_0 = arith.constant 0 : i32
    %c0_i32_1 = arith.constant 0 : i32
    return %c0_i32, %c0_i32_0 : i32, i32
  }
  func.func @transform_12(%arg0: i32) -> (i32, i32) {
    %c0_i32 = arith.constant 0 : i32
    %c0_i32_0 = arith.constant 0 : i32
    return %arg0, %c0_i32 : i32, i32
  }
}

</mosaic_0001>

<bundles_post_ra>
// kernel: tpu_custom_call.1
= control target key start
LH: loop header
LB: loop body
LE: loop exit
PB: predicated region body
PF: predicated region fallthrough
CT: control target
= control target key end

     0   :  { %17 = vsyncpa [#allocation3], 0  ;;  %s9542_s0 = inlined_call_operand.hbm [shape: bf16[128,128], index: 0, kind: input, shape index: {}]   ;;  %s9543_s1 = inlined_call_operand.vmem [shape: f32[1,128], index: 1, kind: input, shape index: {}]   ;;  %s9544_s2 = inlined_call_operand.vmem [shape: f32[1,128], index: 2, kind: input, shape index: {}]   ;;  %s9545_s3 = inlined_call_operand.hbm [shape: bf16[128,384], index: 3, kind: input, shape index: {}]   ;;  %s9546_s4 = inlined_call_operand.hbm [shape: bf16[4,32,128], index: 4, kind: input, shape index: {}]   ;;  %s9547_s5 = inlined_call_operand.vmem [shape: f32[1,128], index: 5, kind: input, shape index: {}]   ;;  %s9548_s6 = inlined_call_operand.vmem [shape: f32[1,128], index: 6, kind: input, shape index: {}]   ;;  %s9549_s7 = inlined_call_operand.vmem [shape: f32[1,128], index: 7, kind: input, shape index: {}]   ;;  %s9550_s8 = inlined_call_operand.hbm [shape: bf16[128,512], index: 8, kind: input, shape index: {}]   ;;  %s9551_s9 = inlined_call_operand.vmem [shape: f32[1,512], index: 9, kind: input, shape index: {}]   ;;  %s9552_s10 = inlined_call_operand.hbm [shape: bf16[512,128], index: 10, kind: input, shape index: {}]   ;;  %s9553_s11 = inlined_call_operand.vmem [shape: f32[1,128], index: 11, kind: input, shape index: {}]   ;;  %s9554_s12 = inlined_call_operand.hbm [shape: bf16[128,128], index: 12, kind: output, shape index: {}]  }
   0x1   :  { %18 = vsyncpa [#allocation6], 0 }
   0x2   :  { %19 = vsyncpa [#allocation9], 0 }
   0x3   :  { %20 = vsyncpa [#allocation4], 0  ;;  %s7539_s21 = smov [#allocation5]   ;;  %s7399_s25 = scalar_lea.hbm %s9545_s3, 3072 }
   0x4   :  { %s42_s22 = sshll.u32 %s7539_s21, 4  ;;  %p7400_p0 = scmp.ne.s32.totalorder %s9545_s3, %s7399_s25  ;;  %s43_s22 = int_to_ptr.vmem [resolvable:$true] %s42_s22 }
   0x5   :  { %p7403_p1 = scmp.lt.u32.totalorder %s7399_s25, %s9545_s3 }
   0x7   :  { %p7405_p2 = pnand %p7403_p1, %p7400_p0 }
   0x9   :  { %7408 = shalt.err (!%p7405_p2)
}
   0xa   :  { %s7409_s30 = scalar_lea.vmem %s43_s22, 3072  ;;  %p7414_p4 = scmp.lt.s32.totalorder %s43_s22, %s43_s22 }
   0xb   :  { %p7410_p3 = scmp.ne.s32.totalorder %s43_s22, %s7409_s30  ;;  %p7415_p5 = scmp.lt.s32.totalorder %s7409_s30, %s7409_s30 }
   0xd   :  { %p7416_p6 = por %p7415_p5, %p7414_p4 }
   0xf   :  { %p7417_p7 = pnand %p7416_p6, %p7410_p3 }
  0x11   :  { %7420 = shalt.err (!%p7417_p7)
}
  0x12   :  { %s7540_s13 = smov 192   ;;  %s7541_s14 = smov 12  }
  0x13   :  { %48 = dma.hbm_to_vmem [thread:$0]  %s9545_s3, 3072, %s43_s22, [#allocation6], %s7540_s13, %s7540_s13, %s7541_s14  }
  0x14   :  { %s7542_s17 = smov [#allocation8]   ;;  %s7421_s21 = scalar_lea.hbm %s9550_s8, 4096 }
  0x15   :  { %s72_s18 = sshll.u32 %s7542_s17, 4  ;;  %p7422_p8 = scmp.ne.s32.totalorder %s9550_s8, %s7421_s21  ;;  %s73_s18 = int_to_ptr.vmem [resolvable:$true] %s72_s18 }
  0x16   :  { %p7425_p9 = scmp.lt.u32.totalorder %s7421_s21, %s9550_s8 }
  0x18   :  { %p7427_p10 = pnand %p7425_p9, %p7422_p8 }
  0x1a   :  { %7430 = shalt.err (!%p7427_p10)
}
  0x1b   :  { %s7431_s27 = scalar_lea.vmem %s73_s18, 4096  ;;  %p7436_p12 = scmp.lt.s32.totalorder %s73_s18, %s73_s18 }
  0x1c   :  { %p7432_p11 = scmp.ne.s32.totalorder %s73_s18, %s7431_s27  ;;  %p7437_p13 = scmp.lt.s32.totalorder %s7431_s27, %s7431_s27 }
  0x1e   :  { %p7438_p0 = por %p7437_p13, %p7436_p12 }
  0x20   :  { %p7439_p1 = pnand %p7438_p0, %p7432_p11 }
  0x22   :  { %7442 = shalt.err (!%p7439_p1)
}
  0x23   :  { %s7543_s3 = smov 256   ;;  %s7544_s22 = smov 16  }
  0x24   :  { %78 = dma.hbm_to_vmem [thread:$0]  %s9550_s8, 4096, %s73_s18, [#allocation9], %s7543_s3, %s7543_s3, %s7544_s22  }
  0x25   :  { %s7545_s30 = smov [#allocation2]   ;;  %s7443_s16 = scalar_lea.hbm %s9542_s0, 1024 }
  0x26   :  { %s26_s13 = sshll.u32 %s7545_s30, 4  ;;  %p7444_p2 = scmp.ne.s32.totalorder %s9542_s0, %s7443_s16  ;;  %s27_s13 = int_to_ptr.vmem [resolvable:$true] %s26_s13 }
  0x27   :  { %p7447_p3 = scmp.lt.u32.totalorder %s7443_s16, %s9542_s0 }
  0x29   :  { %p7449_p4 = pnand %p7447_p3, %p7444_p2 }
  0x2b   :  { %7452 = shalt.err (!%p7449_p4)
}
  0x2c   :  { %s7453_s23 = scalar_lea.vmem %s27_s13, 1024  ;;  %p7458_p6 = scmp.lt.s32.totalorder %s27_s13, %s27_s13 }
  0x2d   :  { %p7454_p5 = scmp.ne.s32.totalorder %s27_s13, %s7453_s23  ;;  %p7459_p7 = scmp.lt.s32.totalorder %s7453_s23, %s7453_s23 }
  0x2f   :  { %p7460_p8 = por %p7459_p7, %p7458_p6 }
  0x31   :  { %p7461_p9 = pnand %p7460_p8, %p7454_p5 }
  0x33   :  { %7464 = shalt.err (!%p7461_p9)
}
  0x34   :  { %s7546_s8 = smov 64   ;;  %s7547_s18 = smov 4  }
  0x35   :  { %32 = dma.hbm_to_vmem [thread:$0]  %s9542_s0, 1024, %s27_s13, [#allocation3], %s7546_s8, %s7546_s8, %s7547_s18  }
  0x36   :  { %s7548_s26 = smov [#allocation7]   ;;  %s7549_s3 = smov [#allocation10]  }
  0x37   :  { %s54_s27 = sshll.u32 %s7548_s26, 4  ;;  %s86_s22 = sshll.u32 %s7549_s3, 4  ;;  %s55_s27 = int_to_ptr.vmem [resolvable:$true] %s54_s27  ;;  %s87_s22 = int_to_ptr.vmem [resolvable:$true] %s86_s22 }
  0x38   :  { %s7465_s30 = scalar_lea.hbm %s9546_s4, 1024 }
  0x39   :  { %p7466_p10 = scmp.ne.s32.totalorder %s9546_s4, %s7465_s30  ;;  %p7469_p11 = scmp.lt.u32.totalorder %s7465_s30, %s9546_s4 }
  0x3b   :  { %p7471_p12 = pnand %p7469_p11, %p7466_p10 }
  0x3d   :  { %7474 = shalt.err (!%p7471_p12)
}
  0x3e   :  { %s7475_s0 = scalar_lea.vmem %s55_s27, 1024  ;;  %p7480_p0 = scmp.lt.s32.totalorder %s55_s27, %s55_s27 }
  0x3f   :  { %p7476_p13 = scmp.ne.s32.totalorder %s55_s27, %s7475_s0  ;;  %p7481_p1 = scmp.lt.s32.totalorder %s7475_s0, %s7475_s0 }
  0x41   :  { %p7482_p2 = por %p7481_p1, %p7480_p0 }
  0x43   :  { %p7483_p3 = pnand %p7482_p2, %p7476_p13 }
  0x45   :  { %7486 = shalt.err (!%p7483_p3)
}
  0x46   :  { %60 = dma.hbm_to_vmem [thread:$0]  %s9546_s4, 1024, %s55_s27, [#allocation6], %s7546_s8, %s7546_s8, %s7547_s18  }
  0x47   :  { %s7487_s23 = scalar_lea.hbm %s9552_s10, 4096 }
  0x48   :  { %p7488_p4 = scmp.ne.s32.totalorder %s9552_s10, %s7487_s23  ;;  %p7491_p5 = scmp.lt.u32.totalorder %s7487_s23, %s9552_s10 }
  0x4a   :  { %p7493_p6 = pnand %p7491_p5, %p7488_p4 }
  0x4c   :  { %7496 = shalt.err (!%p7493_p6)
}
  0x4d   :  { %s7497_s28 = scalar_lea.vmem %s87_s22, 4096  ;;  %p7502_p8 = scmp.lt.s32.totalorder %s87_s22, %s87_s22 }
  0x4e   :  { %p7498_p7 = scmp.ne.s32.totalorder %s87_s22, %s7497_s28  ;;  %p7503_p9 = scmp.lt.s32.totalorder %s7497_s28, %s7497_s28 }
  0x50   :  { %p7504_p10 = por %p7503_p9, %p7502_p8 }
  0x52   :  { %p7505_p11 = pnand %p7504_p10, %p7498_p7 }
  0x54   :  { %7508 = shalt.err (!%p7505_p11)
}
  0x55   :  { %92 = dma.hbm_to_vmem [thread:$0]  %s9552_s10, 4096, %s87_s22, [#allocation9], %s7546_s8, %s7546_s8, %s7547_s18  }
  0x56   :  { %7531 = dma.done.wait [#allocation3], 1024  }
  0x57   :  { %7532 = vsyncadd [#allocation3], 4294966272 }
  0x58   :  { %7533 = dma.done.wait [#allocation6], 4096  }
  0x59   :  { %7534 = vsyncadd [#allocation6], 4294963200 }
  0x5a   :  { %7535 = dma.done.wait [#allocation9], 8192  }
  0x5b   :  { %7536 = vsyncadd [#allocation9], 4294959104  ;;  %v5853_v0 = vld [vmem:[#allocation2] sm:$0xff]   ;;  %v5996_v1 = vld [vmem:[#allocation2 + $0x8] sm:$0xff]   ;;  %vm757_vm0 = vcmask 261120   ;;  %vm847_vm1 = vcmask 523264  }
  0x5c   :  { %v7688_v2 = vunpack.c.l.bf16 %v5853_v0  ;;  %v7690_v3 = vunpack.c.l.bf16 %v5996_v1  ;;  %v5997_v4 = vld [vmem:[#allocation2 + $0x10] sm:$0xff]   ;;  %v7694_v5 = vunpack.c.h.bf16 %v5853_v0  ;;  %v7696_v6 = vunpack.c.h.bf16 %v5996_v1  ;;  %v5998_v7 = vld [vmem:[#allocation2 + $0x18] sm:$0xff]   ;;  %v6825_v13 = vld [vmem:[#allocation5] ss:$12 sps:$4 sm:$0xff]  }
  0x5d   :  { %v7700_v8 = vunpack.c.l.bf16 %v5997_v4  ;;  %v7702_v9 = vunpack.c.h.bf16 %v5997_v4  ;;  %v7706_v10 = vunpack.c.l.bf16 %v5998_v7  ;;  %v7708_v11 = vunpack.c.h.bf16 %v5998_v7  ;;  %v6823_v12 = vld [vmem:[#allocation5 + $0x4] ss:$12 sps:$4 sm:$0xff]   ;;  %v6826_v14 = vld [vmem:[#allocation5 + $0x1c] ss:$12 sps:$4 sm:$0xff]   ;;  %v6830_v52 = vld [vmem:[#allocation5 + $0x34] ss:$12 sps:$4 sm:$0xff]  }
  0x5e   :  { %145 = vadd.xlane.f32.xlu0 %v7688_v2  ;;  %149 = vadd.xlane.f32.xlu1 %v7690_v3  ;;  %9578 = vst [vmem:[#allocation16_spill] sm:$0xff] %v7694_v5  ;;  %v6828_v15 = vld [vmem:[#allocation5 + $0x8] ss:$12 sps:$4 sm:$0xff]   ;;  %v5999_v46 = vld [vmem:[#allocation2 + $0x20] sm:$0xff]   ;;  %v6833_v57 = vld [vmem:[#allocation5 + $0x30] ss:$12 sps:$4 sm:$0xff]  }
  0x5f   :  { %9579 = vst [vmem:[#allocation17_spill] sm:$0xff] %v7700_v8  ;;  %9580 = vst [vmem:[#allocation18_spill] sm:$0xff] %v7702_v9  ;;  %534 = vmatprep.subr.bf16.mxu0 %v6823_v12  ;;  %6344 = vmatprep.subr.bf16.mxu1 %v6828_v15  ;;  %v7752_v49 = vunpack.c.l.bf16 %v5999_v46  ;;  %v6829_v50 = vld [vmem:[#allocation5 + $0x18] ss:$12 sps:$4 sm:$0xff]   ;;  %v6000_v51 = vld [vmem:[#allocation2 + $0x28] sm:$0xff]   ;;  %v7754_v54 = vunpack.c.h.bf16 %v5999_v46 }
  0x60   :  { %9581 = vst [vmem:[#allocation19_spill] sm:$0xff] %v7706_v10  ;;  %9582 = vst [vmem:[#allocation20_spill] sm:$0xff] %v7708_v11  ;;  %535 = vmatpush1.bf16.msra.mxu0 %v6825_v13  ;;  %6345 = vmatpush3.bf16.msra.mxu1 %v6828_v15  ;;  %v6832_v53 = vld [vmem:[#allocation5 + $0x20] ss:$12 sps:$4 sm:$0xff]   ;;  %v7757_v55 = vunpack.c.l.bf16 %v6000_v51  ;;  %v6001_v56 = vld [vmem:[#allocation2 + $0x30] sm:$0xff]   ;;  %v7760_v58 = vunpack.c.h.bf16 %v6000_v51 }
  0x61   :  { %536 = vmatprep.subr.bf16.mxu0 %v6826_v14  ;;  %9583 = vst [vmem:[#allocation21_spill] sm:$0xff] %v7752_v49  ;;  %9584 = vst [vmem:[#allocation22_spill] sm:$0xff] %v7754_v54  ;;  %6346 = vmatprep.subr.bf16.mxu1 %v6832_v53  ;;  %v7763_v59 = vunpack.c.l.bf16 %v6001_v56  ;;  %v6834_v60 = vld [vmem:[#allocation5 + $0x4c] ss:$12 sps:$4 sm:$0xff]   ;;  %v6837_v63 = vld [vmem:[#allocation5 + $0x48] ss:$12 sps:$4 sm:$0xff]   ;;  %v7766_v0 = vunpack.c.h.bf16 %v6001_v56 }
  0x62   :  { %147 = vadd.xlane.f32.xlu0 %v7694_v5  ;;  %151 = vadd.xlane.f32.xlu1 %v7696_v6  ;;  %9585 = vst [vmem:[#allocation23_spill] sm:$0xff] %v7757_v55  ;;  %9586 = vst [vmem:[#allocation24_spill] sm:$0xff] %v7760_v58  ;;  %v6836_v61 = vld [vmem:[#allocation5 + $0x38] ss:$12 sps:$4 sm:$0xff]   ;;  %v6840_v7 = vld [vmem:[#allocation5 + $0x50] ss:$12 sps:$4 sm:$0xff]  }
  0x63   :  { %9587 = vst [vmem:[#allocation25_spill] sm:$0xff] %v7763_v59  ;;  %v6002_v62 = vld [vmem:[#allocation2 + $0x38] sm:$0xff]   ;;  %9588 = vst [vmem:[#allocation26_spill] sm:$0xff] %v7766_v0  ;;  %v6838_v4 = vld [vmem:[#allocation5 + $0x64] ss:$12 sps:$4 sm:$0xff]  }
  0x64   :  { %537 = vmatpush1.bf16.msra.mxu0 %v6829_v50  ;;  %6347 = vmatpush3.bf16.msra.mxu1 %v6832_v53  ;;  %v7769_v1 = vunpack.c.l.bf16 %v6002_v62  ;;  %v6841_v12 = vld [vmem:[#allocation5 + $0x60] ss:$12 sps:$4 sm:$0xff]   ;;  %v7772_v13 = vunpack.c.h.bf16 %v6002_v62  ;;  %v6842_v14 = vld [vmem:[#allocation5 + $0x7c] ss:$12 sps:$4 sm:$0xff]  }
  0x65   :  { %538 = vmatprep.subr.bf16.mxu0 %v6830_v52  ;;  %6348 = vmatprep.subr.bf16.mxu1 %v6836_v61  ;;  %v6844_v15 = vld [vmem:[#allocation5 + $0x68] ss:$12 sps:$4 sm:$0xff]  }
  0x66   :  { %153 = vadd.xlane.f32.xlu0 %v7700_v8  ;;  %155 = vadd.xlane.f32.xlu1 %v7702_v9  ;;  %9589 = vst [vmem:[#allocation27_spill] sm:$0xff] %v7769_v1  ;;  %9590 = vst [vmem:[#allocation28_spill] sm:$0xff] %v7772_v13 }
  0x68   :  { %539 = vmatpush1.bf16.msra.mxu0 %v6833_v57  ;;  %6349 = vmatpush3.bf16.msra.mxu1 %v6836_v61 }
  0x69   :  { %540 = vmatprep.subr.bf16.mxu0 %v6834_v60  ;;  %6350 = vmatprep.subr.bf16.mxu1 %v6840_v7 }
  0x6a   :  { %157 = vadd.xlane.f32.xlu0 %v7706_v10  ;;  %159 = vadd.xlane.f32.xlu1 %v7708_v11 }
  0x6c   :  { %541 = vmatpush1.bf16.msra.mxu0 %v6837_v63  ;;  %6351 = vmatpush3.bf16.msra.mxu1 %v6840_v7  ;;  %v7781_v7 = vld [vmem:[%s9543_s1] ss:$0 sm:$0xff]  ;;  %s7551_s1 = smov 96  }
  0x6d   :  { %542 = vmatprep.subr.bf16.mxu0 %v6838_v4  ;;  %6352 = vmatprep.subr.bf16.mxu1 %v6844_v15 }
  0x70   :  { %543 = vmatpush1.bf16.msra.mxu0 %v6841_v12  ;;  %6353 = vmatpush3.bf16.msra.mxu1 %v6844_v15 }
  0x71   :  { %544 = vmatprep.subr.bf16.mxu0 %v6842_v14 }
  0xeb   :  { %v146_v16 = vpop.xlane.xlu0 %145  ;;  %v150_v17 = vpop.xlane.xlu1 %149 }
  0xec   :  { %v178_v18 = vmul.f32 0.0078125, %v146_v16  ;;  %v180_v19 = vmul.f32 0.0078125, %v150_v17  ;;  %v6845_v16 = vld [vmem:[#allocation5 + $0x78] ss:$12 sps:$4 sm:$0xff]   ;;  %v6846_v17 = vld [vmem:[#allocation5 + $0x94] ss:$12 sps:$4 sm:$0xff]  }
  0xed   :  { %545 = vmatpush1.bf16.msra.mxu0 %v6845_v16 }
  0xee   :  { %v7713_v20 = vsub.f32 %v7688_v2, %v178_v18  ;;  %v7716_v21 = vsub.f32 %v7690_v3, %v180_v19  ;;  %v6848_v18 = vld [vmem:[#allocation5 + $0x80] ss:$12 sps:$4 sm:$0xff]   ;;  %v6849_v19 = vld [vmem:[#allocation5 + $0x90] ss:$12 sps:$4 sm:$0xff]   ;;  %546 = vmatprep.subr.bf16.mxu0 %v6846_v17 }
  0xef   :  { %v148_v22 = vpop.xlane.xlu0 %147  ;;  %v152_v23 = vpop.xlane.xlu1 %151  ;;  %6354 = vmatprep.subr.bf16.mxu1 %v6848_v18 }
  0xf0   :  { %v179_v24 = vmul.f32 0.0078125, %v148_v22  ;;  %v210_v25 = vmul.f32 %v7713_v20, %v7713_v20  ;;  %v181_v26 = vmul.f32 0.0078125, %v152_v23  ;;  %v212_v27 = vmul.f32 %v7716_v21, %v7716_v21  ;;  %v6850_v22 = vld [vmem:[#allocation5 + $0xac] ss:$12 sps:$4 sm:$0xff]   ;;  %6355 = vmatpush3.bf16.msra.mxu1 %v6848_v18 }
  0xf1   :  { %v6852_v23 = vld [vmem:[#allocation5 + $0x98] ss:$12 sps:$4 sm:$0xff]   ;;  %547 = vmatpush1.bf16.msra.mxu0 %v6849_v19 }
  0xf2   :  { %226 = vadd.xlane.f32.xlu0 %v210_v25  ;;  %v7723_v28 = vsub.f32 %v7694_v5, %v179_v24  ;;  %v7726_v29 = vsub.f32 %v7696_v6, %v181_v26  ;;  %v6853_v24 = vld [vmem:[#allocation5 + $0xa8] ss:$12 sps:$4 sm:$0xff]   ;;  %548 = vmatprep.subr.bf16.mxu0 %v6850_v22  ;;  %v6854_v25 = vld [vmem:[#allocation5 + $0xb0] ss:$12 sps:$4 sm:$0xff]   ;;  %v9555_v26 = vmov 0  }
  0xf3   :  { %v154_v30 = vpop.xlane.xlu0 %153  ;;  %v156_v31 = vpop.xlane.xlu1 %155  ;;  %6356 = vmatprep.subr.bf16.mxu1 %v6852_v23  ;;  %566 = vmatprep.mubr.bf16.mxu0 %v9555_v26 }
  0xf4   :  { %v182_v32 = vmul.f32 0.0078125, %v154_v30  ;;  %v211_v33 = vmul.f32 %v7723_v28, %v7723_v28  ;;  %v183_v34 = vmul.f32 0.0078125, %v156_v31  ;;  %v213_v35 = vmul.f32 %v7726_v29, %v7726_v29  ;;  %6357 = vmatpush3.bf16.msra.mxu1 %v6852_v23  ;;  %v7791_v23 = vld [vmem:[%s9544_s2] ss:$0 sm:$0xff]  ;;  %s7552_s2 = smov 32  }
  0xf5   :  { %549 = vmatpush1.bf16.msra.mxu0 %v6853_v24  ;;  %6358 = vmatprep.subr.bf16.mxu1 %v6854_v25 }
  0xf6   :  { %230 = vadd.xlane.f32.xlu0 %v212_v27  ;;  %228 = vadd.xlane.f32.xlu1 %v211_v33  ;;  %v7733_v36 = vsub.f32 %v7700_v8, %v182_v32  ;;  %v7736_v37 = vsub.f32 %v7702_v9, %v183_v34 }
  0xf7   :  { %v158_v38 = vpop.xlane.xlu0 %157  ;;  %v160_v39 = vpop.xlane.xlu1 %159 }
  0xf8   :  { %v184_v40 = vmul.f32 0.0078125, %v158_v38  ;;  %v214_v41 = vmul.f32 %v7733_v36, %v7733_v36  ;;  %v185_v42 = vmul.f32 0.0078125, %v160_v39  ;;  %v215_v43 = vmul.f32 %v7736_v37, %v7736_v37  ;;  %6359 = vmatpush3.bf16.msra.mxu1 %v6854_v25 }
  0xfa   :  { %232 = vadd.xlane.f32.xlu1 %v213_v35  ;;  %234 = vadd.xlane.f32.xlu0 %v214_v41  ;;  %v7743_v44 = vsub.f32 %v7706_v10, %v184_v40  ;;  %v7746_v45 = vsub.f32 %v7708_v11, %v185_v42 }
  0xfc   :  { %v216_v47 = vmul.f32 %v7743_v44, %v7743_v44  ;;  %v217_v48 = vmul.f32 %v7746_v45, %v7746_v45 }
  0xfe   :  { %236 = vadd.xlane.f32.xlu1 %v215_v43  ;;  %238 = vadd.xlane.f32.xlu0 %v216_v47 }
 0x102   :  { %240 = vadd.xlane.f32.xlu1 %v217_v48  ;;  %161 = vadd.xlane.f32.xlu0 %v7752_v49 }
 0x106   :  { %163 = vadd.xlane.f32.xlu1 %v7754_v54  ;;  %165 = vadd.xlane.f32.xlu0 %v7757_v55 }
 0x10a   :  { %167 = vadd.xlane.f32.xlu1 %v7760_v58  ;;  %169 = vadd.xlane.f32.xlu0 %v7763_v59 }
 0x10e   :  { %171 = vadd.xlane.f32.xlu1 %v7766_v0  ;;  %173 = vadd.xlane.f32.xlu0 %v7769_v1 }
 0x112   :  { %175 = vadd.xlane.f32.xlu1 %v7772_v13 }
 0x17f   :  { %v227_v27 = vpop.xlane.xlu0 %226 }
 0x180   :  { %v258_v30 = vmul.f32 0.0078125, %v227_v27 }
 0x182   :  { %v274_v31 = vadd.f32 1e-05, %v258_v30 }
 0x183   :  { %v229_v32 = vpop.xlane.xlu1 %228  ;;  %v231_v33 = vpop.xlane.xlu0 %230 }
 0x184   :  { %6951 = vrsqrt.f32 %v274_v31  ;;  %v259_v34 = vmul.f32 0.0078125, %v229_v32  ;;  %v260_v35 = vmul.f32 0.0078125, %v231_v33 }
 0x186   :  { %v275_v38 = vadd.f32 1e-05, %v259_v34  ;;  %v276_v39 = vadd.f32 1e-05, %v260_v35 }
 0x187   :  { %v233_v40 = vpop.xlane.xlu1 %232  ;;  %v235_v41 = vpop.xlane.xlu0 %234 }
 0x188   :  { %6953 = vrsqrt.f32 %v275_v38  ;;  %v261_v42 = vmul.f32 0.0078125, %v233_v40  ;;  %v262_v43 = vmul.f32 0.0078125, %v235_v41 }
 0x189   :  { %6955 = vrsqrt.f32 %v276_v39 }
 0x18a   :  { %v277_v46 = vadd.f32 1e-05, %v261_v42  ;;  %v278_v47 = vadd.f32 1e-05, %v262_v43 }
 0x18b   :  { %v237_v48 = vpop.xlane.xlu1 %236  ;;  %v239_v50 = vpop.xlane.xlu0 %238 }
 0x18c   :  { %6957 = vrsqrt.f32 %v277_v46  ;;  %v263_v51 = vmul.f32 0.0078125, %v237_v48  ;;  %v264_v52 = vmul.f32 0.0078125, %v239_v50 }
 0x18d   :  { %6959 = vrsqrt.f32 %v278_v47 }
 0x18e   :  { %v6952_v53 = vpop.eup %6951  ;;  %v279_v56 = vadd.f32 1e-05, %v263_v51  ;;  %v280_v57 = vadd.f32 1e-05, %v264_v52 }
 0x18f   :  { %v241_v60 = vpop.xlane.xlu1 %240  ;;  %v162_v61 = vpop.xlane.xlu0 %161  ;;  %v306_v62 = vmul.f32 %v6952_v53, %v7713_v20 }
 0x190   :  { %6961 = vrsqrt.f32 %v279_v56  ;;  %v265_v63 = vmul.f32 0.0078125, %v241_v60  ;;  %v186_v4 = vmul.f32 0.0078125, %v162_v61 }
 0x191   :  { %6963 = vrsqrt.f32 %v280_v57  ;;  %v328_v20 = vmul.f32 %v7781_v7, %v306_v62 }
 0x192   :  { %v6954_v12 = vpop.eup %6953  ;;  %v281_v14 = vadd.f32 1e-05, %v265_v63  ;;  %v7784_v15 = vsub.f32 %v7752_v49, %v186_v4 }
 0x193   :  { %v6956_v16 = vpop.eup %6955  ;;  %v164_v17 = vpop.xlane.xlu1 %163  ;;  %v307_v18 = vmul.f32 %v6954_v12, %v7723_v28  ;;  %v350_v34 = vadd.f32 %v7791_v23, %v328_v20 }
 0x194   :  { %v166_v19 = vpop.xlane.xlu0 %165  ;;  %6965 = vrsqrt.f32 %v281_v14  ;;  %v187_v22 = vmul.f32 0.0078125, %v164_v17  ;;  %v218_v24 = vmul.f32 %v7784_v15, %v7784_v15  ;;  %v308_v30 = vmul.f32 %v6956_v16, %v7716_v21 }
 0x195   :  { %v188_v25 = vmul.f32 0.0078125, %v166_v19  ;;  %v329_v27 = vmul.f32 %v7781_v7, %v307_v18 }
 0x196   :  { %v6958_v31 = vpop.eup %6957  ;;  %v7798_v28 = vsub.f32 %v7754_v54, %v187_v22  ;;  %242 = vadd.xlane.f32.xlu0 %v218_v24  ;;  %v330_v40 = vmul.f32 %v7781_v7, %v308_v30 }
 0x197   :  { %v7801_v32 = vsub.f32 %v7757_v55, %v188_v25  ;;  %v6960_v33 = vpop.eup %6959  ;;  %v351_v35 = vadd.f32 %v7791_v23, %v329_v27  ;;  %v168_v38 = vpop.xlane.xlu1 %167  ;;  %v309_v39 = vmul.f32 %v6958_v31, %v7726_v29 }
 0x198   :  { %v170_v41 = vpop.xlane.xlu0 %169  ;;  %v219_v21 = vmul.f32 %v7798_v28, %v7798_v28  ;;  %v189_v42 = vmul.f32 0.0078125, %v168_v38  ;;  %v310_v43 = vmul.f32 %v6960_v33, %v7733_v36  ;;  %v352_v29 = vadd.f32 %v7791_v23, %v330_v40 }
 0x199   :  { %v220_v46 = vmul.f32 %v7801_v32, %v7801_v32  ;;  %v366_v47 = vpack.c.bf16 %v351_v35, %v350_v34  ;;  %v331_v48 = vmul.f32 %v7781_v7, %v309_v39  ;;  %v190_v50 = vmul.f32 0.0078125, %v170_v41 }
 0x19a   :  { %v6962_v51 = vpop.eup %6961  ;;  %244 = vadd.xlane.f32.xlu1 %v219_v21  ;;  %v7815_v52 = vsub.f32 %v7760_v58, %v189_v42  ;;  %v332_v53 = vmul.f32 %v7781_v7, %v310_v43 }
 0x19b   :  { %246 = vadd.xlane.f32.xlu0 %v220_v46  ;;  %v6964_v56 = vpop.eup %6963  ;;  %567 = vmatmul.mubr.bf16.vlgmr.msra.gmra.mrb[0].mxu0 %v366_v47  ;;  %v353_v36 = vadd.f32 %v7791_v23, %v331_v48  ;;  %v311_v57 = vmul.f32 %v6962_v51, %v7736_v37  ;;  %v172_v60 = vpop.xlane.xlu1 %171  ;;  %v7821_v61 = vsub.f32 %v7763_v59, %v190_v50 }
 0x19c   :  { %6360 = vmatprep.mubr.bf16.mxu1 %v366_v47  ;;  %v174_v62 = vpop.xlane.xlu0 %173  ;;  %576 = vmatprep.mubr.bf16.mxu0 %v9555_v26  ;;  %v221_v63 = vmul.f32 %v7815_v52, %v7815_v52  ;;  %v191_v4 = vmul.f32 0.0078125, %v172_v60  ;;  %v312_v12 = vmul.f32 %v6964_v56, %v7743_v44  ;;  %v354_v20 = vadd.f32 %v7791_v23, %v332_v53 }
 0x19d   :  { %v367_v14 = vpack.c.bf16 %v353_v36, %v352_v29  ;;  %v333_v16 = vmul.f32 %v7781_v7, %v311_v57  ;;  %v222_v17 = vmul.f32 %v7821_v61, %v7821_v61  ;;  %v192_v37 = vmul.f32 0.0078125, %v174_v62 }
 0x19e   :  { %v6966_v18 = vpop.eup %6965  ;;  %248 = vadd.xlane.f32.xlu1 %v221_v63  ;;  %v334_v19 = vmul.f32 %v7781_v7, %v312_v12  ;;  %v7833_v22 = vsub.f32 %v7766_v0, %v191_v4 }
 0x19f   :  { %6361 = vmatmul.mubr.bf16.vlgmr.msra.gmra.mrb[0].mxu1 %v367_v14  ;;  %v355_v24 = vadd.f32 %v7791_v23, %v333_v16  ;;  %v313_v44 = vmul.f32 %v6966_v18, %v7746_v45  ;;  %250 = vadd.xlane.f32.xlu0 %v222_v17  ;;  %v176_v25 = vpop.xlane.xlu1 %175  ;;  %v7838_v27 = vsub.f32 %v7769_v1, %v192_v37 }
 0x1a0   :  { %v223_v30 = vmul.f32 %v7833_v22, %v7833_v22  ;;  %v193_v31 = vmul.f32 0.0078125, %v176_v25  ;;  %v356_v45 = vadd.f32 %v7791_v23, %v334_v19 }
 0x1a1   :  { %v368_v33 = vpack.c.bf16 %v355_v24, %v354_v20  ;;  %v335_v34 = vmul.f32 %v7781_v7, %v313_v44  ;;  %v224_v35 = vmul.f32 %v7838_v27, %v7838_v27 }
 0x1a2   :  { %252 = vadd.xlane.f32.xlu1 %v223_v30  ;;  %v7846_v38 = vsub.f32 %v7772_v13, %v193_v31 }
 0x1a3   :  { %577 = vmatmul.mubr.bf16.gmra.mrb[4].mxu0 %v367_v14  ;;  %6364 = vmatprep.mubr.bf16.mxu1 %v368_v33  ;;  %v357_v39 = vadd.f32 %v7791_v23, %v335_v34 }
 0x1a4   :  { %586 = vmatprep.mubr.bf16.mxu0 %v9555_v26  ;;  %v225_v40 = vmul.f32 %v7846_v38, %v7846_v38  ;;  %254 = vadd.xlane.f32.xlu0 %v224_v35 }
 0x1a5   :  { %v369_v41 = vpack.c.bf16 %v357_v39, %v356_v45 }
 0x1a6   :  { %256 = vadd.xlane.f32.xlu1 %v225_v40 }
 0x1a7   :  { %6365 = vmatmul.mubr.bf16.gmra.mrb[4].mxu1 %v369_v41 }
 0x1ab   :  { %587 = vmatmul.mubr.bf16.gmra.mrb[8].mxu0 %v368_v33 }
 0x1ac   :  { %596 = vmatprep.mubr.bf16.mxu0 %v9555_v26 }
 0x1b3   :  { %597 = vmatmul.mubr.bf16.gmra.mrb[12].mxu0 %v369_v41 }
 0x1b4   :  { %606 = vmatprep.mubr.bf16.mxu0 %v9555_v26 }
 0x223   :  { %v243_v21 = vpop.xlane.xlu0 %242 }
 0x224   :  { %v266_v42 = vmul.f32 0.0078125, %v243_v21 }
 0x226   :  { %v282_v43 = vadd.f32 1e-05, %v266_v42 }
 0x227   :  { %v245_v46 = vpop.xlane.xlu1 %244 }
 0x228   :  { %v247_v47 = vpop.xlane.xlu0 %246  ;;  %v267_v48 = vmul.f32 0.0078125, %v245_v46  ;;  %6967 = vrsqrt.f32 %v282_v43 }
 0x229   :  { %v268_v50 = vmul.f32 0.0078125, %v247_v47 }
 0x22a   :  { %v283_v51 = vadd.f32 1e-05, %v267_v48 }
 0x22b   :  { %v284_v29 = vadd.f32 1e-05, %v268_v50  ;;  %v249_v53 = vpop.xlane.xlu1 %248 }
 0x22c   :  { %6969 = vrsqrt.f32 %v283_v51  ;;  %v269_v56 = vmul.f32 0.0078125, %v249_v53  ;;  %v251_v36 = vpop.xlane.xlu0 %250 }
 0x22d   :  { %6971 = vrsqrt.f32 %v284_v29  ;;  %v270_v57 = vmul.f32 0.0078125, %v251_v36 }
 0x22e   :  { %v285_v60 = vadd.f32 1e-05, %v269_v56 }
 0x22f   :  { %v253_v62 = vpop.xlane.xlu1 %252  ;;  %v286_v63 = vadd.f32 1e-05, %v270_v57 }
 0x230   :  { %6973 = vrsqrt.f32 %v285_v60  ;;  %v271_v4 = vmul.f32 0.0078125, %v253_v62 }
 0x231   :  { %6975 = vrsqrt.f32 %v286_v63  ;;  %v255_v12 = vpop.xlane.xlu0 %254 }
 0x232   :  { %v6968_v14 = vpop.eup %6967  ;;  %v287_v16 = vadd.f32 1e-05, %v271_v4  ;;  %v272_v17 = vmul.f32 0.0078125, %v255_v12 }
 0x233   :  { %v257_v37 = vpop.xlane.xlu1 %256  ;;  %v314_v18 = vmul.f32 %v6968_v14, %v7784_v15 }
 0x234   :  { %6977 = vrsqrt.f32 %v287_v16  ;;  %v273_v20 = vmul.f32 0.0078125, %v257_v37  ;;  %v288_v19 = vadd.f32 1e-05, %v272_v17 }
 0x235   :  { %v336_v31 = vmul.f32 %v7781_v7, %v314_v18 }
 0x236   :  { %v6970_v24 = vpop.eup %6969  ;;  %v289_v44 = vadd.f32 1e-05, %v273_v20  ;;  %6979 = vrsqrt.f32 %v288_v19 }
 0x237   :  { %v6972_v25 = vpop.eup %6971  ;;  %v315_v30 = vmul.f32 %v6970_v24, %v7798_v28  ;;  %v358_v39 = vadd.f32 %v7791_v23, %v336_v31 }
 0x238   :  { %6981 = vrsqrt.f32 %v289_v44  ;;  %v316_v33 = vmul.f32 %v6972_v25, %v7801_v32 }
 0x239   :  { %v337_v34 = vmul.f32 %v7781_v7, %v315_v30 }
 0x23a   :  { %v6974_v35 = vpop.eup %6973  ;;  %v338_v45 = vmul.f32 %v7781_v7, %v316_v33 }
 0x23b   :  { %v6976_v15 = vpop.eup %6975  ;;  %v359_v40 = vadd.f32 %v7791_v23, %v337_v34  ;;  %v317_v41 = vmul.f32 %v6974_v35, %v7815_v52 }
 0x23c   :  { %v318_v21 = vmul.f32 %v6976_v15, %v7821_v61  ;;  %v360_v32 = vadd.f32 %v7791_v23, %v338_v45 }
 0x23d   :  { %v370_v28 = vpack.c.bf16 %v359_v40, %v358_v39  ;;  %v339_v42 = vmul.f32 %v7781_v7, %v317_v41 }
 0x23e   :  { %v6978_v43 = vpop.eup %6977  ;;  %v340_v48 = vmul.f32 %v7781_v7, %v318_v21 }
 0x23f   :  { %607 = vmatmul.mubr.bf16.gmra.mrb[16].mxu0 %v370_v28  ;;  %v361_v46 = vadd.f32 %v7791_v23, %v339_v42  ;;  %6368 = vmatprep.mubr.bf16.mxu1 %v370_v28  ;;  %v319_v47 = vmul.f32 %v6978_v43, %v7833_v22 }
 0x240   :  { %v6980_v50 = vpop.eup %6979  ;;  %616 = vmatprep.mubr.bf16.mxu0 %v9555_v26  ;;  %v362_v53 = vadd.f32 %v7791_v23, %v340_v48 }
 0x241   :  { %v371_v52 = vpack.c.bf16 %v361_v46, %v360_v32  ;;  %v341_v61 = vmul.f32 %v7781_v7, %v319_v47  ;;  %v320_v51 = vmul.f32 %v6980_v50, %v7838_v27 }
 0x242   :  { %v6982_v29 = vpop.eup %6981 }
 0x243   :  { %v363_v56 = vadd.f32 %v7791_v23, %v341_v61  ;;  %6369 = vmatmul.mubr.bf16.gmra.mrb[8].mxu1 %v371_v52  ;;  %v321_v36 = vmul.f32 %v6982_v29, %v7846_v38  ;;  %v342_v22 = vmul.f32 %v7781_v7, %v320_v51 }
 0x245   :  { %v372_v57 = vpack.c.bf16 %v363_v56, %v362_v53  ;;  %v343_v60 = vmul.f32 %v7781_v7, %v321_v36  ;;  %v364_v62 = vadd.f32 %v7791_v23, %v342_v22 }
 0x247   :  { %617 = vmatmul.mubr.bf16.gmra.mrb[20].mxu0 %v371_v52  ;;  %6372 = vmatprep.mubr.bf16.mxu1 %v372_v57  ;;  %v365_v63 = vadd.f32 %v7791_v23, %v343_v60 }
 0x248   :  { %626 = vmatprep.mubr.bf16.mxu0 %v9555_v26 }
 0x249   :  { %v373_v27 = vpack.c.bf16 %v365_v63, %v364_v62 }
 0x24b   :  { %6373 = vmatmul.mubr.bf16.gmra.mrb[12].mxu1 %v373_v27 }
 0x24f   :  { %627 = vmatmul.mubr.bf16.gmra.mrb[24].mxu0 %v372_v57 }
 0x250   :  { %636 = vmatprep.mubr.bf16.mxu0 %v9555_v26 }
 0x257   :  { %637 = vmatmul.mubr.bf16.gmra.mrb[28].mxu0 %v373_v27 }
 0x26e   :  { %v568_v38 = vpop.f32.mrb[0].mxu0 }
 0x26f   :  { %v570_v4 = vpop.f32.mrb[1].mxu0 }
 0x270   :  { %v572_v12 = vpop.f32.mrb[2].mxu0 }
 0x271   :  { %v7882_v14 = vpack.c.bf16 %v572_v12, %v568_v38  ;;  %v574_v7 = vpop.f32.mrb[3].mxu0 }
 0x272   :  { %v7884_v16 = vpack.c.bf16 %v574_v7, %v570_v4  ;;  %v6362_v17 = vpop.f32.mrb[0].mxu1 }
 0x273   :  { %v681_v37 = vpop.f32.mrb[1].mxu1  ;;  %6384 = vmatprep.mubr.msk.bf16.mxu1 %vm757_vm0, %v7882_v14 }
 0x274   :  { %v6363_v23 = vpop.f32.mrb[2].mxu1  ;;  %6776 = vmatprep.subr.msk.bf16.mxu1 %vm757_vm0, %v7884_v16  ;;  %1041 = vrot.lane.b32.xlu0 %v7884_v16, %s7551_s1  ;;  %v771_v18 = vsel %vm757_vm0, %v7884_v16, 0 }
 0x275   :  { %v7894_v20 = vpack.c.bf16 %v6363_v23, %v6362_v17  ;;  %v684_v19 = vpop.f32.mrb[3].mxu1  ;;  %6377 = vmatpush3.bf16.xpose.msra.mxu1 %v771_v18 }
 0x276   :  { %v7896_v24 = vpack.c.bf16 %v684_v19, %v681_v37  ;;  %v578_v44 = vpop.f32.mrb[4].mxu0 }
 0x277   :  { %v580_v25 = vpop.f32.mrb[5].mxu0 }
 0x278   :  { %v582_v30 = vpop.f32.mrb[6].mxu0  ;;  %1029 = vrot.lane.b32.xlu0 %v7882_v14, %s7551_s1 }
 0x279   :  { %v7900_v31 = vpack.c.bf16 %v582_v30, %v578_v44  ;;  %v584_v33 = vpop.f32.mrb[7].mxu0 }
 0x27a   :  { %v7902_v34 = vpack.c.bf16 %v584_v33, %v580_v25  ;;  %v6366_v35 = vpop.f32.mrb[4].mxu1 }
 0x27b   :  { %v697_v45 = vpop.f32.mrb[5].mxu1 }
 0x27c   :  { %1043 = vrot.lane.b32.xlu1 %v7902_v34, %s7551_s1  ;;  %v6367_v15 = vpop.f32.mrb[6].mxu1  ;;  %6777 = vmatprep.subr.msk.bf16.mxu1 %vm757_vm0, %v7902_v34  ;;  %v774_v39 = vsel %vm757_vm0, %v7902_v34, 0 }
 0x27d   :  { %v7910_v40 = vpack.c.bf16 %v6367_v15, %v6366_v35  ;;  %v700_v41 = vpop.f32.mrb[7].mxu1  ;;  %6379 = vmatpush3.bf16.xpose.msra.mxu1 %v774_v39 }
 0x27e   :  { %v7912_v21 = vpack.c.bf16 %v700_v41, %v697_v45  ;;  %v588_v28 = vpop.f32.mrb[8].mxu0 }
 0x27f   :  { %v590_v42 = vpop.f32.mrb[9].mxu0 }
 0x280   :  { %v592_v43 = vpop.f32.mrb[10].mxu0 }
 0x281   :  { %v7914_v32 = vpack.c.bf16 %v592_v43, %v588_v28  ;;  %v594_v46 = vpop.f32.mrb[11].mxu0 }
 0x282   :  { %v7916_v47 = vpack.c.bf16 %v594_v46, %v590_v42 }
 0x283   :  { %1033 = vrot.lane.b32.xlu0 %v7914_v32, %s7551_s1 }
 0x284   :  { %1045 = vrot.lane.b32.xlu1 %v7916_v47, %s7551_s1  ;;  %6778 = vmatprep.subr.msk.bf16.mxu1 %vm757_vm0, %v7916_v47  ;;  %v777_v48 = vsel %vm757_vm0, %v7916_v47, 0 }
 0x285   :  { %6381 = vmatpush3.bf16.xpose.msra.mxu1 %v777_v48 }
 0x286   :  { %v598_v50 = vpop.f32.mrb[12].mxu0 }
 0x287   :  { %v600_v52 = vpop.f32.mrb[13].mxu0 }
 0x288   :  { %v602_v61 = vpop.f32.mrb[14].mxu0 }
 0x289   :  { %v7926_v51 = vpack.c.bf16 %v602_v61, %v598_v50  ;;  %v604_v29 = vpop.f32.mrb[15].mxu0 }
 0x28a   :  { %v7928_v53 = vpack.c.bf16 %v604_v29, %v600_v52 }
 0x28c   :  { %1047 = vrot.lane.b32.xlu1 %v7928_v53, %s7551_s1  ;;  %6779 = vmatprep.subr.msk.bf16.mxu1 %vm757_vm0, %v7928_v53  ;;  %v780_v56 = vsel %vm757_vm0, %v7928_v53, 0 }
 0x28d   :  { %6383 = vmatpush3.bf16.xpose.msra.mxu1 %v780_v56 }
 0x28e   :  { %6392 = vmatprep.subr.bf16.mxu1 %v7896_v24 }
 0x290   :  { %1031 = vrot.lane.b32.xlu1 %v7900_v31, %s7551_s1 }
 0x294   :  { %1035 = vrot.lane.b32.xlu1 %v7926_v51, %s7551_s1  ;;  %6385 = vmatmul.mubr.msk.bf16.vlgmr.msra.gmra.mrb[16].mxu1 %vm757_vm0, %v7900_v31 }
 0x295   :  { %6388 = vmatprep.mubr.msk.bf16.mxu1 %vm757_vm0, %v7914_v32  ;;  %6393 = vmatpush3.bf16.msra.mxu1 %v7896_v24 }
 0x296   :  { %6394 = vmatprep.subr.bf16.mxu1 %v7894_v20 }
 0x299   :  { %6395 = vmatpush3.bf16.msra.mxu1 %v7894_v20 }
 0x29a   :  { %6396 = vmatprep.subr.bf16.mxu1 %v7912_v21 }
 0x29c   :  { %6389 = vmatmul.mubr.msk.bf16.gmra.mrb[20].mxu1 %vm757_vm0, %v7926_v51 }
 0x29d   :  { %6397 = vmatpush3.bf16.msra.mxu1 %v7912_v21 }
 0x29e   :  { %6398 = vmatprep.subr.bf16.mxu1 %v7910_v40 }
 0x2a1   :  { %6399 = vmatpush3.bf16.msra.mxu1 %v7910_v40 }
 0x2e6   :  { %v1042_v36 = vpop.permute.xlu0 %1041 }
 0x2e7   :  { %6780 = vmatprep.subr.msk.bf16.mxu0 %vm757_vm0, %v1042_v36  ;;  %v1062_v22 = vsel %vm757_vm0, %v1042_v36, 0 }
 0x2e8   :  { %6409 = vmatpush3.bf16.xpose.msra.mxu0 %v1062_v22 }
 0x2ea   :  { %v1030_v57 = vpop.permute.xlu0 %1029 }
 0x2eb   :  { %6416 = vmatprep.mubr.msk.bf16.mxu0 %vm757_vm0, %v1030_v57 }
 0x2ee   :  { %v1044_v60 = vpop.permute.xlu1 %1043 }
 0x2ef   :  { %6781 = vmatprep.subr.msk.bf16.mxu0 %vm757_vm0, %v1044_v60  ;;  %v1065_v62 = vsel %vm757_vm0, %v1044_v60, 0 }
 0x2f0   :  { %6411 = vmatpush3.bf16.xpose.msra.mxu0 %v1065_v62 }
 0x2f5   :  { %v1034_v7 = vpop.permute.xlu0 %1033 }
 0x2f6   :  { %v1046_v63 = vpop.permute.xlu1 %1045 }
 0x2f7   :  { %6782 = vmatprep.subr.msk.bf16.mxu0 %vm757_vm0, %v1046_v63  ;;  %v1068_v27 = vsel %vm757_vm0, %v1046_v63, 0 }
 0x2f8   :  { %6413 = vmatpush3.bf16.xpose.msra.mxu0 %v1068_v27 }
 0x2fe   :  { %v1048_v38 = vpop.permute.xlu1 %1047 }
 0x2ff   :  { %6783 = vmatprep.subr.msk.bf16.mxu0 %vm757_vm0, %v1048_v38  ;;  %v1071_v4 = vsel %vm757_vm0, %v1048_v38, 0 }
 0x300   :  { %6415 = vmatpush3.bf16.xpose.msra.mxu0 %v1071_v4 }
 0x302   :  { %v1032_v12 = vpop.permute.xlu1 %1031 }
 0x306   :  { %v1036_v17 = vpop.permute.xlu1 %1035 }
 0x307   :  { %6417 = vmatmul.mubr.msk.bf16.vlgmr.msra.gmra.mrb[32].mxu0 %vm757_vm0, %v1032_v12 }
 0x308   :  { %6420 = vmatprep.mubr.msk.bf16.mxu0 %vm757_vm0, %v1034_v7 }
 0x30f   :  { %6421 = vmatmul.mubr.msk.bf16.gmra.mrb[36].mxu0 %vm757_vm0, %v1036_v17 }
 0x312   :  { %v608_v37 = vpop.f32.mrb[16].mxu0 }
 0x313   :  { %v610_v23 = vpop.f32.mrb[17].mxu0 }
 0x314   :  { %v612_v18 = vpop.f32.mrb[18].mxu0 }
 0x315   :  { %v7966_v19 = vpack.c.bf16 %v612_v18, %v608_v37  ;;  %v614_v44 = vpop.f32.mrb[19].mxu0 }
 0x316   :  { %v7968_v25 = vpack.c.bf16 %v614_v44, %v610_v23  ;;  %v6370_v30 = vpop.f32.mrb[8].mxu1 }
 0x317   :  { %v713_v33 = vpop.f32.mrb[9].mxu1 }
 0x318   :  { %v6371_v35 = vpop.f32.mrb[10].mxu1 }
 0x319   :  { %v7970_v45 = vpack.c.bf16 %v6371_v35, %v6370_v30  ;;  %v716_v15 = vpop.f32.mrb[11].mxu1 }
 0x31a   :  { %v618_v39 = vpop.f32.mrb[20].mxu0  ;;  %v7972_v41 = vpack.c.bf16 %v716_v15, %v713_v33 }
 0x31b   :  { %v620_v28 = vpop.f32.mrb[21].mxu0 }
 0x31c   :  { %v622_v42 = vpop.f32.mrb[22].mxu0 }
 0x31d   :  { %v7974_v43 = vpack.c.bf16 %v622_v42, %v618_v39  ;;  %v624_v46 = vpop.f32.mrb[23].mxu0 }
 0x31e   :  { %v7976_v48 = vpack.c.bf16 %v624_v46, %v620_v28  ;;  %v6374_v50 = vpop.f32.mrb[12].mxu1 }
 0x31f   :  { %v729_v52 = vpop.f32.mrb[13].mxu1 }
 0x320   :  { %v6375_v61 = vpop.f32.mrb[14].mxu1 }
 0x321   :  { %v7978_v29 = vpack.c.bf16 %v6375_v61, %v6374_v50  ;;  %v732_v56 = vpop.f32.mrb[15].mxu1 }
 0x322   :  { %v628_v36 = vpop.f32.mrb[24].mxu0  ;;  %v7980_v22 = vpack.c.bf16 %v732_v56, %v729_v52 }
 0x323   :  { %v630_v57 = vpop.f32.mrb[25].mxu0 }
 0x324   :  { %v632_v60 = vpop.f32.mrb[26].mxu0 }
 0x325   :  { %v7982_v62 = vpack.c.bf16 %v632_v60, %v628_v36  ;;  %v634_v63 = vpop.f32.mrb[27].mxu0 }
 0x326   :  { %v7984_v27 = vpack.c.bf16 %v634_v63, %v630_v57 }
 0x32a   :  { %v638_v38 = vpop.f32.mrb[28].mxu0 }
 0x32b   :  { %v640_v4 = vpop.f32.mrb[29].mxu0 }
 0x32c   :  { %v642_v12 = vpop.f32.mrb[30].mxu0 }
 0x32d   :  { %v7986_v7 = vpack.c.bf16 %v642_v12, %v638_v38  ;;  %v644_v17 = vpop.f32.mrb[31].mxu0 }
 0x32e   :  { %v7988_v37 = vpack.c.bf16 %v644_v17, %v640_v4 }
 0x367   :  { %v6386_v23 = vpop.f32.mrb[16].mxu1 }
 0x368   :  { %v816_v18 = vpop.f32.mrb[17].mxu1  ;;  %v854_v44 = vsel %vm847_vm1, %v6386_v23, -inf }
 0x369   :  { %855 = vmax.xlane.f32.xlu0 %v854_v44  ;;  %v6387_v30 = vpop.f32.mrb[18].mxu1  ;;  %v848_v15 = vsel %vm847_vm1, %v816_v18, -inf }
 0x36a   :  { %v819_v33 = vpop.f32.mrb[19].mxu1  ;;  %v857_v42 = vsel %vm847_vm1, %v6387_v30, -inf }
 0x36b   :  { %v851_v35 = vsel %vm847_vm1, %v819_v33, -inf }
 0x36c   :  { %852 = vmax.xlane.f32.xlu1 %v851_v35 }
 0x36d   :  { %849 = vmax.xlane.f32.xlu0 %v848_v15 }
 0x36f   :  { %v7993_v39 = vpop.f32.mrb[20].mxu1 }
 0x370   :  { %v7995_v28 = vpop.f32.mrb[21].mxu1  ;;  %v866_v36 = vsel %vm847_vm1, %v7993_v39, -inf }
 0x371   :  { %858 = vmax.xlane.f32.xlu0 %v857_v42  ;;  %v6391_v46 = vpop.f32.mrb[22].mxu1  ;;  %v860_v61 = vsel %vm847_vm1, %v7995_v28, -inf }
 0x372   :  { %v7998_v50 = vpop.f32.mrb[23].mxu1  ;;  %v869_v52 = vsel %vm847_vm1, %v6391_v46, -inf }
 0x373   :  { %870 = vmax.xlane.f32.xlu1 %v869_v52  ;;  %v863_v56 = vsel %vm847_vm1, %v7998_v50, -inf }
 0x375   :  { %861 = vmax.xlane.f32.xlu0 %v860_v61 }
 0x377   :  { %864 = vmax.xlane.f32.xlu1 %v863_v56 }
 0x379   :  { %867 = vmax.xlane.f32.xlu0 %v866_v36 }
 0x3da   :  { %v8007_v57 = vpop.f32.mrb[32].mxu0 }
 0x3db   :  { %v8009_v60 = vpop.f32.mrb[33].mxu0  ;;  %v1144_v17 = vsel %vm847_vm1, %v8007_v57, -inf }
 0x3dc   :  { %v8011_v63 = vpop.f32.mrb[34].mxu0  ;;  %v1138_v38 = vsel %vm847_vm1, %v8009_v60, -inf }
 0x3dd   :  { %1139 = vmax.xlane.f32.xlu0 %v1138_v38  ;;  %v8015_v4 = vpop.f32.mrb[35].mxu0  ;;  %v1147_v12 = vsel %vm847_vm1, %v8011_v63, -inf }
 0x3de   :  { %1148 = vmax.xlane.f32.xlu1 %v1147_v12  ;;  %v1141_v44 = vsel %vm847_vm1, %v8015_v4, -inf }
 0x3e1   :  { %1145 = vmax.xlane.f32.xlu0 %v1144_v17 }
 0x3e2   :  { %1142 = vmax.xlane.f32.xlu1 %v1141_v44  ;;  %v8023_v35 = vpop.f32.mrb[36].mxu0 }
 0x3e3   :  { %v8025_v15 = vpop.f32.mrb[37].mxu0  ;;  %v1156_v36 = vsel %vm847_vm1, %v8023_v35, -inf }
 0x3e4   :  { %v8027_v42 = vpop.f32.mrb[38].mxu0  ;;  %v1150_v52 = vsel %vm847_vm1, %v8025_v15, -inf }
 0x3e5   :  { %1151 = vmax.xlane.f32.xlu0 %v1150_v52  ;;  %v8031_v61 = vpop.f32.mrb[39].mxu0  ;;  %v1159_v56 = vsel %vm847_vm1, %v8027_v42, -inf }
 0x3e6   :  { %1160 = vmax.xlane.f32.xlu1 %v1159_v56  ;;  %v1153_v38 = vsel %vm847_vm1, %v8031_v61, -inf }
 0x3e9   :  { %1157 = vmax.xlane.f32.xlu0 %v1156_v36 }
 0x3ea   :  { %1154 = vmax.xlane.f32.xlu1 %v1153_v38 }
 0x3f6   :  { %v856_v12 = vpop.xlane.xlu0 %855 }
 0x3f7   :  { %v874_v17 = vsub.f32 %v6386_v23, %v856_v12 }
 0x3f9   :  { %v884_v44 = vmul.f32 1.442695, %v874_v17  ;;  %v853_v26 = vpop.xlane.xlu1 %852 }
 0x3fa   :  { %v850_v0 = vpop.xlane.xlu0 %849  ;;  %v873_v13 = vsub.f32 %v819_v33, %v853_v26 }
 0x3fb   :  { %6983 = vpow2.f32 %v884_v44  ;;  %v872_v52 = vsub.f32 %v816_v18, %v850_v0 }
 0x3fc   :  { %v882_v58 = vmul.f32 1.442695, %v873_v13 }
 0x3fd   :  { %v880_v59 = vmul.f32 1.442695, %v872_v52 }
 0x3fe   :  { %v859_v1 = vpop.xlane.xlu0 %858 }
 0x3ff   :  { %6985 = vpow2.f32 %v880_v59  ;;  %v875_v56 = vsub.f32 %v6387_v30, %v859_v1 }
 0x400   :  { %v871_v54 = vpop.xlane.xlu1 %870 }
 0x401   :  { %v886_v49 = vmul.f32 1.442695, %v875_v56  ;;  %v879_v36 = vsub.f32 %v6391_v46, %v871_v54 }
 0x402   :  { %v862_v55 = vpop.xlane.xlu0 %861 }
 0x403   :  { %6987 = vpow2.f32 %v886_v49  ;;  %v876_v38 = vsub.f32 %v7995_v28, %v862_v55  ;;  %v894_v12 = vmul.f32 1.442695, %v879_v36 }
 0x404   :  { %v865_v9 = vpop.xlane.xlu1 %864  ;;  %6989 = vpow2.f32 %v882_v58 }
 0x405   :  { %v8040_v23 = vpop.eup %6983  ;;  %v877_v0 = vsub.f32 %v7998_v50, %v865_v9  ;;  %v888_v13 = vmul.f32 1.442695, %v876_v38  ;;  %6991 = vpow2.f32 %v894_v12 }
 0x406   :  { %v868_v26 = vpop.xlane.xlu0 %867  ;;  %v902_v59 = vsel %vm847_vm1, %v8040_v23, 0.0 }
 0x407   :  { %v878_v1 = vsub.f32 %v7993_v39, %v868_v26  ;;  %903 = vadd.xlane.f32.xlu0 %v902_v59  ;;  %v890_v49 = vmul.f32 1.442695, %v877_v0 }
 0x409   :  { %v8046_v54 = vpop.eup %6985  ;;  %v892_v55 = vmul.f32 1.442695, %v878_v1 }
 0x40a   :  { %v896_v18 = vsel %vm847_vm1, %v8046_v54, 0.0 }
 0x40b   :  { %6993 = vpow2.f32 %v892_v55  ;;  %897 = vadd.xlane.f32.xlu0 %v896_v18 }
 0x40c   :  { %6995 = vpow2.f32 %v888_v13 }
 0x40d   :  { %v8050_v9 = vpop.eup %6987  ;;  %6997 = vpow2.f32 %v890_v49 }
 0x40e   :  { %v905_v58 = vsel %vm847_vm1, %v8050_v9, 0.0  ;;  %v8054_v30 = vpop.eup %6989 }
 0x40f   :  { %906 = vadd.xlane.f32.xlu1 %v905_v58  ;;  %v899_v33 = vsel %vm847_vm1, %v8054_v30, 0.0  ;;  %v8058_v39 = vpop.eup %6991 }
 0x410   :  { %v917_v50 = vsel %vm847_vm1, %v8058_v39, 0.0 }
 0x413   :  { %900 = vadd.xlane.f32.xlu1 %v899_v33 }
 0x415   :  { %v8060_v28 = vpop.eup %6993 }
 0x416   :  { %v8062_v46 = vpop.eup %6995  ;;  %v914_v17 = vsel %vm847_vm1, %v8060_v28, 0.0 }
 0x417   :  { %v8068_v44 = vpop.eup %6997  ;;  %918 = vadd.xlane.f32.xlu1 %v917_v50  ;;  %915 = vadd.xlane.f32.xlu0 %v914_v17  ;;  %v908_v56 = vsel %vm847_vm1, %v8062_v46, 0.0 }
 0x418   :  { %v911_v52 = vsel %vm847_vm1, %v8068_v44, 0.0 }
 0x41b   :  { %912 = vadd.xlane.f32.xlu1 %v911_v52  ;;  %909 = vadd.xlane.f32.xlu0 %v908_v56 }
 0x42c   :  { %1236 = vrot.lane.b32.xlu1 %v7894_v20, %s7551_s1 }
 0x430   :  { %1238 = vrot.lane.b32.xlu1 %v7912_v21, %s7551_s1 }
 0x46a   :  { %v1140_v36 = vpop.xlane.xlu0 %1139 }
 0x46b   :  { %v1149_v38 = vpop.xlane.xlu1 %1148  ;;  %v1162_v0 = vsub.f32 %v8009_v60, %v1140_v36 }
 0x46c   :  { %v1165_v12 = vsub.f32 %v8011_v63, %v1149_v38 }
 0x46d   :  { %v1170_v55 = vmul.f32 1.442695, %v1162_v0 }
 0x46e   :  { %v1176_v26 = vmul.f32 1.442695, %v1165_v12  ;;  %v1146_v59 = vpop.xlane.xlu0 %1145 }
 0x46f   :  { %v1164_v1 = vsub.f32 %v8007_v57, %v1146_v59  ;;  %v1143_v13 = vpop.xlane.xlu1 %1142 }
 0x470   :  { %6999 = vpow2.f32 %v1176_v26  ;;  %v1163_v49 = vsub.f32 %v8015_v4, %v1143_v13 }
 0x471   :  { %v1174_v18 = vmul.f32 1.442695, %v1164_v1 }
 0x472   :  { %v1172_v58 = vmul.f32 1.442695, %v1163_v49  ;;  %v1152_v33 = vpop.xlane.xlu0 %1151 }
 0x473   :  { %7001 = vpow2.f32 %v1174_v18  ;;  %v1166_v50 = vsub.f32 %v8025_v15, %v1152_v33  ;;  %v1161_v0 = vpop.xlane.xlu1 %1160 }
 0x474   :  { %7003 = vpow2.f32 %v1172_v58 }
 0x475   :  { %7005 = vpow2.f32 %v1170_v55  ;;  %v1178_v63 = vmul.f32 1.442695, %v1166_v50 }
 0x476   :  { %v1158_v26 = vpop.xlane.xlu0 %1157 }
 0x477   :  { %7007 = vpow2.f32 %v1178_v63  ;;  %v1155_v1 = vpop.xlane.xlu1 %1154  ;;  %v1168_v55 = vsub.f32 %v8023_v35, %v1158_v26 }
 0x478   :  { %v1167_v63 = vsub.f32 %v8031_v61, %v1155_v1 }
 0x479   :  { %v1182_v58 = vmul.f32 1.442695, %v1168_v55 }
 0x47a   :  { %v8083_v60 = vpop.eup %6999  ;;  %v1180_v26 = vmul.f32 1.442695, %v1167_v63 }
 0x47b   :  { %v1195_v57 = vsel %vm847_vm1, %v8083_v60, 0.0 }
 0x47c   :  { %1196 = vadd.xlane.f32.xlu1 %v1195_v57 }
 0x47d   :  { %v8087_v17 = vpop.eup %7001 }
 0x47e   :  { %v8089_v4 = vpop.eup %7003  ;;  %v1192_v52 = vsel %vm847_vm1, %v8087_v17, 0.0 }
 0x47f   :  { %v8093_v56 = vpop.eup %7005  ;;  %1193 = vadd.xlane.f32.xlu0 %v1192_v52  ;;  %v1189_v15 = vsel %vm847_vm1, %v8089_v4, 0.0 }
 0x480   :  { %1190 = vadd.xlane.f32.xlu1 %v1189_v15  ;;  %v1186_v38 = vsel %vm847_vm1, %v8093_v56, 0.0 }
 0x481   :  { %v8097_v36 = vpop.eup %7007 }
 0x482   :  { %v1198_v12 = vsel %vm847_vm1, %v8097_v36, 0.0 }
 0x483   :  { %1187 = vadd.xlane.f32.xlu0 %v1186_v38 }
 0x484   :  { %1199 = vadd.xlane.f32.xlu1 %v1198_v12  ;;  %v1169_v12 = vsub.f32 %v8027_v42, %v1161_v0 }
 0x486   :  { %v1184_v55 = vmul.f32 1.442695, %v1169_v12 }
 0x494   :  { %v904_v59 = vpop.xlane.xlu0 %903 }
 0x495   :  { %1240 = vrot.lane.b32.xlu1 %v7910_v40, %s7551_s1 }
 0x498   :  { %v898_v13 = vpop.xlane.xlu0 %897 }
 0x499   :  { %1234 = vrot.lane.b32.xlu0 %v7896_v24, %s7551_s1  ;;  %1520 = vrot.lane.b32.xlu1 %v7902_v34, %s7546_s8 }
 0x49c   :  { %v907_v49 = vpop.xlane.xlu1 %906 }
 0x49d   :  { %1522 = vrot.lane.b32.xlu1 %v7916_v47, %s7546_s8  ;;  %7009 = vrcp.f32 %v907_v49 }
 0x49e   :  { %7011 = vrcp.f32 %v898_v13 }
 0x49f   :  { %7013 = vrcp.f32 %v904_v59 }
 0x4a0   :  { %v901_v18 = vpop.xlane.xlu1 %900 }
 0x4a1   :  { %7015 = vrcp.f32 %v901_v18  ;;  %1524 = vrot.lane.b32.xlu1 %v7928_v53, %s7546_s8 }
 0x4a4   :  { %v919_v33 = vpop.xlane.xlu1 %918  ;;  %v916_v50 = vpop.xlane.xlu0 %915 }
 0x4a5   :  { %1512 = vrot.lane.b32.xlu1 %v7900_v31, %s7546_s8  ;;  %7017 = vrcp.f32 %v919_v33 }
 0x4a6   :  { %7019 = vrcp.f32 %v916_v50 }
 0x4a7   :  { %v7010_v57 = vpop.eup %7009  ;;  %7021 = vpow2.f32 %v1182_v58 }
 0x4a8   :  { %v913_v52 = vpop.xlane.xlu1 %912  ;;  %v910_v35 = vpop.xlane.xlu0 %909  ;;  %v931_v13 = vmul.f32 %v7010_v57, %v8050_v9 }
 0x4a9   :  { %v7012_v15 = vpop.eup %7011  ;;  %7023 = vrcp.f32 %v913_v52  ;;  %1516 = vrot.lane.b32.xlu1 %v7926_v51, %s7546_s8 }
 0x4aa   :  { %v7014_v38 = vpop.eup %7013  ;;  %7025 = vrcp.f32 %v910_v35  ;;  %v928_v61 = vmul.f32 %v7012_v15, %v8046_v54  ;;  %v6858_v35 = vld [vmem:[#allocation7 + $0x8] sm:$0xff]  }
 0x4ab   :  { %v7016_v59 = vpop.eup %7015  ;;  %v930_v49 = vmul.f32 %v7014_v38, %v8040_v23  ;;  %7027 = vpow2.f32 %v1180_v26 }
 0x4ac   :  { %v929_v1 = vmul.f32 %v7016_v59, %v8054_v30  ;;  %7029 = vpow2.f32 %v1184_v55 }
 0x4ad   :  { %1912 = vrot.lane.b32.xlu1 %v7902_v34, %s7552_s2  ;;  %v937_v58 = vpack.c.bf16 %v931_v13, %v930_v49 }
 0x4ae   :  { %v936_v18 = vpack.c.bf16 %v929_v1, %v928_v61 }
 0x4af   :  { %v7018_v42 = vpop.eup %7017 }
 0x4b0   :  { %6400 = vmatprep.mubr.msk.bf16.mxu1 %vm847_vm1, %v936_v18  ;;  %v7020_v0 = vpop.eup %7019  ;;  %v935_v33 = vmul.f32 %v7018_v42, %v8058_v39 }
 0x4b1   :  { %1916 = vrot.lane.b32.xlu1 %v7928_v53, %s7552_s2  ;;  %6401 = vmatmul.mubr.msk.bf16.vlgmr.msra.gmra.mrb[24].mxu1 %vm847_vm1, %v937_v58  ;;  %v8130_v54 = vpop.eup %7021  ;;  %v934_v30 = vmul.f32 %v7020_v0, %v8060_v28  ;;  %v6855_v58 = vld [vmem:[#allocation7 + $0x10] sm:$0xff]  }
 0x4b2   :  { %v1204_v53 = vsel %vm847_vm1, %v8130_v54, 0.0 }
 0x4b3   :  { %v7024_v23 = vpop.eup %7023  ;;  %v939_v52 = vpack.c.bf16 %v935_v33, %v934_v30 }
 0x4b4   :  { %v7026_v9 = vpop.eup %7025  ;;  %v933_v34 = vmul.f32 %v7024_v23, %v8068_v44  ;;  %v6856_v23 = vld [vmem:[#allocation7 + $0x18] sm:$0xff]  }
 0x4b5   :  { %1904 = vrot.lane.b32.xlu1 %v7900_v31, %s7552_s2  ;;  %v932_v50 = vmul.f32 %v7026_v9, %v8062_v46  ;;  %v8140_v57 = vpop.eup %7027  ;;  %v1237_v46 = vpop.permute.xlu1 %1236 }
 0x4b6   :  { %v1201_v31 = vsel %vm847_vm1, %v8140_v57, 0.0  ;;  %v8148_v39 = vpop.eup %7029 }
 0x4b7   :  { %v938_v63 = vpack.c.bf16 %v933_v34, %v932_v50  ;;  %v1207_v28 = vsel %vm847_vm1, %v8148_v39, 0.0 }
 0x4b8   :  { %1205 = vadd.xlane.f32.xlu0 %v1204_v53 }
 0x4b9   :  { %6404 = vmatprep.mubr.msk.bf16.mxu1 %vm847_vm1, %v938_v63  ;;  %1908 = vrot.lane.b32.xlu1 %v7926_v51, %s7552_s2  ;;  %v6857_v51 = vld [vmem:[#allocation7] sm:$0xff]   ;;  %v1239_v44 = vpop.permute.xlu1 %1238 }
 0x4ba   :  { %6405 = vmatmul.mubr.msk.bf16.gmra.mrb[28].mxu1 %vm847_vm1, %v939_v52  ;;  %6452 = vmatprep.subr.bf16.mxu0 %v6857_v51 }
 0x4bb   :  { %6453 = vmatpush3.bf16.msra.mxu0 %v6857_v51 }
 0x4bc   :  { %1202 = vadd.xlane.f32.xlu0 %v1201_v31  ;;  %6454 = vmatprep.subr.bf16.mxu0 %v6858_v35 }
 0x4bf   :  { %6455 = vmatpush3.bf16.msra.mxu0 %v6858_v35 }
 0x4c0   :  { %1208 = vadd.xlane.f32.xlu0 %v1207_v28 }
 0x4d6   :  { %1518 = vrot.lane.b32.xlu0 %v7884_v16, %s7546_s8 }
 0x4da   :  { %1510 = vrot.lane.b32.xlu0 %v7882_v14, %s7546_s8 }
 0x4de   :  { %1514 = vrot.lane.b32.xlu0 %v7914_v32, %s7546_s8 }
 0x4e2   :  { %1910 = vrot.lane.b32.xlu0 %v7884_v16, %s7552_s2 }
 0x4e6   :  { %1914 = vrot.lane.b32.xlu0 %v7916_v47, %s7552_s2 }
 0x4ea   :  { %1902 = vrot.lane.b32.xlu0 %v7882_v14, %s7552_s2 }
 0x4ee   :  { %1906 = vrot.lane.b32.xlu0 %v7914_v32, %s7552_s2 }
 0x509   :  { %v1197_v15 = vpop.xlane.xlu1 %1196 }
 0x50c   :  { %v1194_v38 = vpop.xlane.xlu0 %1193 }
 0x50d   :  { %v1191_v16 = vpop.xlane.xlu1 %1190 }
 0x50e   :  { %7031 = vrcp.f32 %v1191_v16 }
 0x510   :  { %v1188_v12 = vpop.xlane.xlu0 %1187 }
 0x511   :  { %7033 = vrcp.f32 %v1188_v12  ;;  %v1200_v14 = vpop.xlane.xlu1 %1199 }
 0x512   :  { %7035 = vrcp.f32 %v1194_v38 }
 0x513   :  { %7037 = vrcp.f32 %v1197_v15 }
 0x514   :  { %v1235_v47 = vpop.permute.xlu0 %1234  ;;  %7039 = vrcp.f32 %v1200_v14 }
 0x515   :  { %6424 = vmatprep.subr.bf16.mxu1 %v1235_v47  ;;  %v1241_v49 = vpop.permute.xlu1 %1240 }
 0x516   :  { %6425 = vmatpush3.bf16.msra.mxu1 %v1235_v47 }
 0x517   :  { %6426 = vmatprep.subr.bf16.mxu1 %v1237_v46 }
 0x518   :  { %v7032_v26 = vpop.eup %7031 }
 0x519   :  { %v1219_v61 = vmul.f32 %v7032_v26, %v8089_v4 }
 0x51a   :  { %6427 = vmatpush3.bf16.msra.mxu1 %v1237_v46 }
 0x51b   :  { %v7034_v32 = vpop.eup %7033  ;;  %6428 = vmatprep.subr.bf16.mxu1 %v1239_v44 }
 0x51c   :  { %v7036_v59 = vpop.eup %7035  ;;  %v1218_v13 = vmul.f32 %v7034_v32, %v8093_v56 }
 0x51d   :  { %v7038_v1 = vpop.eup %7037  ;;  %v1220_v18 = vmul.f32 %v7036_v59, %v8087_v17 }
 0x51e   :  { %6429 = vmatpush3.bf16.msra.mxu1 %v1239_v44  ;;  %v1226_v55 = vpack.c.bf16 %v1219_v61, %v1218_v13  ;;  %v1221_v42 = vmul.f32 %v7038_v1, %v8083_v60  ;;  %v7040_v34 = vpop.eup %7039  ;;  %v1521_v1 = vpop.permute.xlu1 %1520 }
 0x51f   :  { %6430 = vmatprep.subr.bf16.mxu1 %v1241_v49  ;;  %v1222_v30 = vmul.f32 %v7040_v34, %v8097_v36 }
 0x520   :  { %6432 = vmatprep.mubr.msk.bf16.mxu1 %vm847_vm1, %v1226_v55  ;;  %v1227_v0 = vpack.c.bf16 %v1221_v42, %v1220_v18 }
 0x522   :  { %6431 = vmatpush3.bf16.msra.mxu1 %v1241_v49  ;;  %v1542_v49 = vsel %vm757_vm0, %v1521_v1, 0  ;;  %v1523_v55 = vpop.permute.xlu1 %1522 }
 0x523   :  { %6440 = vmatprep.subr.bf16.mxu1 %v6855_v58 }
 0x525   :  { %6433 = vmatmul.mubr.msk.bf16.vlgmr.msra.gmra.mrb[32].mxu1 %vm847_vm1, %v1227_v0 }
 0x526   :  { %6441 = vmatpush3.bf16.msra.mxu1 %v6855_v58  ;;  %v1545_v58 = vsel %vm757_vm0, %v1523_v55, 0  ;;  %v1525_v42 = vpop.permute.xlu1 %1524 }
 0x527   :  { %6442 = vmatprep.subr.bf16.mxu1 %v6856_v23 }
 0x52a   :  { %6443 = vmatpush3.bf16.msra.mxu1 %v6856_v23  ;;  %v1548_v23 = vsel %vm757_vm0, %v1525_v42, 0 }
 0x545   :  { %v1206_v4 = vpop.xlane.xlu0 %1205 }
 0x549   :  { %v1203_v56 = vpop.xlane.xlu0 %1202 }
 0x54a   :  { %7041 = vrcp.f32 %v1203_v56 }
 0x54b   :  { %7043 = vrcp.f32 %v1206_v4 }
 0x54d   :  { %v1209_v17 = vpop.xlane.xlu0 %1208 }
 0x54e   :  { %7045 = vrcp.f32 %v1209_v17 }
 0x551   :  { %v1519_v9 = vpop.permute.xlu0 %1518 }
 0x552   :  { %6784 = vmatprep.subr.msk.bf16.mxu1 %vm757_vm0, %v1519_v9  ;;  %v1539_v61 = vsel %vm757_vm0, %v1519_v9, 0 }
 0x554   :  { %v7042_v60 = vpop.eup %7041 }
 0x555   :  { %v1223_v33 = vmul.f32 %v7042_v60, %v8140_v57  ;;  %v7044_v50 = vpop.eup %7043  ;;  %v1511_v18 = vpop.permute.xlu0 %1510 }
 0x556   :  { %v1224_v52 = vmul.f32 %v7044_v50, %v8130_v54 }
 0x557   :  { %v1228_v53 = vpack.c.bf16 %v1223_v33, %v1222_v30  ;;  %v1513_v30 = vpop.permute.xlu1 %1512 }
 0x558   :  { %v7046_v63 = vpop.eup %7045 }
 0x559   :  { %6436 = vmatprep.mubr.msk.bf16.mxu1 %vm847_vm1, %v1228_v53  ;;  %v1225_v31 = vmul.f32 %v7046_v63, %v8148_v39  ;;  %v1515_v0 = vpop.permute.xlu0 %1514 }
 0x55b   :  { %v1229_v28 = vpack.c.bf16 %v1225_v31, %v1224_v52  ;;  %v1517_v50 = vpop.permute.xlu1 %1516 }
 0x55d   :  { %6437 = vmatmul.mubr.msk.bf16.gmra.mrb[36].mxu1 %vm847_vm1, %v1229_v28  ;;  %v1911_v4 = vpop.permute.xlu0 %1910 }
 0x55e   :  { %v1931_v53 = vsel %vm757_vm0, %v1911_v4, 0 }
 0x55f   :  { %v1913_v63 = vpop.permute.xlu1 %1912 }
 0x560   :  { %v1934_v28 = vsel %vm757_vm0, %v1913_v63, 0 }
 0x561   :  { %v1915_v52 = vpop.permute.xlu0 %1914 }
 0x565   :  { %v1903_v31 = vpop.permute.xlu0 %1902 }
 0x584   :  { %v6402_v51 = vpop.f32.mrb[24].mxu1 }
 0x585   :  { %v986_v46 = vpop.f32.mrb[25].mxu1 }
 0x586   :  { %v6403_v44 = vpop.f32.mrb[26].mxu1 }
 0x587   :  { %v1018_v35 = vpack.c.bf16 %v6403_v44, %v6402_v51  ;;  %v989_v15 = vpop.f32.mrb[27].mxu1  ;;  %v1937_v51 = vsel %vm757_vm0, %v1915_v52, 0 }
 0x588   :  { %v1017_v36 = vpack.c.bf16 %v989_v15, %v986_v46  ;;  %v1917_v46 = vpop.permute.xlu1 %1916  ;;  %v1907_v15 = vpop.permute.xlu0 %1906 }
 0x589   :  { %v1940_v44 = vsel %vm757_vm0, %v1917_v46, 0 }
 0x58a   :  { %6456 = vmatprep.mubr.msk.bf16.mxu0 %vm757_vm0, %v1017_v36  ;;  %v2381_v36 = vsel %vm757_vm0, %v7968_v25, 0 }
 0x58b   :  { %6457 = vmatmul.mubr.msk.bf16.vlgmr.msra.gmra.mrb[40].mxu0 %vm757_vm0, %v1018_v35 }
 0x58c   :  { %v1905_v35 = vpop.permute.xlu1 %1904 }
 0x58d   :  { %v6406_v57 = vpop.f32.mrb[28].mxu1 }
 0x58e   :  { %v1002_v38 = vpop.f32.mrb[29].mxu1 }
 0x58f   :  { %v6407_v16 = vpop.f32.mrb[30].mxu1 }
 0x590   :  { %v1020_v12 = vpack.c.bf16 %v6407_v16, %v6406_v57  ;;  %v1005_v54 = vpop.f32.mrb[31].mxu1  ;;  %v1909_v57 = vpop.permute.xlu1 %1908  ;;  %v2387_v16 = vsel %vm757_vm0, %v7984_v27, 0 }
 0x591   :  { %v1019_v47 = vpack.c.bf16 %v1005_v54, %v1002_v38  ;;  %v2384_v38 = vsel %vm757_vm0, %v7976_v48, 0 }
 0x593   :  { %6460 = vmatprep.mubr.msk.bf16.mxu0 %vm757_vm0, %v1019_v47 }
 0x594   :  { %6461 = vmatmul.mubr.msk.bf16.gmra.mrb[44].mxu0 %vm757_vm0, %v1020_v12  ;;  %v2390_v12 = vsel %vm757_vm0, %v7988_v37, 0 }
 0x5f8   :  { %v6434_v39 = vpop.f32.mrb[32].mxu1 }
 0x5f9   :  { %v1292_v14 = vpop.f32.mrb[33].mxu1 }
 0x5fa   :  { %v6435_v26 = vpop.f32.mrb[34].mxu1 }
 0x5fb   :  { %v1324_v32 = vpack.c.bf16 %v6435_v26, %v6434_v39  ;;  %v1295_v59 = vpop.f32.mrb[35].mxu1 }
 0x5fc   :  { %v1323_v13 = vpack.c.bf16 %v1295_v59, %v1292_v14 }
 0x5fe   :  { %6444 = vmatprep.mubr.msk.bf16.mxu1 %vm757_vm0, %v1323_v13 }
 0x5ff   :  { %6445 = vmatmul.mubr.msk.bf16.vlgmr.msra.gmra.mrb[40].mxu1 %vm757_vm0, %v1324_v32 }
 0x600   :  { %6465 = vmatpush3.bf16.xpose.msra.mxu1 %v1539_v61 }
 0x601   :  { %6785 = vmatprep.subr.msk.bf16.mxu1 %vm757_vm0, %v1521_v1 }
 0x608   :  { %6467 = vmatpush3.bf16.xpose.msra.mxu1 %v1542_v49 }
 0x609   :  { %6786 = vmatprep.subr.msk.bf16.mxu1 %vm757_vm0, %v1523_v55 }
 0x610   :  { %6469 = vmatpush3.bf16.xpose.msra.mxu1 %v1545_v58 }
 0x611   :  { %6787 = vmatprep.subr.msk.bf16.mxu1 %vm757_vm0, %v1525_v42 }
 0x618   :  { %6471 = vmatpush3.bf16.xpose.msra.mxu1 %v1548_v23 }
 0x619   :  { %6788 = vmatprep.subr.msk.bf16.mxu1 %vm757_vm0, %v1911_v4 }
 0x630   :  { %v6438_v56 = vpop.f32.mrb[36].mxu1 }
 0x631   :  { %v1308_v17 = vpop.f32.mrb[37].mxu1 }
 0x632   :  { %v6439_v9 = vpop.f32.mrb[38].mxu1 }
 0x633   :  { %v1326_v34 = vpack.c.bf16 %v6439_v9, %v6438_v56  ;;  %v1311_v60 = vpop.f32.mrb[39].mxu1 }
 0x634   :  { %v1325_v33 = vpack.c.bf16 %v1311_v60, %v1308_v17 }
 0x636   :  { %6448 = vmatprep.mubr.msk.bf16.mxu1 %vm757_vm0, %v1325_v33 }
 0x637   :  { %6449 = vmatmul.mubr.msk.bf16.gmra.mrb[44].mxu1 %vm757_vm0, %v1326_v34 }
 0x638   :  { %6472 = vmatprep.mubr.msk.bf16.mxu1 %vm757_vm0, %v1511_v18 }
 0x63f   :  { %6473 = vmatmul.mubr.msk.bf16.vlgmr.msra.gmra.mrb[48].mxu1 %vm757_vm0, %v1513_v30 }
 0x640   :  { %6509 = vmatpush3.bf16.xpose.msra.mxu1 %v1931_v53  ;;  %6476 = vmatprep.mubr.msk.bf16.mxu1 %vm757_vm0, %v1515_v0 }
 0x641   :  { %6789 = vmatprep.subr.msk.bf16.mxu1 %vm757_vm0, %v1913_v63 }
 0x647   :  { %6477 = vmatmul.mubr.msk.bf16.gmra.mrb[52].mxu1 %vm757_vm0, %v1517_v50 }
 0x648   :  { %6511 = vmatpush3.bf16.xpose.msra.mxu1 %v1934_v28  ;;  %6516 = vmatprep.mubr.msk.bf16.mxu1 %vm757_vm0, %v1903_v31 }
 0x649   :  { %6790 = vmatprep.subr.msk.bf16.mxu1 %vm757_vm0, %v1915_v52 }
 0x650   :  { %6513 = vmatpush3.bf16.xpose.msra.mxu1 %v1937_v51 }
 0x651   :  { %6791 = vmatprep.subr.msk.bf16.mxu1 %vm757_vm0, %v1917_v46 }
 0x658   :  { %6515 = vmatpush3.bf16.xpose.msra.mxu1 %v1940_v44 }
 0x659   :  { %6792 = vmatprep.subr.msk.bf16.mxu1 %vm757_vm0, %v7968_v25 }
 0x65f   :  { %6517 = vmatmul.mubr.msk.bf16.vlgmr.msra.gmra.mrb[56].mxu1 %vm757_vm0, %v1905_v35 }
 0x660   :  { %6520 = vmatprep.mubr.msk.bf16.mxu1 %vm757_vm0, %v1907_v15  ;;  %6553 = vmatpush3.bf16.xpose.msra.mxu1 %v2381_v36 }
 0x661   :  { %6793 = vmatprep.subr.msk.bf16.mxu1 %vm757_vm0, %v7976_v48 }
 0x667   :  { %6521 = vmatmul.mubr.msk.bf16.gmra.mrb[60].mxu1 %vm757_vm0, %v1909_v57 }
 0x668   :  { %6555 = vmatpush3.bf16.xpose.msra.mxu1 %v2384_v38  ;;  %6560 = vmatprep.mubr.msk.bf16.mxu1 %vm757_vm0, %v7966_v19 }
 0x669   :  { %6794 = vmatprep.subr.msk.bf16.mxu1 %vm757_vm0, %v7984_v27 }
 0x670   :  { %6557 = vmatpush3.bf16.xpose.msra.mxu1 %v2387_v16 }
 0x671   :  { %6795 = vmatprep.subr.msk.bf16.mxu1 %vm757_vm0, %v7988_v37 }
 0x678   :  { %6559 = vmatpush3.bf16.xpose.msra.mxu1 %v2390_v12 }
 0x67f   :  { %6561 = vmatmul.mubr.msk.bf16.vlgmr.msra.gmra.mrb[64].mxu1 %vm757_vm0, %v7974_v43 }
 0x680   :  { %6564 = vmatprep.mubr.msk.bf16.mxu1 %vm757_vm0, %v7982_v62 }
 0x687   :  { %6565 = vmatmul.mubr.msk.bf16.gmra.mrb[68].mxu1 %vm757_vm0, %v7986_v7 }
 0x6d2   :  { %v8234_v54 = vpop.f32.mrb[40].mxu1 }
 0x6d3   :  { %v8236_v47 = vpop.f32.mrb[41].mxu1 }
 0x6d4   :  { %v8238_v39 = vpop.f32.mrb[42].mxu1 }
 0x6d5   :  { %v8240_v14 = vpop.f32.mrb[43].mxu1 }
 0x70a   :  { %v8242_v26 = vpop.f32.mrb[44].mxu1 }
 0x70b   :  { %9591 = vst [vmem:[#allocation29_spill] sm:$0xff] %v8242_v26  ;;  %v8244_v32 = vpop.f32.mrb[45].mxu1 }
 0x70c   :  { %9592 = vst [vmem:[#allocation30_spill] sm:$0xff] %v8244_v32  ;;  %v8246_v59 = vpop.f32.mrb[46].mxu1 }
 0x70d   :  { %9593 = vst [vmem:[#allocation31_spill] sm:$0xff] %v8246_v59  ;;  %v8248_v13 = vpop.f32.mrb[47].mxu1 }
 0x70e   :  { %9594 = vst [vmem:[#allocation32_spill] sm:$0xff] %v8248_v13 }
 0x712   :  { %v6474_v61 = vpop.f32.mrb[48].mxu1 }
 0x713   :  { %v1584_v1 = vpop.f32.mrb[49].mxu1  ;;  %v1621_v42 = vsel %vm847_vm1, %v6474_v61, -inf }
 0x714   :  { %v6475_v49 = vpop.f32.mrb[50].mxu1  ;;  %v1615_v55 = vsel %vm847_vm1, %v1584_v1, -inf }
 0x715   :  { %1616 = vmax.xlane.f32.xlu0 %v1615_v55  ;;  %v1587_v18 = vpop.f32.mrb[51].mxu1  ;;  %v1624_v56 = vsel %vm847_vm1, %v6475_v49, -inf }
 0x716   :  { %v1618_v58 = vsel %vm847_vm1, %v1587_v18, -inf }
 0x717   :  { %1619 = vmax.xlane.f32.xlu1 %v1618_v58 }
 0x719   :  { %1622 = vmax.xlane.f32.xlu0 %v1621_v42 }
 0x71a   :  { %v6478_v0 = vpop.f32.mrb[52].mxu1 }
 0x71b   :  { %v1600_v23 = vpop.f32.mrb[53].mxu1  ;;  %v1633_v30 = vsel %vm847_vm1, %v6478_v0, -inf }
 0x71c   :  { %v8253_v4 = vpop.f32.mrb[54].mxu1  ;;  %v1627_v34 = vsel %vm847_vm1, %v1600_v23, -inf }
 0x71d   :  { %1625 = vmax.xlane.f32.xlu0 %v1624_v56  ;;  %v8256_v17 = vpop.f32.mrb[55].mxu1  ;;  %v1636_v60 = vsel %vm847_vm1, %v8253_v4, -inf }
 0x71e   :  { %v1630_v9 = vsel %vm847_vm1, %v8256_v17, -inf }
 0x71f   :  { %1631 = vmax.xlane.f32.xlu1 %v1630_v9 }
 0x721   :  { %1628 = vmax.xlane.f32.xlu0 %v1627_v34 }
 0x723   :  { %1637 = vmax.xlane.f32.xlu1 %v1636_v60 }
 0x725   :  { %1634 = vmax.xlane.f32.xlu0 %v1633_v30 }
 0x732   :  { %v8264_v33 = vpop.f32.mrb[56].mxu1 }
 0x733   :  { %v8266_v50 = vpop.f32.mrb[57].mxu1 }
 0x734   :  { %v8268_v53 = vpop.f32.mrb[58].mxu1 }
 0x735   :  { %v8270_v63 = vpop.f32.mrb[59].mxu1 }
 0x73a   :  { %v8272_v52 = vpop.f32.mrb[60].mxu1 }
 0x73b   :  { %v8274_v31 = vpop.f32.mrb[61].mxu1 }
 0x73c   :  { %v8276_v28 = vpop.f32.mrb[62].mxu1 }
 0x73d   :  { %v8278_v51 = vpop.f32.mrb[63].mxu1 }
 0x752   :  { %v8280_v46 = vpop.f32.mrb[64].mxu1 }
 0x753   :  { %v8282_v44 = vpop.f32.mrb[65].mxu1 }
 0x754   :  { %v8284_v35 = vpop.f32.mrb[66].mxu1 }
 0x755   :  { %v8286_v15 = vpop.f32.mrb[67].mxu1 }
 0x75a   :  { %v8288_v36 = vpop.f32.mrb[68].mxu1 }
 0x75b   :  { %v8290_v57 = vpop.f32.mrb[69].mxu1 }
 0x75c   :  { %v8292_v38 = vpop.f32.mrb[70].mxu1 }
 0x75d   :  { %v8294_v16 = vpop.f32.mrb[71].mxu1 }
 0x7a2   :  { %v1617_v12 = vpop.xlane.xlu0 %1616 }
 0x7a3   :  { %v1639_v55 = vsub.f32 %v1584_v1, %v1617_v12 }
 0x7a4   :  { %v1620_v58 = vpop.xlane.xlu1 %1619 }
 0x7a5   :  { %v1647_v9 = vmul.f32 1.442695, %v1639_v55  ;;  %v1640_v34 = vsub.f32 %v1587_v18, %v1620_v58 }
 0x7a6   :  { %v1623_v42 = vpop.xlane.xlu0 %1622 }
 0x7a7   :  { %v1641_v56 = vsub.f32 %v6474_v61, %v1623_v42  ;;  %v1649_v13 = vmul.f32 1.442695, %v1640_v34 }
 0x7a9   :  { %v1651_v60 = vmul.f32 1.442695, %v1641_v56 }
 0x7aa   :  { %v1626_v30 = vpop.xlane.xlu0 %1625 }
 0x7ab   :  { %7047 = vpow2.f32 %v1651_v60  ;;  %v1642_v11 = vsub.f32 %v6475_v49, %v1626_v30  ;;  %v2007_v30 = vsel %vm847_vm1, %v8266_v50, -inf }
 0x7ac   :  { %7049 = vpow2.f32 %v1647_v9 }
 0x7ad   :  { %v1653_v8 = vmul.f32 1.442695, %v1642_v11 }
 0x7ae   :  { %v1629_v59 = vpop.xlane.xlu0 %1628 }
 0x7af   :  { %7051 = vpow2.f32 %v1653_v8  ;;  %v1643_v10 = vsub.f32 %v1600_v23, %v1629_v59  ;;  %v1632_v23 = vpop.xlane.xlu1 %1631 }
 0x7b0   :  { %7053 = vpow2.f32 %v1649_v13  ;;  %v1644_v42 = vsub.f32 %v8256_v17, %v1632_v23 }
 0x7b1   :  { %v1655_v1 = vmul.f32 1.442695, %v1643_v10 }
 0x7b2   :  { %v1635_v32 = vpop.xlane.xlu0 %1634  ;;  %v1657_v9 = vmul.f32 1.442695, %v1644_v42 }
 0x7b3   :  { %v1645_v26 = vsub.f32 %v6478_v0, %v1635_v32  ;;  %v1638_v55 = vpop.xlane.xlu1 %1637 }
 0x7b4   :  { %v1646_v58 = vsub.f32 %v8253_v4, %v1638_v55  ;;  %v2028_v55 = vsel %vm847_vm1, %v8276_v28, -inf }
 0x7b5   :  { %v8296_v5 = vpop.eup %7047  ;;  %v1659_v12 = vmul.f32 1.442695, %v1645_v26 }
 0x7b6   :  { %v1669_v61 = vsel %vm847_vm1, %v8296_v5, 0.0  ;;  %v8300_v18 = vpop.eup %7049  ;;  %v1661_v56 = vmul.f32 1.442695, %v1646_v58 }
 0x7b7   :  { %7055 = vpow2.f32 %v1659_v12  ;;  %1670 = vadd.xlane.f32.xlu0 %v1669_v61  ;;  %v1663_v8 = vsel %vm847_vm1, %v8300_v18, 0.0  ;;  %v2016_v12 = vsel %vm847_vm1, %v8268_v53, -inf  ;;  %v2019_v61 = vsel %vm847_vm1, %v8274_v31, -inf }
 0x7b8   :  { %7057 = vpow2.f32 %v1655_v1  ;;  %v2013_v1 = vsel %vm847_vm1, %v8264_v33, -inf }
 0x7b9   :  { %v8302_v49 = vpop.eup %7051  ;;  %7059 = vpow2.f32 %v1661_v56 }
 0x7ba   :  { %v1672_v11 = vsel %vm847_vm1, %v8302_v49, 0.0  ;;  %v8308_v32 = vpop.eup %7053  ;;  %7061 = vpow2.f32 %v1657_v9 }
 0x7bb   :  { %1664 = vadd.xlane.f32.xlu0 %v1663_v8  ;;  %1673 = vadd.xlane.f32.xlu1 %v1672_v11  ;;  %v1666_v10 = vsel %vm847_vm1, %v8308_v32, 0.0  ;;  %v2025_v8 = vsel %vm847_vm1, %v8272_v52, -inf  ;;  %v2010_v11 = vsel %vm847_vm1, %v8270_v63, -inf }
 0x7bf   :  { %1667 = vadd.xlane.f32.xlu1 %v1666_v10 }
 0x7c1   :  { %v8312_v26 = vpop.eup %7055 }
 0x7c2   :  { %v1681_v59 = vsel %vm847_vm1, %v8312_v26, 0.0  ;;  %v8316_v13 = vpop.eup %7057 }
 0x7c3   :  { %1682 = vadd.xlane.f32.xlu0 %v1681_v59  ;;  %v1675_v0 = vsel %vm847_vm1, %v8316_v13, 0.0  ;;  %v8336_v34 = vpop.eup %7059  ;;  %v2022_v59 = vsel %vm847_vm1, %v8278_v51, -inf }
 0x7c4   :  { %v1684_v4 = vsel %vm847_vm1, %v8336_v34, 0.0  ;;  %v8340_v60 = vpop.eup %7061 }
 0x7c5   :  { %v1678_v17 = vsel %vm847_vm1, %v8340_v60, 0.0 }
 0x7c7   :  { %1676 = vadd.xlane.f32.xlu0 %v1675_v0 }
 0x7d0   :  { %1709 = vrot.lane.b32.xlu1 %v7894_v20, %s7546_s8 }
 0x7d4   :  { %1711 = vrot.lane.b32.xlu1 %v7912_v21, %s7546_s8 }
 0x7dd   :  { %1707 = vrot.lane.b32.xlu0 %v7896_v24, %s7546_s8 }
 0x7e1   :  { %2650 = vrot.lane.b32.xlu0 %v7968_v25, %s7551_s1 }
 0x7e5   :  { %2654 = vrot.lane.b32.xlu0 %v7984_v27, %s7551_s1 }
 0x7e9   :  { %2638 = vrot.lane.b32.xlu0 %v7966_v19, %s7551_s1 }
 0x7ed   :  { %2642 = vrot.lane.b32.xlu0 %v7982_v62, %s7551_s1 }
 0x7f8   :  { %1685 = vadd.xlane.f32.xlu1 %v1684_v4 }
 0x7fc   :  { %1679 = vadd.xlane.f32.xlu1 %v1678_v17 }
 0x80c   :  { %2008 = vmax.xlane.f32.xlu0 %v2007_v30 }
 0x80d   :  { %1713 = vrot.lane.b32.xlu1 %v7910_v40, %s7546_s8 }
 0x810   :  { %2014 = vmax.xlane.f32.xlu0 %v2013_v1 }
 0x811   :  { %2652 = vrot.lane.b32.xlu1 %v7976_v48, %s7551_s1 }
 0x814   :  { %2017 = vmax.xlane.f32.xlu0 %v2016_v12 }
 0x815   :  { %2656 = vrot.lane.b32.xlu1 %v7988_v37, %s7551_s1 }
 0x818   :  { %2020 = vmax.xlane.f32.xlu0 %v2019_v61 }
 0x819   :  { %2640 = vrot.lane.b32.xlu1 %v7974_v43, %s7551_s1 }
 0x81c   :  { %2026 = vmax.xlane.f32.xlu0 %v2025_v8 }
 0x81d   :  { %2644 = vrot.lane.b32.xlu1 %v7986_v7, %s7551_s1 }
 0x841   :  { %2011 = vmax.xlane.f32.xlu1 %v2010_v11 }
 0x844   :  { %v1671_v10 = vpop.xlane.xlu0 %1670 }
 0x845   :  { %2023 = vmax.xlane.f32.xlu1 %v2022_v59 }
 0x848   :  { %v1674_v0 = vpop.xlane.xlu1 %1673  ;;  %v1665_v23 = vpop.xlane.xlu0 %1664 }
 0x849   :  { %2029 = vmax.xlane.f32.xlu1 %v2028_v55  ;;  %7063 = vrcp.f32 %v1665_v23 }
 0x84c   :  { %v1668_v58 = vpop.xlane.xlu1 %1667 }
 0x84d   :  { %7065 = vrcp.f32 %v1668_v58 }
 0x84e   :  { %7067 = vrcp.f32 %v1674_v0 }
 0x84f   :  { %7069 = vrcp.f32 %v1671_v10 }
 0x850   :  { %v1683_v42 = vpop.xlane.xlu0 %1682  ;;  %v1710_v17 = vpop.permute.xlu1 %1709 }
 0x853   :  { %v7064_v9 = vpop.eup %7063 }
 0x854   :  { %v1677_v56 = vpop.xlane.xlu0 %1676  ;;  %v1695_v1 = vmul.f32 %v7064_v9, %v8300_v18  ;;  %v1712_v59 = vpop.permute.xlu1 %1711 }
 0x857   :  { %v7066_v4 = vpop.eup %7065 }
 0x858   :  { %v1708_v30 = vpop.permute.xlu0 %1707  ;;  %v1696_v12 = vmul.f32 %v7066_v4, %v8308_v32  ;;  %v7068_v55 = vpop.eup %7067 }
 0x859   :  { %6480 = vmatprep.subr.bf16.mxu0 %v1708_v30  ;;  %v7070_v9 = vpop.eup %7069  ;;  %v1698_v4 = vmul.f32 %v7068_v55, %v8302_v49 }
 0x85a   :  { %6481 = vmatpush3.bf16.msra.mxu0 %v1708_v30  ;;  %v1703_v61 = vpack.c.bf16 %v1696_v12, %v1695_v1  ;;  %v1697_v30 = vmul.f32 %v7070_v9, %v8296_v5 }
 0x85b   :  { %6482 = vmatprep.subr.bf16.mxu0 %v1710_v17 }
 0x85c   :  { %6488 = vmatprep.mubr.msk.bf16.mxu0 %vm847_vm1, %v1703_v61  ;;  %v2651_v8 = vpop.permute.xlu0 %2650  ;;  %v1704_v1 = vpack.c.bf16 %v1698_v4, %v1697_v30 }
 0x85d   :  { %6796 = vmatprep.subr.msk.bf16.mxu1 %vm757_vm0, %v2651_v8  ;;  %v2671_v11 = vsel %vm757_vm0, %v2651_v8, 0 }
 0x85e   :  { %6483 = vmatpush3.bf16.msra.mxu0 %v1710_v17  ;;  %6585 = vmatpush3.bf16.xpose.msra.mxu1 %v2671_v11 }
 0x85f   :  { %6484 = vmatprep.subr.bf16.mxu0 %v1712_v59 }
 0x860   :  { %v2655_v23 = vpop.permute.xlu0 %2654 }
 0x862   :  { %6485 = vmatpush3.bf16.msra.mxu0 %v1712_v59 }
 0x864   :  { %v2639_v18 = vpop.permute.xlu0 %2638 }
 0x865   :  { %6592 = vmatprep.mubr.msk.bf16.mxu1 %vm757_vm0, %v2639_v18 }
 0x868   :  { %v2643_v5 = vpop.permute.xlu0 %2642 }
 0x885   :  { %v1686_v32 = vpop.xlane.xlu1 %1685 }
 0x886   :  { %7071 = vrcp.f32 %v1686_v32 }
 0x887   :  { %7073 = vrcp.f32 %v1677_v56 }
 0x888   :  { %7075 = vrcp.f32 %v1683_v42 }
 0x889   :  { %v1680_v58 = vpop.xlane.xlu1 %1679 }
 0x88a   :  { %7077 = vrcp.f32 %v1680_v58  ;;  %v2677_v58 = vsel %vm757_vm0, %v2655_v23, 0 }
 0x88d   :  { %v1714_v17 = vpop.permute.xlu1 %1713 }
 0x88e   :  { %6486 = vmatprep.subr.bf16.mxu0 %v1714_v17 }
 0x88f   :  { %6487 = vmatpush3.bf16.msra.mxu0 %v1714_v17 }
 0x890   :  { %v7072_v12 = vpop.eup %7071 }
 0x891   :  { %v2653_v61 = vpop.permute.xlu1 %2652  ;;  %v7074_v0 = vpop.eup %7073  ;;  %v1702_v49 = vmul.f32 %v7072_v12, %v8336_v34 }
 0x892   :  { %6489 = vmatmul.mubr.msk.bf16.vlgmr.msra.gmra.mrb[48].mxu0 %vm847_vm1, %v1704_v1  ;;  %6797 = vmatprep.subr.msk.bf16.mxu1 %vm757_vm0, %v2653_v61  ;;  %v2674_v10 = vsel %vm757_vm0, %v2653_v61, 0  ;;  %v7076_v42 = vpop.eup %7075  ;;  %v1699_v8 = vmul.f32 %v7074_v0, %v8316_v13 }
 0x893   :  { %6587 = vmatpush3.bf16.xpose.msra.mxu1 %v2674_v10  ;;  %v1701_v59 = vmul.f32 %v7076_v42, %v8312_v26 }
 0x894   :  { %v7078_v56 = vpop.eup %7077  ;;  %6798 = vmatprep.subr.msk.bf16.mxu1 %vm757_vm0, %v2655_v23 }
 0x895   :  { %v1700_v11 = vmul.f32 %v7078_v56, %v8340_v60  ;;  %v1706_v32 = vpack.c.bf16 %v1702_v49, %v1701_v59  ;;  %v2657_v9 = vpop.permute.xlu1 %2656 }
 0x896   :  { %v2680_v1 = vsel %vm757_vm0, %v2657_v9, 0 }
 0x897   :  { %v1705_v18 = vpack.c.bf16 %v1700_v11, %v1699_v8 }
 0x899   :  { %6492 = vmatprep.mubr.msk.bf16.mxu0 %vm847_vm1, %v1705_v18  ;;  %v2009_v55 = vpop.xlane.xlu0 %2008  ;;  %v2641_v61 = vpop.permute.xlu1 %2640 }
 0x89a   :  { %6493 = vmatmul.mubr.msk.bf16.gmra.mrb[52].mxu0 %vm847_vm1, %v1706_v32  ;;  %v2031_v34 = vsub.f32 %v8266_v50, %v2009_v55  ;;  %v6859_v55 = vld [vmem:[#allocation7 + $0x20] sm:$0xff]  }
 0x89b   :  { %6589 = vmatpush3.bf16.xpose.msra.mxu1 %v2677_v58  ;;  %6496 = vmatprep.subr.bf16.mxu0 %v6859_v55 }
 0x89c   :  { %6799 = vmatprep.subr.msk.bf16.mxu1 %vm757_vm0, %v2657_v9  ;;  %v2039_v4 = vmul.f32 1.442695, %v2031_v34  ;;  %6497 = vmatpush3.bf16.msra.mxu0 %v6859_v55  ;;  %v6860_v9 = vld [vmem:[#allocation7 + $0x28] sm:$0xff]  }
 0x89d   :  { %v2015_v13 = vpop.xlane.xlu0 %2014  ;;  %v2645_v8 = vpop.permute.xlu1 %2644  ;;  %6498 = vmatprep.subr.bf16.mxu0 %v6860_v9 }
 0x89e   :  { %v2033_v60 = vsub.f32 %v8264_v33, %v2015_v13 }
 0x8a0   :  { %v2043_v26 = vmul.f32 1.442695, %v2033_v60  ;;  %6499 = vmatpush3.bf16.msra.mxu0 %v6860_v9 }
 0x8a1   :  { %v2018_v17 = vpop.xlane.xlu0 %2017 }
 0x8a2   :  { %7079 = vpow2.f32 %v2043_v26  ;;  %v2034_v30 = vsub.f32 %v8268_v53, %v2018_v17  ;;  %v2460_v17 = vsel %vm847_vm1, %v8286_v15, -inf }
 0x8a3   :  { %6591 = vmatpush3.bf16.xpose.msra.mxu1 %v2680_v1  ;;  %7081 = vpow2.f32 %v2039_v4 }
 0x8a4   :  { %v2045_v23 = vmul.f32 1.442695, %v2034_v30 }
 0x8a5   :  { %v2021_v12 = vpop.xlane.xlu0 %2020 }
 0x8a6   :  { %7083 = vpow2.f32 %v2045_v23  ;;  %v2035_v50 = vsub.f32 %v8274_v31, %v2021_v12 }
 0x8a8   :  { %v2047_v53 = vmul.f32 1.442695, %v2035_v50 }
 0x8a9   :  { %v2027_v0 = vpop.xlane.xlu0 %2026 }
 0x8aa   :  { %v2037_v10 = vsub.f32 %v8272_v52, %v2027_v0  ;;  %6593 = vmatmul.mubr.msk.bf16.vlgmr.msra.gmra.mrb[72].mxu1 %vm757_vm0, %v2641_v61 }
 0x8ab   :  { %6596 = vmatprep.mubr.msk.bf16.mxu1 %vm757_vm0, %v2643_v5 }
 0x8ac   :  { %v8398_v33 = vpop.eup %7079  ;;  %v2051_v42 = vmul.f32 1.442695, %v2037_v10 }
 0x8ad   :  { %v2061_v56 = vsel %vm847_vm1, %v8398_v33, 0.0  ;;  %v8402_v49 = vpop.eup %7081 }
 0x8ae   :  { %7085 = vpow2.f32 %v2051_v42  ;;  %2062 = vadd.xlane.f32.xlu0 %v2061_v56  ;;  %v2055_v52 = vsel %vm847_vm1, %v8402_v49, 0.0 }
 0x8af   :  { %7087 = vpow2.f32 %v2047_v53 }
 0x8b0   :  { %v8404_v31 = vpop.eup %7083 }
 0x8b1   :  { %v2064_v5 = vsel %vm847_vm1, %v8404_v31, 0.0 }
 0x8b2   :  { %6597 = vmatmul.mubr.msk.bf16.gmra.mrb[76].mxu1 %vm757_vm0, %v2645_v8  ;;  %2056 = vadd.xlane.f32.xlu0 %v2055_v52  ;;  %v2457_v52 = vsel %vm847_vm1, %v8282_v44, -inf }
 0x8b3   :  { %2065 = vadd.xlane.f32.xlu1 %v2064_v5  ;;  %v2463_v5 = vsel %vm847_vm1, %v8280_v46, -inf }
 0x8b8   :  { %v8411_v11 = vpop.eup %7085 }
 0x8b9   :  { %v2073_v59 = vsel %vm847_vm1, %v8411_v11, 0.0  ;;  %v8415_v18 = vpop.eup %7087 }
 0x8ba   :  { %2074 = vadd.xlane.f32.xlu0 %v2073_v59  ;;  %v2067_v32 = vsel %vm847_vm1, %v8415_v18, 0.0  ;;  %v2466_v59 = vsel %vm847_vm1, %v8284_v35, -inf }
 0x8be   :  { %2068 = vadd.xlane.f32.xlu0 %v2067_v32 }
 0x8ce   :  { %v2012_v58 = vpop.xlane.xlu1 %2011 }
 0x8cf   :  { %v2032_v34 = vsub.f32 %v8270_v63, %v2012_v58 }
 0x8d1   :  { %v2041_v13 = vmul.f32 1.442695, %v2032_v34 }
 0x8d3   :  { %7089 = vpow2.f32 %v2041_v13 }
 0x8d4   :  { %2099 = vrot.lane.b32.xlu0 %v7896_v24, %s7552_s2  ;;  %v2024_v24 = vpop.xlane.xlu1 %2023 }
 0x8d5   :  { %v2036_v30 = vsub.f32 %v8278_v51, %v2024_v24  ;;  %v2478_v51 = vsel %vm847_vm1, %v8292_v38, -inf }
 0x8d7   :  { %v2049_v23 = vmul.f32 1.442695, %v2036_v30 }
 0x8d8   :  { %3126 = vrot.lane.b32.xlu0 %v7968_v25, %s7546_s8  ;;  %v2030_v63 = vpop.xlane.xlu1 %2029 }
 0x8d9   :  { %v2038_v26 = vsub.f32 %v8276_v28, %v2030_v63 }
 0x8db   :  { %v2053_v1 = vmul.f32 1.442695, %v2038_v26  ;;  %v2472_v26 = vsel %vm847_vm1, %v8294_v16, -inf }
 0x8dc   :  { %3130 = vrot.lane.b32.xlu0 %v7984_v27, %s7546_s8 }
 0x8dd   :  { %v8426_v60 = vpop.eup %7089  ;;  %7091 = vpow2.f32 %v2053_v1 }
 0x8de   :  { %v2058_v4 = vsel %vm847_vm1, %v8426_v60, 0.0  ;;  %7093 = vpow2.f32 %v2049_v23 }
 0x8df   :  { %2059 = vadd.xlane.f32.xlu1 %v2058_v4  ;;  %v2469_v4 = vsel %vm847_vm1, %v8290_v57, -inf }
 0x8e0   :  { %3118 = vrot.lane.b32.xlu0 %v7966_v19, %s7546_s8 }
 0x8e4   :  { %3122 = vrot.lane.b32.xlu0 %v7982_v62, %s7546_s8 }
 0x8e7   :  { %v8442_v12 = vpop.eup %7091 }
 0x8f0   :  { %2101 = vrot.lane.b32.xlu1 %v7894_v20, %s7552_s2  ;;  %v2076_v20 = vsel %vm847_vm1, %v8442_v12, 0.0 }
 0x8f4   :  { %2103 = vrot.lane.b32.xlu1 %v7912_v21, %s7552_s2  ;;  %v8446_v21 = vpop.eup %7093 }
 0x8f5   :  { %v2070_v28 = vsel %vm847_vm1, %v8446_v21, 0.0 }
 0x903   :  { %2461 = vmax.xlane.f32.xlu0 %v2460_v17 }
 0x918   :  { %2077 = vadd.xlane.f32.xlu1 %v2076_v20 }
 0x919   :  { %3124 = vrot.lane.b32.xlu0 %v7986_v7, %s7546_s8 }
 0x91c   :  { %2071 = vadd.xlane.f32.xlu1 %v2070_v28 }
 0x92d   :  { %2105 = vrot.lane.b32.xlu1 %v7910_v40, %s7552_s2 }
 0x931   :  { %3128 = vrot.lane.b32.xlu1 %v7976_v48, %s7546_s8 }
 0x935   :  { %3132 = vrot.lane.b32.xlu1 %v7988_v37, %s7546_s8 }
 0x938   :  { %2479 = vmax.xlane.f32.xlu0 %v2478_v51  ;;  %v2475_v51 = vsel %vm847_vm1, %v8288_v36, -inf }
 0x939   :  { %3120 = vrot.lane.b32.xlu1 %v7974_v43, %s7546_s8 }
 0x93b   :  { %v8462_v50 = vpop.xlane.xlu0 %2062 }
 0x93f   :  { %v2057_v61 = vpop.xlane.xlu0 %2056 }
 0x940   :  { %v2066_v9 = vpop.xlane.xlu1 %2065  ;;  %7095 = vrcp.f32 %v2057_v61 }
 0x947   :  { %v8464_v0 = vpop.xlane.xlu0 %2074 }
 0x94b   :  { %v8466_v10 = vpop.xlane.xlu0 %2068 }
 0x94e   :  { %2843 = vrot.lane.b32.xlu0 %v7972_v41, %s7551_s1 }
 0x94f   :  { %v2100_v40 = vpop.permute.xlu0 %2099 }
 0x950   :  { %6524 = vmatprep.subr.bf16.mxu0 %v2100_v40 }
 0x953   :  { %v3127_v53 = vpop.permute.xlu0 %3126 }
 0x954   :  { %6800 = vmatprep.subr.msk.bf16.mxu1 %vm757_vm0, %v3127_v53  ;;  %v3147_v42 = vsel %vm757_vm0, %v3127_v53, 0 }
 0x955   :  { %6641 = vmatpush3.bf16.xpose.msra.mxu1 %v3147_v42 }
 0x957   :  { %v8472_v56 = vpop.permute.xlu0 %3130 }
 0x95b   :  { %v3119_v8 = vpop.permute.xlu0 %3118 }
 0x95c   :  { %6648 = vmatprep.mubr.msk.bf16.mxu1 %vm757_vm0, %v3119_v8 }
 0x95d   :  { %2458 = vmax.xlane.f32.xlu1 %v2457_v52 }
 0x961   :  { %2464 = vmax.xlane.f32.xlu1 %v2463_v5 }
 0x965   :  { %v6490_v32 = vpop.f32.mrb[48].mxu0  ;;  %2467 = vmax.xlane.f32.xlu1 %v2466_v59 }
 0x966   :  { %v1765_v55 = vpop.f32.mrb[49].mxu0 }
 0x967   :  { %v6491_v58 = vpop.f32.mrb[50].mxu0 }
 0x968   :  { %v1797_v34 = vpack.c.bf16 %v6491_v58, %v6490_v32  ;;  %v1768_v13 = vpop.f32.mrb[51].mxu0 }
 0x969   :  { %v1796_v24 = vpack.c.bf16 %v1768_v13, %v1765_v55  ;;  %2470 = vmax.xlane.f32.xlu1 %v2469_v4 }
 0x96b   :  { %6500 = vmatprep.mubr.msk.bf16.mxu0 %vm757_vm0, %v1796_v24 }
 0x96c   :  { %6501 = vmatmul.mubr.msk.bf16.vlgmr.msra.gmra.mrb[40].mxu0 %vm757_vm0, %v1797_v34  ;;  %v2060_v63 = vpop.xlane.xlu1 %2059 }
 0x96d   :  { %7097 = vrcp.f32 %v2060_v63  ;;  %6525 = vmatpush3.bf16.msra.mxu0 %v2100_v40  ;;  %v6494_v17 = vpop.f32.mrb[52].mxu0  ;;  %2473 = vmax.xlane.f32.xlu1 %v2472_v26  ;;  %v7096_v40 = vpop.eup %7095 }
 0x96e   :  { %v1781_v30 = vpop.f32.mrb[53].mxu0  ;;  %v2087_v8 = vmul.f32 %v7096_v40, %v8402_v49  ;;  %7099 = vrcp.f32 %v2066_v9  ;;  %v6861_v40 = vld [vmem:[#allocation7 + $0x30] sm:$0xff]  }
 0x96f   :  { %v6495_v1 = vpop.f32.mrb[54].mxu0  ;;  %7101 = vrcp.f32 %v8462_v50 }
 0x970   :  { %v1799_v23 = vpack.c.bf16 %v6495_v1, %v6494_v17  ;;  %v1784_v20 = vpop.f32.mrb[55].mxu0  ;;  %v2102_v28 = vpop.permute.xlu1 %2101 }
 0x971   :  { %v1798_v61 = vpack.c.bf16 %v1784_v20, %v1781_v30  ;;  %2476 = vmax.xlane.f32.xlu1 %v2475_v51  ;;  %6526 = vmatprep.subr.bf16.mxu0 %v2102_v28 }
 0x972   :  { %6527 = vmatpush3.bf16.msra.mxu0 %v2102_v28 }
 0x973   :  { %6504 = vmatprep.mubr.msk.bf16.mxu0 %vm757_vm0, %v1798_v61 }
 0x974   :  { %6505 = vmatmul.mubr.msk.bf16.gmra.mrb[44].mxu0 %vm757_vm0, %v1799_v23  ;;  %v2104_v53 = vpop.permute.xlu1 %2103 }
 0x975   :  { %6528 = vmatprep.subr.bf16.mxu0 %v2104_v53 }
 0x976   :  { %6529 = vmatpush3.bf16.msra.mxu0 %v2104_v53 }
 0x977   :  { %v7098_v42 = vpop.eup %7097 }
 0x978   :  { %v2088_v52 = vmul.f32 %v7098_v42, %v8426_v60  ;;  %v7100_v28 = vpop.eup %7099 }
 0x979   :  { %v7102_v61 = vpop.eup %7101  ;;  %v2090_v53 = vmul.f32 %v7100_v28, %v8404_v31 }
 0x97a   :  { %v2095_v5 = vpack.c.bf16 %v2088_v52, %v2087_v8  ;;  %v2089_v9 = vmul.f32 %v7102_v61, %v8398_v33 }
 0x97c   :  { %6532 = vmatprep.mubr.msk.bf16.mxu0 %vm847_vm1, %v2095_v5  ;;  %v2096_v50 = vpack.c.bf16 %v2090_v53, %v2089_v9 }
 0x97d   :  { %v8494_v59 = vpop.f32.mrb[72].mxu1 }
 0x97e   :  { %v8496_v32 = vpop.f32.mrb[73].mxu1  ;;  %v2753_v24 = vsel %vm847_vm1, %v8494_v59, -inf }
 0x97f   :  { %v8498_v55 = vpop.f32.mrb[74].mxu1  ;;  %v2747_v58 = vsel %vm847_vm1, %v8496_v32, -inf }
 0x980   :  { %v8502_v34 = vpop.f32.mrb[75].mxu1  ;;  %2748 = vmax.xlane.f32.xlu1 %v2747_v58  ;;  %v2756_v26 = vsel %vm847_vm1, %v8498_v55, -inf }
 0x981   :  { %v2750_v49 = vsel %vm847_vm1, %v8502_v34, -inf }
 0x984   :  { %2751 = vmax.xlane.f32.xlu1 %v2750_v49 }
 0x985   :  { %v8506_v60 = vpop.f32.mrb[76].mxu1 }
 0x986   :  { %v8508_v13 = vpop.f32.mrb[77].mxu1  ;;  %v2765_v1 = vsel %vm847_vm1, %v8506_v60, -inf }
 0x987   :  { %v8510_v4 = vpop.f32.mrb[78].mxu1  ;;  %v2759_v17 = vsel %vm847_vm1, %v8508_v13, -inf }
 0x988   :  { %v8514_v63 = vpop.f32.mrb[79].mxu1  ;;  %2754 = vmax.xlane.f32.xlu1 %v2753_v24  ;;  %v2768_v23 = vsel %vm847_vm1, %v8510_v4, -inf }
 0x989   :  { %v2762_v30 = vsel %vm847_vm1, %v8514_v63, -inf }
 0x98c   :  { %2757 = vmax.xlane.f32.xlu1 %v2756_v26 }
 0x990   :  { %2760 = vmax.xlane.f32.xlu1 %v2759_v17 }
 0x994   :  { %2763 = vmax.xlane.f32.xlu1 %v2762_v30 }
 0x998   :  { %2766 = vmax.xlane.f32.xlu1 %v2765_v1  ;;  %v3153_v1 = vsel %vm757_vm0, %v8472_v56, 0 }
 0x99c   :  { %2769 = vmax.xlane.f32.xlu1 %v2768_v23 }
 0x9a5   :  { %v2078_v20 = vpop.xlane.xlu1 %2077 }
 0x9a6   :  { %7103 = vrcp.f32 %v2078_v20 }
 0x9a7   :  { %7105 = vrcp.f32 %v8466_v10  ;;  %v6862_v10 = vld [vmem:[#allocation7 + $0x38] sm:$0xff]  }
 0x9a8   :  { %7107 = vrcp.f32 %v8464_v0 }
 0x9a9   :  { %v2072_v51 = vpop.xlane.xlu1 %2071 }
 0x9aa   :  { %7109 = vrcp.f32 %v2072_v51 }
 0x9ad   :  { %2845 = vrot.lane.b32.xlu1 %v7970_v45, %s7551_s1  ;;  %v2106_v42 = vpop.permute.xlu1 %2105 }
 0x9ae   :  { %6530 = vmatprep.subr.bf16.mxu0 %v2106_v42 }
 0x9af   :  { %6531 = vmatpush3.bf16.msra.mxu0 %v2106_v42 }
 0x9b0   :  { %6540 = vmatprep.subr.bf16.mxu0 %v6861_v40  ;;  %v7104_v8 = vpop.eup %7103 }
 0x9b1   :  { %v3129_v52 = vpop.permute.xlu1 %3128  ;;  %v7106_v0 = vpop.eup %7105  ;;  %v2094_v33 = vmul.f32 %v7104_v8, %v8442_v12 }
 0x9b2   :  { %6533 = vmatmul.mubr.msk.bf16.vlgmr.msra.gmra.mrb[56].mxu0 %vm847_vm1, %v2096_v50  ;;  %6801 = vmatprep.subr.msk.bf16.mxu1 %vm757_vm0, %v3129_v52  ;;  %v3150_v31 = vsel %vm757_vm0, %v3129_v52, 0  ;;  %v7108_v5 = vpop.eup %7107  ;;  %v2091_v49 = vmul.f32 %v7106_v0, %v8415_v18 }
 0x9b3   :  { %6541 = vmatpush3.bf16.msra.mxu0 %v6861_v40  ;;  %6643 = vmatpush3.bf16.xpose.msra.mxu1 %v3150_v31  ;;  %v2093_v26 = vmul.f32 %v7108_v5, %v8411_v11  ;;  %v3123_v11 = vpop.permute.xlu0 %3122 }
 0x9b4   :  { %v7110_v58 = vpop.eup %7109  ;;  %6802 = vmatprep.subr.msk.bf16.mxu1 %vm757_vm0, %v8472_v56  ;;  %6542 = vmatprep.subr.bf16.mxu0 %v6862_v10 }
 0x9b5   :  { %v2092_v24 = vmul.f32 %v7110_v58, %v8446_v21  ;;  %v2098_v30 = vpack.c.bf16 %v2094_v33, %v2093_v26  ;;  %v3133_v23 = vpop.permute.xlu1 %3132 }
 0x9b6   :  { %v3156_v18 = vsel %vm757_vm0, %v3133_v23, 0 }
 0x9b7   :  { %6543 = vmatpush3.bf16.msra.mxu0 %v6862_v10  ;;  %v2097_v17 = vpack.c.bf16 %v2092_v24, %v2091_v49  ;;  %v2462_v21 = vpop.xlane.xlu0 %2461 }
 0x9b8   :  { %6568 = vmatprep.subr.bf16.mxu0 %v7972_v41  ;;  %v2482_v53 = vsub.f32 %v8286_v15, %v2462_v21 }
 0x9b9   :  { %6536 = vmatprep.mubr.msk.bf16.mxu0 %vm847_vm1, %v2097_v17  ;;  %v3121_v12 = vpop.permute.xlu1 %3120 }
 0x9ba   :  { %6537 = vmatmul.mubr.msk.bf16.gmra.mrb[60].mxu0 %vm847_vm1, %v2098_v30  ;;  %v2491_v8 = vmul.f32 1.442695, %v2482_v53 }
 0x9bb   :  { %6645 = vmatpush3.bf16.xpose.msra.mxu1 %v3153_v1  ;;  %v3125_v20 = vpop.permute.xlu0 %3124 }
 0x9bc   :  { %6803 = vmatprep.subr.msk.bf16.mxu1 %vm757_vm0, %v3133_v23 }
 0x9c3   :  { %6647 = vmatpush3.bf16.xpose.msra.mxu1 %v3156_v18 }
 0x9c5   :  { %v2480_v9 = vpop.xlane.xlu0 %2479 }
 0x9c6   :  { %v2488_v52 = vsub.f32 %v8292_v38, %v2480_v9 }
 0x9ca   :  { %6649 = vmatmul.mubr.msk.bf16.vlgmr.msra.gmra.mrb[80].mxu1 %vm757_vm0, %v3121_v12 }
 0x9cb   :  { %6652 = vmatprep.mubr.msk.bf16.mxu1 %vm757_vm0, %v3123_v11 }
 0x9d2   :  { %6653 = vmatmul.mubr.msk.bf16.gmra.mrb[84].mxu1 %vm757_vm0, %v3125_v20 }
 0x9ea   :  { %v2459_v28 = vpop.xlane.xlu1 %2458 }
 0x9eb   :  { %v2481_v56 = vsub.f32 %v8282_v44, %v2459_v28  ;;  %v2503_v44 = vmul.f32 1.442695, %v2488_v52 }
 0x9ed   :  { %v2489_v40 = vmul.f32 1.442695, %v2481_v56 }
 0x9ee   :  { %v2465_v51 = vpop.xlane.xlu1 %2464 }
 0x9ef   :  { %v2483_v61 = vsub.f32 %v8280_v46, %v2465_v51 }
 0x9f1   :  { %v2493_v42 = vmul.f32 1.442695, %v2483_v61 }
 0x9f2   :  { %v2468_v50 = vpop.xlane.xlu1 %2467 }
 0x9f3   :  { %7111 = vpow2.f32 %v2493_v42  ;;  %v2484_v10 = vsub.f32 %v8284_v35, %v2468_v50 }
 0x9f4   :  { %7113 = vpow2.f32 %v2489_v40 }
 0x9f5   :  { %v2495_v0 = vmul.f32 1.442695, %v2484_v10 }
 0x9f6   :  { %v2471_v31 = vpop.xlane.xlu1 %2470 }
 0x9f7   :  { %7115 = vpow2.f32 %v2495_v0  ;;  %v2485_v58 = vsub.f32 %v8290_v57, %v2471_v31 }
 0x9f8   :  { %7117 = vpow2.f32 %v2491_v8 }
 0x9f9   :  { %7119 = vpow2.f32 %v2503_v44  ;;  %v2497_v17 = vmul.f32 1.442695, %v2485_v58 }
 0x9fa   :  { %v2474_v5 = vpop.xlane.xlu1 %2473 }
 0x9fb   :  { %v2486_v46 = vsub.f32 %v8294_v16, %v2474_v5 }
 0x9fd   :  { %v8558_v15 = vpop.eup %7111  ;;  %v2499_v33 = vmul.f32 1.442695, %v2486_v46 }
 0x9fe   :  { %v2477_v49 = vpop.xlane.xlu1 %2476  ;;  %v2511_v35 = vsel %vm847_vm1, %v8558_v15, 0.0  ;;  %v8563_v38 = vpop.eup %7113 }
 0x9ff   :  { %v2487_v24 = vsub.f32 %v8288_v36, %v2477_v49  ;;  %2512 = vadd.xlane.f32.xlu0 %v2511_v35  ;;  %7121 = vpow2.f32 %v2499_v33  ;;  %v2505_v57 = vsel %vm847_vm1, %v8563_v38, 0.0 }
 0xa01   :  { %v8566_v26 = vpop.eup %7115  ;;  %v2501_v16 = vmul.f32 1.442695, %v2487_v24 }
 0xa02   :  { %v2514_v30 = vsel %vm847_vm1, %v8566_v26, 0.0  ;;  %v8572_v1 = vpop.eup %7117 }
 0xa03   :  { %7123 = vpow2.f32 %v2501_v16  ;;  %2515 = vadd.xlane.f32.xlu1 %v2514_v30  ;;  %2506 = vadd.xlane.f32.xlu0 %v2505_v57  ;;  %v2508_v36 = vsel %vm847_vm1, %v8572_v1, 0.0  ;;  %v8576_v23 = vpop.eup %7119 }
 0xa04   :  { %7125 = vpow2.f32 %v2497_v17  ;;  %v2526_v18 = vsel %vm847_vm1, %v8576_v23, 0.0 }
 0xa07   :  { %2509 = vadd.xlane.f32.xlu1 %v2508_v36 }
 0xa09   :  { %v8580_v11 = vpop.eup %7121 }
 0xa0a   :  { %v2520_v28 = vsel %vm847_vm1, %v8580_v11, 0.0 }
 0xa0b   :  { %2527 = vadd.xlane.f32.xlu1 %v2526_v18 }
 0xa0d   :  { %v8582_v12 = vpop.eup %7123  ;;  %v2749_v21 = vpop.xlane.xlu1 %2748 }
 0xa0e   :  { %v2523_v20 = vsel %vm847_vm1, %v8582_v12, 0.0  ;;  %v8588_v56 = vpop.eup %7125  ;;  %v2771_v53 = vsub.f32 %v8496_v32, %v2749_v21 }
 0xa0f   :  { %2524 = vadd.xlane.f32.xlu0 %v2523_v20  ;;  %2521 = vadd.xlane.f32.xlu1 %v2520_v28  ;;  %v2517_v61 = vsel %vm847_vm1, %v8588_v56, 0.0 }
 0xa10   :  { %v2779_v9 = vmul.f32 1.442695, %v2771_v53 }
 0xa11   :  { %v2752_v51 = vpop.xlane.xlu1 %2751 }
 0xa12   :  { %v2772_v50 = vsub.f32 %v8502_v34, %v2752_v51 }
 0xa13   :  { %2518 = vadd.xlane.f32.xlu0 %v2517_v61 }
 0xa14   :  { %v2781_v0 = vmul.f32 1.442695, %v2772_v50 }
 0xa15   :  { %v2755_v40 = vpop.xlane.xlu1 %2754 }
 0xa16   :  { %v2773_v42 = vsub.f32 %v8494_v59, %v2755_v40 }
 0xa18   :  { %v2783_v10 = vmul.f32 1.442695, %v2773_v42  ;;  %v8652_v42 = vpop.permute.xlu0 %2843 }
 0xa19   :  { %v2758_v8 = vpop.xlane.xlu1 %2757 }
 0xa1a   :  { %7127 = vpow2.f32 %v2783_v10  ;;  %v2774_v52 = vsub.f32 %v8498_v55, %v2758_v8 }
 0xa1b   :  { %7129 = vpow2.f32 %v2779_v9 }
 0xa1c   :  { %v2785_v31 = vmul.f32 1.442695, %v2774_v52 }
 0xa1d   :  { %v2761_v44 = vpop.xlane.xlu1 %2760 }
 0xa1e   :  { %7131 = vpow2.f32 %v2785_v31  ;;  %v2775_v32 = vsub.f32 %v8508_v13, %v2761_v44 }
 0xa1f   :  { %7133 = vpow2.f32 %v2781_v0 }
 0xa20   :  { %v2787_v49 = vmul.f32 1.442695, %v2775_v32 }
 0xa21   :  { %v2764_v5 = vpop.xlane.xlu1 %2763 }
 0xa22   :  { %v2776_v35 = vsub.f32 %v8514_v63, %v2764_v5 }
 0xa24   :  { %v8596_v46 = vpop.eup %7127 }
 0xa25   :  { %v2767_v59 = vpop.xlane.xlu1 %2766  ;;  %v2801_v34 = vsel %vm847_vm1, %v8596_v46, 0.0  ;;  %v8601_v58 = vpop.eup %7129 }
 0xa26   :  { %v2777_v33 = vsub.f32 %v8506_v60, %v2767_v59  ;;  %2802 = vadd.xlane.f32.xlu0 %v2801_v34  ;;  %v2795_v16 = vsel %vm847_vm1, %v8601_v58, 0.0  ;;  %v2789_v60 = vmul.f32 1.442695, %v2776_v35 }
 0xa28   :  { %v8604_v55 = vpop.eup %7131  ;;  %v2791_v24 = vmul.f32 1.442695, %v2777_v33 }
 0xa29   :  { %v2770_v17 = vpop.xlane.xlu1 %2769  ;;  %v2804_v13 = vsel %vm847_vm1, %v8604_v55, 0.0  ;;  %v8611_v30 = vpop.eup %7133 }
 0xa2a   :  { %7135 = vpow2.f32 %v2791_v24  ;;  %v2778_v57 = vsub.f32 %v8510_v4, %v2770_v17  ;;  %2796 = vadd.xlane.f32.xlu0 %v2795_v16  ;;  %2805 = vadd.xlane.f32.xlu1 %v2804_v13  ;;  %v2798_v63 = vsel %vm847_vm1, %v8611_v30, 0.0 }
 0xa2b   :  { %7137 = vpow2.f32 %v2787_v49 }
 0xa2c   :  { %v2793_v36 = vmul.f32 1.442695, %v2778_v57 }
 0xa2e   :  { %7139 = vpow2.f32 %v2793_v36  ;;  %2799 = vadd.xlane.f32.xlu1 %v2798_v63 }
 0xa2f   :  { %7141 = vpow2.f32 %v2789_v60 }
 0xa34   :  { %v8616_v18 = vpop.eup %7135 }
 0xa35   :  { %v2813_v21 = vsel %vm847_vm1, %v8616_v18, 0.0  ;;  %v8620_v20 = vpop.eup %7137 }
 0xa36   :  { %2814 = vadd.xlane.f32.xlu0 %v2813_v21  ;;  %v2807_v28 = vsel %vm847_vm1, %v8620_v20, 0.0 }
 0xa38   :  { %v8622_v4 = vpop.eup %7139 }
 0xa39   :  { %v2816_v51 = vsel %vm847_vm1, %v8622_v4, 0.0  ;;  %v8628_v61 = vpop.eup %7141 }
 0xa3a   :  { %2808 = vadd.xlane.f32.xlu0 %v2807_v28  ;;  %2817 = vadd.xlane.f32.xlu1 %v2816_v51  ;;  %v2810_v53 = vsel %vm847_vm1, %v8628_v61, 0.0 }
 0xa3e   :  { %2811 = vadd.xlane.f32.xlu1 %v2810_v53 }
 0xa4f   :  { %2847 = vrot.lane.b32.xlu1 %v7980_v22, %s7551_s1 }
 0xa50   :  { %2849 = vrot.lane.b32.xlu0 %v7978_v29, %s7551_s1 }
 0xa53   :  { %3517 = vrot.lane.b32.xlu1 %v7968_v25, %s7552_s2 }
 0xa54   :  { %3519 = vrot.lane.b32.xlu0 %v7976_v48, %s7552_s2 }
 0xa57   :  { %3521 = vrot.lane.b32.xlu1 %v7984_v27, %s7552_s2 }
 0xa58   :  { %3523 = vrot.lane.b32.xlu0 %v7988_v37, %s7552_s2 }
 0xa5b   :  { %3509 = vrot.lane.b32.xlu1 %v7966_v19, %s7552_s2  ;;  %v8655_v19 = vpop.permute.xlu1 %2845 }
 0xa5c   :  { %3511 = vrot.lane.b32.xlu0 %v7974_v43, %s7552_s2 }
 0xa5f   :  { %3513 = vrot.lane.b32.xlu1 %v7982_v62, %s7552_s2 }
 0xa60   :  { %3515 = vrot.lane.b32.xlu0 %v7986_v7, %s7552_s2 }
 0xa85   :  { %v6534_v25 = vpop.f32.mrb[56].mxu0 }
 0xa86   :  { %v2157_v48 = vpop.f32.mrb[57].mxu0 }
 0xa87   :  { %v6535_v40 = vpop.f32.mrb[58].mxu0 }
 0xa88   :  { %v2189_v27 = vpack.c.bf16 %v6535_v40, %v6534_v25  ;;  %v2160_v9 = vpop.f32.mrb[59].mxu0 }
 0xa89   :  { %v2188_v37 = vpack.c.bf16 %v2160_v9, %v2157_v48 }
 0xa8b   :  { %6544 = vmatprep.mubr.msk.bf16.mxu0 %vm757_vm0, %v2188_v37 }
 0xa8c   :  { %6545 = vmatmul.mubr.msk.bf16.vlgmr.msra.gmra.mrb[40].mxu0 %vm757_vm0, %v2189_v27  ;;  %v2513_v43 = vpop.xlane.xlu0 %2512 }
 0xa8d   :  { %6569 = vmatpush3.bf16.msra.mxu0 %v7972_v41  ;;  %v6538_v62 = vpop.f32.mrb[60].mxu0 }
 0xa8e   :  { %6570 = vmatprep.subr.bf16.mxu0 %v7970_v45  ;;  %v2173_v7 = vpop.f32.mrb[61].mxu0 }
 0xa8f   :  { %v6539_v50 = vpop.f32.mrb[62].mxu0 }
 0xa90   :  { %v2191_v10 = vpack.c.bf16 %v6539_v50, %v6538_v62  ;;  %v2516_v8 = vpop.xlane.xlu1 %2515  ;;  %v2176_v52 = vpop.f32.mrb[63].mxu0 }
 0xa91   :  { %v2190_v0 = vpack.c.bf16 %v2176_v52, %v2173_v7  ;;  %6571 = vmatpush3.bf16.msra.mxu0 %v7970_v45  ;;  %v2507_v31 = vpop.xlane.xlu0 %2506  ;;  %7143 = vrcp.f32 %v2516_v8 }
 0xa92   :  { %6572 = vmatprep.subr.bf16.mxu0 %v7980_v22  ;;  %7145 = vrcp.f32 %v2507_v31 }
 0xa93   :  { %6548 = vmatprep.mubr.msk.bf16.mxu0 %vm757_vm0, %v2190_v0  ;;  %7147 = vrcp.f32 %v2513_v43 }
 0xa94   :  { %6549 = vmatmul.mubr.msk.bf16.gmra.mrb[44].mxu0 %vm757_vm0, %v2191_v10  ;;  %v2510_v44 = vpop.xlane.xlu1 %2509 }
 0xa95   :  { %6573 = vmatpush3.bf16.msra.mxu0 %v7980_v22  ;;  %7149 = vrcp.f32 %v2510_v44 }
 0xa96   :  { %6574 = vmatprep.subr.bf16.mxu0 %v7978_v29 }
 0xa98   :  { %v2528_v5 = vpop.xlane.xlu1 %2527 }
 0xa99   :  { %6575 = vmatpush3.bf16.msra.mxu0 %v7978_v29 }
 0xa9a   :  { %6600 = vmatprep.subr.bf16.mxu0 %v8652_v42 }
 0xa9b   :  { %v7144_v32 = vpop.eup %7143 }
 0xa9c   :  { %v2522_v59 = vpop.xlane.xlu1 %2521  ;;  %v2525_v34 = vpop.xlane.xlu0 %2524  ;;  %v2540_v16 = vmul.f32 %v7144_v32, %v8566_v26 }
 0xa9d   :  { %v7146_v33 = vpop.eup %7145  ;;  %v8668_v49 = vpop.f32.mrb[80].mxu1  ;;  %7151 = vrcp.f32 %v2525_v34 }
 0xa9e   :  { %v7148_v35 = vpop.eup %7147  ;;  %v8670_v24 = vpop.f32.mrb[81].mxu1  ;;  %7153 = vrcp.f32 %v2522_v59  ;;  %v2537_v63 = vmul.f32 %v7146_v33, %v8563_v38 }
 0xa9f   :  { %v7150_v17 = vpop.eup %7149  ;;  %v8673_v13 = vpop.f32.mrb[82].mxu1  ;;  %v3223_v57 = vsel %vm847_vm1, %v8670_v24, -inf  ;;  %7155 = vrcp.f32 %v2528_v5  ;;  %v2539_v28 = vmul.f32 %v7148_v35, %v8558_v15  ;;  %v3229_v15 = vsel %vm847_vm1, %v8668_v49, -inf }
 0xaa0   :  { %v8677_v60 = vpop.f32.mrb[83].mxu1  ;;  %3224 = vmax.xlane.f32.xlu1 %v3223_v57  ;;  %v2519_v36 = vpop.xlane.xlu0 %2518  ;;  %v2538_v21 = vmul.f32 %v7150_v17, %v8572_v1  ;;  %v3232_v25 = vsel %vm847_vm1, %v8673_v13, -inf }
 0xaa1   :  { %7157 = vrcp.f32 %v2519_v36  ;;  %v3226_v26 = vsel %vm847_vm1, %v8677_v60, -inf  ;;  %v2546_v53 = vpack.c.bf16 %v2540_v16, %v2539_v28 }
 0xaa2   :  { %3227 = vmax.xlane.f32.xlu0 %v3226_v26  ;;  %v2545_v51 = vpack.c.bf16 %v2538_v21, %v2537_v63 }
 0xaa4   :  { %3233 = vmax.xlane.f32.xlu1 %v3232_v25  ;;  %6576 = vmatprep.mubr.msk.bf16.mxu0 %vm847_vm1, %v2545_v51 }
 0xaa5   :  { %6577 = vmatmul.mubr.msk.bf16.vlgmr.msra.gmra.mrb[64].mxu0 %vm847_vm1, %v2546_v53  ;;  %v8688_v38 = vpop.f32.mrb[84].mxu1 }
 0xaa6   :  { %6601 = vmatpush3.bf16.msra.mxu0 %v8652_v42  ;;  %3230 = vmax.xlane.f32.xlu0 %v3229_v15  ;;  %v8693_v1 = vpop.f32.mrb[85].mxu1  ;;  %v3241_v8 = vsel %vm847_vm1, %v8688_v38, -inf }
 0xaa7   :  { %6602 = vmatprep.subr.bf16.mxu0 %v8655_v19  ;;  %v8696_v48 = vpop.f32.mrb[86].mxu1  ;;  %v7152_v40 = vpop.eup %7151  ;;  %v3235_v37 = vsel %vm847_vm1, %v8693_v1, -inf }
 0xaa8   :  { %v8698_v27 = vpop.f32.mrb[87].mxu1  ;;  %v7154_v9 = vpop.eup %7153  ;;  %v2543_v7 = vmul.f32 %v7152_v40, %v8582_v12  ;;  %v3244_v0 = vsel %vm847_vm1, %v8696_v48, -inf }
 0xaa9   :  { %v3238_v43 = vsel %vm847_vm1, %v8698_v27, -inf  ;;  %v7156_v62 = vpop.eup %7155  ;;  %v2542_v10 = vmul.f32 %v7154_v9, %v8580_v11 }
 0xaaa   :  { %6603 = vmatpush3.bf16.msra.mxu0 %v8655_v19  ;;  %3236 = vmax.xlane.f32.xlu0 %v3235_v37  ;;  %v2544_v52 = vmul.f32 %v7156_v62, %v8576_v23 }
 0xaab   :  { %v7158_v42 = vpop.eup %7157  ;;  %3239 = vmax.xlane.f32.xlu1 %v3238_v43 }
 0xaac   :  { %v2541_v50 = vmul.f32 %v7158_v42, %v8588_v56  ;;  %v2548_v19 = vpack.c.bf16 %v2544_v52, %v2543_v7 }
 0xaae   :  { %3242 = vmax.xlane.f32.xlu0 %v3241_v8  ;;  %v2547_v31 = vpack.c.bf16 %v2542_v10, %v2541_v50 }
 0xaaf   :  { %3245 = vmax.xlane.f32.xlu1 %v3244_v0  ;;  %v9595_v0 = vmov 0  }
 0xab0   :  { %6580 = vmatprep.mubr.msk.bf16.mxu0 %vm847_vm1, %v2547_v31  ;;  %v6863_v31 = vld [vmem:[#allocation7 + $0x10] sm:$0xff]  }
 0xab1   :  { %6581 = vmatmul.mubr.msk.bf16.gmra.mrb[68].mxu0 %vm847_vm1, %v2548_v19 }
 0xab3   :  { %v2803_v12 = vpop.xlane.xlu0 %2802 }
 0xab7   :  { %v2806_v56 = vpop.xlane.xlu1 %2805  ;;  %v2797_v44 = vpop.xlane.xlu0 %2796 }
 0xab8   :  { %7159 = vrcp.f32 %v2797_v44 }
 0xabb   :  { %v2800_v11 = vpop.xlane.xlu1 %2799 }
 0xabc   :  { %7161 = vrcp.f32 %v2800_v11 }
 0xabd   :  { %7163 = vrcp.f32 %v2806_v56 }
 0xabe   :  { %7165 = vrcp.f32 %v2803_v12  ;;  %v6864_v12 = vld [vmem:[#allocation7 + $0x18] sm:$0xff]  }
 0xac0   :  { %3317 = vrot.lane.b32.xlu1 %v7970_v45, %s7546_s8 }
 0xac2   :  { %v7160_v5 = vpop.eup %7159 }
 0xac3   :  { %v2815_v23 = vpop.xlane.xlu0 %2814  ;;  %v2827_v33 = vmul.f32 %v7160_v5, %v8601_v58 }
 0xac4   :  { %3315 = vrot.lane.b32.xlu0 %v7972_v41, %s7546_s8 }
 0xac6   :  { %v7162_v32 = vpop.eup %7161 }
 0xac7   :  { %v2818_v59 = vpop.xlane.xlu1 %2817  ;;  %v2809_v34 = vpop.xlane.xlu0 %2808  ;;  %v2828_v35 = vmul.f32 %v7162_v32, %v8611_v30 }
 0xac8   :  { %7167 = vrcp.f32 %v2809_v34  ;;  %v7164_v57 = vpop.eup %7163 }
 0xac9   :  { %v2835_v17 = vpack.c.bf16 %v2828_v35, %v2827_v33  ;;  %v7166_v21 = vpop.eup %7165  ;;  %v2830_v28 = vmul.f32 %v7164_v57, %v8604_v55 }
 0xaca   :  { %v2829_v30 = vmul.f32 %v7166_v21, %v8596_v46 }
 0xacb   :  { %v2812_v16 = vpop.xlane.xlu1 %2811  ;;  %6608 = vmatprep.mubr.msk.bf16.mxu0 %vm847_vm1, %v2835_v17  ;;  %v2850_v36 = vpop.permute.xlu0 %2849 }
 0xacc   :  { %7169 = vrcp.f32 %v2812_v16  ;;  %v2836_v15 = vpack.c.bf16 %v2830_v28, %v2829_v30 }
 0xacd   :  { %7171 = vrcp.f32 %v2818_v59 }
 0xace   :  { %7173 = vrcp.f32 %v2815_v23  ;;  %v8745_v23 = vld [vmem:[#allocation7] sm:$0xff]  }
 0xacf   :  { %v2848_v63 = vpop.permute.xlu1 %2847  ;;  %v3520_v53 = vpop.permute.xlu0 %3519 }
 0xad0   :  { %6604 = vmatprep.subr.bf16.mxu0 %v2848_v63  ;;  %v3541_v7 = vsel %vm757_vm0, %v3520_v53, 0 }
 0xad1   :  { %6605 = vmatpush3.bf16.msra.mxu0 %v2848_v63 }
 0xad2   :  { %6606 = vmatprep.subr.bf16.mxu0 %v2850_v36  ;;  %v7168_v26 = vpop.eup %7167 }
 0xad3   :  { %v3518_v58 = vpop.permute.xlu1 %3517  ;;  %v2831_v55 = vmul.f32 %v7168_v26, %v8620_v20  ;;  %v3524_v10 = vpop.permute.xlu0 %3523 }
 0xad4   :  { %v3538_v51 = vsel %vm757_vm0, %v3518_v58, 0  ;;  %6804 = vmatprep.subr.msk.bf16.mxu1 %vm757_vm0, %v3518_v58 }
 0xad5   :  { %6607 = vmatpush3.bf16.msra.mxu0 %v2850_v36  ;;  %6685 = vmatpush3.bf16.xpose.msra.mxu1 %v3538_v51 }
 0xad6   :  { %v7170_v25 = vpop.eup %7169  ;;  %6805 = vmatprep.subr.msk.bf16.mxu1 %vm757_vm0, %v3520_v53  ;;  %6616 = vmatprep.subr.bf16.mxu0 %v6863_v31 }
 0xad7   :  { %v7172_v40 = vpop.eup %7171  ;;  %v3522_v9 = vpop.permute.xlu1 %3521  ;;  %v2832_v37 = vmul.f32 %v7170_v25, %v8628_v61 }
 0xad8   :  { %6609 = vmatmul.mubr.msk.bf16.vlgmr.msra.gmra.mrb[72].mxu0 %vm847_vm1, %v2836_v15  ;;  %v7174_v46 = vpop.eup %7173  ;;  %v2834_v62 = vmul.f32 %v7172_v40, %v8622_v4  ;;  %v3544_v61 = vsel %vm757_vm0, %v3522_v9, 0  ;;  %v3547_v4 = vsel %vm757_vm0, %v3524_v10, 0  ;;  %v3512_v8 = vpop.permute.xlu0 %3511 }
 0xad9   :  { %v2837_v43 = vpack.c.bf16 %v2832_v37, %v2831_v55  ;;  %v2833_v50 = vmul.f32 %v7174_v46, %v8616_v18  ;;  %6617 = vmatpush3.bf16.msra.mxu0 %v6863_v31 }
 0xada   :  { %6618 = vmatprep.subr.bf16.mxu0 %v6864_v12 }
 0xadb   :  { %v3510_v42 = vpop.permute.xlu1 %3509  ;;  %6612 = vmatprep.mubr.msk.bf16.mxu0 %vm847_vm1, %v2837_v43  ;;  %v2838_v20 = vpack.c.bf16 %v2834_v62, %v2833_v50 }
 0xadc   :  { %6692 = vmatprep.mubr.msk.bf16.mxu1 %vm757_vm0, %v3510_v42  ;;  %v3516_v18 = vpop.permute.xlu0 %3515 }
 0xadd   :  { %6687 = vmatpush3.bf16.xpose.msra.mxu1 %v3541_v7  ;;  %6619 = vmatpush3.bf16.msra.mxu0 %v6864_v12 }
 0xade   :  { %6806 = vmatprep.subr.msk.bf16.mxu1 %vm757_vm0, %v3522_v9  ;;  %6628 = vmatprep.subr.bf16.mxu0 %v8745_v23 }
 0xadf   :  { %v3514_v52 = vpop.permute.xlu1 %3513 }
 0xae0   :  { %6613 = vmatmul.mubr.msk.bf16.gmra.mrb[76].mxu0 %vm847_vm1, %v2838_v20 }
 0xae5   :  { %6689 = vmatpush3.bf16.xpose.msra.mxu1 %v3544_v61 }
 0xae6   :  { %6807 = vmatprep.subr.msk.bf16.mxu1 %vm757_vm0, %v3524_v10 }
 0xaed   :  { %6691 = vmatpush3.bf16.xpose.msra.mxu1 %v3547_v4 }
 0xaf4   :  { %6693 = vmatmul.mubr.msk.bf16.vlgmr.msra.gmra.mrb[88].mxu1 %vm757_vm0, %v3512_v8 }
 0xaf5   :  { %6696 = vmatprep.mubr.msk.bf16.mxu1 %vm757_vm0, %v3514_v52 }
 0xafc   :  { %6697 = vmatmul.mubr.msk.bf16.gmra.mrb[92].mxu1 %vm757_vm0, %v3516_v18  ;;  %v8796_v18 = vld [vmem:[%s9547_s5] ss:$0 sm:$0xff] }
 0xafd   :  { %4465 = vmatprep.mubr.bf16.mxu1 %v9595_v0 }
 0xb2d   :  { %v3225_v19 = vpop.xlane.xlu1 %3224 }
 0xb2e   :  { %v3247_v5 = vsub.f32 %v8670_v24, %v3225_v19  ;;  %v9596_v19 = vld [vmem:[#allocation16_spill] sm:$0xff] }
 0xb2f   :  { %v3228_v56 = vpop.xlane.xlu0 %3227 }
 0xb30   :  { %v3248_v44 = vsub.f32 %v8677_v60, %v3228_v56  ;;  %v3255_v17 = vmul.f32 1.442695, %v3247_v5 }
 0xb31   :  { %v3234_v11 = vpop.xlane.xlu1 %3233 }
 0xb32   :  { %v3250_v32 = vsub.f32 %v8673_v13, %v3234_v11  ;;  %v3257_v59 = vmul.f32 1.442695, %v3248_v44 }
 0xb33   :  { %v3231_v34 = vpop.xlane.xlu0 %3230 }
 0xb34   :  { %v3261_v33 = vmul.f32 1.442695, %v3250_v32  ;;  %v3249_v35 = vsub.f32 %v8668_v49, %v3231_v34 }
 0xb36   :  { %7175 = vpow2.f32 %v3261_v33  ;;  %v3259_v16 = vmul.f32 1.442695, %v3249_v35  ;;  %v9599_v35 = vld [vmem:[#allocation19_spill] sm:$0xff] }
 0xb37   :  { %7177 = vpow2.f32 %v3257_v59  ;;  %v3237_v60 = vpop.xlane.xlu0 %3236  ;;  %v9598_v59 = vld [vmem:[#allocation30_spill] sm:$0xff] }
 0xb38   :  { %7179 = vpow2.f32 %v3259_v16  ;;  %v3240_v57 = vpop.xlane.xlu1 %3239  ;;  %v3251_v36 = vsub.f32 %v8693_v1, %v3237_v60  ;;  %v9600_v16 = vld [vmem:[#allocation31_spill] sm:$0xff] }
 0xb39   :  { %7181 = vpow2.f32 %v3255_v17  ;;  %v3252_v24 = vsub.f32 %v8698_v27, %v3240_v57 }
 0xb3a   :  { %v3263_v58 = vmul.f32 1.442695, %v3251_v36  ;;  %v9601_v36 = vld [vmem:[#allocation17_spill] sm:$0xff] }
 0xb3b   :  { %v3243_v13 = vpop.xlane.xlu0 %3242  ;;  %v3265_v26 = vmul.f32 1.442695, %v3252_v24 }
 0xb3c   :  { %v3246_v63 = vpop.xlane.xlu1 %3245  ;;  %v3253_v21 = vsub.f32 %v8688_v38, %v3243_v13  ;;  %v9602_v13 = vld [vmem:[#allocation32_spill] sm:$0xff] }
 0xb3d   :  { %v3254_v28 = vsub.f32 %v8696_v48, %v3246_v63 }
 0xb3e   :  { %v3267_v49 = vmul.f32 1.442695, %v3253_v21  ;;  %v9603_v21 = vld [vmem:[#allocation20_spill] sm:$0xff] }
 0xb3f   :  { %v3269_v30 = vmul.f32 1.442695, %v3254_v28 }
 0xb40   :  { %v8755_v51 = vpop.eup %7175  ;;  %7183 = vpow2.f32 %v3267_v49 }
 0xb41   :  { %v8757_v53 = vpop.eup %7177  ;;  %7185 = vpow2.f32 %v3269_v30  ;;  %v3280_v1 = vsel %vm847_vm1, %v8755_v51, 0.0 }
 0xb42   :  { %v8761_v27 = vpop.eup %7179  ;;  %7187 = vpow2.f32 %v3263_v58  ;;  %3281 = vadd.xlane.f32.xlu1 %v3280_v1  ;;  %v3274_v25 = vsel %vm847_vm1, %v8757_v53, 0.0  ;;  %v9604_v58 = vld [vmem:[#allocation18_spill] sm:$0xff] }
 0xb43   :  { %7189 = vpow2.f32 %v3265_v26  ;;  %v3277_v38 = vsel %vm847_vm1, %v8761_v27, 0.0  ;;  %v8765_v48 = vpop.eup %7181 }
 0xb44   :  { %3278 = vadd.xlane.f32.xlu0 %v3277_v38  ;;  %v3271_v15 = vsel %vm847_vm1, %v8765_v48, 0.0 }
 0xb46   :  { %3275 = vadd.xlane.f32.xlu1 %v3274_v25 }
 0xb48   :  { %3272 = vadd.xlane.f32.xlu0 %v3271_v15 }
 0xb4a   :  { %v8771_v40 = vpop.eup %7183 }
 0xb4b   :  { %v8773_v9 = vpop.eup %7185  ;;  %v3289_v55 = vsel %vm847_vm1, %v8771_v40, 0.0 }
 0xb4c   :  { %v8777_v37 = vpop.eup %7187  ;;  %v3292_v46 = vsel %vm847_vm1, %v8773_v9, 0.0  ;;  %3290 = vadd.xlane.f32.xlu0 %v3289_v55 }
 0xb4d   :  { %v8781_v43 = vpop.eup %7189  ;;  %3293 = vadd.xlane.f32.xlu1 %v3292_v46  ;;  %v3283_v62 = vsel %vm847_vm1, %v8777_v37, 0.0 }
 0xb4e   :  { %v3286_v42 = vsel %vm847_vm1, %v8781_v43, 0.0 }
 0xb50   :  { %3284 = vadd.xlane.f32.xlu0 %v3283_v62 }
 0xb51   :  { %3287 = vadd.xlane.f32.xlu1 %v3286_v42 }
 0xb5f   :  { %v6546_v7 = vpop.f32.mrb[40].mxu0 }
 0xb60   :  { %v6728_v50 = vadd.f32 %v6546_v7, %v8234_v54  ;;  %v2255_v20 = vpop.f32.mrb[41].mxu0 }
 0xb61   :  { %v6729_v61 = vadd.f32 %v2255_v20, %v8236_v47  ;;  %v6547_v10 = vpop.f32.mrb[42].mxu0 }
 0xb62   :  { %v2296_v4 = vadd.f32 %v6728_v50, %v7690_v3  ;;  %v6730_v8 = vadd.f32 %v6547_v10, %v8238_v39  ;;  %3319 = vrot.lane.b32.xlu1 %v7980_v22, %s7546_s8  ;;  %v2258_v52 = vpop.f32.mrb[43].mxu0 }
 0xb63   :  { %v2294_v31 = vadd.f32 %v6729_v61, %v7688_v2  ;;  %v6731_v54 = vadd.f32 %v2258_v52, %v8240_v14  ;;  %v9597_v2 = vld [vmem:[#allocation29_spill] sm:$0xff] }
 0xb64   :  { %v2297_v47 = vadd.f32 %v6730_v8, %v7696_v6  ;;  %v2310_v3 = vadd.f32 %v8796_v18, %v2296_v4 }
 0xb65   :  { %v2295_v12 = vadd.f32 %v6731_v54, %v9596_v19  ;;  %v2308_v56 = vadd.f32 %v8796_v18, %v2294_v31 }
 0xb66   :  { %v2311_v39 = vadd.f32 %v8796_v18, %v2297_v47  ;;  %3321 = vrot.lane.b32.xlu0 %v7978_v29, %s7546_s8 }
 0xb67   :  { %v2309_v44 = vadd.f32 %v8796_v18, %v2295_v12  ;;  %v6550_v11 = vpop.f32.mrb[44].mxu0 }
 0xb68   :  { %v8808_v5 = vpack.c.bf16 %v2311_v39, %v2310_v3  ;;  %v6732_v14 = vadd.f32 %v6550_v11, %v9597_v2  ;;  %v2271_v32 = vpop.f32.mrb[45].mxu0  ;;  %v6866_v39 = vld [vmem:[#allocation7 + $0x8] sm:$0xff]  }
 0xb69   :  { %v8811_v6 = vpack.c.bf16 %v2309_v44, %v2308_v56  ;;  %v6733_v34 = vadd.f32 %v2271_v32, %v9598_v59  ;;  %v6551_v33 = vpop.f32.mrb[46].mxu0  ;;  %v3316_v32 = vpop.permute.xlu0 %3315 }
 0xb6a   :  { %v2300_v17 = vadd.f32 %v6732_v14, %v9599_v35  ;;  %v6734_v60 = vadd.f32 %v6551_v33, %v9600_v16  ;;  %v2274_v57 = vpop.f32.mrb[47].mxu0 }
 0xb6b   :  { %v2298_v24 = vadd.f32 %v6733_v34, %v9601_v36  ;;  %v6735_v63 = vadd.f32 %v2274_v57, %v9602_v13  ;;  %v3318_v34 = vpop.permute.xlu1 %3317 }
 0xb6c   :  { %v2301_v28 = vadd.f32 %v6734_v60, %v9603_v21  ;;  %v2314_v26 = vadd.f32 %v8796_v18, %v2300_v17 }
 0xb6d   :  { %v2299_v49 = vadd.f32 %v6735_v63, %v9604_v58  ;;  %v2312_v1 = vadd.f32 %v8796_v18, %v2298_v24 }
 0xb6e   :  { %v2315_v30 = vadd.f32 %v8796_v18, %v2301_v28 }
 0xb6f   :  { %v2313_v38 = vadd.f32 %v8796_v18, %v2299_v49 }
 0xb70   :  { %v8824_v25 = vpack.c.bf16 %v2315_v30, %v2314_v26 }
 0xb71   :  { %v8826_v15 = vpack.c.bf16 %v2313_v38, %v2312_v1 }
 0xb78   :  { %v6578_v55 = vpop.f32.mrb[64].mxu0 }
 0xb79   :  { %v2595_v46 = vpop.f32.mrb[65].mxu0 }
 0xb7a   :  { %v6579_v62 = vpop.f32.mrb[66].mxu0 }
 0xb7b   :  { %v2627_v42 = vpack.c.bf16 %v6579_v62, %v6578_v55  ;;  %v2598_v7 = vpop.f32.mrb[67].mxu0 }
 0xb7c   :  { %v2626_v50 = vpack.c.bf16 %v2598_v7, %v2595_v46 }
 0xb84   :  { %v6582_v20 = vpop.f32.mrb[68].mxu0 }
 0xb85   :  { %v2611_v61 = vpop.f32.mrb[69].mxu0 }
 0xb86   :  { %v6583_v10 = vpop.f32.mrb[70].mxu0 }
 0xb87   :  { %v2629_v4 = vpack.c.bf16 %v6583_v10, %v6582_v20  ;;  %v2614_v8 = vpop.f32.mrb[71].mxu0 }
 0xb88   :  { %v2628_v52 = vpack.c.bf16 %v2614_v8, %v2611_v61 }
 0xbab   :  { %v6610_v31 = vpop.f32.mrb[72].mxu0 }
 0xbac   :  { %v2901_v54 = vpop.f32.mrb[73].mxu0 }
 0xbad   :  { %v6611_v47 = vpop.f32.mrb[74].mxu0 }
 0xbae   :  { %v2933_v19 = vpack.c.bf16 %v6611_v47, %v6610_v31  ;;  %v2904_v12 = vpop.f32.mrb[75].mxu0 }
 0xbaf   :  { %v2932_v3 = vpack.c.bf16 %v2904_v12, %v2901_v54 }
 0xbb1   :  { %6620 = vmatprep.mubr.msk.bf16.mxu0 %vm757_vm0, %v2932_v3 }
 0xbb2   :  { %6621 = vmatmul.mubr.msk.bf16.vlgmr.msra.gmra.mrb[80].mxu0 %vm757_vm0, %v2933_v19  ;;  %v6867_v19 = vld [vmem:[#allocation7 + $0x20] sm:$0xff]  }
 0xbb3   :  { %6629 = vmatpush3.bf16.msra.mxu0 %v8745_v23  ;;  %v6614_v56 = vpop.f32.mrb[76].mxu0 }
 0xbb4   :  { %v2917_v44 = vpop.f32.mrb[77].mxu0  ;;  %6630 = vmatprep.subr.bf16.mxu0 %v6866_v39 }
 0xbb5   :  { %v6615_v11 = vpop.f32.mrb[78].mxu0 }
 0xbb6   :  { %v2935_v2 = vpack.c.bf16 %v6615_v11, %v6614_v56  ;;  %v2920_v14 = vpop.f32.mrb[79].mxu0 }
 0xbb7   :  { %v2934_v59 = vpack.c.bf16 %v2920_v14, %v2917_v44  ;;  %6631 = vmatpush3.bf16.msra.mxu0 %v6866_v39  ;;  %v6868_v44 = vld [vmem:[#allocation7 + $0x28] sm:$0xff]  }
 0xbb8   :  { %6656 = vmatprep.subr.bf16.mxu0 %v3316_v32 }
 0xbb9   :  { %6624 = vmatprep.mubr.msk.bf16.mxu0 %vm757_vm0, %v2934_v59 }
 0xbba   :  { %6625 = vmatmul.mubr.msk.bf16.gmra.mrb[84].mxu0 %vm757_vm0, %v2935_v2 }
 0xbbb   :  { %6632 = vmatprep.mubr.msk.bf16.mxu0 %vm757_vm0, %v2626_v50 }
 0xbc2   :  { %6633 = vmatmul.mubr.msk.bf16.vlgmr.msra.gmra.mrb[80].mxu0 %vm757_vm0, %v2627_v42 }
 0xbc3   :  { %6657 = vmatpush3.bf16.msra.mxu0 %v3316_v32  ;;  %6636 = vmatprep.mubr.msk.bf16.mxu0 %vm757_vm0, %v2628_v52 }
 0xbc4   :  { %6658 = vmatprep.subr.bf16.mxu0 %v3318_v34 }
 0xbc7   :  { %6659 = vmatpush3.bf16.msra.mxu0 %v3318_v34  ;;  %v8836_v23 = vpop.f32.mrb[88].mxu1 }
 0xbc8   :  { %v8838_v33 = vpop.f32.mrb[89].mxu1  ;;  %v3620_v13 = vsel %vm847_vm1, %v8836_v23, -inf }
 0xbc9   :  { %v8840_v35 = vpop.f32.mrb[90].mxu1  ;;  %v3614_v17 = vsel %vm847_vm1, %v8838_v33, -inf }
 0xbca   :  { %6637 = vmatmul.mubr.msk.bf16.gmra.mrb[84].mxu0 %vm757_vm0, %v2629_v4  ;;  %v8845_v16 = vpop.f32.mrb[91].mxu1  ;;  %3615 = vmax.xlane.f32.xlu1 %v3614_v17  ;;  %v3623_v57 = vsel %vm847_vm1, %v8840_v35, -inf }
 0xbcb   :  { %v3617_v60 = vsel %vm847_vm1, %v8845_v16, -inf }
 0xbcc   :  { %3618 = vmax.xlane.f32.xlu0 %v3617_v60 }
 0xbce   :  { %3624 = vmax.xlane.f32.xlu1 %v3623_v57 }
 0xbcf   :  { %v3282_v36 = vpop.xlane.xlu1 %3281  ;;  %v8851_v24 = vpop.f32.mrb[92].mxu1 }
 0xbd0   :  { %v8855_v63 = vpop.f32.mrb[93].mxu1  ;;  %3621 = vmax.xlane.f32.xlu0 %v3620_v13  ;;  %v3632_v55 = vsel %vm847_vm1, %v8851_v24, -inf }
 0xbd1   :  { %v8857_v21 = vpop.f32.mrb[94].mxu1  ;;  %v3279_v28 = vpop.xlane.xlu0 %3278  ;;  %v3626_v30 = vsel %vm847_vm1, %v8855_v63, -inf }
 0xbd2   :  { %v8859_v58 = vpop.f32.mrb[95].mxu1  ;;  %v3635_v38 = vsel %vm847_vm1, %v8857_v21, -inf }
 0xbd3   :  { %v3276_v49 = vpop.xlane.xlu1 %3275  ;;  %v3629_v26 = vsel %vm847_vm1, %v8859_v58, -inf }
 0xbd4   :  { %7191 = vrcp.f32 %v3276_v49  ;;  %3630 = vmax.xlane.f32.xlu1 %v3629_v26  ;;  %3627 = vmax.xlane.f32.xlu0 %v3626_v30 }
 0xbd5   :  { %v3273_v1 = vpop.xlane.xlu0 %3272 }
 0xbd6   :  { %7193 = vrcp.f32 %v3273_v1 }
 0xbd7   :  { %7195 = vrcp.f32 %v3279_v28 }
 0xbd8   :  { %3636 = vmax.xlane.f32.xlu1 %v3635_v38  ;;  %3633 = vmax.xlane.f32.xlu0 %v3632_v55  ;;  %7197 = vrcp.f32 %v3282_v36 }
 0xbd9   :  { %v3291_v46 = vpop.xlane.xlu0 %3290 }
 0xbda   :  { %v3294_v62 = vpop.xlane.xlu1 %3293  ;;  %7199 = vrcp.f32 %v3291_v46 }
 0xbdd   :  { %v3285_v42 = vpop.xlane.xlu0 %3284 }
 0xbde   :  { %v7192_v7 = vpop.eup %7191  ;;  %v3288_v50 = vpop.xlane.xlu1 %3287  ;;  %7201 = vrcp.f32 %v3285_v42 }
 0xbdf   :  { %7203 = vrcp.f32 %v3288_v50  ;;  %v3304_v10 = vmul.f32 %v7192_v7, %v8757_v53 }
 0xbe0   :  { %v7194_v20 = vpop.eup %7193  ;;  %7205 = vrcp.f32 %v3294_v62 }
 0xbe1   :  { %v3303_v61 = vmul.f32 %v7194_v20, %v8765_v48  ;;  %v7196_v4 = vpop.eup %7195  ;;  %v3322_v54 = vpop.permute.xlu0 %3321 }
 0xbe2   :  { %v3320_v8 = vpop.permute.xlu1 %3319  ;;  %v7198_v31 = vpop.eup %7197  ;;  %v3305_v47 = vmul.f32 %v7196_v4, %v8761_v27 }
 0xbe3   :  { %6660 = vmatprep.subr.bf16.mxu0 %v3320_v8  ;;  %v3311_v52 = vpack.c.bf16 %v3304_v10, %v3303_v61  ;;  %v3306_v3 = vmul.f32 %v7198_v31, %v8755_v51 }
 0xbe4   :  { %6661 = vmatpush3.bf16.msra.mxu0 %v3320_v8  ;;  %v7200_v12 = vpop.eup %7199 }
 0xbe5   :  { %6662 = vmatprep.subr.bf16.mxu0 %v3322_v54  ;;  %6664 = vmatprep.mubr.msk.bf16.mxu0 %vm847_vm1, %v3311_v52  ;;  %v3312_v53 = vpack.c.bf16 %v3306_v3, %v3305_v47  ;;  %v3309_v14 = vmul.f32 %v7200_v12, %v8771_v40  ;;  %v8934_v12 = vunpack.c.l.bf16 %v8808_v5  ;;  %v8938_v3 = vunpack.c.h.bf16 %v8808_v5 }
 0xbe8   :  { %v7202_v39 = vpop.eup %7201  ;;  %6663 = vmatpush3.bf16.msra.mxu0 %v3322_v54 }
 0xbe9   :  { %v7204_v48 = vpop.eup %7203  ;;  %v3307_v56 = vmul.f32 %v7202_v39, %v8777_v37  ;;  %6672 = vmatprep.subr.bf16.mxu0 %v6867_v19  ;;  %v8953_v39 = vunpack.c.h.bf16 %v8826_v15 }
 0xbea   :  { %v7206_v11 = vpop.eup %7205  ;;  %v3308_v2 = vmul.f32 %v7204_v48, %v8781_v43  ;;  %v8958_v48 = vunpack.c.h.bf16 %v8824_v25 }
 0xbeb   :  { %6665 = vmatmul.mubr.msk.bf16.vlgmr.msra.gmra.mrb[88].mxu0 %vm847_vm1, %v3312_v53  ;;  %v3310_v32 = vmul.f32 %v7206_v11, %v8773_v9 }
 0xbec   :  { %v3313_v27 = vpack.c.bf16 %v3308_v2, %v3307_v56  ;;  %6673 = vmatpush3.bf16.msra.mxu0 %v6867_v19  ;;  %v8930_v19 = vunpack.c.l.bf16 %v8811_v6 }
 0xbed   :  { %6674 = vmatprep.subr.bf16.mxu0 %v6868_v44  ;;  %v3314_v51 = vpack.c.bf16 %v3310_v32, %v3309_v14 }
 0xbee   :  { %6668 = vmatprep.mubr.msk.bf16.mxu0 %vm847_vm1, %v3313_v27  ;;  %3706 = vrot.lane.b32.xlu0 %v7972_v41, %s7552_s2 }
 0xbf0   :  { %6675 = vmatpush3.bf16.msra.mxu0 %v6868_v44 }
 0xbf3   :  { %6669 = vmatmul.mubr.msk.bf16.gmra.mrb[92].mxu0 %vm847_vm1, %v3314_v51 }
 0xc57   :  { %v3616_v37 = vpop.xlane.xlu1 %3615 }
 0xc58   :  { %v3638_v17 = vsub.f32 %v8838_v33, %v3616_v37 }
 0xc59   :  { %v3619_v43 = vpop.xlane.xlu0 %3618 }
 0xc5a   :  { %v3639_v59 = vsub.f32 %v8845_v16, %v3619_v43  ;;  %v3646_v13 = vmul.f32 1.442695, %v3638_v17 }
 0xc5b   :  { %v3625_v34 = vpop.xlane.xlu1 %3624 }
 0xc5c   :  { %v3641_v40 = vsub.f32 %v8840_v35, %v3625_v34  ;;  %v3648_v9 = vmul.f32 1.442695, %v3639_v59 }
 0xc5d   :  { %v3622_v60 = vpop.xlane.xlu0 %3621 }
 0xc5e   :  { %v3652_v57 = vmul.f32 1.442695, %v3641_v40  ;;  %v3640_v36 = vsub.f32 %v8836_v23, %v3622_v60 }
 0xc60   :  { %7207 = vpow2.f32 %v3652_v57  ;;  %v3650_v41 = vmul.f32 1.442695, %v3640_v36 }
 0xc61   :  { %7209 = vpow2.f32 %v3648_v9  ;;  %v3631_v28 = vpop.xlane.xlu1 %3630  ;;  %v3628_v49 = vpop.xlane.xlu0 %3627 }
 0xc62   :  { %7211 = vpow2.f32 %v3650_v41  ;;  %v3642_v16 = vsub.f32 %v8855_v63, %v3628_v49  ;;  %v3643_v63 = vsub.f32 %v8859_v58, %v3631_v28 }
 0xc63   :  { %7213 = vpow2.f32 %v3646_v13 }
 0xc64   :  { %v3654_v1 = vmul.f32 1.442695, %v3642_v16  ;;  %v3656_v20 = vmul.f32 1.442695, %v3643_v63 }
 0xc65   :  { %v3634_v26 = vpop.xlane.xlu0 %3633  ;;  %v3637_v30 = vpop.xlane.xlu1 %3636 }
 0xc66   :  { %v3644_v33 = vsub.f32 %v8851_v24, %v3634_v26  ;;  %v3645_v38 = vsub.f32 %v8857_v21, %v3637_v30 }
 0xc68   :  { %v3658_v35 = vmul.f32 1.442695, %v3644_v33  ;;  %v3660_v24 = vmul.f32 1.442695, %v3645_v38  ;;  %v6869_v38 = vld [vmem:[#allocation7 + $0x30] sm:$0xff]  }
 0xc69   :  { %v3707_v55 = vpop.permute.xlu0 %3706 }
 0xc6a   :  { %v8890_v23 = vpop.eup %7207  ;;  %6700 = vmatprep.subr.bf16.mxu0 %v3707_v55  ;;  %7215 = vpow2.f32 %v3658_v35 }
 0xc6b   :  { %v8892_v46 = vpop.eup %7209  ;;  %v3671_v62 = vsel %vm847_vm1, %v8890_v23, 0.0  ;;  %7217 = vpow2.f32 %v3654_v1 }
 0xc6c   :  { %v8896_v42 = vpop.eup %7211  ;;  %3672 = vadd.xlane.f32.xlu1 %v3671_v62  ;;  %v3665_v50 = vsel %vm847_vm1, %v8892_v46, 0.0  ;;  %7219 = vpow2.f32 %v3660_v24 }
 0xc6d   :  { %v3668_v21 = vsel %vm847_vm1, %v8896_v42, 0.0  ;;  %v8901_v7 = vpop.eup %7213  ;;  %7221 = vpow2.f32 %v3656_v20 }
 0xc6e   :  { %3669 = vadd.xlane.f32.xlu0 %v3668_v21  ;;  %v3662_v61 = vsel %vm847_vm1, %v8901_v7, 0.0 }
 0xc70   :  { %3666 = vadd.xlane.f32.xlu1 %v3665_v50 }
 0xc72   :  { %3663 = vadd.xlane.f32.xlu0 %v3662_v61 }
 0xc74   :  { %v8907_v10 = vpop.eup %7215 }
 0xc75   :  { %v3680_v58 = vsel %vm847_vm1, %v8907_v10, 0.0  ;;  %v8911_v4 = vpop.eup %7217 }
 0xc76   :  { %3681 = vadd.xlane.f32.xlu1 %v3680_v58  ;;  %v3674_v8 = vsel %vm847_vm1, %v8911_v4, 0.0  ;;  %v8915_v52 = vpop.eup %7219 }
 0xc77   :  { %v3683_v31 = vsel %vm847_vm1, %v8915_v52, 0.0  ;;  %v8919_v54 = vpop.eup %7221 }
 0xc78   :  { %v3677_v47 = vsel %vm847_vm1, %v8919_v54, 0.0 }
 0xc7a   :  { %3675 = vadd.xlane.f32.xlu1 %v3674_v8 }
 0xc7e   :  { %3684 = vadd.xlane.f32.xlu1 %v3683_v31 }
 0xc82   :  { %3678 = vadd.xlane.f32.xlu1 %v3677_v47 }
 0xc88   :  { %3710 = vrot.lane.b32.xlu0 %v7980_v22, %s7552_s2  ;;  %v8950_v22 = vunpack.c.l.bf16 %v8824_v25 }
 0xc8c   :  { %3712 = vrot.lane.b32.xlu0 %v7978_v29, %s7552_s2  ;;  %v8942_v29 = vunpack.c.l.bf16 %v8826_v15 }
 0xc93   :  { %3708 = vrot.lane.b32.xlu1 %v7970_v45, %s7552_s2  ;;  %v8945_v45 = vunpack.c.h.bf16 %v8811_v6 }
 0xcab   :  { %3992 = vadd.xlane.f32.xlu0 %v8930_v19 }
 0xcaf   :  { %3996 = vadd.xlane.f32.xlu0 %v8934_v12 }
 0xcb3   :  { %3998 = vadd.xlane.f32.xlu0 %v8938_v3 }
 0xcb7   :  { %4000 = vadd.xlane.f32.xlu0 %v8942_v29  ;;  %3994 = vadd.xlane.f32.xlu1 %v8945_v45 }
 0xcbb   :  { %4004 = vadd.xlane.f32.xlu0 %v8950_v22  ;;  %4002 = vadd.xlane.f32.xlu1 %v8953_v39 }
 0xcbe   :  { %v6666_v5 = vpop.f32.mrb[88].mxu0 }
 0xcbf   :  { %v3373_v6 = vpop.f32.mrb[89].mxu0  ;;  %4006 = vadd.xlane.f32.xlu1 %v8958_v48 }
 0xcc0   :  { %v6667_v53 = vpop.f32.mrb[90].mxu0 }
 0xcc1   :  { %v3405_v56 = vpack.c.bf16 %v6667_v53, %v6666_v5  ;;  %v3376_v44 = vpop.f32.mrb[91].mxu0 }
 0xcc2   :  { %v3404_v11 = vpack.c.bf16 %v3376_v44, %v3373_v6  ;;  %v9605_v44 = vld [vmem:[#allocation23_spill] sm:$0xff] }
 0xcc4   :  { %6676 = vmatprep.mubr.msk.bf16.mxu0 %vm757_vm0, %v3404_v11 }
 0xcc5   :  { %6677 = vmatmul.mubr.msk.bf16.vlgmr.msra.gmra.mrb[80].mxu0 %vm757_vm0, %v3405_v56 }
 0xcc6   :  { %6701 = vmatpush3.bf16.msra.mxu0 %v3707_v55  ;;  %v6670_v15 = vpop.f32.mrb[92].mxu0 }
 0xcc7   :  { %v3389_v2 = vpop.f32.mrb[93].mxu0 }
 0xcc8   :  { %v6671_v27 = vpop.f32.mrb[94].mxu0 }
 0xcc9   :  { %v3407_v14 = vpack.c.bf16 %v6671_v27, %v6670_v15  ;;  %v3392_v32 = vpop.f32.mrb[95].mxu0 }
 0xcca   :  { %v3406_v51 = vpack.c.bf16 %v3392_v32, %v3389_v2  ;;  %v9606_v2 = vld [vmem:[#allocation21_spill] sm:$0xff] }
 0xccc   :  { %6680 = vmatprep.mubr.msk.bf16.mxu0 %vm757_vm0, %v3406_v51  ;;  %v9607_v51 = vld [vmem:[#allocation24_spill] sm:$0xff] }
 0xccd   :  { %6681 = vmatmul.mubr.msk.bf16.gmra.mrb[84].mxu0 %vm757_vm0, %v3407_v14 }
 0xcf9   :  { %v3673_v25 = vpop.xlane.xlu1 %3672 }
 0xcfb   :  { %v3670_v37 = vpop.xlane.xlu0 %3669 }
 0xcfd   :  { %v3667_v43 = vpop.xlane.xlu1 %3666 }
 0xcfe   :  { %7223 = vrcp.f32 %v3667_v43  ;;  %v9608_v43 = vld [vmem:[#allocation22_spill] sm:$0xff] }
 0xcff   :  { %v3664_v59 = vpop.xlane.xlu0 %3663 }
 0xd00   :  { %7225 = vrcp.f32 %v3664_v59 }
 0xd01   :  { %7227 = vrcp.f32 %v3670_v37 }
 0xd02   :  { %7229 = vrcp.f32 %v3673_v25 }
 0xd03   :  { %v3682_v34 = vpop.xlane.xlu1 %3681  ;;  %v3711_v28 = vpop.permute.xlu0 %3710 }
 0xd07   :  { %v3676_v40 = vpop.xlane.xlu1 %3675  ;;  %v3713_v33 = vpop.permute.xlu0 %3712 }
 0xd08   :  { %v7224_v17 = vpop.eup %7223  ;;  %7231 = vrcp.f32 %v3676_v40 }
 0xd09   :  { %v3695_v57 = vmul.f32 %v7224_v17, %v8892_v46 }
 0xd0a   :  { %v7226_v9 = vpop.eup %7225 }
 0xd0b   :  { %v3694_v60 = vmul.f32 %v7226_v9, %v8901_v7  ;;  %v3685_v36 = vpop.xlane.xlu1 %3684  ;;  %v7228_v16 = vpop.eup %7227 }
 0xd0c   :  { %v7230_v26 = vpop.eup %7229  ;;  %v3696_v1 = vmul.f32 %v7228_v16, %v8896_v42  ;;  %v9610_v16 = vld [vmem:[#allocation25_spill] sm:$0xff] }
 0xd0d   :  { %v3702_v13 = vpack.c.bf16 %v3695_v57, %v3694_v60  ;;  %v3697_v46 = vmul.f32 %v7230_v26, %v8890_v23  ;;  %v6870_v23 = vld [vmem:[#allocation7 + $0x38] sm:$0xff]  }
 0xd0f   :  { %6708 = vmatprep.mubr.msk.bf16.mxu0 %vm847_vm1, %v3702_v13  ;;  %v3679_v41 = vpop.xlane.xlu1 %3678  ;;  %v3703_v63 = vpack.c.bf16 %v3697_v46, %v3696_v1  ;;  %v9613_v1 = vld [vmem:[#allocation28_spill] sm:$0xff]  ;;  %v9614_v46 = vld [vmem:[#allocation26_spill] sm:$0xff] }
 0xd10   :  { %7233 = vrcp.f32 %v3679_v41  ;;  %v9609_v41 = vld [vmem:[#allocation27_spill] sm:$0xff] }
 0xd11   :  { %7235 = vrcp.f32 %v3685_v36 }
 0xd12   :  { %7237 = vrcp.f32 %v3682_v34  ;;  %v7232_v30 = vpop.eup %7231 }
 0xd13   :  { %v3709_v49 = vpop.permute.xlu1 %3708  ;;  %v3698_v62 = vmul.f32 %v7232_v30, %v8911_v4 }
 0xd14   :  { %6702 = vmatprep.subr.bf16.mxu0 %v3709_v49 }
 0xd15   :  { %6703 = vmatpush3.bf16.msra.mxu0 %v3709_v49 }
 0xd16   :  { %6704 = vmatprep.subr.bf16.mxu0 %v3711_v28 }
 0xd19   :  { %6705 = vmatpush3.bf16.msra.mxu0 %v3711_v28 }
 0xd1a   :  { %v7234_v35 = vpop.eup %7233  ;;  %6706 = vmatprep.subr.bf16.mxu0 %v3713_v33 }
 0xd1b   :  { %v3699_v55 = vmul.f32 %v7234_v35, %v8919_v54  ;;  %v7236_v24 = vpop.eup %7235 }
 0xd1c   :  { %v7238_v7 = vpop.eup %7237  ;;  %v3701_v42 = vmul.f32 %v7236_v24, %v8915_v52 }
 0xd1d   :  { %6707 = vmatpush3.bf16.msra.mxu0 %v3713_v33  ;;  %v3704_v21 = vpack.c.bf16 %v3699_v55, %v3698_v62  ;;  %v3700_v50 = vmul.f32 %v7238_v7, %v8907_v10 }
 0xd1e   :  { %6716 = vmatprep.subr.bf16.mxu0 %v6869_v38 }
 0xd1f   :  { %v3705_v20 = vpack.c.bf16 %v3701_v42, %v3700_v50 }
 0xd20   :  { %6709 = vmatmul.mubr.msk.bf16.vlgmr.msra.gmra.mrb[96].mxu0 %vm847_vm1, %v3703_v63 }
 0xd21   :  { %6712 = vmatprep.mubr.msk.bf16.mxu0 %vm847_vm1, %v3704_v21  ;;  %6717 = vmatpush3.bf16.msra.mxu0 %v6869_v38 }
 0xd22   :  { %6718 = vmatprep.subr.bf16.mxu0 %v6870_v23 }
 0xd25   :  { %6719 = vmatpush3.bf16.msra.mxu0 %v6870_v23 }
 0xd28   :  { %6713 = vmatmul.mubr.msk.bf16.gmra.mrb[100].mxu0 %vm847_vm1, %v3705_v20 }
 0xd38   :  { %v3993_v32 = vpop.xlane.xlu0 %3992 }
 0xd3c   :  { %v3997_v13 = vpop.xlane.xlu0 %3996 }
 0xd40   :  { %v3999_v20 = vpop.xlane.xlu0 %3998 }
 0xd44   :  { %v3995_v23 = vpop.xlane.xlu1 %3994 }
 0xdf3   :  { %v6710_v61 = vpop.f32.mrb[96].mxu0 }
 0xdf4   :  { %v3764_v58 = vpop.f32.mrb[97].mxu0 }
 0xdf5   :  { %v6711_v4 = vpop.f32.mrb[98].mxu0 }
 0xdf6   :  { %v3796_v8 = vpack.c.bf16 %v6711_v4, %v6710_v61  ;;  %v3767_v31 = vpop.f32.mrb[99].mxu0  ;;  %v4024_v4 = vmul.f32 0.0078125, %v3993_v32 }
 0xdf7   :  { %v3795_v54 = vpack.c.bf16 %v3767_v31, %v3764_v58 }
 0xdf9   :  { %6720 = vmatprep.mubr.msk.bf16.mxu0 %vm757_vm0, %v3795_v54 }
 0xdfa   :  { %6721 = vmatmul.mubr.msk.bf16.vlgmr.msra.gmra.mrb[80].mxu0 %vm757_vm0, %v3796_v8  ;;  %v4025_v8 = vmul.f32 0.0078125, %v3995_v23  ;;  %v6897_v23 = vld [vmem:[#allocation8 + $0x84] ss:$16 sps:$4 sm:$0xff]  }
 0xdfb   :  { %v6714_v47 = vpop.f32.mrb[100].mxu0 }
 0xdfc   :  { %v3780_v52 = vpop.f32.mrb[101].mxu0 }
 0xdfd   :  { %v6715_v5 = vpop.f32.mrb[102].mxu0 }
 0xdfe   :  { %v3798_v10 = vpack.c.bf16 %v6715_v5, %v6714_v47  ;;  %v3783_v6 = vpop.f32.mrb[103].mxu0  ;;  %v4027_v47 = vmul.f32 0.0078125, %v3999_v20  ;;  %v4003_v5 = vpop.xlane.xlu1 %4002  ;;  %v6892_v20 = vld [vmem:[#allocation8 + $0x68] ss:$16 sps:$4 sm:$0xff]  }
 0xdff   :  { %v3797_v53 = vpack.c.bf16 %v3783_v6, %v3780_v52  ;;  %v4001_v52 = vpop.xlane.xlu0 %4000  ;;  %v9020_v6 = vsub.f32 %v8945_v45, %v4025_v8  ;;  %v6903_v8 = vld [vmem:[#allocation8 + $0xa4] ss:$16 sps:$4 sm:$0xff]  }
 0xe01   :  { %6724 = vmatprep.mubr.msk.bf16.mxu0 %vm757_vm0, %v3797_v53 }
 0xe02   :  { %6725 = vmatmul.mubr.msk.bf16.gmra.mrb[84].mxu0 %vm757_vm0, %v3798_v10  ;;  %v9017_v10 = vsub.f32 %v8930_v19, %v4024_v4  ;;  %v6898_v4 = vld [vmem:[#allocation8 + $0x88] ss:$16 sps:$4 sm:$0xff]  }
 0xe03   :  { %4578 = vmatprep.mubr.bf16.mxu0 %v9595_v0  ;;  %v4005_v32 = vpop.xlane.xlu0 %4004 }
 0xecd   :  { %v6722_v56 = vpop.f32.mrb[80].mxu0 }
 0xece   :  { %v3902_v11 = vadd.f32 %v6722_v56, %v9605_v44  ;;  %v3861_v15 = vpop.f32.mrb[81].mxu0 }
 0xecf   :  { %v3900_v27 = vadd.f32 %v9606_v2, %v3861_v15  ;;  %v6723_v14 = vpop.f32.mrb[82].mxu0  ;;  %v4028_v15 = vmul.f32 0.0078125, %v4001_v52  ;;  %v4029_v2 = vmul.f32 0.0078125, %v4003_v5  ;;  %v6904_v52 = vld [vmem:[#allocation8 + $0xa8] ss:$16 sps:$4 sm:$0xff]  }
 0xed0   :  { %v3903_v25 = vadd.f32 %v6723_v14, %v9607_v51  ;;  %v3864_v37 = vpop.f32.mrb[83].mxu0  ;;  %v3910_v34 = vadd.f32 %v8796_v18, %v3902_v11  ;;  %v9032_v11 = vsub.f32 %v8938_v3, %v4027_v47  ;;  %v4056_v14 = vmul.f32 %v9017_v10, %v9017_v10  ;;  %v4007_v51 = vpop.xlane.xlu1 %4006  ;;  %v6901_v47 = vld [vmem:[#allocation8 + $0xa0] ss:$16 sps:$4 sm:$0xff]   ;;  %v6909_v5 = vld [vmem:[#allocation8 + $0xc4] ss:$16 sps:$4 sm:$0xff]  }
 0xed1   :  { %v3901_v59 = vadd.f32 %v9608_v43, %v3864_v37  ;;  %v3908_v40 = vadd.f32 %v8796_v18, %v3900_v27  ;;  %v4057_v27 = vmul.f32 %v9020_v6, %v9020_v6  ;;  %v9043_v43 = vsub.f32 %v8942_v29, %v4028_v15  ;;  %v6912_v15 = vld [vmem:[#allocation8 + $0xcc] ss:$16 sps:$4 sm:$0xff]  }
 0xed2   :  { %v3911_v17 = vadd.f32 %v8796_v18, %v3903_v25  ;;  %v4059_v37 = vmul.f32 %v9032_v11, %v9032_v11 }
 0xed3   :  { %v3909_v9 = vadd.f32 %v8796_v18, %v3901_v59  ;;  %v9046_v59 = vsub.f32 %v8953_v39, %v4029_v2  ;;  %v6907_v2 = vld [vmem:[#allocation8 + $0xc0] ss:$16 sps:$4 sm:$0xff]  }
 0xed4   :  { %v5912_v60 = vpack.c.bf16 %v3911_v17, %v3910_v34  ;;  %v4030_v34 = vmul.f32 0.0078125, %v4005_v32  ;;  %v4031_v17 = vmul.f32 0.0078125, %v4007_v51  ;;  %v6915_v32 = vld [vmem:[#allocation8 + $0xe4] ss:$16 sps:$4 sm:$0xff]   ;;  %v6916_v51 = vld [vmem:[#allocation8 + $0xe8] ss:$16 sps:$4 sm:$0xff]  }
 0xed5   :  { %v5907_v57 = vpack.c.bf16 %v3909_v9, %v3908_v40  ;;  %v6726_v36 = vpop.f32.mrb[84].mxu0  ;;  %v6871_v40 = vld [vmem:[#allocation8] ss:$16 sps:$4 sm:$0xff]   ;;  %v6873_v9 = vld [vmem:[#allocation8 + $0x4] ss:$16 sps:$4 sm:$0xff]  }
 0xed6   :  { %v3906_v28 = vadd.f32 %v6726_v36, %v9609_v41  ;;  %v3877_v49 = vpop.f32.mrb[85].mxu0  ;;  %v9004_v42 = vunpack.c.h.bf16 %v5912_v60  ;;  %v9006_v50 = vunpack.c.l.bf16 %v5912_v60  ;;  %v6874_v60 = vld [vmem:[#allocation8 + $0x8] ss:$16 sps:$4 sm:$0xff]   ;;  %v9049_v36 = vsub.f32 %v8950_v22, %v4030_v34  ;;  %4433 = vmatprep.subr.bf16.mxu1 %v6873_v9 }
 0xed7   :  { %v3904_v26 = vadd.f32 %v9610_v16, %v3877_v49  ;;  %v6727_v30 = vpop.f32.mrb[86].mxu0  ;;  %v8992_v33 = vunpack.c.h.bf16 %v5907_v57  ;;  %v8994_v35 = vunpack.c.l.bf16 %v5907_v57  ;;  %v6876_v57 = vld [vmem:[#allocation8 + $0xc] ss:$16 sps:$4 sm:$0xff]   ;;  %v4061_v41 = vmul.f32 %v9046_v59, %v9046_v59  ;;  %4434 = vmatpush1.bf16.msra.mxu1 %v6871_v40  ;;  %v6877_v49 = vld [vmem:[#allocation8 + $0x20] ss:$16 sps:$4 sm:$0xff]  }
 0xed8   :  { %v3907_v38 = vadd.f32 %v6727_v30, %v9613_v1  ;;  %v3880_v55 = vpop.f32.mrb[87].mxu0  ;;  %v3914_v63 = vadd.f32 %v8796_v18, %v3906_v28  ;;  %9615 = vst [vmem:[#allocation30_spill] sm:$0xff] %v9004_v42  ;;  %9616 = vst [vmem:[#allocation19_spill] sm:$0xff] %v9006_v50  ;;  %v4060_v28 = vmul.f32 %v9043_v43, %v9043_v43  ;;  %4546 = vmatprep.subr.bf16.mxu0 %v6876_v57  ;;  %v6879_v16 = vld [vmem:[#allocation8 + $0x24] ss:$16 sps:$4 sm:$0xff]  }
 0xed9   :  { %9611 = vst [vmem:[#allocation16_spill] sm:$0xff] %v8992_v33  ;;  %9612 = vst [vmem:[#allocation29_spill] sm:$0xff] %v8994_v35  ;;  %v3905_v62 = vadd.f32 %v9614_v46, %v3880_v55  ;;  %4010 = vadd.xlane.f32.xlu1 %v8992_v33  ;;  %4008 = vadd.xlane.f32.xlu0 %v8994_v35  ;;  %v3912_v21 = vadd.f32 %v8796_v18, %v3904_v26  ;;  %v6880_v26 = vld [vmem:[#allocation8 + $0x28] ss:$16 sps:$4 sm:$0xff]   ;;  %v6882_v30 = vld [vmem:[#allocation8 + $0x2c] ss:$16 sps:$4 sm:$0xff]  }
 0xeda   :  { %v3915_v24 = vadd.f32 %v8796_v18, %v3907_v38  ;;  %4547 = vmatpush1.bf16.msra.mxu0 %v6874_v60  ;;  %v4062_v38 = vmul.f32 %v9049_v36, %v9049_v36  ;;  %4435 = vmatprep.subr.bf16.mxu1 %v6879_v16  ;;  %v6883_v55 = vld [vmem:[#allocation8 + $0x40] ss:$16 sps:$4 sm:$0xff]   ;;  %v6885_v46 = vld [vmem:[#allocation8 + $0x44] ss:$16 sps:$4 sm:$0xff]  }
 0xedb   :  { %v3913_v7 = vadd.f32 %v8796_v18, %v3905_v62  ;;  %v4026_v18 = vmul.f32 0.0078125, %v3997_v13  ;;  %v9052_v13 = vsub.f32 %v8958_v48, %v4031_v17  ;;  %4548 = vmatprep.subr.bf16.mxu0 %v6882_v30  ;;  %4436 = vmatpush1.bf16.msra.mxu1 %v6877_v49  ;;  %v6886_v62 = vld [vmem:[#allocation8 + $0x48] ss:$16 sps:$4 sm:$0xff]  }
 0xedc   :  { %v5922_v61 = vpack.c.bf16 %v3915_v24, %v3914_v63  ;;  %v6888_v63 = vld [vmem:[#allocation8 + $0x4c] ss:$16 sps:$4 sm:$0xff]   ;;  %4437 = vmatprep.subr.bf16.mxu1 %v6885_v46  ;;  %v6891_v24 = vld [vmem:[#allocation8 + $0x64] ss:$16 sps:$4 sm:$0xff]  }
 0xedd   :  { %v5917_v58 = vpack.c.bf16 %v3913_v7, %v3912_v21  ;;  %4014 = vadd.xlane.f32.xlu1 %v9004_v42  ;;  %4012 = vadd.xlane.f32.xlu0 %v9006_v50  ;;  %v9029_v44 = vsub.f32 %v8934_v12, %v4026_v18  ;;  %v4063_v1 = vmul.f32 %v9052_v13, %v9052_v13  ;;  %v6894_v21 = vld [vmem:[#allocation8 + $0x6c] ss:$16 sps:$4 sm:$0xff]   ;;  %v6889_v7 = vld [vmem:[#allocation8 + $0x60] ss:$16 sps:$4 sm:$0xff]  }
 0xede   :  { %v9022_v53 = vunpack.c.h.bf16 %v5922_v61  ;;  %v9024_v56 = vunpack.c.l.bf16 %v5922_v61  ;;  %4549 = vmatpush1.bf16.msra.mxu0 %v6880_v26  ;;  %v6900_v61 = vld [vmem:[#allocation8 + $0x8c] ss:$16 sps:$4 sm:$0xff]  }
 0xedf   :  { %v9010_v31 = vunpack.c.h.bf16 %v5917_v58  ;;  %v9012_v54 = vunpack.c.l.bf16 %v5917_v58  ;;  %v4058_v25 = vmul.f32 %v9029_v44, %v9029_v44  ;;  %4550 = vmatprep.subr.bf16.mxu0 %v6888_v63  ;;  %4438 = vmatpush1.bf16.msra.mxu1 %v6883_v55  ;;  %v6895_v58 = vld [vmem:[#allocation8 + $0x80] ss:$16 sps:$4 sm:$0xff]   ;;  %v6906_v18 = vld [vmem:[#allocation8 + $0xac] ss:$16 sps:$4 sm:$0xff]  }
 0xee0   :  { %9619 = vst [vmem:[#allocation32_spill] sm:$0xff] %v9022_v53  ;;  %9620 = vst [vmem:[#allocation20_spill] sm:$0xff] %v9024_v56  ;;  %4439 = vmatprep.subr.bf16.mxu1 %v6891_v24 }
 0xee1   :  { %9617 = vst [vmem:[#allocation31_spill] sm:$0xff] %v9010_v31  ;;  %9618 = vst [vmem:[#allocation17_spill] sm:$0xff] %v9012_v54  ;;  %4018 = vadd.xlane.f32.xlu1 %v9010_v31  ;;  %4016 = vadd.xlane.f32.xlu0 %v9012_v54 }
 0xee2   :  { %4551 = vmatpush1.bf16.msra.mxu0 %v6886_v62 }
 0xee3   :  { %4552 = vmatprep.subr.bf16.mxu0 %v6894_v21  ;;  %4440 = vmatpush1.bf16.msra.mxu1 %v6889_v7 }
 0xee4   :  { %4441 = vmatprep.subr.bf16.mxu1 %v6897_v23 }
 0xee5   :  { %4022 = vadd.xlane.f32.xlu1 %v9022_v53  ;;  %4020 = vadd.xlane.f32.xlu0 %v9024_v56 }
 0xee6   :  { %4553 = vmatpush1.bf16.msra.mxu0 %v6892_v20 }
 0xee7   :  { %4554 = vmatprep.subr.bf16.mxu0 %v6900_v61  ;;  %4442 = vmatpush1.bf16.msra.mxu1 %v6895_v58 }
 0xee8   :  { %4443 = vmatprep.subr.bf16.mxu1 %v6903_v8 }
 0xee9   :  { %4074 = vadd.xlane.f32.xlu1 %v4057_v27  ;;  %4072 = vadd.xlane.f32.xlu0 %v4056_v14  ;;  %v6910_v27 = vld [vmem:[#allocation8 + $0xc8] ss:$16 sps:$4 sm:$0xff]   ;;  %v6913_v14 = vld [vmem:[#allocation8 + $0xe0] ss:$16 sps:$4 sm:$0xff]  }
 0xeea   :  { %4555 = vmatpush1.bf16.msra.mxu0 %v6898_v4 }
 0xeeb   :  { %4556 = vmatprep.subr.bf16.mxu0 %v6906_v18  ;;  %4444 = vmatpush1.bf16.msra.mxu1 %v6901_v47 }
 0xeec   :  { %4445 = vmatprep.subr.bf16.mxu1 %v6909_v5 }
 0xeed   :  { %4076 = vadd.xlane.f32.xlu0 %v4058_v25  ;;  %4078 = vadd.xlane.f32.xlu1 %v4059_v37  ;;  %v6918_v25 = vld [vmem:[#allocation8 + $0xec] ss:$16 sps:$4 sm:$0xff]  }
 0xeee   :  { %4557 = vmatpush1.bf16.msra.mxu0 %v6904_v52 }
 0xeef   :  { %4558 = vmatprep.subr.bf16.mxu0 %v6912_v15  ;;  %4446 = vmatpush1.bf16.msra.mxu1 %v6907_v2 }
 0xef0   :  { %4447 = vmatprep.subr.bf16.mxu1 %v6915_v32 }
 0xef1   :  { %4082 = vadd.xlane.f32.xlu1 %v4061_v41  ;;  %4080 = vadd.xlane.f32.xlu0 %v4060_v28 }
 0xef2   :  { %4559 = vmatpush1.bf16.msra.mxu0 %v6910_v27 }
 0xef3   :  { %4560 = vmatprep.subr.bf16.mxu0 %v6918_v25  ;;  %4448 = vmatpush1.bf16.msra.mxu1 %v6913_v14 }
 0xef5   :  { %4086 = vadd.xlane.f32.xlu1 %v4063_v1  ;;  %4084 = vadd.xlane.f32.xlu0 %v4062_v38 }
 0xef6   :  { %4561 = vmatpush1.bf16.msra.mxu0 %v6916_v51 }
 0xf66   :  { %v4011_v37 = vpop.xlane.xlu1 %4010  ;;  %v4009_v34 = vpop.xlane.xlu0 %4008 }
 0xf67   :  { %v4033_v17 = vmul.f32 0.0078125, %v4011_v37  ;;  %v4032_v40 = vmul.f32 0.0078125, %v4009_v34 }
 0xf69   :  { %v9063_v9 = vsub.f32 %v8992_v33, %v4033_v17  ;;  %v9066_v60 = vsub.f32 %v8994_v35, %v4032_v40 }
 0xf6a   :  { %v4015_v57 = vpop.xlane.xlu1 %4014  ;;  %v4013_v41 = vpop.xlane.xlu0 %4012 }
 0xf6b   :  { %v4035_v28 = vmul.f32 0.0078125, %v4015_v57  ;;  %v4034_v49 = vmul.f32 0.0078125, %v4013_v41  ;;  %v4065_v16 = vmul.f32 %v9063_v9, %v9063_v9  ;;  %v4064_v26 = vmul.f32 %v9066_v60, %v9066_v60 }
 0xf6d   :  { %v9073_v30 = vsub.f32 %v9004_v42, %v4035_v28  ;;  %v9076_v1 = vsub.f32 %v9006_v50, %v4034_v49  ;;  %4090 = vadd.xlane.f32.xlu1 %v4065_v16  ;;  %4088 = vadd.xlane.f32.xlu0 %v4064_v26 }
 0xf6e   :  { %v4019_v38 = vpop.xlane.xlu1 %4018  ;;  %v4017_v55 = vpop.xlane.xlu0 %4016 }
 0xf6f   :  { %v4037_v46 = vmul.f32 0.0078125, %v4019_v38  ;;  %v4036_v62 = vmul.f32 0.0078125, %v4017_v55  ;;  %v4067_v63 = vmul.f32 %v9073_v30, %v9073_v30  ;;  %v4066_v24 = vmul.f32 %v9076_v1, %v9076_v1 }
 0xf71   :  { %v9083_v21 = vsub.f32 %v9010_v31, %v4037_v46  ;;  %v9086_v7 = vsub.f32 %v9012_v54, %v4036_v62  ;;  %4094 = vadd.xlane.f32.xlu1 %v4067_v63  ;;  %4092 = vadd.xlane.f32.xlu0 %v4066_v24 }
 0xf72   :  { %v4023_v20 = vpop.xlane.xlu1 %4022  ;;  %v4021_v23 = vpop.xlane.xlu0 %4020 }
 0xf73   :  { %v4039_v61 = vmul.f32 0.0078125, %v4023_v20  ;;  %v4038_v58 = vmul.f32 0.0078125, %v4021_v23  ;;  %v4069_v4 = vmul.f32 %v9083_v21, %v9083_v21  ;;  %v4068_v8 = vmul.f32 %v9086_v7, %v9086_v7  ;;  %v9105_v20 = vld [vmem:[%s9548_s6] ss:$0 sm:$0xff] }
 0xf75   :  { %v9093_v18 = vsub.f32 %v9022_v53, %v4039_v61  ;;  %v9096_v47 = vsub.f32 %v9024_v56, %v4038_v58  ;;  %4098 = vadd.xlane.f32.xlu1 %v4069_v4  ;;  %4096 = vadd.xlane.f32.xlu0 %v4068_v8  ;;  %v9112_v8 = vld [vmem:[%s9549_s7] ss:$0 sm:$0xff] }
 0xf76   :  { %v4075_v52 = vpop.xlane.xlu1 %4074  ;;  %v4073_v5 = vpop.xlane.xlu0 %4072 }
 0xf77   :  { %v4105_v15 = vmul.f32 0.0078125, %v4075_v52  ;;  %v4104_v2 = vmul.f32 0.0078125, %v4073_v5  ;;  %v4071_v27 = vmul.f32 %v9093_v18, %v9093_v18  ;;  %v4070_v14 = vmul.f32 %v9096_v47, %v9096_v47 }
 0xf79   :  { %v4121_v32 = vadd.f32 1e-05, %v4105_v15  ;;  %v4120_v51 = vadd.f32 1e-05, %v4104_v2  ;;  %4102 = vadd.xlane.f32.xlu1 %v4071_v27  ;;  %4100 = vadd.xlane.f32.xlu0 %v4070_v14 }
 0xf7a   :  { %v4079_v25 = vpop.xlane.xlu1 %4078  ;;  %v4077_v37 = vpop.xlane.xlu0 %4076 }
 0xf7b   :  { %7239 = vrsqrt.f32 %v4121_v32  ;;  %v4107_v34 = vmul.f32 0.0078125, %v4079_v25  ;;  %v4106_v17 = vmul.f32 0.0078125, %v4077_v37 }
 0xf7c   :  { %7241 = vrsqrt.f32 %v4120_v51 }
 0xf7d   :  { %v4123_v40 = vadd.f32 1e-05, %v4107_v34  ;;  %v4122_v57 = vadd.f32 1e-05, %v4106_v17 }
 0xf7e   :  { %v4083_v41 = vpop.xlane.xlu1 %4082  ;;  %v4081_v28 = vpop.xlane.xlu0 %4080 }
 0xf7f   :  { %7243 = vrsqrt.f32 %v4123_v40  ;;  %v4109_v49 = vmul.f32 0.0078125, %v4083_v41  ;;  %v4108_v16 = vmul.f32 0.0078125, %v4081_v28 }
 0xf80   :  { %7245 = vrsqrt.f32 %v4122_v57 }
 0xf81   :  { %v4125_v26 = vadd.f32 1e-05, %v4109_v49  ;;  %v4124_v38 = vadd.f32 1e-05, %v4108_v16 }
 0xf82   :  { %v4087_v55 = vpop.xlane.xlu1 %4086  ;;  %v4085_v46 = vpop.xlane.xlu0 %4084 }
 0xf83   :  { %7247 = vrsqrt.f32 %v4125_v26  ;;  %v4111_v62 = vmul.f32 0.0078125, %v4087_v55  ;;  %v4110_v63 = vmul.f32 0.0078125, %v4085_v46 }
 0xf84   :  { %7249 = vrsqrt.f32 %v4124_v38 }
 0xf85   :  { %v7240_v24 = vpop.eup %7239  ;;  %v4127_v4 = vadd.f32 1e-05, %v4111_v62  ;;  %v4126_v5 = vadd.f32 1e-05, %v4110_v63 }
 0xf86   :  { %v7242_v23 = vpop.eup %7241  ;;  %v4153_v61 = vmul.f32 %v7240_v24, %v9020_v6 }
 0xf87   :  { %v4152_v58 = vmul.f32 %v7242_v23, %v9017_v10  ;;  %7251 = vrsqrt.f32 %v4127_v4  ;;  %v6922_v4 = vld [vmem:[#allocation10 + $0x80] sm:$0xff]  }
 0xf88   :  { %v4175_v52 = vmul.f32 %v9105_v20, %v4153_v61  ;;  %7253 = vrsqrt.f32 %v4126_v5  ;;  %v6924_v5 = vld [vmem:[#allocation10 + $0xc8] sm:$0xff]  }
 0xf89   :  { %v7244_v15 = vpop.eup %7243  ;;  %v4174_v2 = vmul.f32 %v9105_v20, %v4152_v58  ;;  %v6921_v58 = vld [vmem:[#allocation10] sm:$0xff]  }
 0xf8a   :  { %v7246_v27 = vpop.eup %7245  ;;  %v4197_v14 = vadd.f32 %v9112_v8, %v4175_v52  ;;  %v4155_v32 = vmul.f32 %v7244_v15, %v9032_v11  ;;  %v6923_v52 = vld [vmem:[#allocation10 + $0x48] sm:$0xff]  }
 0xf8b   :  { %v4196_v10 = vadd.f32 %v9112_v8, %v4174_v2  ;;  %v4154_v6 = vmul.f32 %v7246_v27, %v9029_v44  ;;  %v6925_v15 = vld [vmem:[#allocation10 + $0x8] sm:$0xff]   ;;  %v6927_v27 = vld [vmem:[#allocation10 + $0x50] sm:$0xff]  }
 0xf8c   :  { %v4177_v34 = vmul.f32 %v9105_v20, %v4155_v32  ;;  %v6926_v2 = vld [vmem:[#allocation10 + $0x88] sm:$0xff]   ;;  %v6929_v32 = vld [vmem:[#allocation10 + $0x10] sm:$0xff]  }
 0xf8d   :  { %v7248_v51 = vpop.eup %7247  ;;  %v4212_v25 = vpack.c.bf16 %v4197_v14, %v4196_v10  ;;  %v4176_v37 = vmul.f32 %v9105_v20, %v4154_v6  ;;  %v6928_v14 = vld [vmem:[#allocation10 + $0xd0] sm:$0xff]   ;;  %v6931_v6 = vld [vmem:[#allocation10 + $0x58] sm:$0xff]  }
 0xf8e   :  { %v7250_v17 = vpop.eup %7249  ;;  %v4199_v40 = vadd.f32 %v9112_v8, %v4177_v34  ;;  %v4157_v57 = vmul.f32 %v7248_v51, %v9046_v59  ;;  %v6930_v10 = vld [vmem:[#allocation10 + $0x90] sm:$0xff]   ;;  %v6932_v51 = vld [vmem:[#allocation10 + $0xd8] sm:$0xff]   ;;  %v6935_v34 = vld [vmem:[#allocation10 + $0x60] sm:$0xff]  }
 0xf8f   :  { %4466 = vmatmul.mubr.bf16.vlgmr.msra.gmra.mrb[96].mxu1 %v4212_v25  ;;  %4579 = vmatmul.mubr.bf16.vlgmr.msra.gmra.mrb[104].mxu0 %v4212_v25  ;;  %v4198_v11 = vadd.f32 %v9112_v8, %v4176_v37  ;;  %v4156_v44 = vmul.f32 %v7250_v17, %v9043_v43  ;;  %v6933_v25 = vld [vmem:[#allocation10 + $0x18] sm:$0xff]   ;;  %v6936_v17 = vld [vmem:[#allocation10 + $0xe0] sm:$0xff]  }
 0xf90   :  { %4475 = vmatprep.mubr.bf16.mxu1 %v9595_v0  ;;  %4588 = vmatprep.mubr.bf16.mxu0 %v9595_v0  ;;  %v4179_v16 = vmul.f32 %v9105_v20, %v4157_v57  ;;  %v6934_v37 = vld [vmem:[#allocation10 + $0x98] sm:$0xff]   ;;  %v6940_v57 = vld [vmem:[#allocation10 + $0xe8] sm:$0xff]  }
 0xf91   :  { %v7252_v41 = vpop.eup %7251  ;;  %v4213_v28 = vpack.c.bf16 %v4199_v40, %v4198_v11  ;;  %v4178_v49 = vmul.f32 %v9105_v20, %v4156_v44  ;;  %v6937_v11 = vld [vmem:[#allocation10 + $0x20] sm:$0xff]   ;;  %v6939_v44 = vld [vmem:[#allocation10 + $0x68] sm:$0xff]  }
 0xf92   :  { %v7254_v26 = vpop.eup %7253  ;;  %v4201_v55 = vadd.f32 %v9112_v8, %v4179_v16  ;;  %v4159_v59 = vmul.f32 %v7252_v41, %v9052_v13  ;;  %v6920_v13 = vld [vmem:[#allocation10 + $0xc0] sm:$0xff]   ;;  %v6941_v41 = vld [vmem:[#allocation10 + $0x28] sm:$0xff]  }
 0xf93   :  { %v4200_v38 = vadd.f32 %v9112_v8, %v4178_v49  ;;  %v4158_v43 = vmul.f32 %v7254_v26, %v9049_v36  ;;  %v6919_v36 = vld [vmem:[#allocation10 + $0x40] sm:$0xff]   ;;  %6280 = vmatprep.subr.bf16.mxu0 %v6920_v13 }
 0xf94   :  { %v4181_v63 = vmul.f32 %v9105_v20, %v4159_v59  ;;  %6216 = vmatprep.subr.bf16.mxu1 %v6919_v36  ;;  %6281 = vmatpush3.bf16.msra.mxu0 %v6922_v4  ;;  %v6938_v40 = vld [vmem:[#allocation10 + $0xa0] sm:$0xff]   ;;  %v6943_v59 = vld [vmem:[#allocation10 + $0x70] sm:$0xff]  }
 0xf95   :  { %v4214_v46 = vpack.c.bf16 %v4201_v55, %v4200_v38  ;;  %v4180_v62 = vmul.f32 %v9105_v20, %v4158_v43  ;;  %6217 = vmatpush3.bf16.msra.mxu1 %v6921_v58  ;;  %6282 = vmatprep.subr.bf16.mxu0 %v6924_v5  ;;  %v6946_v36 = vld [vmem:[#allocation10 + $0xb0] sm:$0xff]  }
 0xf96   :  { %v4203_v23 = vadd.f32 %v9112_v8, %v4181_v63  ;;  %6218 = vmatprep.subr.bf16.mxu1 %v6923_v52 }
 0xf97   :  { %4476 = vmatmul.mubr.bf16.gmra.mrb[100].mxu1 %v4213_v28  ;;  %4589 = vmatmul.mubr.bf16.gmra.mrb[108].mxu0 %v4213_v28  ;;  %v4202_v24 = vadd.f32 %v9112_v8, %v4180_v62  ;;  %v6942_v28 = vld [vmem:[#allocation10 + $0xa8] sm:$0xff]  }
 0xf98   :  { %4485 = vmatprep.mubr.bf16.mxu1 %v9595_v0  ;;  %4598 = vmatprep.mubr.bf16.mxu0 %v9595_v0 }
 0xf99   :  { %v4215_v61 = vpack.c.bf16 %v4203_v23, %v4202_v24  ;;  %6219 = vmatpush3.bf16.msra.mxu1 %v6925_v15  ;;  %6283 = vmatpush3.bf16.msra.mxu0 %v6926_v2  ;;  %v6947_v2 = vld [vmem:[#allocation10 + $0x78] sm:$0xff]  }
 0xf9a   :  { %6220 = vmatprep.subr.bf16.mxu1 %v6927_v27  ;;  %6284 = vmatprep.subr.bf16.mxu0 %v6928_v14  ;;  %v6948_v27 = vld [vmem:[#allocation10 + $0xf8] sm:$0xff]  }
 0xf9b   :  { %v6949_v14 = vld [vmem:[#allocation10 + $0x38] sm:$0xff]  }
 0xf9d   :  { %6221 = vmatpush3.bf16.msra.mxu1 %v6929_v32  ;;  %6285 = vmatpush3.bf16.msra.mxu0 %v6930_v10  ;;  %v6950_v32 = vld [vmem:[#allocation10 + $0xb8] sm:$0xff]  }
 0xf9e   :  { %6222 = vmatprep.subr.bf16.mxu1 %v6931_v6  ;;  %6286 = vmatprep.subr.bf16.mxu0 %v6932_v51 }
 0xf9f   :  { %4486 = vmatmul.mubr.bf16.gmra.mrb[104].mxu1 %v4214_v46  ;;  %4599 = vmatmul.mubr.bf16.gmra.mrb[112].mxu0 %v4214_v46  ;;  %v6944_v46 = vld [vmem:[#allocation10 + $0xf0] sm:$0xff]  }
 0xfa0   :  { %4495 = vmatprep.mubr.bf16.mxu1 %v9595_v0  ;;  %4608 = vmatprep.mubr.bf16.mxu0 %v9595_v0 }
 0xfa1   :  { %6223 = vmatpush3.bf16.msra.mxu1 %v6933_v25  ;;  %6287 = vmatpush3.bf16.msra.mxu0 %v6934_v37 }
 0xfa2   :  { %6224 = vmatprep.subr.bf16.mxu1 %v6935_v34  ;;  %6288 = vmatprep.subr.bf16.mxu0 %v6936_v17 }
 0xfa5   :  { %6225 = vmatpush3.bf16.msra.mxu1 %v6937_v11  ;;  %6289 = vmatpush3.bf16.msra.mxu0 %v6938_v40 }
 0xfa6   :  { %6226 = vmatprep.subr.bf16.mxu1 %v6939_v44  ;;  %6290 = vmatprep.subr.bf16.mxu0 %v6940_v57 }
 0xfa7   :  { %4496 = vmatmul.mubr.bf16.gmra.mrb[108].mxu1 %v4215_v61  ;;  %4609 = vmatmul.mubr.bf16.gmra.mrb[116].mxu0 %v4215_v61  ;;  %v6945_v61 = vld [vmem:[#allocation10 + $0x30] sm:$0xff]  }
 0xfa8   :  { %4505 = vmatprep.mubr.bf16.mxu1 %v9595_v0  ;;  %4618 = vmatprep.mubr.bf16.mxu0 %v9595_v0 }
 0xfa9   :  { %6227 = vmatpush3.bf16.msra.mxu1 %v6941_v41  ;;  %6291 = vmatpush3.bf16.msra.mxu0 %v6942_v28 }
 0xfaa   :  { %6228 = vmatprep.subr.bf16.mxu1 %v6943_v59  ;;  %6292 = vmatprep.subr.bf16.mxu0 %v6944_v46 }
 0xfad   :  { %6229 = vmatpush3.bf16.msra.mxu1 %v6945_v61  ;;  %6293 = vmatpush3.bf16.msra.mxu0 %v6946_v36 }
 0xfae   :  { %6230 = vmatprep.subr.bf16.mxu1 %v6947_v2  ;;  %6294 = vmatprep.subr.bf16.mxu0 %v6948_v27 }
 0xfb1   :  { %6231 = vmatpush3.bf16.msra.mxu1 %v6949_v14  ;;  %6295 = vmatpush3.bf16.msra.mxu0 %v6950_v32 }
 0xffa   :  { %v4091_v49 = vpop.xlane.xlu1 %4090  ;;  %v4089_v16 = vpop.xlane.xlu0 %4088 }
 0xffb   :  { %v4113_v26 = vmul.f32 0.0078125, %v4091_v49  ;;  %v4112_v38 = vmul.f32 0.0078125, %v4089_v16 }
 0xffd   :  { %v4129_v55 = vadd.f32 1e-05, %v4113_v26  ;;  %v4128_v43 = vadd.f32 1e-05, %v4112_v38 }
 0xffe   :  { %v4095_v62 = vpop.xlane.xlu1 %4094  ;;  %v4093_v63 = vpop.xlane.xlu0 %4092 }
 0xfff   :  { %7255 = vrsqrt.f32 %v4129_v55  ;;  %v4115_v24 = vmul.f32 0.0078125, %v4095_v62  ;;  %v4114_v23 = vmul.f32 0.0078125, %v4093_v63 }
0x1000   :  { %7257 = vrsqrt.f32 %v4128_v43 }
0x1001   :  { %v4131_v13 = vadd.f32 1e-05, %v4115_v24  ;;  %v4130_v58 = vadd.f32 1e-05, %v4114_v23 }
0x1002   :  { %v4099_v4 = vpop.xlane.xlu1 %4098  ;;  %v4097_v52 = vpop.xlane.xlu0 %4096 }
0x1003   :  { %7259 = vrsqrt.f32 %v4131_v13  ;;  %v4117_v5 = vmul.f32 0.0078125, %v4099_v4  ;;  %v4116_v15 = vmul.f32 0.0078125, %v4097_v52 }
0x1004   :  { %7261 = vrsqrt.f32 %v4130_v58 }
0x1005   :  { %v4133_v10 = vadd.f32 1e-05, %v4117_v5  ;;  %v4132_v6 = vadd.f32 1e-05, %v4116_v15 }
0x1006   :  { %v4103_v51 = vpop.xlane.xlu1 %4102  ;;  %v4101_v25 = vpop.xlane.xlu0 %4100 }
0x1007   :  { %7263 = vrsqrt.f32 %v4133_v10  ;;  %v4119_v37 = vmul.f32 0.0078125, %v4103_v51  ;;  %v4118_v34 = vmul.f32 0.0078125, %v4101_v25 }
0x1008   :  { %7265 = vrsqrt.f32 %v4132_v6 }
0x1009   :  { %v7256_v17 = vpop.eup %7255  ;;  %v4135_v44 = vadd.f32 1e-05, %v4119_v37  ;;  %v4134_v41 = vadd.f32 1e-05, %v4118_v34 }
0x100a   :  { %v7258_v11 = vpop.eup %7257  ;;  %v4161_v40 = vmul.f32 %v7256_v17, %v9063_v9 }
0x100b   :  { %v4160_v57 = vmul.f32 %v7258_v11, %v9066_v60  ;;  %7267 = vrsqrt.f32 %v4135_v44 }
0x100c   :  { %v4183_v28 = vmul.f32 %v9105_v20, %v4161_v40  ;;  %7269 = vrsqrt.f32 %v4134_v41 }
0x100d   :  { %v7260_v49 = vpop.eup %7259  ;;  %v4182_v16 = vmul.f32 %v9105_v20, %v4160_v57 }
0x100e   :  { %v7262_v26 = vpop.eup %7261  ;;  %v4205_v38 = vadd.f32 %v9112_v8, %v4183_v28  ;;  %v4163_v55 = vmul.f32 %v7260_v49, %v9073_v30 }
0x100f   :  { %v4204_v43 = vadd.f32 %v9112_v8, %v4182_v16  ;;  %v4162_v59 = vmul.f32 %v7262_v26, %v9076_v1 }
0x1010   :  { %v4185_v62 = vmul.f32 %v9105_v20, %v4163_v55 }
0x1011   :  { %v7264_v9 = vpop.eup %7263  ;;  %v4216_v46 = vpack.c.bf16 %v4205_v38, %v4204_v43  ;;  %v4184_v60 = vmul.f32 %v9105_v20, %v4162_v59 }
0x1012   :  { %v7266_v63 = vpop.eup %7265  ;;  %v4207_v24 = vadd.f32 %v9112_v8, %v4185_v62  ;;  %v4165_v23 = vmul.f32 %v7264_v9, %v9083_v21 }
0x1013   :  { %4506 = vmatmul.mubr.bf16.gmra.mrb[112].mxu1 %v4216_v46  ;;  %4619 = vmatmul.mubr.bf16.gmra.mrb[120].mxu0 %v4216_v46  ;;  %v4206_v30 = vadd.f32 %v9112_v8, %v4184_v60  ;;  %v4164_v1 = vmul.f32 %v7266_v63, %v9086_v7 }
0x1014   :  { %4515 = vmatprep.mubr.bf16.mxu1 %v9595_v0  ;;  %4628 = vmatprep.mubr.bf16.mxu0 %v9595_v0  ;;  %v4187_v58 = vmul.f32 %v9105_v20, %v4165_v23 }
0x1015   :  { %v7268_v61 = vpop.eup %7267  ;;  %v4217_v36 = vpack.c.bf16 %v4207_v24, %v4206_v30  ;;  %v4186_v13 = vmul.f32 %v9105_v20, %v4164_v1 }
0x1016   :  { %v7270_v4 = vpop.eup %7269  ;;  %v4209_v5 = vadd.f32 %v9112_v8, %v4187_v58  ;;  %v4167_v21 = vmul.f32 %v7268_v61, %v9093_v18 }
0x1017   :  { %v4208_v52 = vadd.f32 %v9112_v8, %v4186_v13  ;;  %v4166_v7 = vmul.f32 %v7270_v4, %v9096_v47  ;;  %v4253_v47 = vlaneseq }
0x1018   :  { %v4189_v27 = vmul.f32 %v9105_v20, %v4167_v21 }
0x1019   :  { %v4218_v15 = vpack.c.bf16 %v4209_v5, %v4208_v52  ;;  %v4188_v2 = vmul.f32 %v9105_v20, %v4166_v7  ;;  %v4254_v18 = vshrl.u32 %v4253_v47, 7  ;;  %v3958_v20 = vld [vmem:[%s9551_s9] sm:$0xf] }
0x101a   :  { %v4211_v32 = vadd.f32 %v9112_v8, %v4189_v27 }
0x101b   :  { %4516 = vmatmul.mubr.bf16.gmra.mrb[116].mxu1 %v4217_v36  ;;  %4629 = vmatmul.mubr.bf16.gmra.mrb[124].mxu0 %v4217_v36  ;;  %v4210_v14 = vadd.f32 %v9112_v8, %v4188_v2  ;;  %v4255_v6 = vsub.s32 0, %v4254_v18  ;;  %v4263_v51 = vsub.s32 2, %v4254_v18  ;;  %v4259_v25 = vsub.s32 1, %v4254_v18 }
0x101c   :  { %4525 = vmatprep.mubr.bf16.mxu1 %v9595_v0  ;;  %4638 = vmatprep.mubr.bf16.mxu0 %v9595_v0  ;;  %v4267_v37 = vsub.s32 3, %v4254_v18 }
0x101d   :  { %v4219_v10 = vpack.c.bf16 %v4211_v32, %v4210_v14  ;;  %v9177_v34 = vrot.slane %v3958_v20, %v4255_v6  ;;  %v9181_v17 = vrot.slane %v3958_v20, %v4259_v25 }
0x101e   :  { %v9183_v8 = vrot.slane %v3958_v20, %v4267_v37 }
0x1023   :  { %4526 = vmatmul.mubr.bf16.gmra.mrb[120].mxu1 %v4218_v15  ;;  %4639 = vmatmul.mubr.bf16.gmra.mrb[128].mxu0 %v4218_v15 }
0x1024   :  { %4535 = vmatprep.mubr.bf16.mxu1 %v9595_v0  ;;  %4648 = vmatprep.mubr.bf16.mxu0 %v9595_v0  ;;  %v9179_v0 = vrot.slane %v3958_v20, %v4263_v51 }
0x102b   :  { %4536 = vmatmul.mubr.bf16.gmra.mrb[124].mxu1 %v4219_v10  ;;  %4649 = vmatmul.mubr.bf16.gmra.mrb[132].mxu0 %v4219_v10 }
0x1062   :  { %v4467_v11 = vpop.f32.mrb[96].mxu1  ;;  %v4580_v40 = vpop.f32.mrb[104].mxu0 }
0x1063   :  { %v4468_v44 = vadd.f32 %v4467_v11, %v9177_v34  ;;  %v4581_v57 = vadd.f32 %v4580_v40, %v9179_v0  ;;  %v4469_v41 = vpop.f32.mrb[97].mxu1  ;;  %v4582_v28 = vpop.f32.mrb[105].mxu0 }
0x1064   :  { %v4470_v49 = vadd.f32 %v4469_v41, %v9181_v17  ;;  %v4583_v16 = vadd.f32 %v4582_v28, %v9183_v8  ;;  %v4471_v26 = vpop.f32.mrb[98].mxu1  ;;  %v4584_v38 = vpop.f32.mrb[106].mxu0 }
0x1065   :  { %v4723_v55 = vmul.f32 0.70710677, %v4468_v44  ;;  %v4725_v43 = vmul.f32 0.70710677, %v4581_v57  ;;  %v4472_v46 = vadd.f32 %v4471_v26, %v9177_v34  ;;  %v4585_v60 = vadd.f32 %v4584_v38, %v9179_v0  ;;  %v4473_v62 = vpop.f32.mrb[99].mxu1  ;;  %v4586_v63 = vpop.f32.mrb[107].mxu0 }
0x1066   :  { %v4724_v59 = vmul.f32 0.70710677, %v4470_v49  ;;  %v4726_v9 = vmul.f32 0.70710677, %v4583_v16  ;;  %v4474_v30 = vadd.f32 %v4473_v62, %v9181_v17  ;;  %v4587_v24 = vadd.f32 %v4586_v63, %v9183_v8 }
0x1067   :  { %7271 = verf.f32 %v4723_v55  ;;  %v4727_v1 = vmul.f32 0.70710677, %v4472_v46  ;;  %v4729_v23 = vmul.f32 0.70710677, %v4585_v60  ;;  %v4659_v18 = vmul.f32 0.5, %v4468_v44 }
0x1068   :  { %7273 = verf.f32 %v4725_v43  ;;  %v4728_v61 = vmul.f32 0.70710677, %v4474_v30  ;;  %v4730_v13 = vmul.f32 0.70710677, %v4587_v24  ;;  %v4661_v40 = vmul.f32 0.5, %v4581_v57 }
0x1069   :  { %7275 = verf.f32 %v4724_v59  ;;  %v9200_v41 = vmul.f32 0.5, %v4470_v49  ;;  %v9202_v28 = vmul.f32 0.5, %v4583_v16  ;;  %v4663_v44 = vmul.f32 0.5, %v4472_v46 }
0x106a   :  { %7277 = verf.f32 %v4726_v9  ;;  %v4477_v36 = vpop.f32.mrb[100].mxu1  ;;  %v4590_v4 = vpop.f32.mrb[108].mxu0  ;;  %v4665_v62 = vmul.f32 0.5, %v4585_v60  ;;  %v9204_v63 = vmul.f32 0.5, %v4474_v30 }
0x106b   :  { %7279 = verf.f32 %v4727_v1  ;;  %v4478_v58 = vadd.f32 %v4477_v36, %v9177_v34  ;;  %v4479_v52 = vpop.f32.mrb[101].mxu1  ;;  %v4591_v5 = vadd.f32 %v4590_v4, %v9179_v0  ;;  %v4592_v21 = vpop.f32.mrb[109].mxu0 }
0x106c   :  { %7281 = verf.f32 %v4729_v23  ;;  %v4480_v7 = vadd.f32 %v4479_v52, %v9181_v17  ;;  %v4481_v15 = vpop.f32.mrb[102].mxu1  ;;  %v4593_v27 = vadd.f32 %v4592_v21, %v9183_v8  ;;  %v4594_v14 = vpop.f32.mrb[110].mxu0 }
0x106d   :  { %7283 = verf.f32 %v4728_v61  ;;  %v4731_v2 = vmul.f32 0.70710677, %v4478_v58  ;;  %v4483_v32 = vpop.f32.mrb[103].mxu1  ;;  %v4733_v10 = vmul.f32 0.70710677, %v4591_v5  ;;  %v4596_v47 = vpop.f32.mrb[111].mxu0  ;;  %v4482_v20 = vadd.f32 %v4481_v15, %v9177_v34 }
0x106e   :  { %7285 = verf.f32 %v4730_v13  ;;  %v4732_v6 = vmul.f32 0.70710677, %v4480_v7  ;;  %v4734_v51 = vmul.f32 0.70710677, %v4593_v27  ;;  %v4595_v25 = vadd.f32 %v4594_v14, %v9179_v0 }
0x106f   :  { %7287 = verf.f32 %v4731_v2  ;;  %v4484_v37 = vadd.f32 %v4483_v32, %v9181_v17  ;;  %v4735_v55 = vmul.f32 0.70710677, %v4482_v20  ;;  %v4597_v23 = vadd.f32 %v4596_v47, %v9183_v8 }
0x1070   :  { %7289 = verf.f32 %v4733_v10  ;;  %v4737_v1 = vmul.f32 0.70710677, %v4595_v25  ;;  %v9207_v61 = vmul.f32 0.5, %v4587_v24  ;;  %v9209_v16 = vmul.f32 0.5, %v4478_v58 }
0x1071   :  { %v7272_v11 = vpop.eup %7271  ;;  %7291 = verf.f32 %v4732_v6  ;;  %v4736_v36 = vmul.f32 0.70710677, %v4484_v37  ;;  %v9211_v21 = vmul.f32 0.5, %v4591_v5  ;;  %v9213_v15 = vmul.f32 0.5, %v4480_v7 }
0x1072   :  { %v7274_v26 = vpop.eup %7273  ;;  %v4851_v38 = vadd.f32 1.0, %v7272_v11  ;;  %7293 = verf.f32 %v4734_v51  ;;  %v4487_v43 = vpop.f32.mrb[104].mxu1  ;;  %v9215_v60 = vmul.f32 0.5, %v4593_v27  ;;  %v4738_v5 = vmul.f32 0.70710677, %v4597_v23 }
0x1073   :  { %v4600_v59 = vpop.f32.mrb[112].mxu0  ;;  %v7276_v9 = vpop.eup %7275  ;;  %v4853_v52 = vadd.f32 1.0, %v7274_v26  ;;  %7295 = verf.f32 %v4735_v55  ;;  %v4488_v7 = vadd.f32 %v4487_v43, %v9177_v34  ;;  %v9234_v43 = vmul.f32 0.5, %v4482_v20 }
0x1074   :  { %v4489_v57 = vpop.f32.mrb[105].mxu1  ;;  %v7278_v49 = vpop.eup %7277  ;;  %v9219_v32 = vmul.f32 %v4851_v38, %v4659_v18  ;;  %v4852_v24 = vadd.f32 1.0, %v7276_v9  ;;  %7297 = verf.f32 %v4737_v1  ;;  %v4601_v26 = vadd.f32 %v4600_v59, %v9179_v0 }
0x1075   :  { %v4602_v13 = vpop.f32.mrb[113].mxu0  ;;  %v4491_v46 = vpop.f32.mrb[106].mxu1  ;;  %v4854_v27 = vadd.f32 1.0, %v7278_v49  ;;  %7299 = verf.f32 %v4736_v36  ;;  %v9227_v38 = vmul.f32 %v4853_v52, %v4661_v40  ;;  %v4739_v55 = vmul.f32 0.70710677, %v4488_v7 }
0x1076   :  { %v7280_v4 = vpop.eup %7279  ;;  %v4604_v30 = vpop.f32.mrb[114].mxu0  ;;  %v9236_v49 = vmul.f32 0.5, %v4595_v25  ;;  %v9242_v52 = vmul.f32 0.5, %v4597_v23  ;;  %7301 = verf.f32 %v4738_v5  ;;  %v9245_v20 = vmul.f32 %v4852_v24, %v9200_v41 }
0x1077   :  { %v9217_v2 = vpop.f32.mrb[107].mxu1  ;;  %v7282_v14 = vpop.eup %7281  ;;  %v4855_v58 = vadd.f32 1.0, %v7280_v4  ;;  %v4490_v4 = vadd.f32 %v4489_v57, %v9181_v17  ;;  %v9248_v25 = vmul.f32 %v4854_v27, %v9202_v28  ;;  %7303 = verf.f32 %v4739_v55 }
0x1078   :  { %v9221_v10 = vpop.f32.mrb[115].mxu0  ;;  %v7284_v47 = vpop.eup %7283  ;;  %v4857_v6 = vadd.f32 1.0, %v7282_v14  ;;  %v4603_v5 = vadd.f32 %v4602_v13, %v9183_v8  ;;  %v4492_v28 = vadd.f32 %v4491_v46, %v9177_v34  ;;  %v4605_v24 = vadd.f32 %v4604_v30, %v9179_v0 }
0x1079   :  { %v7286_v51 = vpop.eup %7285  ;;  %v9224_v11 = vmul.f32 %v4855_v58, %v4663_v44  ;;  %v9238_v44 = vmul.f32 0.5, %v4484_v37  ;;  %v4741_v37 = vmul.f32 0.70710677, %v4601_v26  ;;  %v4740_v23 = vmul.f32 0.70710677, %v4490_v4 }
0x107a   :  { %v7288_v18 = vpop.eup %7287  ;;  %v9229_v9 = vmul.f32 %v4857_v6, %v4665_v62  ;;  %v4497_v36 = vpop.f32.mrb[108].mxu1  ;;  %v4856_v62 = vadd.f32 1.0, %v7284_v47  ;;  %v4858_v40 = vadd.f32 1.0, %v7286_v51  ;;  %v9262_v50 = vmul.f32 0.5, %v4488_v7 }
0x107b   :  { %v7290_v14 = vpop.eup %7289  ;;  %v4610_v59 = vpop.f32.mrb[116].mxu0  ;;  %v4859_v47 = vadd.f32 1.0, %v7288_v18  ;;  %7305 = verf.f32 %v4741_v37  ;;  %v9264_v18 = vmul.f32 0.5, %v4601_v26  ;;  %v4742_v13 = vmul.f32 0.70710677, %v4603_v5 }
0x107c   :  { %v7292_v58 = vpop.eup %7291  ;;  %v4499_v57 = vpop.f32.mrb[109].mxu1  ;;  %v4861_v41 = vadd.f32 1.0, %v7290_v14  ;;  %v4920_v27 = vmul.f32 %v4856_v62, %v9204_v63  ;;  %7307 = verf.f32 %v4740_v23  ;;  %v4743_v33 = vmul.f32 0.70710677, %v4492_v28 }
0x107d   :  { %v4612_v6 = vpop.f32.mrb[117].mxu0  ;;  %v7294_v53 = vpop.eup %7293  ;;  %v4860_v55 = vadd.f32 1.0, %v7292_v58  ;;  %v4922_v14 = vmul.f32 %v4858_v40, %v9207_v61  ;;  %v9268_v37 = vmul.f32 %v4859_v47, %v9209_v16  ;;  %v9270_v46 = vmul.f32 0.5, %v4490_v4 }
0x107e   :  { %v9250_v1 = vpop.f32.mrb[110].mxu1  ;;  %v9252_v56 = vpop.f32.mrb[118].mxu0  ;;  %v4862_v42 = vadd.f32 1.0, %v7294_v53  ;;  %v4745_v30 = vmul.f32 0.70710677, %v4605_v24  ;;  %v9273_v53 = vmul.f32 %v4861_v41, %v9211_v21  ;;  %7309 = verf.f32 %v4742_v13 }
0x107f   :  { %v9255_v31 = vpop.f32.mrb[111].mxu1  ;;  %v9257_v54 = vpop.f32.mrb[119].mxu0  ;;  %v4494_v7 = vadd.f32 %v9217_v2, %v9181_v17  ;;  %v4607_v26 = vadd.f32 %v9221_v10, %v9183_v8  ;;  %v9280_v58 = vmul.f32 %v4860_v55, %v9213_v15  ;;  %7311 = verf.f32 %v4743_v33 }
0x1080   :  { %v7296_v51 = vpop.eup %7295  ;;  %v9283_v61 = vmul.f32 %v4862_v42, %v9215_v60  ;;  %v9286_v16 = vadd.f32 %v4497_v36, %v9177_v34  ;;  %v9288_v21 = vmul.f32 0.5, %v4603_v5  ;;  %7313 = verf.f32 %v4745_v30 }
0x1081   :  { %v7298_v35 = vpop.eup %7297  ;;  %v4863_v4 = vadd.f32 1.0, %v7296_v51  ;;  %v4744_v40 = vmul.f32 0.70710677, %v4494_v7  ;;  %v4679_v23 = vmul.f32 0.5, %v4492_v28  ;;  %v4746_v10 = vmul.f32 0.70710677, %v4607_v26 }
0x1082   :  { %v7300_v63 = vpop.eup %7299  ;;  %v4865_v2 = vadd.f32 1.0, %v7298_v35  ;;  %v4747_v15 = vmul.f32 0.70710677, %v9286_v16  ;;  %v9292_v42 = vadd.f32 %v4610_v59, %v9179_v0  ;;  %v9295_v33 = vadd.f32 %v4499_v57, %v9181_v17 }
0x1083   :  { %v7302_v62 = vpop.eup %7301  ;;  %v4864_v47 = vadd.f32 1.0, %v7300_v63  ;;  %7315 = verf.f32 %v4744_v40  ;;  %v9298_v60 = vadd.f32 %v4612_v6, %v9183_v8  ;;  %v4980_v36 = vpack.c.bf16 %v4920_v27, %v9245_v20 }
0x1084   :  { %v7304_v41 = vpop.eup %7303  ;;  %7317 = verf.f32 %v4746_v10  ;;  %v4982_v35 = vpack.c.bf16 %v4922_v14, %v9248_v25  ;;  %v4927_v28 = vmul.f32 %v4863_v4, %v9234_v43  ;;  %v4866_v55 = vadd.f32 1.0, %v7302_v62 }
0x1085   :  { %v7306_v5 = vpop.eup %7305  ;;  %v4681_v51 = vmul.f32 0.5, %v4605_v24  ;;  %v4749_v13 = vmul.f32 0.70710677, %v9292_v42  ;;  %v4929_v59 = vmul.f32 %v4865_v2, %v9236_v49  ;;  %v4928_v57 = vmul.f32 %v4864_v47, %v9238_v44  ;;  %5305 = vmatprep.mubr.bf16.mxu1 %v4980_v36 }
0x1086   :  { %v4867_v30 = vadd.f32 1.0, %v7304_v41  ;;  %v4748_v63 = vmul.f32 0.70710677, %v9295_v33  ;;  %5402 = vmatprep.mubr.bf16.mxu0 %v4982_v35  ;;  %v7308_v6 = vpop.eup %7307  ;;  %v4680_v20 = vmul.f32 0.5, %v4494_v7  ;;  %7319 = verf.f32 %v4747_v15 }
0x1087   :  { %v4750_v25 = vmul.f32 0.70710677, %v9298_v60  ;;  %v9310_v43 = vadd.f32 %v9250_v1, %v9177_v34  ;;  %v9621_v24 = vpack.c.bf16 %v9224_v11, %v9219_v32  ;;  %v9622_v49 = vpack.c.bf16 %v9229_v9, %v9227_v38 }
0x1088   :  { %v4869_v44 = vadd.f32 1.0, %v7306_v5  ;;  %7321 = verf.f32 %v4749_v13  ;;  %v4615_v27 = vadd.f32 %v9252_v56, %v9179_v0  ;;  %v9322_v14 = vadd.f32 %v9255_v31, %v9181_v17  ;;  %v7310_v7 = vpop.eup %7309 }
0x1089   :  { %5306 = vmatmul.mubr.bf16.vlgmr.msra.gmra.mrb[128].mxu1 %v9621_v24  ;;  %5403 = vmatmul.mubr.bf16.vlgmr.msra.gmra.mrb[136].mxu0 %v9622_v49  ;;  %v4930_v1 = vmul.f32 %v4866_v55, %v9242_v52  ;;  %v4682_v4 = vmul.f32 0.5, %v4607_v26  ;;  %7323 = verf.f32 %v4748_v63  ;;  %v4751_v32 = vmul.f32 0.70710677, %v9310_v43  ;;  %v7312_v11 = vpop.eup %7311 }
0x108a   :  { %v4931_v38 = vmul.f32 %v4867_v30, %v9262_v50  ;;  %v4868_v9 = vadd.f32 1.0, %v7308_v6  ;;  %7325 = verf.f32 %v4750_v25  ;;  %v4753_v40 = vmul.f32 0.70710677, %v4615_v27  ;;  %v7314_v62 = vpop.eup %7313 }
0x108b   :  { %v4871_v2 = vadd.f32 1.0, %v7312_v11  ;;  %7327 = verf.f32 %v4751_v32  ;;  %v4752_v56 = vmul.f32 0.70710677, %v9322_v14  ;;  %v4617_v31 = vadd.f32 %v9257_v54, %v9183_v8 }
0x108c   :  { %v4933_v52 = vmul.f32 %v4869_v44, %v9264_v18  ;;  %v4873_v26 = vadd.f32 1.0, %v7314_v62  ;;  %7329 = verf.f32 %v4753_v40  ;;  %v4984_v47 = vpack.c.bf16 %v4928_v57, %v9280_v58 }
0x108d   :  { %v7316_v10 = vpop.eup %7315  ;;  %v4870_v41 = vadd.f32 1.0, %v7310_v7  ;;  %v4935_v50 = vmul.f32 %v4871_v2, %v4679_v23  ;;  %7331 = verf.f32 %v4752_v56  ;;  %v4754_v15 = vmul.f32 0.70710677, %v4617_v31 }
0x108e   :  { %v7318_v36 = vpop.eup %7317  ;;  %v4937_v35 = vmul.f32 %v4873_v26, %v4681_v51  ;;  %v4872_v5 = vadd.f32 1.0, %v7316_v10  ;;  %5313 = vmatprep.mubr.bf16.mxu1 %v4984_v47  ;;  %v4986_v55 = vpack.c.bf16 %v4930_v1, %v9283_v61  ;;  %v4983_v13 = vpack.c.bf16 %v4927_v28, %v9268_v37 }
0x108f   :  { %v4874_v54 = vadd.f32 1.0, %v7318_v36  ;;  %7333 = verf.f32 %v4754_v15  ;;  %v4985_v18 = vpack.c.bf16 %v4929_v59, %v9273_v53  ;;  %v4987_v30 = vpack.c.bf16 %v4935_v50, %v4931_v38 }
0x1090   :  { %v4932_v58 = vmul.f32 %v4868_v9, %v9270_v46  ;;  %v4936_v57 = vmul.f32 %v4872_v5, %v4680_v20  ;;  %5410 = vmatprep.mubr.bf16.mxu0 %v4986_v55  ;;  %v4989_v23 = vpack.c.bf16 %v4937_v35, %v4933_v52  ;;  %v7320_v63 = vpop.eup %7319  ;;  %v4934_v51 = vmul.f32 %v4870_v41, %v9288_v21 }
0x1091   :  { %5314 = vmatmul.mubr.bf16.gmra.mrb[132].mxu1 %v4983_v13  ;;  %v4938_v6 = vmul.f32 %v4874_v54, %v4682_v4  ;;  %5411 = vmatmul.mubr.bf16.gmra.mrb[140].mxu0 %v4985_v18  ;;  %v4875_v49 = vadd.f32 1.0, %v7320_v63  ;;  %v4683_v59 = vmul.f32 0.5, %v9286_v16  ;;  %v4685_v44 = vmul.f32 0.5, %v9292_v42 }
0x1092   :  { %v7322_v25 = vpop.eup %7321  ;;  %v4988_v61 = vpack.c.bf16 %v4936_v57, %v4932_v58  ;;  %v4687_v21 = vmul.f32 0.5, %v9310_v43  ;;  %v4684_v32 = vmul.f32 0.5, %v9295_v33  ;;  %v4689_v11 = vmul.f32 0.5, %v4615_v27 }
0x1093   :  { %v7324_v24 = vpop.eup %7323  ;;  %v4990_v37 = vpack.c.bf16 %v4938_v6, %v4934_v51  ;;  %v4877_v46 = vadd.f32 1.0, %v7322_v25  ;;  %v4688_v9 = vmul.f32 0.5, %v9322_v14  ;;  %v4939_v40 = vmul.f32 %v4875_v49, %v4683_v59 }
0x1094   :  { %v7326_v28 = vpop.eup %7325  ;;  %5321 = vmatprep.mubr.bf16.mxu1 %v4988_v61  ;;  %v4876_v7 = vadd.f32 1.0, %v7324_v24  ;;  %v4686_v42 = vmul.f32 0.5, %v9298_v60  ;;  %v4690_v47 = vmul.f32 0.5, %v4617_v31 }
0x1095   :  { %v7328_v53 = vpop.eup %7327  ;;  %5418 = vmatprep.mubr.bf16.mxu0 %v4990_v37  ;;  %v4878_v62 = vadd.f32 1.0, %v7326_v28  ;;  %v4941_v52 = vmul.f32 %v4877_v46, %v4685_v44 }
0x1096   :  { %v7330_v20 = vpop.eup %7329  ;;  %v4879_v1 = vadd.f32 1.0, %v7328_v53  ;;  %v4940_v43 = vmul.f32 %v4876_v7, %v4684_v32 }
0x1097   :  { %v7332_v4 = vpop.eup %7331  ;;  %v4881_v38 = vadd.f32 1.0, %v7330_v20  ;;  %v4942_v50 = vmul.f32 %v4878_v62, %v4686_v42 }
0x1098   :  { %v4943_v2 = vmul.f32 %v4879_v1, %v4687_v21  ;;  %v4880_v16 = vadd.f32 1.0, %v7332_v4 }
0x1099   :  { %5322 = vmatmul.mubr.bf16.gmra.mrb[136].mxu1 %v4987_v30  ;;  %v7334_v56 = vpop.eup %7333  ;;  %v4945_v26 = vmul.f32 %v4881_v38, %v4689_v11  ;;  %5419 = vmatmul.mubr.bf16.gmra.mrb[144].mxu0 %v4989_v23 }
0x109a   :  { %v4944_v10 = vmul.f32 %v4880_v16, %v4688_v9  ;;  %v4882_v41 = vadd.f32 1.0, %v7334_v56  ;;  %v4991_v33 = vpack.c.bf16 %v4943_v2, %v4939_v40 }
0x109b   :  { %v4993_v27 = vpack.c.bf16 %v4945_v26, %v4941_v52 }
0x109c   :  { %v4946_v15 = vmul.f32 %v4882_v41, %v4690_v47  ;;  %v4992_v14 = vpack.c.bf16 %v4944_v10, %v4940_v43 }
0x109e   :  { %5329 = vmatprep.mubr.bf16.mxu1 %v4992_v14  ;;  %v4994_v36 = vpack.c.bf16 %v4946_v15, %v4942_v50 }
0x10a0   :  { %5426 = vmatprep.mubr.bf16.mxu0 %v4994_v36 }
0x10a1   :  { %5330 = vmatmul.mubr.bf16.gmra.mrb[140].mxu1 %v4991_v33  ;;  %5427 = vmatmul.mubr.bf16.gmra.mrb[148].mxu0 %v4993_v27 }
0x10e6   :  { %v4507_v35 = vpop.f32.mrb[112].mxu1  ;;  %v4620_v5 = vpop.f32.mrb[120].mxu0 }
0x10e7   :  { %v4508_v60 = vadd.f32 %v4507_v35, %v9177_v34  ;;  %v4621_v31 = vadd.f32 %v4620_v5, %v9179_v0  ;;  %v4509_v55 = vpop.f32.mrb[113].mxu1  ;;  %v4622_v13 = vpop.f32.mrb[121].mxu0 }
0x10e8   :  { %v4510_v54 = vadd.f32 %v4509_v55, %v9181_v17  ;;  %v4623_v18 = vadd.f32 %v4622_v13, %v9183_v8  ;;  %v4511_v30 = vpop.f32.mrb[114].mxu1  ;;  %v4624_v58 = vpop.f32.mrb[122].mxu0 }
0x10e9   :  { %v4755_v57 = vmul.f32 0.70710677, %v4508_v60  ;;  %v4757_v23 = vmul.f32 0.70710677, %v4621_v31  ;;  %v4512_v6 = vadd.f32 %v4511_v30, %v9177_v34  ;;  %v4625_v25 = vadd.f32 %v4624_v58, %v9179_v0  ;;  %v4513_v61 = vpop.f32.mrb[115].mxu1  ;;  %v4626_v24 = vpop.f32.mrb[123].mxu0 }
0x10ea   :  { %v4756_v63 = vmul.f32 0.70710677, %v4510_v54  ;;  %v4758_v51 = vmul.f32 0.70710677, %v4623_v18  ;;  %v4514_v37 = vadd.f32 %v4513_v61, %v9181_v17  ;;  %v4627_v28 = vadd.f32 %v4626_v24, %v9183_v8 }
0x10eb   :  { %7335 = verf.f32 %v4755_v57  ;;  %v4759_v49 = vmul.f32 0.70710677, %v4512_v6  ;;  %v4761_v53 = vmul.f32 0.70710677, %v4625_v25  ;;  %v4691_v56 = vmul.f32 0.5, %v4508_v60 }
0x10ec   :  { %7337 = verf.f32 %v4757_v23  ;;  %v4760_v59 = vmul.f32 0.70710677, %v4514_v37  ;;  %v4762_v20 = vmul.f32 0.70710677, %v4627_v28  ;;  %v4693_v41 = vmul.f32 0.5, %v4621_v31 }
0x10ed   :  { %7339 = verf.f32 %v4756_v63  ;;  %v4692_v33 = vmul.f32 0.5, %v4510_v54  ;;  %v4694_v27 = vmul.f32 0.5, %v4623_v18  ;;  %v4695_v15 = vmul.f32 0.5, %v4512_v6 }
0x10ee   :  { %7341 = verf.f32 %v4758_v51  ;;  %v4517_v46 = vpop.f32.mrb[116].mxu1  ;;  %v4630_v7 = vpop.f32.mrb[124].mxu0  ;;  %v9358_v14 = vmul.f32 0.5, %v4625_v25  ;;  %v9361_v13 = vmul.f32 0.5, %v4514_v37  ;;  %v9363_v30 = vmul.f32 0.5, %v4627_v28 }
0x10ef   :  { %7343 = verf.f32 %v4759_v49  ;;  %v4518_v44 = vadd.f32 %v4517_v46, %v9177_v34  ;;  %v4519_v21 = vpop.f32.mrb[117].mxu1  ;;  %v4631_v1 = vadd.f32 %v4630_v7, %v9179_v0  ;;  %v4632_v32 = vpop.f32.mrb[125].mxu0 }
0x10f0   :  { %7345 = verf.f32 %v4761_v53  ;;  %v4520_v4 = vadd.f32 %v4519_v21, %v9181_v17  ;;  %v4521_v11 = vpop.f32.mrb[118].mxu1  ;;  %v4633_v9 = vadd.f32 %v4632_v32, %v9183_v8  ;;  %v4634_v40 = vpop.f32.mrb[126].mxu0 }
0x10f1   :  { %7347 = verf.f32 %v4760_v59  ;;  %v4763_v38 = vmul.f32 0.70710677, %v4518_v44  ;;  %v4523_v62 = vpop.f32.mrb[119].mxu1  ;;  %v4765_v2 = vmul.f32 0.70710677, %v4631_v1  ;;  %v4636_v16 = vpop.f32.mrb[127].mxu0  ;;  %v4522_v26 = vadd.f32 %v4521_v11, %v9177_v34 }
0x10f2   :  { %7349 = verf.f32 %v4762_v20  ;;  %v4764_v52 = vmul.f32 0.70710677, %v4520_v4  ;;  %v4766_v42 = vmul.f32 0.70710677, %v4633_v9  ;;  %v4635_v47 = vadd.f32 %v4634_v40, %v9179_v0 }
0x10f3   :  { %7351 = verf.f32 %v4763_v38  ;;  %v4524_v43 = vadd.f32 %v4523_v62, %v9181_v17  ;;  %v4767_v36 = vmul.f32 0.70710677, %v4522_v26  ;;  %v4637_v35 = vadd.f32 %v4636_v16, %v9183_v8 }
0x10f4   :  { %7353 = verf.f32 %v4765_v2  ;;  %v4769_v58 = vmul.f32 0.70710677, %v4635_v47  ;;  %v9365_v18 = vmul.f32 0.5, %v4518_v44  ;;  %v9367_v57 = vmul.f32 0.5, %v4631_v1 }
0x10f5   :  { %v7336_v10 = vpop.eup %7335  ;;  %7355 = verf.f32 %v4764_v52  ;;  %v4768_v23 = vmul.f32 0.70710677, %v4524_v43  ;;  %v9369_v61 = vmul.f32 0.5, %v4520_v4  ;;  %v9371_v24 = vmul.f32 0.5, %v4633_v9 }
0x10f6   :  { %v7338_v50 = vpop.eup %7337  ;;  %v4527_v5 = vpop.f32.mrb[120].mxu1  ;;  %7357 = verf.f32 %v4766_v42  ;;  %v4883_v25 = vadd.f32 1.0, %v7336_v10  ;;  %v4770_v46 = vmul.f32 0.70710677, %v4637_v35  ;;  %v9377_v11 = vmul.f32 0.5, %v4522_v26 }
0x10f7   :  { %v4640_v60 = vpop.f32.mrb[128].mxu0  ;;  %v7340_v55 = vpop.eup %7339  ;;  %7359 = verf.f32 %v4767_v36  ;;  %v4885_v53 = vadd.f32 1.0, %v7338_v50  ;;  %v4528_v1 = vadd.f32 %v4527_v5, %v9177_v34  ;;  %v9379_v38 = vmul.f32 0.5, %v4635_v47 }
0x10f8   :  { %v4529_v31 = vpop.f32.mrb[121].mxu1  ;;  %v7342_v54 = vpop.eup %7341  ;;  %7361 = verf.f32 %v4769_v58  ;;  %v4884_v59 = vadd.f32 1.0, %v7340_v55  ;;  %v4641_v4 = vadd.f32 %v4640_v60, %v9179_v0  ;;  %v9382_v62 = vmul.f32 %v4883_v25, %v4691_v56 }
0x10f9   :  { %v4642_v63 = vpop.f32.mrb[129].mxu0  ;;  %v4531_v51 = vpop.f32.mrb[122].mxu1  ;;  %7363 = verf.f32 %v4768_v23  ;;  %v4886_v7 = vadd.f32 1.0, %v7342_v54  ;;  %v4530_v9 = vadd.f32 %v4529_v31, %v9181_v17  ;;  %v9384_v16 = vmul.f32 0.5, %v4524_v43 }
0x10fa   :  { %v7344_v6 = vpop.eup %7343  ;;  %v4644_v37 = vpop.f32.mrb[130].mxu0  ;;  %7365 = verf.f32 %v4770_v46  ;;  %v4771_v52 = vmul.f32 0.70710677, %v4528_v1  ;;  %v9386_v10 = vmul.f32 %v4885_v53, %v4693_v41  ;;  %v9388_v50 = vmul.f32 %v4884_v59, %v4692_v33 }
0x10fb   :  { %v4533_v28 = vpop.f32.mrb[123].mxu1  ;;  %v7346_v49 = vpop.eup %7345  ;;  %v4887_v21 = vadd.f32 1.0, %v7344_v6  ;;  %v9390_v36 = vmul.f32 0.5, %v4637_v35  ;;  %v4773_v26 = vmul.f32 0.70710677, %v4641_v4  ;;  %v9392_v55 = vmul.f32 %v4886_v7, %v4694_v27 }
0x10fc   :  { %v9373_v20 = vpop.f32.mrb[131].mxu0  ;;  %v7348_v44 = vpop.eup %7347  ;;  %v4889_v2 = vadd.f32 1.0, %v7346_v49  ;;  %7367 = verf.f32 %v4771_v52  ;;  %v4772_v41 = vmul.f32 0.70710677, %v4530_v9  ;;  %v4532_v49 = vadd.f32 %v4531_v51, %v9177_v34 }
0x10fd   :  { %v7350_v32 = vpop.eup %7349  ;;  %v9394_v58 = vmul.f32 %v4887_v21, %v4695_v15  ;;  %v4888_v56 = vadd.f32 1.0, %v7348_v44  ;;  %7369 = verf.f32 %v4773_v26  ;;  %v4643_v15 = vadd.f32 %v4642_v63, %v9183_v8 }
0x10fe   :  { %v7352_v40 = vpop.eup %7351  ;;  %v4537_v47 = vpop.f32.mrb[124].mxu1  ;;  %v4890_v54 = vadd.f32 1.0, %v7350_v32  ;;  %v9401_v25 = vmul.f32 %v4889_v2, %v9358_v14  ;;  %7371 = verf.f32 %v4772_v41  ;;  %v4645_v7 = vadd.f32 %v4644_v37, %v9179_v0 }
0x10ff   :  { %v7354_v42 = vpop.eup %7353  ;;  %v4650_v5 = vpop.f32.mrb[132].mxu0  ;;  %v4891_v23 = vadd.f32 1.0, %v7352_v40  ;;  %v4534_v21 = vadd.f32 %v4533_v28, %v9181_v17  ;;  %v4952_v14 = vmul.f32 %v4888_v56, %v9361_v13  ;;  %v4707_v40 = vmul.f32 0.5, %v4528_v1 }
0x1100   :  { %v7356_v60 = vpop.eup %7355  ;;  %v4539_v43 = vpop.f32.mrb[125].mxu1  ;;  %v4893_v27 = vadd.f32 1.0, %v7354_v42  ;;  %v9412_v2 = vmul.f32 0.5, %v4641_v4  ;;  %v4774_v63 = vmul.f32 0.70710677, %v4643_v15  ;;  %v4954_v51 = vmul.f32 %v4890_v54, %v9363_v30 }
0x1101   :  { %v4652_v31 = vpop.f32.mrb[133].mxu0  ;;  %v9396_v33 = vpop.f32.mrb[126].mxu1  ;;  %v4892_v44 = vadd.f32 1.0, %v7356_v60  ;;  %v9416_v42 = vmul.f32 %v4891_v23, %v9365_v18  ;;  %v9418_v26 = vmul.f32 0.5, %v4530_v9  ;;  %v4775_v60 = vmul.f32 0.70710677, %v4532_v49 }
0x1102   :  { %v9398_v35 = vpop.f32.mrb[134].mxu0  ;;  %v7358_v6 = vpop.eup %7357  ;;  %v9421_v37 = vmul.f32 %v4893_v27, %v9367_v57  ;;  %7373 = verf.f32 %v4774_v63  ;;  %v4777_v41 = vmul.f32 0.70710677, %v4645_v7  ;;  %v4776_v56 = vmul.f32 0.70710677, %v4534_v21 }
0x1103   :  { %v9405_v53 = vpop.f32.mrb[127].mxu1  ;;  %v9407_v59 = vpop.f32.mrb[135].mxu0  ;;  %v4894_v28 = vadd.f32 1.0, %v7358_v6  ;;  %v9424_v1 = vmul.f32 %v4892_v44, %v9369_v61  ;;  %7375 = verf.f32 %v4775_v60  ;;  %v4647_v18 = vadd.f32 %v9373_v20, %v9183_v8 }
0x1104   :  { %v7360_v46 = vpop.eup %7359  ;;  %7377 = verf.f32 %v4777_v41  ;;  %v9429_v57 = vadd.f32 %v4537_v47, %v9177_v34  ;;  %v9432_v9 = vadd.f32 %v4650_v5, %v9179_v0  ;;  %v9435_v23 = vadd.f32 %v4539_v43, %v9181_v17 }
0x1105   :  { %v7362_v32 = vpop.eup %7361  ;;  %v4895_v4 = vadd.f32 1.0, %v7360_v46  ;;  %7379 = verf.f32 %v4776_v56  ;;  %v9438_v6 = vmul.f32 %v4894_v28, %v9371_v24  ;;  %v4778_v46 = vmul.f32 0.70710677, %v4647_v18 }
0x1106   :  { %v7364_v52 = vpop.eup %7363  ;;  %v4897_v30 = vadd.f32 1.0, %v7362_v32  ;;  %v9441_v44 = vadd.f32 %v4652_v31, %v9183_v8  ;;  %v9443_v32 = vmul.f32 0.5, %v4643_v15  ;;  %v4711_v47 = vmul.f32 0.5, %v4532_v49 }
0x1107   :  { %v7366_v13 = vpop.eup %7365  ;;  %v4896_v54 = vadd.f32 1.0, %v7364_v52  ;;  %v4713_v63 = vmul.f32 0.5, %v4645_v7  ;;  %v4779_v5 = vmul.f32 0.70710677, %v9429_v57  ;;  %v9447_v52 = vmul.f32 %v4895_v4, %v9377_v11 }
0x1108   :  { %v7368_v61 = vpop.eup %7367  ;;  %v4898_v27 = vadd.f32 1.0, %v7366_v13  ;;  %v9450_v43 = vmul.f32 %v4897_v30, %v9379_v38  ;;  %7381 = verf.f32 %v4778_v46  ;;  %v4781_v24 = vmul.f32 0.70710677, %v9432_v9 }
0x1109   :  { %v7370_v20 = vpop.eup %7369  ;;  %v4960_v31 = vmul.f32 %v4896_v54, %v9384_v16  ;;  %v4899_v28 = vadd.f32 1.0, %v7368_v61  ;;  %v4712_v41 = vmul.f32 0.5, %v4534_v21  ;;  %v4780_v15 = vmul.f32 0.70710677, %v9435_v23 }
0x110a   :  { %v7372_v60 = vpop.eup %7371  ;;  %v4962_v49 = vmul.f32 %v4898_v27, %v9390_v36  ;;  %v4901_v7 = vadd.f32 1.0, %v7370_v20  ;;  %v4714_v13 = vmul.f32 0.5, %v4647_v18  ;;  %v4782_v11 = vmul.f32 0.70710677, %v9441_v44 }
0x110b   :  { %7383 = verf.f32 %v4779_v5  ;;  %v4996_v38 = vpack.c.bf16 %v4952_v14, %v9388_v50  ;;  %v4998_v4 = vpack.c.bf16 %v4954_v51, %v9392_v55  ;;  %v4542_v56 = vadd.f32 %v9396_v33, %v9177_v34 }
0x110c   :  { %v7374_v30 = vpop.eup %7373  ;;  %v4900_v16 = vadd.f32 1.0, %v7372_v60  ;;  %7385 = verf.f32 %v4781_v24  ;;  %v4655_v21 = vadd.f32 %v9398_v35, %v9179_v0  ;;  %v4995_v36 = vpack.c.bf16 %v9394_v58, %v9382_v62 }
0x110d   :  { %v7376_v54 = vpop.eup %7375  ;;  %v9465_v18 = vmul.f32 %v4899_v28, %v4707_v40  ;;  %7387 = verf.f32 %v4780_v15  ;;  %5337 = vmatprep.mubr.bf16.mxu1 %v4996_v38  ;;  %5434 = vmatprep.mubr.bf16.mxu0 %v4998_v4  ;;  %v4783_v50 = vmul.f32 0.70710677, %v4542_v56  ;;  %v4997_v55 = vpack.c.bf16 %v9401_v25, %v9386_v10 }
0x110e   :  { %v7378_v34 = vpop.eup %7377  ;;  %v4903_v33 = vadd.f32 1.0, %v7376_v54  ;;  %7389 = verf.f32 %v4782_v11  ;;  %v4785_v14 = vmul.f32 0.70710677, %v4655_v21  ;;  %5338 = vmatmul.mubr.bf16.gmra.mrb[144].mxu1 %v4995_v36  ;;  %v4544_v0 = vadd.f32 %v9405_v53, %v9181_v17 }
0x110f   :  { %v7380_v35 = vpop.eup %7379  ;;  %v9472_v62 = vmul.f32 %v4901_v7, %v9412_v2  ;;  %v4905_v58 = vadd.f32 1.0, %v7378_v34  ;;  %7391 = verf.f32 %v4783_v50  ;;  %5435 = vmatmul.mubr.bf16.gmra.mrb[152].mxu0 %v4997_v55  ;;  %v4657_v40 = vadd.f32 %v9407_v59, %v9183_v8 }
0x1110   :  { %v4964_v10 = vmul.f32 %v4900_v16, %v9418_v26  ;;  %v4967_v25 = vmul.f32 %v4903_v33, %v4711_v47  ;;  %v4904_v51 = vadd.f32 1.0, %v7380_v35  ;;  %7393 = verf.f32 %v4785_v14 }
0x1111   :  { %v4902_v61 = vadd.f32 1.0, %v7374_v30  ;;  %v4969_v27 = vmul.f32 %v4905_v58, %v4713_v63  ;;  %v4784_v46 = vmul.f32 0.70710677, %v4544_v0  ;;  %v4786_v20 = vmul.f32 0.70710677, %v4657_v40 }
0x1112   :  { %v7382_v17 = vpop.eup %7381  ;;  %v4968_v53 = vmul.f32 %v4904_v51, %v4712_v41  ;;  %v5000_v2 = vpack.c.bf16 %v4960_v31, %v9424_v1  ;;  %v5002_v5 = vpack.c.bf16 %v4962_v49, %v9438_v6  ;;  %v4999_v24 = vpack.c.bf16 %v9447_v52, %v9416_v42 }
0x1113   :  { %v4906_v60 = vadd.f32 1.0, %v7382_v17  ;;  %7395 = verf.f32 %v4784_v46  ;;  %v5001_v8 = vpack.c.bf16 %v9450_v43, %v9421_v37  ;;  %v5003_v59 = vpack.c.bf16 %v4967_v25, %v9465_v18 }
0x1114   :  { %7397 = verf.f32 %v4786_v20  ;;  %5345 = vmatprep.mubr.bf16.mxu1 %v5000_v2  ;;  %5442 = vmatprep.mubr.bf16.mxu0 %v5002_v5  ;;  %v5004_v26 = vpack.c.bf16 %v4968_v53, %v4964_v10  ;;  %v5005_v47 = vpack.c.bf16 %v4969_v27, %v9472_v62  ;;  %v4966_v1 = vmul.f32 %v4902_v61, %v9443_v32 }
0x1115   :  { %v7384_v63 = vpop.eup %7383  ;;  %v4970_v6 = vmul.f32 %v4906_v60, %v4714_v13  ;;  %v4715_v49 = vmul.f32 0.5, %v9429_v57  ;;  %v4719_v7 = vmul.f32 0.5, %v4542_v56  ;;  %v4717_v38 = vmul.f32 0.5, %v9432_v9 }
0x1116   :  { %v7386_v31 = vpop.eup %7385  ;;  %5346 = vmatmul.mubr.bf16.gmra.mrb[148].mxu1 %v4999_v24  ;;  %v4907_v37 = vadd.f32 1.0, %v7384_v63  ;;  %v4721_v32 = vmul.f32 0.5, %v4655_v21  ;;  %v4716_v34 = vmul.f32 0.5, %v9435_v23  ;;  %v4720_v33 = vmul.f32 0.5, %v4544_v0 }
0x1117   :  { %v7388_v42 = vpop.eup %7387  ;;  %5443 = vmatmul.mubr.bf16.gmra.mrb[156].mxu0 %v5001_v8  ;;  %5353 = vmatprep.mubr.bf16.mxu1 %v5004_v26  ;;  %v5006_v52 = vpack.c.bf16 %v4970_v6, %v4966_v1  ;;  %v4909_v41 = vadd.f32 1.0, %v7386_v31  ;;  %v4718_v56 = vmul.f32 0.5, %v9441_v44  ;;  %v4722_v35 = vmul.f32 0.5, %v4657_v40  ;;  %v9493_v44 = vld [vmem:[%s9553_s11] ss:$0 sm:$0xff]  ;;  %s7553_s11 = smov [#allocation11]  }
0x1118   :  { %v7390_v28 = vpop.eup %7389  ;;  %v4971_v4 = vmul.f32 %v4907_v37, %v4715_v49  ;;  %v4908_v30 = vadd.f32 1.0, %v7388_v42  ;;  %s5568_s19 = sshll.u32 %s7553_s11, 4  ;;  %s5569_s19 = int_to_ptr.vmem [resolvable:$true] %s5568_s19 }
0x1119   :  { %v7392_v43 = vpop.eup %7391  ;;  %5450 = vmatprep.mubr.bf16.mxu0 %v5006_v52  ;;  %v4973_v54 = vmul.f32 %v4909_v41, %v4717_v38  ;;  %v4910_v18 = vadd.f32 1.0, %v7390_v28  ;;  %s7509_s20 = scalar_lea.vmem %s5569_s19, 1024  ;;  %p7514_p13 = scmp.lt.s32.totalorder %s5569_s19, %s5569_s19 }
0x111a   :  { %v7394_v15 = vpop.eup %7393  ;;  %v4911_v11 = vadd.f32 1.0, %v7392_v43  ;;  %v4972_v62 = vmul.f32 %v4908_v30, %v4716_v34  ;;  %p7510_p12 = scmp.ne.s32.totalorder %s5569_s19, %s7509_s20  ;;  %p7515_p0 = scmp.lt.s32.totalorder %s7509_s20, %s7509_s20 }
0x111b   :  { %v4913_v13 = vadd.f32 1.0, %v7394_v15  ;;  %v4974_v10 = vmul.f32 %v4910_v18, %v4718_v56 }
0x111c   :  { %v4975_v16 = vmul.f32 %v4911_v11, %v4719_v7  ;;  %p7516_p1 = por %p7515_p0, %p7514_p13 }
0x111d   :  { %v7396_v36 = vpop.eup %7395  ;;  %v4977_v50 = vmul.f32 %v4913_v13, %v4721_v32 }
0x111e   :  { %v7398_v55 = vpop.eup %7397  ;;  %v4912_v14 = vadd.f32 1.0, %v7396_v36  ;;  %5354 = vmatmul.mubr.bf16.gmra.mrb[152].mxu1 %v5003_v59  ;;  %v5007_v57 = vpack.c.bf16 %v4975_v16, %v4971_v4  ;;  %p7517_p2 = pnand %p7516_p1, %p7510_p12 }
0x111f   :  { %v4914_v9 = vadd.f32 1.0, %v7398_v55  ;;  %5451 = vmatmul.mubr.bf16.gmra.mrb[160].mxu0 %v5005_v47  ;;  %v5009_v21 = vpack.c.bf16 %v4977_v50, %v4973_v54 }
0x1120   :  { %v4976_v58 = vmul.f32 %v4912_v14, %v4720_v33 }
0x1121   :  { %v4978_v25 = vmul.f32 %v4914_v9, %v4722_v35 }
0x1122   :  { %v5008_v51 = vpack.c.bf16 %v4976_v58, %v4972_v62 }
0x1123   :  { %v5010_v61 = vpack.c.bf16 %v4978_v25, %v4974_v10 }
0x1124   :  { %5361 = vmatprep.mubr.bf16.mxu1 %v5008_v51 }
0x1125   :  { %5458 = vmatprep.mubr.bf16.mxu0 %v5010_v61 }
0x1126   :  { %5362 = vmatmul.mubr.bf16.gmra.mrb[156].mxu1 %v5007_v57 }
0x1127   :  { %5459 = vmatmul.mubr.bf16.gmra.mrb[164].mxu0 %v5009_v21 }
0x115c   :  { %v6232_v23 = vpop.f32.mrb[128].mxu1  ;;  %v6296_v0 = vpop.f32.mrb[136].mxu0 }
0x115d   :  { %v6233_v40 = vpop.f32.mrb[129].mxu1  ;;  %v6297_v27 = vpop.f32.mrb[137].mxu0 }
0x115e   :  { %v6234_v46 = vadd.f32 %v6233_v40, %v6232_v23  ;;  %v6298_v20 = vadd.f32 %v6297_v27, %v6296_v0  ;;  %v6235_v17 = vpop.f32.mrb[130].mxu1  ;;  %v6299_v53 = vpop.f32.mrb[138].mxu0 }
0x115f   :  { %v6236_v2 = vpop.f32.mrb[131].mxu1  ;;  %v6300_v5 = vpop.f32.mrb[139].mxu0 }
0x1160   :  { %v5308_v24 = vadd.f32 %v6234_v46, %v9493_v44  ;;  %v6237_v60 = vadd.f32 %v6236_v2, %v6235_v17  ;;  %v6301_v8 = vadd.f32 %v6300_v5, %v6299_v53 }
0x1162   :  { %v5405_v59 = vadd.f32 %v6298_v20, %v5308_v24  ;;  %v5311_v26 = vadd.f32 %v6237_v60, %v9493_v44 }
0x1164   :  { %v5408_v47 = vadd.f32 %v6301_v8, %v5311_v26  ;;  %v6238_v63 = vpop.f32.mrb[132].mxu1  ;;  %v5467_v1 = vadd.f32 %v8930_v19, %v5405_v59  ;;  %v6302_v31 = vpop.f32.mrb[140].mxu0 }
0x1165   :  { %v6239_v42 = vpop.f32.mrb[133].mxu1  ;;  %v6303_v28 = vpop.f32.mrb[141].mxu0 }
0x1166   :  { %v5468_v6 = vadd.f32 %v8945_v45, %v5408_v47  ;;  %v6240_v52 = vadd.f32 %v6239_v42, %v6238_v63  ;;  %v6241_v37 = vpop.f32.mrb[134].mxu1  ;;  %v6304_v41 = vadd.f32 %v6303_v28, %v6302_v31  ;;  %v6305_v15 = vpop.f32.mrb[142].mxu0 }
0x1167   :  { %v6242_v49 = vpop.f32.mrb[135].mxu1  ;;  %v6306_v38 = vpop.f32.mrb[143].mxu0 }
0x1168   :  { %v5959_v43 = vpack.c.bf16 %v5468_v6, %v5467_v1  ;;  %v5316_v7 = vadd.f32 %v6240_v52, %v9493_v44  ;;  %v6243_v11 = vadd.f32 %v6242_v49, %v6241_v37  ;;  %v6307_v32 = vadd.f32 %v6306_v38, %v6305_v15 }
0x116a   :  { %5960 = vst [vmem:[#allocation11] sm:$0xff] %v5959_v43   ;;  %v5413_v13 = vadd.f32 %v6304_v41, %v5316_v7  ;;  %v5319_v19 = vadd.f32 %v6243_v11, %v9493_v44 }
0x116c   :  { %v5416_v4 = vadd.f32 %v6307_v32, %v5319_v19  ;;  %v6244_v45 = vpop.f32.mrb[136].mxu1  ;;  %v6308_v30 = vpop.f32.mrb[144].mxu0  ;;  %v5469_v36 = vadd.f32 %v8934_v12, %v5413_v13  ;;  %v9623_v13 = vld [vmem:[#allocation29_spill] sm:$0xff] }
0x116d   :  { %v6245_v16 = vpop.f32.mrb[137].mxu1  ;;  %v6309_v50 = vpop.f32.mrb[145].mxu0 }
0x116e   :  { %v5470_v54 = vadd.f32 %v8938_v3, %v5416_v4  ;;  %v6246_v18 = vadd.f32 %v6245_v16, %v6244_v45  ;;  %v6247_v55 = vpop.f32.mrb[138].mxu1  ;;  %v6310_v34 = vadd.f32 %v6309_v50, %v6308_v30  ;;  %v6311_v33 = vpop.f32.mrb[146].mxu0  ;;  %v9624_v4 = vld [vmem:[#allocation16_spill] sm:$0xff] }
0x116f   :  { %v6248_v14 = vpop.f32.mrb[139].mxu1  ;;  %v6312_v9 = vpop.f32.mrb[147].mxu0 }
0x1170   :  { %v5964_v57 = vpack.c.bf16 %v5470_v54, %v5469_v36  ;;  %v5324_v56 = vadd.f32 %v6246_v18, %v9493_v44  ;;  %v6249_v35 = vadd.f32 %v6248_v14, %v6247_v55  ;;  %v6313_v21 = vadd.f32 %v6312_v9, %v6311_v33 }
0x1172   :  { %6017 = vst [vmem:[#allocation11 + $0x8] sm:$0xff] %v5964_v57   ;;  %v5421_v62 = vadd.f32 %v6310_v34, %v5324_v56  ;;  %v5327_v58 = vadd.f32 %v6249_v35, %v9493_v44 }
0x1174   :  { %v5424_v10 = vadd.f32 %v6313_v21, %v5327_v58  ;;  %v6250_v12 = vpop.f32.mrb[140].mxu1  ;;  %v6314_v25 = vpop.f32.mrb[148].mxu0  ;;  %v5471_v51 = vadd.f32 %v8942_v29, %v5421_v62 }
0x1175   :  { %v6251_v3 = vpop.f32.mrb[141].mxu1  ;;  %v6315_v0 = vpop.f32.mrb[149].mxu0 }
0x1176   :  { %v5472_v61 = vadd.f32 %v8953_v39, %v5424_v10  ;;  %v6252_v23 = vadd.f32 %v6251_v3, %v6250_v12  ;;  %v6253_v40 = vpop.f32.mrb[142].mxu1  ;;  %v6316_v27 = vadd.f32 %v6315_v0, %v6314_v25  ;;  %v6317_v46 = vpop.f32.mrb[150].mxu0  ;;  %v9625_v10 = vld [vmem:[#allocation19_spill] sm:$0xff]  ;;  %v9626_v25 = vld [vmem:[#allocation30_spill] sm:$0xff] }
0x1177   :  { %v6254_v20 = vpop.f32.mrb[143].mxu1  ;;  %v6318_v5 = vpop.f32.mrb[151].mxu0 }
0x1178   :  { %v5969_v17 = vpack.c.bf16 %v5472_v61, %v5471_v51  ;;  %v5332_v53 = vadd.f32 %v6252_v23, %v9493_v44  ;;  %v6255_v2 = vadd.f32 %v6254_v20, %v6253_v40  ;;  %v6319_v24 = vadd.f32 %v6318_v5, %v6317_v46 }
0x117a   :  { %6018 = vst [vmem:[#allocation11 + $0x10] sm:$0xff] %v5969_v17   ;;  %v5429_v60 = vadd.f32 %v6316_v27, %v5332_v53  ;;  %v5335_v8 = vadd.f32 %v6255_v2, %v9493_v44 }
0x117c   :  { %v5432_v59 = vadd.f32 %v6319_v24, %v5335_v8  ;;  %v5473_v29 = vadd.f32 %v8950_v22, %v5429_v60 }
0x117e   :  { %v5474_v39 = vadd.f32 %v8958_v48, %v5432_v59 }
0x1180   :  { %v5974_v26 = vpack.c.bf16 %v5474_v39, %v5473_v29  ;;  %v9627_v39 = vld [vmem:[#allocation17_spill] sm:$0xff] }
0x1182   :  { %6019 = vst [vmem:[#allocation11 + $0x18] sm:$0xff] %v5974_v26  }
0x11e1   :  { %v6256_v47 = vpop.f32.mrb[144].mxu1 }
0x11e2   :  { %v6320_v63 = vpop.f32.mrb[152].mxu0  ;;  %v6257_v1 = vpop.f32.mrb[145].mxu1 }
0x11e3   :  { %v6258_v6 = vadd.f32 %v6257_v1, %v6256_v47  ;;  %v6321_v31 = vpop.f32.mrb[153].mxu0  ;;  %v6259_v42 = vpop.f32.mrb[146].mxu1  ;;  %v9628_v47 = vld [vmem:[#allocation31_spill] sm:$0xff] }
0x11e4   :  { %v6322_v52 = vadd.f32 %v6321_v31, %v6320_v63  ;;  %v6323_v28 = vpop.f32.mrb[154].mxu0  ;;  %v6260_v37 = vpop.f32.mrb[147].mxu1 }
0x11e5   :  { %v5340_v43 = vadd.f32 %v6258_v6, %v9493_v44  ;;  %v6261_v41 = vadd.f32 %v6260_v37, %v6259_v42  ;;  %v6324_v15 = vpop.f32.mrb[155].mxu0 }
0x11e6   :  { %v6325_v49 = vadd.f32 %v6324_v15, %v6323_v28 }
0x11e7   :  { %v5437_v7 = vadd.f32 %v6322_v52, %v5340_v43  ;;  %v5343_v22 = vadd.f32 %v6261_v41, %v9493_v44 }
0x11e9   :  { %v5440_v48 = vadd.f32 %v6325_v49, %v5343_v22  ;;  %v6262_v11 = vpop.f32.mrb[148].mxu1  ;;  %v5475_v19 = vadd.f32 %v9623_v13, %v5437_v7 }
0x11ea   :  { %v6326_v38 = vpop.f32.mrb[156].mxu0  ;;  %v6263_v32 = vpop.f32.mrb[149].mxu1 }
0x11eb   :  { %v5476_v45 = vadd.f32 %v9624_v4, %v5440_v48  ;;  %v6264_v30 = vadd.f32 %v6263_v32, %v6262_v11  ;;  %v6327_v16 = vpop.f32.mrb[157].mxu0  ;;  %v6265_v36 = vpop.f32.mrb[150].mxu1  ;;  %v9629_v11 = vld [vmem:[#allocation20_spill] sm:$0xff] }
0x11ec   :  { %v6328_v54 = vadd.f32 %v6327_v16, %v6326_v38  ;;  %v6329_v18 = vpop.f32.mrb[158].mxu0  ;;  %v6266_v50 = vpop.f32.mrb[151].mxu1  ;;  %v9630_v32 = vld [vmem:[#allocation32_spill] sm:$0xff] }
0x11ed   :  { %v5979_v55 = vpack.c.bf16 %v5476_v45, %v5475_v19  ;;  %v5348_v34 = vadd.f32 %v6264_v30, %v9493_v44  ;;  %v6267_v33 = vadd.f32 %v6266_v50, %v6265_v36  ;;  %v6330_v14 = vpop.f32.mrb[159].mxu0 }
0x11ee   :  { %v6331_v57 = vadd.f32 %v6330_v14, %v6329_v18 }
0x11ef   :  { %6020 = vst [vmem:[#allocation11 + $0x20] sm:$0xff] %v5979_v55   ;;  %v5445_v56 = vadd.f32 %v6328_v54, %v5348_v34  ;;  %v5351_v35 = vadd.f32 %v6267_v33, %v9493_v44 }
0x11f1   :  { %v5448_v9 = vadd.f32 %v6331_v57, %v5351_v35  ;;  %v6268_v21 = vpop.f32.mrb[152].mxu1  ;;  %v5477_v12 = vadd.f32 %v9625_v10, %v5445_v56 }
0x11f2   :  { %v6332_v62 = vpop.f32.mrb[160].mxu0  ;;  %v6269_v58 = vpop.f32.mrb[153].mxu1 }
0x11f3   :  { %v5478_v3 = vadd.f32 %v9626_v25, %v5448_v9  ;;  %v6270_v51 = vadd.f32 %v6269_v58, %v6268_v21  ;;  %v6333_v61 = vpop.f32.mrb[161].mxu0  ;;  %v6271_v23 = vpop.f32.mrb[154].mxu1 }
0x11f4   :  { %v6334_v0 = vadd.f32 %v6333_v61, %v6332_v62  ;;  %v6335_v40 = vpop.f32.mrb[162].mxu0  ;;  %v6272_v27 = vpop.f32.mrb[155].mxu1 }
0x11f5   :  { %v5984_v46 = vpack.c.bf16 %v5478_v3, %v5477_v12  ;;  %v5356_v20 = vadd.f32 %v6270_v51, %v9493_v44  ;;  %v6273_v17 = vadd.f32 %v6272_v27, %v6271_v23  ;;  %v6336_v53 = vpop.f32.mrb[163].mxu0 }
0x11f6   :  { %v6337_v2 = vadd.f32 %v6336_v53, %v6335_v40 }
0x11f7   :  { %6021 = vst [vmem:[#allocation11 + $0x28] sm:$0xff] %v5984_v46   ;;  %v5453_v5 = vadd.f32 %v6334_v0, %v5356_v20  ;;  %v5359_v24 = vadd.f32 %v6273_v17, %v9493_v44 }
0x11f9   :  { %v5456_v60 = vadd.f32 %v6337_v2, %v5359_v24  ;;  %v6274_v8 = vpop.f32.mrb[156].mxu1  ;;  %v5479_v26 = vadd.f32 %v9627_v39, %v5453_v5 }
0x11fa   :  { %v6338_v59 = vpop.f32.mrb[164].mxu0  ;;  %v6275_v29 = vpop.f32.mrb[157].mxu1 }
0x11fb   :  { %v5480_v63 = vadd.f32 %v9628_v47, %v5456_v60  ;;  %v6276_v1 = vadd.f32 %v6275_v29, %v6274_v8  ;;  %v6339_v6 = vpop.f32.mrb[165].mxu0  ;;  %v6277_v31 = vpop.f32.mrb[158].mxu1 }
0x11fc   :  { %v6340_v42 = vadd.f32 %v6339_v6, %v6338_v59  ;;  %v6341_v52 = vpop.f32.mrb[166].mxu0  ;;  %v6278_v28 = vpop.f32.mrb[159].mxu1 }
0x11fd   :  { %v5989_v37 = vpack.c.bf16 %v5480_v63, %v5479_v26  ;;  %v5364_v43 = vadd.f32 %v6276_v1, %v9493_v44  ;;  %v6279_v41 = vadd.f32 %v6278_v28, %v6277_v31  ;;  %v6342_v15 = vpop.f32.mrb[167].mxu0 }
0x11fe   :  { %v6343_v49 = vadd.f32 %v6342_v15, %v6341_v52 }
0x11ff   :  { %6022 = vst [vmem:[#allocation11 + $0x30] sm:$0xff] %v5989_v37   ;;  %v5461_v7 = vadd.f32 %v6340_v42, %v5364_v43  ;;  %v5367_v22 = vadd.f32 %v6279_v41, %v9493_v44 }
0x1201   :  { %v5464_v48 = vadd.f32 %v6343_v49, %v5367_v22  ;;  %v5481_v38 = vadd.f32 %v9629_v11, %v5461_v7 }
0x1203   :  { %v5482_v13 = vadd.f32 %v9630_v32, %v5464_v48 }
0x1205   :  { %v5994_v19 = vpack.c.bf16 %v5482_v13, %v5481_v38 }
0x1207   :  { %6023 = vst [vmem:[#allocation11 + $0x38] sm:$0xff] %v5994_v19  }
0x1208   :  { %7520 = shalt.err (!%p7517_p2)
}
0x1209   :  { %s7521_s24 = scalar_lea.hbm %s9554_s12, 1024 }
0x120a   :  { %p7522_p3 = scmp.ne.s32.totalorder %s9554_s12, %s7521_s24  ;;  %p7525_p4 = scmp.lt.u32.totalorder %s7521_s24, %s9554_s12 }
0x120c   :  { %p7527_p5 = pnand %p7525_p4, %p7522_p3 }
0x120e   :  { %7530 = shalt.err (!%p7527_p5)
}
0x120f   :  { %5574 = dma.vmem_to_hbm [thread:$0]  %s5569_s19, 1024, %s9554_s12, [#allocation4], %s7546_s8, %s7546_s8, %s7547_s18  }
0x1210   :  { %7537 = dma.done.wait [#allocation4], 1024  }
0x1211   :  { %7538 = vsyncadd [#allocation4], 4294966272 }
0x1212   :  { %5578 = vsyncpa [#allocation3], 1 }
0x1213   :  { %5579 = vsyncpa [#allocation6], 1 }
0x1214   :  { %5580 = vsyncpa [#allocation9], 1 }
0x1215   :  { %5581 = vsyncpa [#allocation4], 1 }

// kernel: tpu_custom_call.1
= control target key start
LH: loop header
LB: loop body
LE: loop exit
PB: predicated region body
PF: predicated region fallthrough
CT: control target
= control target key end

     0   :  { %17 = vsyncpa [#allocation3], 0  ;;  %s9542_s0 = inlined_call_operand.hbm [shape: bf16[128,128], index: 0, kind: input, shape index: {}]   ;;  %s9543_s1 = inlined_call_operand.vmem [shape: f32[1,128], index: 1, kind: input, shape index: {}]   ;;  %s9544_s2 = inlined_call_operand.vmem [shape: f32[1,128], index: 2, kind: input, shape index: {}]   ;;  %s9545_s3 = inlined_call_operand.hbm [shape: bf16[128,384], index: 3, kind: input, shape index: {}]   ;;  %s9546_s4 = inlined_call_operand.hbm [shape: bf16[4,32,128], index: 4, kind: input, shape index: {}]   ;;  %s9547_s5 = inlined_call_operand.vmem [shape: f32[1,128], index: 5, kind: input, shape index: {}]   ;;  %s9548_s6 = inlined_call_operand.vmem [shape: f32[1,128], index: 6, kind: input, shape index: {}]   ;;  %s9549_s7 = inlined_call_operand.vmem [shape: f32[1,128], index: 7, kind: input, shape index: {}]   ;;  %s9550_s8 = inlined_call_operand.hbm [shape: bf16[128,512], index: 8, kind: input, shape index: {}]   ;;  %s9551_s9 = inlined_call_operand.vmem [shape: f32[1,512], index: 9, kind: input, shape index: {}]   ;;  %s9552_s10 = inlined_call_operand.hbm [shape: bf16[512,128], index: 10, kind: input, shape index: {}]   ;;  %s9553_s11 = inlined_call_operand.vmem [shape: f32[1,128], index: 11, kind: input, shape index: {}]   ;;  %s9554_s12 = inlined_call_operand.hbm [shape: bf16[128,128], index: 12, kind: output, shape index: {}]  }
   0x1   :  { %18 = vsyncpa [#allocation6], 0 }
   0x2   :  { %19 = vsyncpa [#allocation9], 0 }
   0x3   :  { %20 = vsyncpa [#allocation4], 0  ;;  %s7539_s21 = smov [#allocation5]   ;;  %s7399_s25 = scalar_lea.hbm %s9545_s3, 3072 }
   0x4   :  { %s42_s22 = sshll.u32 %s7539_s21, 4  ;;  %p7400_p0 = scmp.ne.s32.totalorder %s9545_s3, %s7399_s25  ;;  %s43_s22 = int_to_ptr.vmem [resolvable:$true] %s42_s22 }
   0x5   :  { %p7403_p1 = scmp.lt.u32.totalorder %s7399_s25, %s9545_s3 }
   0x7   :  { %p7405_p2 = pnand %p7403_p1, %p7400_p0 }
   0x9   :  { %7408 = shalt.err (!%p7405_p2)
}
   0xa   :  { %s7409_s30 = scalar_lea.vmem %s43_s22, 3072  ;;  %p7414_p4 = scmp.lt.s32.totalorder %s43_s22, %s43_s22 }
   0xb   :  { %p7410_p3 = scmp.ne.s32.totalorder %s43_s22, %s7409_s30  ;;  %p7415_p5 = scmp.lt.s32.totalorder %s7409_s30, %s7409_s30 }
   0xd   :  { %p7416_p6 = por %p7415_p5, %p7414_p4 }
   0xf   :  { %p7417_p7 = pnand %p7416_p6, %p7410_p3 }
  0x11   :  { %7420 = shalt.err (!%p7417_p7)
}
  0x12   :  { %s7540_s13 = smov 192   ;;  %s7541_s14 = smov 12  }
  0x13   :  { %48 = dma.hbm_to_vmem [thread:$0]  %s9545_s3, 3072, %s43_s22, [#allocation6], %s7540_s13, %s7540_s13, %s7541_s14  }
  0x14   :  { %s7542_s17 = smov [#allocation8]   ;;  %s7421_s21 = scalar_lea.hbm %s9550_s8, 4096 }
  0x15   :  { %s72_s18 = sshll.u32 %s7542_s17, 4  ;;  %p7422_p8 = scmp.ne.s32.totalorder %s9550_s8, %s7421_s21  ;;  %s73_s18 = int_to_ptr.vmem [resolvable:$true] %s72_s18 }
  0x16   :  { %p7425_p9 = scmp.lt.u32.totalorder %s7421_s21, %s9550_s8 }
  0x18   :  { %p7427_p10 = pnand %p7425_p9, %p7422_p8 }
  0x1a   :  { %7430 = shalt.err (!%p7427_p10)
}
  0x1b   :  { %s7431_s27 = scalar_lea.vmem %s73_s18, 4096  ;;  %p7436_p12 = scmp.lt.s32.totalorder %s73_s18, %s73_s18 }
  0x1c   :  { %p7432_p11 = scmp.ne.s32.totalorder %s73_s18, %s7431_s27  ;;  %p7437_p13 = scmp.lt.s32.totalorder %s7431_s27, %s7431_s27 }
  0x1e   :  { %p7438_p0 = por %p7437_p13, %p7436_p12 }
  0x20   :  { %p7439_p1 = pnand %p7438_p0, %p7432_p11 }
  0x22   :  { %7442 = shalt.err (!%p7439_p1)
}
  0x23   :  { %s7543_s3 = smov 256   ;;  %s7544_s22 = smov 16  }
  0x24   :  { %78 = dma.hbm_to_vmem [thread:$0]  %s9550_s8, 4096, %s73_s18, [#allocation9], %s7543_s3, %s7543_s3, %s7544_s22  }
  0x25   :  { %s7545_s30 = smov [#allocation2]   ;;  %s7443_s16 = scalar_lea.hbm %s9542_s0, 1024 }
  0x26   :  { %s26_s13 = sshll.u32 %s7545_s30, 4  ;;  %p7444_p2 = scmp.ne.s32.totalorder %s9542_s0, %s7443_s16  ;;  %s27_s13 = int_to_ptr.vmem [resolvable:$true] %s26_s13 }
  0x27   :  { %p7447_p3 = scmp.lt.u32.totalorder %s7443_s16, %s9542_s0 }
  0x29   :  { %p7449_p4 = pnand %p7447_p3, %p7444_p2 }
  0x2b   :  { %7452 = shalt.err (!%p7449_p4)
}
  0x2c   :  { %s7453_s23 = scalar_lea.vmem %s27_s13, 1024  ;;  %p7458_p6 = scmp.lt.s32.totalorder %s27_s13, %s27_s13 }
  0x2d   :  { %p7454_p5 = scmp.ne.s32.totalorder %s27_s13, %s7453_s23  ;;  %p7459_p7 = scmp.lt.s32.totalorder %s7453_s23, %s7453_s23 }
  0x2f   :  { %p7460_p8 = por %p7459_p7, %p7458_p6 }
  0x31   :  { %p7461_p9 = pnand %p7460_p8, %p7454_p5 }
  0x33   :  { %7464 = shalt.err (!%p7461_p9)
}
  0x34   :  { %s7546_s8 = smov 64   ;;  %s7547_s18 = smov 4  }
  0x35   :  { %32 = dma.hbm_to_vmem [thread:$0]  %s9542_s0, 1024, %s27_s13, [#allocation3], %s7546_s8, %s7546_s8, %s7547_s18  }
  0x36   :  { %s7548_s26 = smov [#allocation7]   ;;  %s7549_s3 = smov [#allocation10]  }
  0x37   :  { %s54_s27 = sshll.u32 %s7548_s26, 4  ;;  %s86_s22 = sshll.u32 %s7549_s3, 4  ;;  %s55_s27 = int_to_ptr.vmem [resolvable:$true] %s54_s27  ;;  %s87_s22 = int_to_ptr.vmem [resolvable:$true] %s86_s22 }
  0x38   :  { %s7465_s30 = scalar_lea.hbm %s9546_s4, 1024 }
  0x39   :  { %p7466_p10 = scmp.ne.s32.totalorder %s9546_s4, %s7465_s30  ;;  %p7469_p11 = scmp.lt.u32.totalorder %s7465_s30, %s9546_s4 }
  0x3b   :  { %p7471_p12 = pnand %p7469_p11, %p7466_p10 }
  0x3d   :  { %7474 = shalt.err (!%p7471_p12)
}
  0x3e   :  { %s7475_s0 = scalar_lea.vmem %s55_s27, 1024  ;;  %p7480_p0 = scmp.lt.s32.totalorder %s55_s27, %s55_s27 }
  0x3f   :  { %p7476_p13 = scmp.ne.s32.totalorder %s55_s27, %s7475_s0  ;;  %p7481_p1 = scmp.lt.s32.totalorder %s7475_s0, %s7475_s0 }
  0x41   :  { %p7482_p2 = por %p7481_p1, %p7480_p0 }
  0x43   :  { %p7483_p3 = pnand %p7482_p2, %p7476_p13 }
  0x45   :  { %7486 = shalt.err (!%p7483_p3)
}
  0x46   :  { %60 = dma.hbm_to_vmem [thread:$0]  %s9546_s4, 1024, %s55_s27, [#allocation6], %s7546_s8, %s7546_s8, %s7547_s18  }
  0x47   :  { %s7487_s23 = scalar_lea.hbm %s9552_s10, 4096 }
  0x48   :  { %p7488_p4 = scmp.ne.s32.totalorder %s9552_s10, %s7487_s23  ;;  %p7491_p5 = scmp.lt.u32.totalorder %s7487_s23, %s9552_s10 }
  0x4a   :  { %p7493_p6 = pnand %p7491_p5, %p7488_p4 }
  0x4c   :  { %7496 = shalt.err (!%p7493_p6)
}
  0x4d   :  { %s7497_s28 = scalar_lea.vmem %s87_s22, 4096  ;;  %p7502_p8 = scmp.lt.s32.totalorder %s87_s22, %s87_s22 }
  0x4e   :  { %p7498_p7 = scmp.ne.s32.totalorder %s87_s22, %s7497_s28  ;;  %p7503_p9 = scmp.lt.s32.totalorder %s7497_s28, %s7497_s28 }
  0x50   :  { %p7504_p10 = por %p7503_p9, %p7502_p8 }
  0x52   :  { %p7505_p11 = pnand %p7504_p10, %p7498_p7 }
  0x54   :  { %7508 = shalt.err (!%p7505_p11)
}
  0x55   :  { %92 = dma.hbm_to_vmem [thread:$0]  %s9552_s10, 4096, %s87_s22, [#allocation9], %s7546_s8, %s7546_s8, %s7547_s18  }
  0x56   :  { %7531 = dma.done.wait [#allocation3], 1024  }
  0x57   :  { %7532 = vsyncadd [#allocation3], 4294966272 }
  0x58   :  { %7533 = dma.done.wait [#allocation6], 4096  }
  0x59   :  { %7534 = vsyncadd [#allocation6], 4294963200 }
  0x5a   :  { %7535 = dma.done.wait [#allocation9], 8192  }
  0x5b   :  { %7536 = vsyncadd [#allocation9], 4294959104  ;;  %v5853_v0 = vld [vmem:[#allocation2] sm:$0xff]   ;;  %v5996_v1 = vld [vmem:[#allocation2 + $0x8] sm:$0xff]   ;;  %vm757_vm0 = vcmask 261120   ;;  %vm847_vm1 = vcmask 523264  }
  0x5c   :  { %v7688_v2 = vunpack.c.l.bf16 %v5853_v0  ;;  %v7690_v3 = vunpack.c.l.bf16 %v5996_v1  ;;  %v5997_v4 = vld [vmem:[#allocation2 + $0x10] sm:$0xff]   ;;  %v7694_v5 = vunpack.c.h.bf16 %v5853_v0  ;;  %v7696_v6 = vunpack.c.h.bf16 %v5996_v1  ;;  %v5998_v7 = vld [vmem:[#allocation2 + $0x18] sm:$0xff]   ;;  %v6825_v13 = vld [vmem:[#allocation5] ss:$12 sps:$4 sm:$0xff]  }
  0x5d   :  { %v7700_v8 = vunpack.c.l.bf16 %v5997_v4  ;;  %v7702_v9 = vunpack.c.h.bf16 %v5997_v4  ;;  %v7706_v10 = vunpack.c.l.bf16 %v5998_v7  ;;  %v7708_v11 = vunpack.c.h.bf16 %v5998_v7  ;;  %v6823_v12 = vld [vmem:[#allocation5 + $0x4] ss:$12 sps:$4 sm:$0xff]   ;;  %v6826_v14 = vld [vmem:[#allocation5 + $0x1c] ss:$12 sps:$4 sm:$0xff]   ;;  %v6830_v52 = vld [vmem:[#allocation5 + $0x34] ss:$12 sps:$4 sm:$0xff]  }
  0x5e   :  { %145 = vadd.xlane.f32.xlu0 %v7688_v2  ;;  %149 = vadd.xlane.f32.xlu1 %v7690_v3  ;;  %9578 = vst [vmem:[#allocation16_spill] sm:$0xff] %v7694_v5  ;;  %v6828_v15 = vld [vmem:[#allocation5 + $0x8] ss:$12 sps:$4 sm:$0xff]   ;;  %v5999_v46 = vld [vmem:[#allocation2 + $0x20] sm:$0xff]   ;;  %v6833_v57 = vld [vmem:[#allocation5 + $0x30] ss:$12 sps:$4 sm:$0xff]  }
  0x5f   :  { %9579 = vst [vmem:[#allocation17_spill] sm:$0xff] %v7700_v8  ;;  %9580 = vst [vmem:[#allocation18_spill] sm:$0xff] %v7702_v9  ;;  %534 = vmatprep.subr.bf16.mxu0 %v6823_v12  ;;  %6344 = vmatprep.subr.bf16.mxu1 %v6828_v15  ;;  %v7752_v49 = vunpack.c.l.bf16 %v5999_v46  ;;  %v6829_v50 = vld [vmem:[#allocation5 + $0x18] ss:$12 sps:$4 sm:$0xff]   ;;  %v6000_v51 = vld [vmem:[#allocation2 + $0x28] sm:$0xff]   ;;  %v7754_v54 = vunpack.c.h.bf16 %v5999_v46 }
  0x60   :  { %9581 = vst [vmem:[#allocation19_spill] sm:$0xff] %v7706_v10  ;;  %9582 = vst [vmem:[#allocation20_spill] sm:$0xff] %v7708_v11  ;;  %535 = vmatpush1.bf16.msra.mxu0 %v6825_v13  ;;  %6345 = vmatpush3.bf16.msra.mxu1 %v6828_v15  ;;  %v6832_v53 = vld [vmem:[#allocation5 + $0x20] ss:$12 sps:$4 sm:$0xff]   ;;  %v7757_v55 = vunpack.c.l.bf16 %v6000_v51  ;;  %v6001_v56 = vld [vmem:[#allocation2 + $0x30] sm:$0xff]   ;;  %v7760_v58 = vunpack.c.h.bf16 %v6000_v51 }
  0x61   :  { %536 = vmatprep.subr.bf16.mxu0 %v6826_v14  ;;  %9583 = vst [vmem:[#allocation21_spill] sm:$0xff] %v7752_v49  ;;  %9584 = vst [vmem:[#allocation22_spill] sm:$0xff] %v7754_v54  ;;  %6346 = vmatprep.subr.bf16.mxu1 %v6832_v53  ;;  %v7763_v59 = vunpack.c.l.bf16 %v6001_v56  ;;  %v6834_v60 = vld [vmem:[#allocation5 + $0x4c] ss:$12 sps:$4 sm:$0xff]   ;;  %v6837_v63 = vld [vmem:[#allocation5 + $0x48] ss:$12 sps:$4 sm:$0xff]   ;;  %v7766_v0 = vunpack.c.h.bf16 %v6001_v56 }
  0x62   :  { %147 = vadd.xlane.f32.xlu0 %v7694_v5  ;;  %151 = vadd.xlane.f32.xlu1 %v7696_v6  ;;  %9585 = vst [vmem:[#allocation23_spill] sm:$0xff] %v7757_v55  ;;  %9586 = vst [vmem:[#allocation24_spill] sm:$0xff] %v7760_v58  ;;  %v6836_v61 = vld [vmem:[#allocation5 + $0x38] ss:$12 sps:$4 sm:$0xff]   ;;  %v6840_v7 = vld [vmem:[#allocation5 + $0x50] ss:$12 sps:$4 sm:$0xff]  }
  0x63   :  { %9587 = vst [vmem:[#allocation25_spill] sm:$0xff] %v7763_v59  ;;  %v6002_v62 = vld [vmem:[#allocation2 + $0x38] sm:$0xff]   ;;  %9588 = vst [vmem:[#allocation26_spill] sm:$0xff] %v7766_v0  ;;  %v6838_v4 = vld [vmem:[#allocation5 + $0x64] ss:$12 sps:$4 sm:$0xff]  }
  0x64   :  { %537 = vmatpush1.bf16.msra.mxu0 %v6829_v50  ;;  %6347 = vmatpush3.bf16.msra.mxu1 %v6832_v53  ;;  %v7769_v1 = vunpack.c.l.bf16 %v6002_v62  ;;  %v6841_v12 = vld [vmem:[#allocation5 + $0x60] ss:$12 sps:$4 sm:$0xff]   ;;  %v7772_v13 = vunpack.c.h.bf16 %v6002_v62  ;;  %v6842_v14 = vld [vmem:[#allocation5 + $0x7c] ss:$12 sps:$4 sm:$0xff]  }
  0x65   :  { %538 = vmatprep.subr.bf16.mxu0 %v6830_v52  ;;  %6348 = vmatprep.subr.bf16.mxu1 %v6836_v61  ;;  %v6844_v15 = vld [vmem:[#allocation5 + $0x68] ss:$12 sps:$4 sm:$0xff]  }
  0x66   :  { %153 = vadd.xlane.f32.xlu0 %v7700_v8  ;;  %155 = vadd.xlane.f32.xlu1 %v7702_v9  ;;  %9589 = vst [vmem:[#allocation27_spill] sm:$0xff] %v7769_v1  ;;  %9590 = vst [vmem:[#allocation28_spill] sm:$0xff] %v7772_v13 }
  0x68   :  { %539 = vmatpush1.bf16.msra.mxu0 %v6833_v57  ;;  %6349 = vmatpush3.bf16.msra.mxu1 %v6836_v61 }
  0x69   :  { %540 = vmatprep.subr.bf16.mxu0 %v6834_v60  ;;  %6350 = vmatprep.subr.bf16.mxu1 %v6840_v7 }
  0x6a   :  { %157 = vadd.xlane.f32.xlu0 %v7706_v10  ;;  %159 = vadd.xlane.f32.xlu1 %v7708_v11 }
  0x6c   :  { %541 = vmatpush1.bf16.msra.mxu0 %v6837_v63  ;;  %6351 = vmatpush3.bf16.msra.mxu1 %v6840_v7  ;;  %v7781_v7 = vld [vmem:[%s9543_s1] ss:$0 sm:$0xff]  ;;  %s7551_s1 = smov 96  }
  0x6d   :  { %542 = vmatprep.subr.bf16.mxu0 %v6838_v4  ;;  %6352 = vmatprep.subr.bf16.mxu1 %v6844_v15 }
  0x70   :  { %543 = vmatpush1.bf16.msra.mxu0 %v6841_v12  ;;  %6353 = vmatpush3.bf16.msra.mxu1 %v6844_v15 }
  0x71   :  { %544 = vmatprep.subr.bf16.mxu0 %v6842_v14 }
  0xeb   :  { %v146_v16 = vpop.xlane.xlu0 %145  ;;  %v150_v17 = vpop.xlane.xlu1 %149 }
  0xec   :  { %v178_v18 = vmul.f32 0.0078125, %v146_v16  ;;  %v180_v19 = vmul.f32 0.0078125, %v150_v17  ;;  %v6845_v16 = vld [vmem:[#allocation5 + $0x78] ss:$12 sps:$4 sm:$0xff]   ;;  %v6846_v17 = vld [vmem:[#allocation5 + $0x94] ss:$12 sps:$4 sm:$0xff]  }
  0xed   :  { %545 = vmatpush1.bf16.msra.mxu0 %v6845_v16 }
  0xee   :  { %v7713_v20 = vsub.f32 %v7688_v2, %v178_v18  ;;  %v7716_v21 = vsub.f32 %v7690_v3, %v180_v19  ;;  %v6848_v18 = vld [vmem:[#allocation5 + $0x80] ss:$12 sps:$4 sm:$0xff]   ;;  %v6849_v19 = vld [vmem:[#allocation5 + $0x90] ss:$12 sps:$4 sm:$0xff]   ;;  %546 = vmatprep.subr.bf16.mxu0 %v6846_v17 }
  0xef   :  { %v148_v22 = vpop.xlane.xlu0 %147  ;;  %v152_v23 = vpop.xlane.xlu1 %151  ;;  %6354 = vmatprep.subr.bf16.mxu1 %v6848_v18 }
  0xf0   :  { %v179_v24 = vmul.f32 0.0078125, %v148_v22  ;;  %v210_v25 = vmul.f32 %v7713_v20, %v7713_v20  ;;  %v181_v26 = vmul.f32 0.0078125, %v152_v23  ;;  %v212_v27 = vmul.f32 %v7716_v21, %v7716_v21  ;;  %v6850_v22 = vld [vmem:[#allocation5 + $0xac] ss:$12 sps:$4 sm:$0xff]   ;;  %6355 = vmatpush3.bf16.msra.mxu1 %v6848_v18 }
  0xf1   :  { %v6852_v23 = vld [vmem:[#allocation5 + $0x98] ss:$12 sps:$4 sm:$0xff]   ;;  %547 = vmatpush1.bf16.msra.mxu0 %v6849_v19 }
  0xf2   :  { %226 = vadd.xlane.f32.xlu0 %v210_v25  ;;  %v7723_v28 = vsub.f32 %v7694_v5, %v179_v24  ;;  %v7726_v29 = vsub.f32 %v7696_v6, %v181_v26  ;;  %v6853_v24 = vld [vmem:[#allocation5 + $0xa8] ss:$12 sps:$4 sm:$0xff]   ;;  %548 = vmatprep.subr.bf16.mxu0 %v6850_v22  ;;  %v6854_v25 = vld [vmem:[#allocation5 + $0xb0] ss:$12 sps:$4 sm:$0xff]   ;;  %v9555_v26 = vmov 0  }
  0xf3   :  { %v154_v30 = vpop.xlane.xlu0 %153  ;;  %v156_v31 = vpop.xlane.xlu1 %155  ;;  %6356 = vmatprep.subr.bf16.mxu1 %v6852_v23  ;;  %566 = vmatprep.mubr.bf16.mxu0 %v9555_v26 }
  0xf4   :  { %v182_v32 = vmul.f32 0.0078125, %v154_v30  ;;  %v211_v33 = vmul.f32 %v7723_v28, %v7723_v28  ;;  %v183_v34 = vmul.f32 0.0078125, %v156_v31  ;;  %v213_v35 = vmul.f32 %v7726_v29, %v7726_v29  ;;  %6357 = vmatpush3.bf16.msra.mxu1 %v6852_v23  ;;  %v7791_v23 = vld [vmem:[%s9544_s2] ss:$0 sm:$0xff]  ;;  %s7552_s2 = smov 32  }
  0xf5   :  { %549 = vmatpush1.bf16.msra.mxu0 %v6853_v24  ;;  %6358 = vmatprep.subr.bf16.mxu1 %v6854_v25 }
  0xf6   :  { %230 = vadd.xlane.f32.xlu0 %v212_v27  ;;  %228 = vadd.xlane.f32.xlu1 %v211_v33  ;;  %v7733_v36 = vsub.f32 %v7700_v8, %v182_v32  ;;  %v7736_v37 = vsub.f32 %v7702_v9, %v183_v34 }
  0xf7   :  { %v158_v38 = vpop.xlane.xlu0 %157  ;;  %v160_v39 = vpop.xlane.xlu1 %159 }
  0xf8   :  { %v184_v40 = vmul.f32 0.0078125, %v158_v38  ;;  %v214_v41 = vmul.f32 %v7733_v36, %v7733_v36  ;;  %v185_v42 = vmul.f32 0.0078125, %v160_v39  ;;  %v215_v43 = vmul.f32 %v7736_v37, %v7736_v37  ;;  %6359 = vmatpush3.bf16.msra.mxu1 %v6854_v25 }
  0xfa   :  { %232 = vadd.xlane.f32.xlu1 %v213_v35  ;;  %234 = vadd.xlane.f32.xlu0 %v214_v41  ;;  %v7743_v44 = vsub.f32 %v7706_v10, %v184_v40  ;;  %v7746_v45 = vsub.f32 %v7708_v11, %v185_v42 }
  0xfc   :  { %v216_v47 = vmul.f32 %v7743_v44, %v7743_v44  ;;  %v217_v48 = vmul.f32 %v7746_v45, %v7746_v45 }
  0xfe   :  { %236 = vadd.xlane.f32.xlu1 %v215_v43  ;;  %238 = vadd.xlane.f32.xlu0 %v216_v47 }
 0x102   :  { %240 = vadd.xlane.f32.xlu1 %v217_v48  ;;  %161 = vadd.xlane.f32.xlu0 %v7752_v49 }
 0x106   :  { %163 = vadd.xlane.f32.xlu1 %v7754_v54  ;;  %165 = vadd.xlane.f32.xlu0 %v7757_v55 }
 0x10a   :  { %167 = vadd.xlane.f32.xlu1 %v7760_v58  ;;  %169 = vadd.xlane.f32.xlu0 %v7763_v59 }
 0x10e   :  { %171 = vadd.xlane.f32.xlu1 %v7766_v0  ;;  %173 = vadd.xlane.f32.xlu0 %v7769_v1 }
 0x112   :  { %175 = vadd.xlane.f32.xlu1 %v7772_v13 }
 0x17f   :  { %v227_v27 = vpop.xlane.xlu0 %226 }
 0x180   :  { %v258_v30 = vmul.f32 0.0078125, %v227_v27 }
 0x182   :  { %v274_v31 = vadd.f32 1e-05, %v258_v30 }
 0x183   :  { %v229_v32 = vpop.xlane.xlu1 %228  ;;  %v231_v33 = vpop.xlane.xlu0 %230 }
 0x184   :  { %6951 = vrsqrt.f32 %v274_v31  ;;  %v259_v34 = vmul.f32 0.0078125, %v229_v32  ;;  %v260_v35 = vmul.f32 0.0078125, %v231_v33 }
 0x186   :  { %v275_v38 = vadd.f32 1e-05, %v259_v34  ;;  %v276_v39 = vadd.f32 1e-05, %v260_v35 }
 0x187   :  { %v233_v40 = vpop.xlane.xlu1 %232  ;;  %v235_v41 = vpop.xlane.xlu0 %234 }
 0x188   :  { %6953 = vrsqrt.f32 %v275_v38  ;;  %v261_v42 = vmul.f32 0.0078125, %v233_v40  ;;  %v262_v43 = vmul.f32 0.0078125, %v235_v41 }
 0x189   :  { %6955 = vrsqrt.f32 %v276_v39 }
 0x18a   :  { %v277_v46 = vadd.f32 1e-05, %v261_v42  ;;  %v278_v47 = vadd.f32 1e-05, %v262_v43 }
 0x18b   :  { %v237_v48 = vpop.xlane.xlu1 %236  ;;  %v239_v50 = vpop.xlane.xlu0 %238 }
 0x18c   :  { %6957 = vrsqrt.f32 %v277_v46  ;;  %v263_v51 = vmul.f32 0.0078125, %v237_v48  ;;  %v264_v52 = vmul.f32 0.0078125, %v239_v50 }
 0x18d   :  { %6959 = vrsqrt.f32 %v278_v47 }
 0x18e   :  { %v6952_v53 = vpop.eup %6951  ;;  %v279_v56 = vadd.f32 1e-05, %v263_v51  ;;  %v280_v57 = vadd.f32 1e-05, %v264_v52 }
 0x18f   :  { %v241_v60 = vpop.xlane.xlu1 %240  ;;  %v162_v61 = vpop.xlane.xlu0 %161  ;;  %v306_v62 = vmul.f32 %v6952_v53, %v7713_v20 }
 0x190   :  { %6961 = vrsqrt.f32 %v279_v56  ;;  %v265_v63 = vmul.f32 0.0078125, %v241_v60  ;;  %v186_v4 = vmul.f32 0.0078125, %v162_v61 }
 0x191   :  { %6963 = vrsqrt.f32 %v280_v57  ;;  %v328_v20 = vmul.f32 %v7781_v7, %v306_v62 }
 0x192   :  { %v6954_v12 = vpop.eup %6953  ;;  %v281_v14 = vadd.f32 1e-05, %v265_v63  ;;  %v7784_v15 = vsub.f32 %v7752_v49, %v186_v4 }
 0x193   :  { %v6956_v16 = vpop.eup %6955  ;;  %v164_v17 = vpop.xlane.xlu1 %163  ;;  %v307_v18 = vmul.f32 %v6954_v12, %v7723_v28  ;;  %v350_v34 = vadd.f32 %v7791_v23, %v328_v20 }
 0x194   :  { %v166_v19 = vpop.xlane.xlu0 %165  ;;  %6965 = vrsqrt.f32 %v281_v14  ;;  %v187_v22 = vmul.f32 0.0078125, %v164_v17  ;;  %v218_v24 = vmul.f32 %v7784_v15, %v7784_v15  ;;  %v308_v30 = vmul.f32 %v6956_v16, %v7716_v21 }
 0x195   :  { %v188_v25 = vmul.f32 0.0078125, %v166_v19  ;;  %v329_v27 = vmul.f32 %v7781_v7, %v307_v18 }
 0x196   :  { %v6958_v31 = vpop.eup %6957  ;;  %v7798_v28 = vsub.f32 %v7754_v54, %v187_v22  ;;  %242 = vadd.xlane.f32.xlu0 %v218_v24  ;;  %v330_v40 = vmul.f32 %v7781_v7, %v308_v30 }
 0x197   :  { %v7801_v32 = vsub.f32 %v7757_v55, %v188_v25  ;;  %v6960_v33 = vpop.eup %6959  ;;  %v351_v35 = vadd.f32 %v7791_v23, %v329_v27  ;;  %v168_v38 = vpop.xlane.xlu1 %167  ;;  %v309_v39 = vmul.f32 %v6958_v31, %v7726_v29 }
 0x198   :  { %v170_v41 = vpop.xlane.xlu0 %169  ;;  %v219_v21 = vmul.f32 %v7798_v28, %v7798_v28  ;;  %v189_v42 = vmul.f32 0.0078125, %v168_v38  ;;  %v310_v43 = vmul.f32 %v6960_v33, %v7733_v36  ;;  %v352_v29 = vadd.f32 %v7791_v23, %v330_v40 }
 0x199   :  { %v220_v46 = vmul.f32 %v7801_v32, %v7801_v32  ;;  %v366_v47 = vpack.c.bf16 %v351_v35, %v350_v34  ;;  %v331_v48 = vmul.f32 %v7781_v7, %v309_v39  ;;  %v190_v50 = vmul.f32 0.0078125, %v170_v41 }
 0x19a   :  { %v6962_v51 = vpop.eup %6961  ;;  %244 = vadd.xlane.f32.xlu1 %v219_v21  ;;  %v7815_v52 = vsub.f32 %v7760_v58, %v189_v42  ;;  %v332_v53 = vmul.f32 %v7781_v7, %v310_v43 }
 0x19b   :  { %246 = vadd.xlane.f32.xlu0 %v220_v46  ;;  %v6964_v56 = vpop.eup %6963  ;;  %567 = vmatmul.mubr.bf16.vlgmr.msra.gmra.mrb[0].mxu0 %v366_v47  ;;  %v353_v36 = vadd.f32 %v7791_v23, %v331_v48  ;;  %v311_v57 = vmul.f32 %v6962_v51, %v7736_v37  ;;  %v172_v60 = vpop.xlane.xlu1 %171  ;;  %v7821_v61 = vsub.f32 %v7763_v59, %v190_v50 }
 0x19c   :  { %6360 = vmatprep.mubr.bf16.mxu1 %v366_v47  ;;  %v174_v62 = vpop.xlane.xlu0 %173  ;;  %576 = vmatprep.mubr.bf16.mxu0 %v9555_v26  ;;  %v221_v63 = vmul.f32 %v7815_v52, %v7815_v52  ;;  %v191_v4 = vmul.f32 0.0078125, %v172_v60  ;;  %v312_v12 = vmul.f32 %v6964_v56, %v7743_v44  ;;  %v354_v20 = vadd.f32 %v7791_v23, %v332_v53 }
 0x19d   :  { %v367_v14 = vpack.c.bf16 %v353_v36, %v352_v29  ;;  %v333_v16 = vmul.f32 %v7781_v7, %v311_v57  ;;  %v222_v17 = vmul.f32 %v7821_v61, %v7821_v61  ;;  %v192_v37 = vmul.f32 0.0078125, %v174_v62 }
 0x19e   :  { %v6966_v18 = vpop.eup %6965  ;;  %248 = vadd.xlane.f32.xlu1 %v221_v63  ;;  %v334_v19 = vmul.f32 %v7781_v7, %v312_v12  ;;  %v7833_v22 = vsub.f32 %v7766_v0, %v191_v4 }
 0x19f   :  { %6361 = vmatmul.mubr.bf16.vlgmr.msra.gmra.mrb[0].mxu1 %v367_v14  ;;  %v355_v24 = vadd.f32 %v7791_v23, %v333_v16  ;;  %v313_v44 = vmul.f32 %v6966_v18, %v7746_v45  ;;  %250 = vadd.xlane.f32.xlu0 %v222_v17  ;;  %v176_v25 = vpop.xlane.xlu1 %175  ;;  %v7838_v27 = vsub.f32 %v7769_v1, %v192_v37 }
 0x1a0   :  { %v223_v30 = vmul.f32 %v7833_v22, %v7833_v22  ;;  %v193_v31 = vmul.f32 0.0078125, %v176_v25  ;;  %v356_v45 = vadd.f32 %v7791_v23, %v334_v19 }
 0x1a1   :  { %v368_v33 = vpack.c.bf16 %v355_v24, %v354_v20  ;;  %v335_v34 = vmul.f32 %v7781_v7, %v313_v44  ;;  %v224_v35 = vmul.f32 %v7838_v27, %v7838_v27 }
 0x1a2   :  { %252 = vadd.xlane.f32.xlu1 %v223_v30  ;;  %v7846_v38 = vsub.f32 %v7772_v13, %v193_v31 }
 0x1a3   :  { %577 = vmatmul.mubr.bf16.gmra.mrb[4].mxu0 %v367_v14  ;;  %6364 = vmatprep.mubr.bf16.mxu1 %v368_v33  ;;  %v357_v39 = vadd.f32 %v7791_v23, %v335_v34 }
 0x1a4   :  { %586 = vmatprep.mubr.bf16.mxu0 %v9555_v26  ;;  %v225_v40 = vmul.f32 %v7846_v38, %v7846_v38  ;;  %254 = vadd.xlane.f32.xlu0 %v224_v35 }
 0x1a5   :  { %v369_v41 = vpack.c.bf16 %v357_v39, %v356_v45 }
 0x1a6   :  { %256 = vadd.xlane.f32.xlu1 %v225_v40 }
 0x1a7   :  { %6365 = vmatmul.mubr.bf16.gmra.mrb[4].mxu1 %v369_v41 }
 0x1ab   :  { %587 = vmatmul.mubr.bf16.gmra.mrb[8].mxu0 %v368_v33 }
 0x1ac   :  { %596 = vmatprep.mubr.bf16.mxu0 %v9555_v26 }
 0x1b3   :  { %597 = vmatmul.mubr.bf16.gmra.mrb[12].mxu0 %v369_v41 }
 0x1b4   :  { %606 = vmatprep.mubr.bf16.mxu0 %v9555_v26 }
 0x223   :  { %v243_v21 = vpop.xlane.xlu0 %242 }
 0x224   :  { %v266_v42 = vmul.f32 0.0078125, %v243_v21 }
 0x226   :  { %v282_v43 = vadd.f32 1e-05, %v266_v42 }
 0x227   :  { %v245_v46 = vpop.xlane.xlu1 %244 }
 0x228   :  { %v247_v47 = vpop.xlane.xlu0 %246  ;;  %v267_v48 = vmul.f32 0.0078125, %v245_v46  ;;  %6967 = vrsqrt.f32 %v282_v43 }
 0x229   :  { %v268_v50 = vmul.f32 0.0078125, %v247_v47 }
 0x22a   :  { %v283_v51 = vadd.f32 1e-05, %v267_v48 }
 0x22b   :  { %v284_v29 = vadd.f32 1e-05, %v268_v50  ;;  %v249_v53 = vpop.xlane.xlu1 %248 }
 0x22c   :  { %6969 = vrsqrt.f32 %v283_v51  ;;  %v269_v56 = vmul.f32 0.0078125, %v249_v53  ;;  %v251_v36 = vpop.xlane.xlu0 %250 }
 0x22d   :  { %6971 = vrsqrt.f32 %v284_v29  ;;  %v270_v57 = vmul.f32 0.0078125, %v251_v36 }
 0x22e   :  { %v285_v60 = vadd.f32 1e-05, %v269_v56 }
 0x22f   :  { %v253_v62 = vpop.xlane.xlu1 %252  ;;  %v286_v63 = vadd.f32 1e-05, %v270_v57 }
 0x230   :  { %6973 = vrsqrt.f32 %v285_v60  ;;  %v271_v4 = vmul.f32 0.0078125, %v253_v62 }
 0x231   :  { %6975 = vrsqrt.f32 %v286_v63  ;;  %v255_v12 = vpop.xlane.xlu0 %254 }
 0x232   :  { %v6968_v14 = vpop.eup %6967  ;;  %v287_v16 = vadd.f32 1e-05, %v271_v4  ;;  %v272_v17 = vmul.f32 0.0078125, %v255_v12 }
 0x233   :  { %v257_v37 = vpop.xlane.xlu1 %256  ;;  %v314_v18 = vmul.f32 %v6968_v14, %v7784_v15 }
 0x234   :  { %6977 = vrsqrt.f32 %v287_v16  ;;  %v273_v20 = vmul.f32 0.0078125, %v257_v37  ;;  %v288_v19 = vadd.f32 1e-05, %v272_v17 }
 0x235   :  { %v336_v31 = vmul.f32 %v7781_v7, %v314_v18 }
 0x236   :  { %v6970_v24 = vpop.eup %6969  ;;  %v289_v44 = vadd.f32 1e-05, %v273_v20  ;;  %6979 = vrsqrt.f32 %v288_v19 }
 0x237   :  { %v6972_v25 = vpop.eup %6971  ;;  %v315_v30 = vmul.f32 %v6970_v24, %v7798_v28  ;;  %v358_v39 = vadd.f32 %v7791_v23, %v336_v31 }
 0x238   :  { %6981 = vrsqrt.f32 %v289_v44  ;;  %v316_v33 = vmul.f32 %v6972_v25, %v7801_v32 }
 0x239   :  { %v337_v34 = vmul.f32 %v7781_v7, %v315_v30 }
 0x23a   :  { %v6974_v35 = vpop.eup %6973  ;;  %v338_v45 = vmul.f32 %v7781_v7, %v316_v33 }
 0x23b   :  { %v6976_v15 = vpop.eup %6975  ;;  %v359_v40 = vadd.f32 %v7791_v23, %v337_v34  ;;  %v317_v41 = vmul.f32 %v6974_v35, %v7815_v52 }
 0x23c   :  { %v318_v21 = vmul.f32 %v6976_v15, %v7821_v61  ;;  %v360_v32 = vadd.f32 %v7791_v23, %v338_v45 }
 0x23d   :  { %v370_v28 = vpack.c.bf16 %v359_v40, %v358_v39  ;;  %v339_v42 = vmul.f32 %v7781_v7, %v317_v41 }
 0x23e   :  { %v6978_v43 = vpop.eup %6977  ;;  %v340_v48 = vmul.f32 %v7781_v7, %v318_v21 }
 0x23f   :  { %607 = vmatmul.mubr.bf16.gmra.mrb[16].mxu0 %v370_v28  ;;  %v361_v46 = vadd.f32 %v7791_v23, %v339_v42  ;;  %6368 = vmatprep.mubr.bf16.mxu1 %v370_v28  ;;  %v319_v47 = vmul.f32 %v6978_v43, %v7833_v22 }
 0x240   :  { %v6980_v50 = vpop.eup %6979  ;;  %616 = vmatprep.mubr.bf16.mxu0 %v9555_v26  ;;  %v362_v53 = vadd.f32 %v7791_v23, %v340_v48 }
 0x241   :  { %v371_v52 = vpack.c.bf16 %v361_v46, %v360_v32  ;;  %v341_v61 = vmul.f32 %v7781_v7, %v319_v47  ;;  %v320_v51 = vmul.f32 %v6980_v50, %v7838_v27 }
 0x242   :  { %v6982_v29 = vpop.eup %6981 }
 0x243   :  { %v363_v56 = vadd.f32 %v7791_v23, %v341_v61  ;;  %6369 = vmatmul.mubr.bf16.gmra.mrb[8].mxu1 %v371_v52  ;;  %v321_v36 = vmul.f32 %v6982_v29, %v7846_v38  ;;  %v342_v22 = vmul.f32 %v7781_v7, %v320_v51 }
 0x245   :  { %v372_v57 = vpack.c.bf16 %v363_v56, %v362_v53  ;;  %v343_v60 = vmul.f32 %v7781_v7, %v321_v36  ;;  %v364_v62 = vadd.f32 %v7791_v23, %v342_v22 }
 0x247   :  { %617 = vmatmul.mubr.bf16.gmra.mrb[20].mxu0 %v371_v52  ;;  %6372 = vmatprep.mubr.bf16.mxu1 %v372_v57  ;;  %v365_v63 = vadd.f32 %v7791_v23, %v343_v60 }
 0x248   :  { %626 = vmatprep.mubr.bf16.mxu0 %v9555_v26 }
 0x249   :  { %v373_v27 = vpack.c.bf16 %v365_v63, %v364_v62 }
 0x24b   :  { %6373 = vmatmul.mubr.bf16.gmra.mrb[12].mxu1 %v373_v27 }
 0x24f   :  { %627 = vmatmul.mubr.bf16.gmra.mrb[24].mxu0 %v372_v57 }
 0x250   :  { %636 = vmatprep.mubr.bf16.mxu0 %v9555_v26 }
 0x257   :  { %637 = vmatmul.mubr.bf16.gmra.mrb[28].mxu0 %v373_v27 }
 0x26e   :  { %v568_v38 = vpop.f32.mrb[0].mxu0 }
 0x26f   :  { %v570_v4 = vpop.f32.mrb[1].mxu0 }
 0x270   :  { %v572_v12 = vpop.f32.mrb[2].mxu0 }
 0x271   :  { %v7882_v14 = vpack.c.bf16 %v572_v12, %v568_v38  ;;  %v574_v7 = vpop.f32.mrb[3].mxu0 }
 0x272   :  { %v7884_v16 = vpack.c.bf16 %v574_v7, %v570_v4  ;;  %v6362_v17 = vpop.f32.mrb[0].mxu1 }
 0x273   :  { %v681_v37 = vpop.f32.mrb[1].mxu1  ;;  %6384 = vmatprep.mubr.msk.bf16.mxu1 %vm757_vm0, %v7882_v14 }
 0x274   :  { %v6363_v23 = vpop.f32.mrb[2].mxu1  ;;  %6776 = vmatprep.subr.msk.bf16.mxu1 %vm757_vm0, %v7884_v16  ;;  %1041 = vrot.lane.b32.xlu0 %v7884_v16, %s7551_s1  ;;  %v771_v18 = vsel %vm757_vm0, %v7884_v16, 0 }
 0x275   :  { %v7894_v20 = vpack.c.bf16 %v6363_v23, %v6362_v17  ;;  %v684_v19 = vpop.f32.mrb[3].mxu1  ;;  %6377 = vmatpush3.bf16.xpose.msra.mxu1 %v771_v18 }
 0x276   :  { %v7896_v24 = vpack.c.bf16 %v684_v19, %v681_v37  ;;  %v578_v44 = vpop.f32.mrb[4].mxu0 }
 0x277   :  { %v580_v25 = vpop.f32.mrb[5].mxu0 }
 0x278   :  { %v582_v30 = vpop.f32.mrb[6].mxu0  ;;  %1029 = vrot.lane.b32.xlu0 %v7882_v14, %s7551_s1 }
 0x279   :  { %v7900_v31 = vpack.c.bf16 %v582_v30, %v578_v44  ;;  %v584_v33 = vpop.f32.mrb[7].mxu0 }
 0x27a   :  { %v7902_v34 = vpack.c.bf16 %v584_v33, %v580_v25  ;;  %v6366_v35 = vpop.f32.mrb[4].mxu1 }
 0x27b   :  { %v697_v45 = vpop.f32.mrb[5].mxu1 }
 0x27c   :  { %1043 = vrot.lane.b32.xlu1 %v7902_v34, %s7551_s1  ;;  %v6367_v15 = vpop.f32.mrb[6].mxu1  ;;  %6777 = vmatprep.subr.msk.bf16.mxu1 %vm757_vm0, %v7902_v34  ;;  %v774_v39 = vsel %vm757_vm0, %v7902_v34, 0 }
 0x27d   :  { %v7910_v40 = vpack.c.bf16 %v6367_v15, %v6366_v35  ;;  %v700_v41 = vpop.f32.mrb[7].mxu1  ;;  %6379 = vmatpush3.bf16.xpose.msra.mxu1 %v774_v39 }
 0x27e   :  { %v7912_v21 = vpack.c.bf16 %v700_v41, %v697_v45  ;;  %v588_v28 = vpop.f32.mrb[8].mxu0 }
 0x27f   :  { %v590_v42 = vpop.f32.mrb[9].mxu0 }
 0x280   :  { %v592_v43 = vpop.f32.mrb[10].mxu0 }
 0x281   :  { %v7914_v32 = vpack.c.bf16 %v592_v43, %v588_v28  ;;  %v594_v46 = vpop.f32.mrb[11].mxu0 }
 0x282   :  { %v7916_v47 = vpack.c.bf16 %v594_v46, %v590_v42 }
 0x283   :  { %1033 = vrot.lane.b32.xlu0 %v7914_v32, %s7551_s1 }
 0x284   :  { %1045 = vrot.lane.b32.xlu1 %v7916_v47, %s7551_s1  ;;  %6778 = vmatprep.subr.msk.bf16.mxu1 %vm757_vm0, %v7916_v47  ;;  %v777_v48 = vsel %vm757_vm0, %v7916_v47, 0 }
 0x285   :  { %6381 = vmatpush3.bf16.xpose.msra.mxu1 %v777_v48 }
 0x286   :  { %v598_v50 = vpop.f32.mrb[12].mxu0 }
 0x287   :  { %v600_v52 = vpop.f32.mrb[13].mxu0 }
 0x288   :  { %v602_v61 = vpop.f32.mrb[14].mxu0 }
 0x289   :  { %v7926_v51 = vpack.c.bf16 %v602_v61, %v598_v50  ;;  %v604_v29 = vpop.f32.mrb[15].mxu0 }
 0x28a   :  { %v7928_v53 = vpack.c.bf16 %v604_v29, %v600_v52 }
 0x28c   :  { %1047 = vrot.lane.b32.xlu1 %v7928_v53, %s7551_s1  ;;  %6779 = vmatprep.subr.msk.bf16.mxu1 %vm757_vm0, %v7928_v53  ;;  %v780_v56 = vsel %vm757_vm0, %v7928_v53, 0 }
 0x28d   :  { %6383 = vmatpush3.bf16.xpose.msra.mxu1 %v780_v56 }
 0x28e   :  { %6392 = vmatprep.subr.bf16.mxu1 %v7896_v24 }
 0x290   :  { %1031 = vrot.lane.b32.xlu1 %v7900_v31, %s7551_s1 }
 0x294   :  { %1035 = vrot.lane.b32.xlu1 %v7926_v51, %s7551_s1  ;;  %6385 = vmatmul.mubr.msk.bf16.vlgmr.msra.gmra.mrb[16].mxu1 %vm757_vm0, %v7900_v31 }
 0x295   :  { %6388 = vmatprep.mubr.msk.bf16.mxu1 %vm757_vm0, %v7914_v32  ;;  %6393 = vmatpush3.bf16.msra.mxu1 %v7896_v24 }
 0x296   :  { %6394 = vmatprep.subr.bf16.mxu1 %v7894_v20 }
 0x299   :  { %6395 = vmatpush3.bf16.msra.mxu1 %v7894_v20 }
 0x29a   :  { %6396 = vmatprep.subr.bf16.mxu1 %v7912_v21 }
 0x29c   :  { %6389 = vmatmul.mubr.msk.bf16.gmra.mrb[20].mxu1 %vm757_vm0, %v7926_v51 }
 0x29d   :  { %6397 = vmatpush3.bf16.msra.mxu1 %v7912_v21 }
 0x29e   :  { %6398 = vmatprep.subr.bf16.mxu1 %v7910_v40 }
 0x2a1   :  { %6399 = vmatpush3.bf16.msra.mxu1 %v7910_v40 }
 0x2e6   :  { %v1042_v36 = vpop.permute.xlu0 %1041 }
 0x2e7   :  { %6780 = vmatprep.subr.msk.bf16.mxu0 %vm757_vm0, %v1042_v36  ;;  %v1062_v22 = vsel %vm757_vm0, %v1042_v36, 0 }
 0x2e8   :  { %6409 = vmatpush3.bf16.xpose.msra.mxu0 %v1062_v22 }
 0x2ea   :  { %v1030_v57 = vpop.permute.xlu0 %1029 }
 0x2eb   :  { %6416 = vmatprep.mubr.msk.bf16.mxu0 %vm757_vm0, %v1030_v57 }
 0x2ee   :  { %v1044_v60 = vpop.permute.xlu1 %1043 }
 0x2ef   :  { %6781 = vmatprep.subr.msk.bf16.mxu0 %vm757_vm0, %v1044_v60  ;;  %v1065_v62 = vsel %vm757_vm0, %v1044_v60, 0 }
 0x2f0   :  { %6411 = vmatpush3.bf16.xpose.msra.mxu0 %v1065_v62 }
 0x2f5   :  { %v1034_v7 = vpop.permute.xlu0 %1033 }
 0x2f6   :  { %v1046_v63 = vpop.permute.xlu1 %1045 }
 0x2f7   :  { %6782 = vmatprep.subr.msk.bf16.mxu0 %vm757_vm0, %v1046_v63  ;;  %v1068_v27 = vsel %vm757_vm0, %v1046_v63, 0 }
 0x2f8   :  { %6413 = vmatpush3.bf16.xpose.msra.mxu0 %v1068_v27 }
 0x2fe   :  { %v1048_v38 = vpop.permute.xlu1 %1047 }
 0x2ff   :  { %6783 = vmatprep.subr.msk.bf16.mxu0 %vm757_vm0, %v1048_v38  ;;  %v1071_v4 = vsel %vm757_vm0, %v1048_v38, 0 }
 0x300   :  { %6415 = vmatpush3.bf16.xpose.msra.mxu0 %v1071_v4 }
 0x302   :  { %v1032_v12 = vpop.permute.xlu1 %1031 }
 0x306   :  { %v1036_v17 = vpop.permute.xlu1 %1035 }
 0x307   :  { %6417 = vmatmul.mubr.msk.bf16.vlgmr.msra.gmra.mrb[32].mxu0 %vm757_vm0, %v1032_v12 }
 0x308   :  { %6420 = vmatprep.mubr.msk.bf16.mxu0 %vm757_vm0, %v1034_v7 }
 0x30f   :  { %6421 = vmatmul.mubr.msk.bf16.gmra.mrb[36].mxu0 %vm757_vm0, %v1036_v17 }
 0x312   :  { %v608_v37 = vpop.f32.mrb[16].mxu0 }
 0x313   :  { %v610_v23 = vpop.f32.mrb[17].mxu0 }
 0x314   :  { %v612_v18 = vpop.f32.mrb[18].mxu0 }
 0x315   :  { %v7966_v19 = vpack.c.bf16 %v612_v18, %v608_v37  ;;  %v614_v44 = vpop.f32.mrb[19].mxu0 }
 0x316   :  { %v7968_v25 = vpack.c.bf16 %v614_v44, %v610_v23  ;;  %v6370_v30 = vpop.f32.mrb[8].mxu1 }
 0x317   :  { %v713_v33 = vpop.f32.mrb[9].mxu1 }
 0x318   :  { %v6371_v35 = vpop.f32.mrb[10].mxu1 }
 0x319   :  { %v7970_v45 = vpack.c.bf16 %v6371_v35, %v6370_v30  ;;  %v716_v15 = vpop.f32.mrb[11].mxu1 }
 0x31a   :  { %v618_v39 = vpop.f32.mrb[20].mxu0  ;;  %v7972_v41 = vpack.c.bf16 %v716_v15, %v713_v33 }
 0x31b   :  { %v620_v28 = vpop.f32.mrb[21].mxu0 }
 0x31c   :  { %v622_v42 = vpop.f32.mrb[22].mxu0 }
 0x31d   :  { %v7974_v43 = vpack.c.bf16 %v622_v42, %v618_v39  ;;  %v624_v46 = vpop.f32.mrb[23].mxu0 }
 0x31e   :  { %v7976_v48 = vpack.c.bf16 %v624_v46, %v620_v28  ;;  %v6374_v50 = vpop.f32.mrb[12].mxu1 }
 0x31f   :  { %v729_v52 = vpop.f32.mrb[13].mxu1 }
 0x320   :  { %v6375_v61 = vpop.f32.mrb[14].mxu1 }
 0x321   :  { %v7978_v29 = vpack.c.bf16 %v6375_v61, %v6374_v50  ;;  %v732_v56 = vpop.f32.mrb[15].mxu1 }
 0x322   :  { %v628_v36 = vpop.f32.mrb[24].mxu0  ;;  %v7980_v22 = vpack.c.bf16 %v732_v56, %v729_v52 }
 0x323   :  { %v630_v57 = vpop.f32.mrb[25].mxu0 }
 0x324   :  { %v632_v60 = vpop.f32.mrb[26].mxu0 }
 0x325   :  { %v7982_v62 = vpack.c.bf16 %v632_v60, %v628_v36  ;;  %v634_v63 = vpop.f32.mrb[27].mxu0 }
 0x326   :  { %v7984_v27 = vpack.c.bf16 %v634_v63, %v630_v57 }
 0x32a   :  { %v638_v38 = vpop.f32.mrb[28].mxu0 }
 0x32b   :  { %v640_v4 = vpop.f32.mrb[29].mxu0 }
 0x32c   :  { %v642_v12 = vpop.f32.mrb[30].mxu0 }
 0x32d   :  { %v7986_v7 = vpack.c.bf16 %v642_v12, %v638_v38  ;;  %v644_v17 = vpop.f32.mrb[31].mxu0 }
 0x32e   :  { %v7988_v37 = vpack.c.bf16 %v644_v17, %v640_v4 }
 0x367   :  { %v6386_v23 = vpop.f32.mrb[16].mxu1 }
 0x368   :  { %v816_v18 = vpop.f32.mrb[17].mxu1  ;;  %v854_v44 = vsel %vm847_vm1, %v6386_v23, -inf }
 0x369   :  { %855 = vmax.xlane.f32.xlu0 %v854_v44  ;;  %v6387_v30 = vpop.f32.mrb[18].mxu1  ;;  %v848_v15 = vsel %vm847_vm1, %v816_v18, -inf }
 0x36a   :  { %v819_v33 = vpop.f32.mrb[19].mxu1  ;;  %v857_v42 = vsel %vm847_vm1, %v6387_v30, -inf }
 0x36b   :  { %v851_v35 = vsel %vm847_vm1, %v819_v33, -inf }
 0x36c   :  { %852 = vmax.xlane.f32.xlu1 %v851_v35 }
 0x36d   :  { %849 = vmax.xlane.f32.xlu0 %v848_v15 }
 0x36f   :  { %v7993_v39 = vpop.f32.mrb[20].mxu1 }
 0x370   :  { %v7995_v28 = vpop.f32.mrb[21].mxu1  ;;  %v866_v36 = vsel %vm847_vm1, %v7993_v39, -inf }
 0x371   :  { %858 = vmax.xlane.f32.xlu0 %v857_v42  ;;  %v6391_v46 = vpop.f32.mrb[22].mxu1  ;;  %v860_v61 = vsel %vm847_vm1, %v7995_v28, -inf }
 0x372   :  { %v7998_v50 = vpop.f32.mrb[23].mxu1  ;;  %v869_v52 = vsel %vm847_vm1, %v6391_v46, -inf }
 0x373   :  { %870 = vmax.xlane.f32.xlu1 %v869_v52  ;;  %v863_v56 = vsel %vm847_vm1, %v7998_v50, -inf }
 0x375   :  { %861 = vmax.xlane.f32.xlu0 %v860_v61 }
 0x377   :  { %864 = vmax.xlane.f32.xlu1 %v863_v56 }
 0x379   :  { %867 = vmax.xlane.f32.xlu0 %v866_v36 }
 0x3da   :  { %v8007_v57 = vpop.f32.mrb[32].mxu0 }
 0x3db   :  { %v8009_v60 = vpop.f32.mrb[33].mxu0  ;;  %v1144_v17 = vsel %vm847_vm1, %v8007_v57, -inf }
 0x3dc   :  { %v8011_v63 = vpop.f32.mrb[34].mxu0  ;;  %v1138_v38 = vsel %vm847_vm1, %v8009_v60, -inf }
 0x3dd   :  { %1139 = vmax.xlane.f32.xlu0 %v1138_v38  ;;  %v8015_v4 = vpop.f32.mrb[35].mxu0  ;;  %v1147_v12 = vsel %vm847_vm1, %v8011_v63, -inf }
 0x3de   :  { %1148 = vmax.xlane.f32.xlu1 %v1147_v12  ;;  %v1141_v44 = vsel %vm847_vm1, %v8015_v4, -inf }
 0x3e1   :  { %1145 = vmax.xlane.f32.xlu0 %v1144_v17 }
 0x3e2   :  { %1142 = vmax.xlane.f32.xlu1 %v1141_v44  ;;  %v8023_v35 = vpop.f32.mrb[36].mxu0 }
 0x3e3   :  { %v8025_v15 = vpop.f32.mrb[37].mxu0  ;;  %v1156_v36 = vsel %vm847_vm1, %v8023_v35, -inf }
 0x3e4   :  { %v8027_v42 = vpop.f32.mrb[38].mxu0  ;;  %v1150_v52 = vsel %vm847_vm1, %v8025_v15, -inf }
 0x3e5   :  { %1151 = vmax.xlane.f32.xlu0 %v1150_v52  ;;  %v8031_v61 = vpop.f32.mrb[39].mxu0  ;;  %v1159_v56 = vsel %vm847_vm1, %v8027_v42, -inf }
 0x3e6   :  { %1160 = vmax.xlane.f32.xlu1 %v1159_v56  ;;  %v1153_v38 = vsel %vm847_vm1, %v8031_v61, -inf }
 0x3e9   :  { %1157 = vmax.xlane.f32.xlu0 %v1156_v36 }
 0x3ea   :  { %1154 = vmax.xlane.f32.xlu1 %v1153_v38 }
 0x3f6   :  { %v856_v12 = vpop.xlane.xlu0 %855 }
 0x3f7   :  { %v874_v17 = vsub.f32 %v6386_v23, %v856_v12 }
 0x3f9   :  { %v884_v44 = vmul.f32 1.442695, %v874_v17  ;;  %v853_v26 = vpop.xlane.xlu1 %852 }
 0x3fa   :  { %v850_v0 = vpop.xlane.xlu0 %849  ;;  %v873_v13 = vsub.f32 %v819_v33, %v853_v26 }
 0x3fb   :  { %6983 = vpow2.f32 %v884_v44  ;;  %v872_v52 = vsub.f32 %v816_v18, %v850_v0 }
 0x3fc   :  { %v882_v58 = vmul.f32 1.442695, %v873_v13 }
 0x3fd   :  { %v880_v59 = vmul.f32 1.442695, %v872_v52 }
 0x3fe   :  { %v859_v1 = vpop.xlane.xlu0 %858 }
 0x3ff   :  { %6985 = vpow2.f32 %v880_v59  ;;  %v875_v56 = vsub.f32 %v6387_v30, %v859_v1 }
 0x400   :  { %v871_v54 = vpop.xlane.xlu1 %870 }
 0x401   :  { %v886_v49 = vmul.f32 1.442695, %v875_v56  ;;  %v879_v36 = vsub.f32 %v6391_v46, %v871_v54 }
 0x402   :  { %v862_v55 = vpop.xlane.xlu0 %861 }
 0x403   :  { %6987 = vpow2.f32 %v886_v49  ;;  %v876_v38 = vsub.f32 %v7995_v28, %v862_v55  ;;  %v894_v12 = vmul.f32 1.442695, %v879_v36 }
 0x404   :  { %v865_v9 = vpop.xlane.xlu1 %864  ;;  %6989 = vpow2.f32 %v882_v58 }
 0x405   :  { %v8040_v23 = vpop.eup %6983  ;;  %v877_v0 = vsub.f32 %v7998_v50, %v865_v9  ;;  %v888_v13 = vmul.f32 1.442695, %v876_v38  ;;  %6991 = vpow2.f32 %v894_v12 }
 0x406   :  { %v868_v26 = vpop.xlane.xlu0 %867  ;;  %v902_v59 = vsel %vm847_vm1, %v8040_v23, 0.0 }
 0x407   :  { %v878_v1 = vsub.f32 %v7993_v39, %v868_v26  ;;  %903 = vadd.xlane.f32.xlu0 %v902_v59  ;;  %v890_v49 = vmul.f32 1.442695, %v877_v0 }
 0x409   :  { %v8046_v54 = vpop.eup %6985  ;;  %v892_v55 = vmul.f32 1.442695, %v878_v1 }
 0x40a   :  { %v896_v18 = vsel %vm847_vm1, %v8046_v54, 0.0 }
 0x40b   :  { %6993 = vpow2.f32 %v892_v55  ;;  %897 = vadd.xlane.f32.xlu0 %v896_v18 }
 0x40c   :  { %6995 = vpow2.f32 %v888_v13 }
 0x40d   :  { %v8050_v9 = vpop.eup %6987  ;;  %6997 = vpow2.f32 %v890_v49 }
 0x40e   :  { %v905_v58 = vsel %vm847_vm1, %v8050_v9, 0.0  ;;  %v8054_v30 = vpop.eup %6989 }
 0x40f   :  { %906 = vadd.xlane.f32.xlu1 %v905_v58  ;;  %v899_v33 = vsel %vm847_vm1, %v8054_v30, 0.0  ;;  %v8058_v39 = vpop.eup %6991 }
 0x410   :  { %v917_v50 = vsel %vm847_vm1, %v8058_v39, 0.0 }
 0x413   :  { %900 = vadd.xlane.f32.xlu1 %v899_v33 }
 0x415   :  { %v8060_v28 = vpop.eup %6993 }
 0x416   :  { %v8062_v46 = vpop.eup %6995  ;;  %v914_v17 = vsel %vm847_vm1, %v8060_v28, 0.0 }
 0x417   :  { %v8068_v44 = vpop.eup %6997  ;;  %918 = vadd.xlane.f32.xlu1 %v917_v50  ;;  %915 = vadd.xlane.f32.xlu0 %v914_v17  ;;  %v908_v56 = vsel %vm847_vm1, %v8062_v46, 0.0 }
 0x418   :  { %v911_v52 = vsel %vm847_vm1, %v8068_v44, 0.0 }
 0x41b   :  { %912 = vadd.xlane.f32.xlu1 %v911_v52  ;;  %909 = vadd.xlane.f32.xlu0 %v908_v56 }
 0x42c   :  { %1236 = vrot.lane.b32.xlu1 %v7894_v20, %s7551_s1 }
 0x430   :  { %1238 = vrot.lane.b32.xlu1 %v7912_v21, %s7551_s1 }
 0x46a   :  { %v1140_v36 = vpop.xlane.xlu0 %1139 }
 0x46b   :  { %v1149_v38 = vpop.xlane.xlu1 %1148  ;;  %v1162_v0 = vsub.f32 %v8009_v60, %v1140_v36 }
 0x46c   :  { %v1165_v12 = vsub.f32 %v8011_v63, %v1149_v38 }
 0x46d   :  { %v1170_v55 = vmul.f32 1.442695, %v1162_v0 }
 0x46e   :  { %v1176_v26 = vmul.f32 1.442695, %v1165_v12  ;;  %v1146_v59 = vpop.xlane.xlu0 %1145 }
 0x46f   :  { %v1164_v1 = vsub.f32 %v8007_v57, %v1146_v59  ;;  %v1143_v13 = vpop.xlane.xlu1 %1142 }
 0x470   :  { %6999 = vpow2.f32 %v1176_v26  ;;  %v1163_v49 = vsub.f32 %v8015_v4, %v1143_v13 }
 0x471   :  { %v1174_v18 = vmul.f32 1.442695, %v1164_v1 }
 0x472   :  { %v1172_v58 = vmul.f32 1.442695, %v1163_v49  ;;  %v1152_v33 = vpop.xlane.xlu0 %1151 }
 0x473   :  { %7001 = vpow2.f32 %v1174_v18  ;;  %v1166_v50 = vsub.f32 %v8025_v15, %v1152_v33  ;;  %v1161_v0 = vpop.xlane.xlu1 %1160 }
 0x474   :  { %7003 = vpow2.f32 %v1172_v58 }
 0x475   :  { %7005 = vpow2.f32 %v1170_v55  ;;  %v1178_v63 = vmul.f32 1.442695, %v1166_v50 }
 0x476   :  { %v1158_v26 = vpop.xlane.xlu0 %1157 }
 0x477   :  { %7007 = vpow2.f32 %v1178_v63  ;;  %v1155_v1 = vpop.xlane.xlu1 %1154  ;;  %v1168_v55 = vsub.f32 %v8023_v35, %v1158_v26 }
 0x478   :  { %v1167_v63 = vsub.f32 %v8031_v61, %v1155_v1 }
 0x479   :  { %v1182_v58 = vmul.f32 1.442695, %v1168_v55 }
 0x47a   :  { %v8083_v60 = vpop.eup %6999  ;;  %v1180_v26 = vmul.f32 1.442695, %v1167_v63 }
 0x47b   :  { %v1195_v57 = vsel %vm847_vm1, %v8083_v60, 0.0 }
 0x47c   :  { %1196 = vadd.xlane.f32.xlu1 %v1195_v57 }
 0x47d   :  { %v8087_v17 = vpop.eup %7001 }
 0x47e   :  { %v8089_v4 = vpop.eup %7003  ;;  %v1192_v52 = vsel %vm847_vm1, %v8087_v17, 0.0 }
 0x47f   :  { %v8093_v56 = vpop.eup %7005  ;;  %1193 = vadd.xlane.f32.xlu0 %v1192_v52  ;;  %v1189_v15 = vsel %vm847_vm1, %v8089_v4, 0.0 }
 0x480   :  { %1190 = vadd.xlane.f32.xlu1 %v1189_v15  ;;  %v1186_v38 = vsel %vm847_vm1, %v8093_v56, 0.0 }
 0x481   :  { %v8097_v36 = vpop.eup %7007 }
 0x482   :  { %v1198_v12 = vsel %vm847_vm1, %v8097_v36, 0.0 }
 0x483   :  { %1187 = vadd.xlane.f32.xlu0 %v1186_v38 }
 0x484   :  { %1199 = vadd.xlane.f32.xlu1 %v1198_v12  ;;  %v1169_v12 = vsub.f32 %v8027_v42, %v1161_v0 }
 0x486   :  { %v1184_v55 = vmul.f32 1.442695, %v1169_v12 }
 0x494   :  { %v904_v59 = vpop.xlane.xlu0 %903 }
 0x495   :  { %1240 = vrot.lane.b32.xlu1 %v7910_v40, %s7551_s1 }
 0x498   :  { %v898_v13 = vpop.xlane.xlu0 %897 }
 0x499   :  { %1234 = vrot.lane.b32.xlu0 %v7896_v24, %s7551_s1  ;;  %1520 = vrot.lane.b32.xlu1 %v7902_v34, %s7546_s8 }
 0x49c   :  { %v907_v49 = vpop.xlane.xlu1 %906 }
 0x49d   :  { %1522 = vrot.lane.b32.xlu1 %v7916_v47, %s7546_s8  ;;  %7009 = vrcp.f32 %v907_v49 }
 0x49e   :  { %7011 = vrcp.f32 %v898_v13 }
 0x49f   :  { %7013 = vrcp.f32 %v904_v59 }
 0x4a0   :  { %v901_v18 = vpop.xlane.xlu1 %900 }
 0x4a1   :  { %7015 = vrcp.f32 %v901_v18  ;;  %1524 = vrot.lane.b32.xlu1 %v7928_v53, %s7546_s8 }
 0x4a4   :  { %v919_v33 = vpop.xlane.xlu1 %918  ;;  %v916_v50 = vpop.xlane.xlu0 %915 }
 0x4a5   :  { %1512 = vrot.lane.b32.xlu1 %v7900_v31, %s7546_s8  ;;  %7017 = vrcp.f32 %v919_v33 }
 0x4a6   :  { %7019 = vrcp.f32 %v916_v50 }
 0x4a7   :  { %v7010_v57 = vpop.eup %7009  ;;  %7021 = vpow2.f32 %v1182_v58 }
 0x4a8   :  { %v913_v52 = vpop.xlane.xlu1 %912  ;;  %v910_v35 = vpop.xlane.xlu0 %909  ;;  %v931_v13 = vmul.f32 %v7010_v57, %v8050_v9 }
 0x4a9   :  { %v7012_v15 = vpop.eup %7011  ;;  %7023 = vrcp.f32 %v913_v52  ;;  %1516 = vrot.lane.b32.xlu1 %v7926_v51, %s7546_s8 }
 0x4aa   :  { %v7014_v38 = vpop.eup %7013  ;;  %7025 = vrcp.f32 %v910_v35  ;;  %v928_v61 = vmul.f32 %v7012_v15, %v8046_v54  ;;  %v6858_v35 = vld [vmem:[#allocation7 + $0x8] sm:$0xff]  }
 0x4ab   :  { %v7016_v59 = vpop.eup %7015  ;;  %v930_v49 = vmul.f32 %v7014_v38, %v8040_v23  ;;  %7027 = vpow2.f32 %v1180_v26 }
 0x4ac   :  { %v929_v1 = vmul.f32 %v7016_v59, %v8054_v30  ;;  %7029 = vpow2.f32 %v1184_v55 }
 0x4ad   :  { %1912 = vrot.lane.b32.xlu1 %v7902_v34, %s7552_s2  ;;  %v937_v58 = vpack.c.bf16 %v931_v13, %v930_v49 }
 0x4ae   :  { %v936_v18 = vpack.c.bf16 %v929_v1, %v928_v61 }
 0x4af   :  { %v7018_v42 = vpop.eup %7017 }
 0x4b0   :  { %6400 = vmatprep.mubr.msk.bf16.mxu1 %vm847_vm1, %v936_v18  ;;  %v7020_v0 = vpop.eup %7019  ;;  %v935_v33 = vmul.f32 %v7018_v42, %v8058_v39 }
 0x4b1   :  { %1916 = vrot.lane.b32.xlu1 %v7928_v53, %s7552_s2  ;;  %6401 = vmatmul.mubr.msk.bf16.vlgmr.msra.gmra.mrb[24].mxu1 %vm847_vm1, %v937_v58  ;;  %v8130_v54 = vpop.eup %7021  ;;  %v934_v30 = vmul.f32 %v7020_v0, %v8060_v28  ;;  %v6855_v58 = vld [vmem:[#allocation7 + $0x10] sm:$0xff]  }
 0x4b2   :  { %v1204_v53 = vsel %vm847_vm1, %v8130_v54, 0.0 }
 0x4b3   :  { %v7024_v23 = vpop.eup %7023  ;;  %v939_v52 = vpack.c.bf16 %v935_v33, %v934_v30 }
 0x4b4   :  { %v7026_v9 = vpop.eup %7025  ;;  %v933_v34 = vmul.f32 %v7024_v23, %v8068_v44  ;;  %v6856_v23 = vld [vmem:[#allocation7 + $0x18] sm:$0xff]  }
 0x4b5   :  { %1904 = vrot.lane.b32.xlu1 %v7900_v31, %s7552_s2  ;;  %v932_v50 = vmul.f32 %v7026_v9, %v8062_v46  ;;  %v8140_v57 = vpop.eup %7027  ;;  %v1237_v46 = vpop.permute.xlu1 %1236 }
 0x4b6   :  { %v1201_v31 = vsel %vm847_vm1, %v8140_v57, 0.0  ;;  %v8148_v39 = vpop.eup %7029 }
 0x4b7   :  { %v938_v63 = vpack.c.bf16 %v933_v34, %v932_v50  ;;  %v1207_v28 = vsel %vm847_vm1, %v8148_v39, 0.0 }
 0x4b8   :  { %1205 = vadd.xlane.f32.xlu0 %v1204_v53 }
 0x4b9   :  { %6404 = vmatprep.mubr.msk.bf16.mxu1 %vm847_vm1, %v938_v63  ;;  %1908 = vrot.lane.b32.xlu1 %v7926_v51, %s7552_s2  ;;  %v6857_v51 = vld [vmem:[#allocation7] sm:$0xff]   ;;  %v1239_v44 = vpop.permute.xlu1 %1238 }
 0x4ba   :  { %6405 = vmatmul.mubr.msk.bf16.gmra.mrb[28].mxu1 %vm847_vm1, %v939_v52  ;;  %6452 = vmatprep.subr.bf16.mxu0 %v6857_v51 }
 0x4bb   :  { %6453 = vmatpush3.bf16.msra.mxu0 %v6857_v51 }
 0x4bc   :  { %1202 = vadd.xlane.f32.xlu0 %v1201_v31  ;;  %6454 = vmatprep.subr.bf16.mxu0 %v6858_v35 }
 0x4bf   :  { %6455 = vmatpush3.bf16.msra.mxu0 %v6858_v35 }
 0x4c0   :  { %1208 = vadd.xlane.f32.xlu0 %v1207_v28 }
 0x4d6   :  { %1518 = vrot.lane.b32.xlu0 %v7884_v16, %s7546_s8 }
 0x4da   :  { %1510 = vrot.lane.b32.xlu0 %v7882_v14, %s7546_s8 }
 0x4de   :  { %1514 = vrot.lane.b32.xlu0 %v7914_v32, %s7546_s8 }
 0x4e2   :  { %1910 = vrot.lane.b32.xlu0 %v7884_v16, %s7552_s2 }
 0x4e6   :  { %1914 = vrot.lane.b32.xlu0 %v7916_v47, %s7552_s2 }
 0x4ea   :  { %1902 = vrot.lane.b32.xlu0 %v7882_v14, %s7552_s2 }
 0x4ee   :  { %1906 = vrot.lane.b32.xlu0 %v7914_v32, %s7552_s2 }
 0x509   :  { %v1197_v15 = vpop.xlane.xlu1 %1196 }
 0x50c   :  { %v1194_v38 = vpop.xlane.xlu0 %1193 }
 0x50d   :  { %v1191_v16 = vpop.xlane.xlu1 %1190 }
 0x50e   :  { %7031 = vrcp.f32 %v1191_v16 }
 0x510   :  { %v1188_v12 = vpop.xlane.xlu0 %1187 }
 0x511   :  { %7033 = vrcp.f32 %v1188_v12  ;;  %v1200_v14 = vpop.xlane.xlu1 %1199 }
 0x512   :  { %7035 = vrcp.f32 %v1194_v38 }
 0x513   :  { %7037 = vrcp.f32 %v1197_v15 }
 0x514   :  { %v1235_v47 = vpop.permute.xlu0 %1234  ;;  %7039 = vrcp.f32 %v1200_v14 }
 0x515   :  { %6424 = vmatprep.subr.bf16.mxu1 %v1235_v47  ;;  %v1241_v49 = vpop.permute.xlu1 %1240 }
 0x516   :  { %6425 = vmatpush3.bf16.msra.mxu1 %v1235_v47 }
 0x517   :  { %6426 = vmatprep.subr.bf16.mxu1 %v1237_v46 }
 0x518   :  { %v7032_v26 = vpop.eup %7031 }
 0x519   :  { %v1219_v61 = vmul.f32 %v7032_v26, %v8089_v4 }
 0x51a   :  { %6427 = vmatpush3.bf16.msra.mxu1 %v1237_v46 }
 0x51b   :  { %v7034_v32 = vpop.eup %7033  ;;  %6428 = vmatprep.subr.bf16.mxu1 %v1239_v44 }
 0x51c   :  { %v7036_v59 = vpop.eup %7035  ;;  %v1218_v13 = vmul.f32 %v7034_v32, %v8093_v56 }
 0x51d   :  { %v7038_v1 = vpop.eup %7037  ;;  %v1220_v18 = vmul.f32 %v7036_v59, %v8087_v17 }
 0x51e   :  { %6429 = vmatpush3.bf16.msra.mxu1 %v1239_v44  ;;  %v1226_v55 = vpack.c.bf16 %v1219_v61, %v1218_v13  ;;  %v1221_v42 = vmul.f32 %v7038_v1, %v8083_v60  ;;  %v7040_v34 = vpop.eup %7039  ;;  %v1521_v1 = vpop.permute.xlu1 %1520 }
 0x51f   :  { %6430 = vmatprep.subr.bf16.mxu1 %v1241_v49  ;;  %v1222_v30 = vmul.f32 %v7040_v34, %v8097_v36 }
 0x520   :  { %6432 = vmatprep.mubr.msk.bf16.mxu1 %vm847_vm1, %v1226_v55  ;;  %v1227_v0 = vpack.c.bf16 %v1221_v42, %v1220_v18 }
 0x522   :  { %6431 = vmatpush3.bf16.msra.mxu1 %v1241_v49  ;;  %v1542_v49 = vsel %vm757_vm0, %v1521_v1, 0  ;;  %v1523_v55 = vpop.permute.xlu1 %1522 }
 0x523   :  { %6440 = vmatprep.subr.bf16.mxu1 %v6855_v58 }
 0x525   :  { %6433 = vmatmul.mubr.msk.bf16.vlgmr.msra.gmra.mrb[32].mxu1 %vm847_vm1, %v1227_v0 }
 0x526   :  { %6441 = vmatpush3.bf16.msra.mxu1 %v6855_v58  ;;  %v1545_v58 = vsel %vm757_vm0, %v1523_v55, 0  ;;  %v1525_v42 = vpop.permute.xlu1 %1524 }
 0x527   :  { %6442 = vmatprep.subr.bf16.mxu1 %v6856_v23 }
 0x52a   :  { %6443 = vmatpush3.bf16.msra.mxu1 %v6856_v23  ;;  %v1548_v23 = vsel %vm757_vm0, %v1525_v42, 0 }
 0x545   :  { %v1206_v4 = vpop.xlane.xlu0 %1205 }
 0x549   :  { %v1203_v56 = vpop.xlane.xlu0 %1202 }
 0x54a   :  { %7041 = vrcp.f32 %v1203_v56 }
 0x54b   :  { %7043 = vrcp.f32 %v1206_v4 }
 0x54d   :  { %v1209_v17 = vpop.xlane.xlu0 %1208 }
 0x54e   :  { %7045 = vrcp.f32 %v1209_v17 }
 0x551   :  { %v1519_v9 = vpop.permute.xlu0 %1518 }
 0x552   :  { %6784 = vmatprep.subr.msk.bf16.mxu1 %vm757_vm0, %v1519_v9  ;;  %v1539_v61 = vsel %vm757_vm0, %v1519_v9, 0 }
 0x554   :  { %v7042_v60 = vpop.eup %7041 }
 0x555   :  { %v1223_v33 = vmul.f32 %v7042_v60, %v8140_v57  ;;  %v7044_v50 = vpop.eup %7043  ;;  %v1511_v18 = vpop.permute.xlu0 %1510 }
 0x556   :  { %v1224_v52 = vmul.f32 %v7044_v50, %v8130_v54 }
 0x557   :  { %v1228_v53 = vpack.c.bf16 %v1223_v33, %v1222_v30  ;;  %v1513_v30 = vpop.permute.xlu1 %1512 }
 0x558   :  { %v7046_v63 = vpop.eup %7045 }
 0x559   :  { %6436 = vmatprep.mubr.msk.bf16.mxu1 %vm847_vm1, %v1228_v53  ;;  %v1225_v31 = vmul.f32 %v7046_v63, %v8148_v39  ;;  %v1515_v0 = vpop.permute.xlu0 %1514 }
 0x55b   :  { %v1229_v28 = vpack.c.bf16 %v1225_v31, %v1224_v52  ;;  %v1517_v50 = vpop.permute.xlu1 %1516 }
 0x55d   :  { %6437 = vmatmul.mubr.msk.bf16.gmra.mrb[36].mxu1 %vm847_vm1, %v1229_v28  ;;  %v1911_v4 = vpop.permute.xlu0 %1910 }
 0x55e   :  { %v1931_v53 = vsel %vm757_vm0, %v1911_v4, 0 }
 0x55f   :  { %v1913_v63 = vpop.permute.xlu1 %1912 }
 0x560   :  { %v1934_v28 = vsel %vm757_vm0, %v1913_v63, 0 }
 0x561   :  { %v1915_v52 = vpop.permute.xlu0 %1914 }
 0x565   :  { %v1903_v31 = vpop.permute.xlu0 %1902 }
 0x584   :  { %v6402_v51 = vpop.f32.mrb[24].mxu1 }
 0x585   :  { %v986_v46 = vpop.f32.mrb[25].mxu1 }
 0x586   :  { %v6403_v44 = vpop.f32.mrb[26].mxu1 }
 0x587   :  { %v1018_v35 = vpack.c.bf16 %v6403_v44, %v6402_v51  ;;  %v989_v15 = vpop.f32.mrb[27].mxu1  ;;  %v1937_v51 = vsel %vm757_vm0, %v1915_v52, 0 }
 0x588   :  { %v1017_v36 = vpack.c.bf16 %v989_v15, %v986_v46  ;;  %v1917_v46 = vpop.permute.xlu1 %1916  ;;  %v1907_v15 = vpop.permute.xlu0 %1906 }
 0x589   :  { %v1940_v44 = vsel %vm757_vm0, %v1917_v46, 0 }
 0x58a   :  { %6456 = vmatprep.mubr.msk.bf16.mxu0 %vm757_vm0, %v1017_v36  ;;  %v2381_v36 = vsel %vm757_vm0, %v7968_v25, 0 }
 0x58b   :  { %6457 = vmatmul.mubr.msk.bf16.vlgmr.msra.gmra.mrb[40].mxu0 %vm757_vm0, %v1018_v35 }
 0x58c   :  { %v1905_v35 = vpop.permute.xlu1 %1904 }
 0x58d   :  { %v6406_v57 = vpop.f32.mrb[28].mxu1 }
 0x58e   :  { %v1002_v38 = vpop.f32.mrb[29].mxu1 }
 0x58f   :  { %v6407_v16 = vpop.f32.mrb[30].mxu1 }
 0x590   :  { %v1020_v12 = vpack.c.bf16 %v6407_v16, %v6406_v57  ;;  %v1005_v54 = vpop.f32.mrb[31].mxu1  ;;  %v1909_v57 = vpop.permute.xlu1 %1908  ;;  %v2387_v16 = vsel %vm757_vm0, %v7984_v27, 0 }
 0x591   :  { %v1019_v47 = vpack.c.bf16 %v1005_v54, %v1002_v38  ;;  %v2384_v38 = vsel %vm757_vm0, %v7976_v48, 0 }
 0x593   :  { %6460 = vmatprep.mubr.msk.bf16.mxu0 %vm757_vm0, %v1019_v47 }
 0x594   :  { %6461 = vmatmul.mubr.msk.bf16.gmra.mrb[44].mxu0 %vm757_vm0, %v1020_v12  ;;  %v2390_v12 = vsel %vm757_vm0, %v7988_v37, 0 }
 0x5f8   :  { %v6434_v39 = vpop.f32.mrb[32].mxu1 }
 0x5f9   :  { %v1292_v14 = vpop.f32.mrb[33].mxu1 }
 0x5fa   :  { %v6435_v26 = vpop.f32.mrb[34].mxu1 }
 0x5fb   :  { %v1324_v32 = vpack.c.bf16 %v6435_v26, %v6434_v39  ;;  %v1295_v59 = vpop.f32.mrb[35].mxu1 }
 0x5fc   :  { %v1323_v13 = vpack.c.bf16 %v1295_v59, %v1292_v14 }
 0x5fe   :  { %6444 = vmatprep.mubr.msk.bf16.mxu1 %vm757_vm0, %v1323_v13 }
 0x5ff   :  { %6445 = vmatmul.mubr.msk.bf16.vlgmr.msra.gmra.mrb[40].mxu1 %vm757_vm0, %v1324_v32 }
 0x600   :  { %6465 = vmatpush3.bf16.xpose.msra.mxu1 %v1539_v61 }
 0x601   :  { %6785 = vmatprep.subr.msk.bf16.mxu1 %vm757_vm0, %v1521_v1 }
 0x608   :  { %6467 = vmatpush3.bf16.xpose.msra.mxu1 %v1542_v49 }
 0x609   :  { %6786 = vmatprep.subr.msk.bf16.mxu1 %vm757_vm0, %v1523_v55 }
 0x610   :  { %6469 = vmatpush3.bf16.xpose.msra.mxu1 %v1545_v58 }
 0x611   :  { %6787 = vmatprep.subr.msk.bf16.mxu1 %vm757_vm0, %v1525_v42 }
 0x618   :  { %6471 = vmatpush3.bf16.xpose.msra.mxu1 %v1548_v23 }
 0x619   :  { %6788 = vmatprep.subr.msk.bf16.mxu1 %vm757_vm0, %v1911_v4 }
 0x630   :  { %v6438_v56 = vpop.f32.mrb[36].mxu1 }
 0x631   :  { %v1308_v17 = vpop.f32.mrb[37].mxu1 }
 0x632   :  { %v6439_v9 = vpop.f32.mrb[38].mxu1 }
 0x633   :  { %v1326_v34 = vpack.c.bf16 %v6439_v9, %v6438_v56  ;;  %v1311_v60 = vpop.f32.mrb[39].mxu1 }
 0x634   :  { %v1325_v33 = vpack.c.bf16 %v1311_v60, %v1308_v17 }
 0x636   :  { %6448 = vmatprep.mubr.msk.bf16.mxu1 %vm757_vm0, %v1325_v33 }
 0x637   :  { %6449 = vmatmul.mubr.msk.bf16.gmra.mrb[44].mxu1 %vm757_vm0, %v1326_v34 }
 0x638   :  { %6472 = vmatprep.mubr.msk.bf16.mxu1 %vm757_vm0, %v1511_v18 }
 0x63f   :  { %6473 = vmatmul.mubr.msk.bf16.vlgmr.msra.gmra.mrb[48].mxu1 %vm757_vm0, %v1513_v30 }
 0x640   :  { %6509 = vmatpush3.bf16.xpose.msra.mxu1 %v1931_v53  ;;  %6476 = vmatprep.mubr.msk.bf16.mxu1 %vm757_vm0, %v1515_v0 }
 0x641   :  { %6789 = vmatprep.subr.msk.bf16.mxu1 %vm757_vm0, %v1913_v63 }
 0x647   :  { %6477 = vmatmul.mubr.msk.bf16.gmra.mrb[52].mxu1 %vm757_vm0, %v1517_v50 }
 0x648   :  { %6511 = vmatpush3.bf16.xpose.msra.mxu1 %v1934_v28  ;;  %6516 = vmatprep.mubr.msk.bf16.mxu1 %vm757_vm0, %v1903_v31 }
 0x649   :  { %6790 = vmatprep.subr.msk.bf16.mxu1 %vm757_vm0, %v1915_v52 }
 0x650   :  { %6513 = vmatpush3.bf16.xpose.msra.mxu1 %v1937_v51 }
 0x651   :  { %6791 = vmatprep.subr.msk.bf16.mxu1 %vm757_vm0, %v1917_v46 }
 0x658   :  { %6515 = vmatpush3.bf16.xpose.msra.mxu1 %v1940_v44 }
 0x659   :  { %6792 = vmatprep.subr.msk.bf16.mxu1 %vm757_vm0, %v7968_v25 }
 0x65f   :  { %6517 = vmatmul.mubr.msk.bf16.vlgmr.msra.gmra.mrb[56].mxu1 %vm757_vm0, %v1905_v35 }
 0x660   :  { %6520 = vmatprep.mubr.msk.bf16.mxu1 %vm757_vm0, %v1907_v15  ;;  %6553 = vmatpush3.bf16.xpose.msra.mxu1 %v2381_v36 }
 0x661   :  { %6793 = vmatprep.subr.msk.bf16.mxu1 %vm757_vm0, %v7976_v48 }
 0x667   :  { %6521 = vmatmul.mubr.msk.bf16.gmra.mrb[60].mxu1 %vm757_vm0, %v1909_v57 }
 0x668   :  { %6555 = vmatpush3.bf16.xpose.msra.mxu1 %v2384_v38  ;;  %6560 = vmatprep.mubr.msk.bf16.mxu1 %vm757_vm0, %v7966_v19 }
 0x669   :  { %6794 = vmatprep.subr.msk.bf16.mxu1 %vm757_vm0, %v7984_v27 }
 0x670   :  { %6557 = vmatpush3.bf16.xpose.msra.mxu1 %v2387_v16 }
 0x671   :  { %6795 = vmatprep.subr.msk.bf16.mxu1 %vm757_vm0, %v7988_v37 }
 0x678   :  { %6559 = vmatpush3.bf16.xpose.msra.mxu1 %v2390_v12 }
 0x67f   :  { %6561 = vmatmul.mubr.msk.bf16.vlgmr.msra.gmra.mrb[64].mxu1 %vm757_vm0, %v7974_v43 }
 0x680   :  { %6564 = vmatprep.mubr.msk.bf16.mxu1 %vm757_vm0, %v7982_v62 }
 0x687   :  { %6565 = vmatmul.mubr.msk.bf16.gmra.mrb[68].mxu1 %vm757_vm0, %v7986_v7 }
 0x6d2   :  { %v8234_v54 = vpop.f32.mrb[40].mxu1 }
 0x6d3   :  { %v8236_v47 = vpop.f32.mrb[41].mxu1 }
 0x6d4   :  { %v8238_v39 = vpop.f32.mrb[42].mxu1 }
 0x6d5   :  { %v8240_v14 = vpop.f32.mrb[43].mxu1 }
 0x70a   :  { %v8242_v26 = vpop.f32.mrb[44].mxu1 }
 0x70b   :  { %9591 = vst [vmem:[#allocation29_spill] sm:$0xff] %v8242_v26  ;;  %v8244_v32 = vpop.f32.mrb[45].mxu1 }
 0x70c   :  { %9592 = vst [vmem:[#allocation30_spill] sm:$0xff] %v8244_v32  ;;  %v8246_v59 = vpop.f32.mrb[46].mxu1 }
 0x70d   :  { %9593 = vst [vmem:[#allocation31_spill] sm:$0xff] %v8246_v59  ;;  %v8248_v13 = vpop.f32.mrb[47].mxu1 }
 0x70e   :  { %9594 = vst [vmem:[#allocation32_spill] sm:$0xff] %v8248_v13 }
 0x712   :  { %v6474_v61 = vpop.f32.mrb[48].mxu1 }
 0x713   :  { %v1584_v1 = vpop.f32.mrb[49].mxu1  ;;  %v1621_v42 = vsel %vm847_vm1, %v6474_v61, -inf }
 0x714   :  { %v6475_v49 = vpop.f32.mrb[50].mxu1  ;;  %v1615_v55 = vsel %vm847_vm1, %v1584_v1, -inf }
 0x715   :  { %1616 = vmax.xlane.f32.xlu0 %v1615_v55  ;;  %v1587_v18 = vpop.f32.mrb[51].mxu1  ;;  %v1624_v56 = vsel %vm847_vm1, %v6475_v49, -inf }
 0x716   :  { %v1618_v58 = vsel %vm847_vm1, %v1587_v18, -inf }
 0x717   :  { %1619 = vmax.xlane.f32.xlu1 %v1618_v58 }
 0x719   :  { %1622 = vmax.xlane.f32.xlu0 %v1621_v42 }
 0x71a   :  { %v6478_v0 = vpop.f32.mrb[52].mxu1 }
 0x71b   :  { %v1600_v23 = vpop.f32.mrb[53].mxu1  ;;  %v1633_v30 = vsel %vm847_vm1, %v6478_v0, -inf }
 0x71c   :  { %v8253_v4 = vpop.f32.mrb[54].mxu1  ;;  %v1627_v34 = vsel %vm847_vm1, %v1600_v23, -inf }
 0x71d   :  { %1625 = vmax.xlane.f32.xlu0 %v1624_v56  ;;  %v8256_v17 = vpop.f32.mrb[55].mxu1  ;;  %v1636_v60 = vsel %vm847_vm1, %v8253_v4, -inf }
 0x71e   :  { %v1630_v9 = vsel %vm847_vm1, %v8256_v17, -inf }
 0x71f   :  { %1631 = vmax.xlane.f32.xlu1 %v1630_v9 }
 0x721   :  { %1628 = vmax.xlane.f32.xlu0 %v1627_v34 }
 0x723   :  { %1637 = vmax.xlane.f32.xlu1 %v1636_v60 }
 0x725   :  { %1634 = vmax.xlane.f32.xlu0 %v1633_v30 }
 0x732   :  { %v8264_v33 = vpop.f32.mrb[56].mxu1 }
 0x733   :  { %v8266_v50 = vpop.f32.mrb[57].mxu1 }
 0x734   :  { %v8268_v53 = vpop.f32.mrb[58].mxu1 }
 0x735   :  { %v8270_v63 = vpop.f32.mrb[59].mxu1 }
 0x73a   :  { %v8272_v52 = vpop.f32.mrb[60].mxu1 }
 0x73b   :  { %v8274_v31 = vpop.f32.mrb[61].mxu1 }
 0x73c   :  { %v8276_v28 = vpop.f32.mrb[62].mxu1 }
 0x73d   :  { %v8278_v51 = vpop.f32.mrb[63].mxu1 }
 0x752   :  { %v8280_v46 = vpop.f32.mrb[64].mxu1 }
 0x753   :  { %v8282_v44 = vpop.f32.mrb[65].mxu1 }
 0x754   :  { %v8284_v35 = vpop.f32.mrb[66].mxu1 }
 0x755   :  { %v8286_v15 = vpop.f32.mrb[67].mxu1 }
 0x75a   :  { %v8288_v36 = vpop.f32.mrb[68].mxu1 }
 0x75b   :  { %v8290_v57 = vpop.f32.mrb[69].mxu1 }
 0x75c   :  { %v8292_v38 = vpop.f32.mrb[70].mxu1 }
 0x75d   :  { %v8294_v16 = vpop.f32.mrb[71].mxu1 }
 0x7a2   :  { %v1617_v12 = vpop.xlane.xlu0 %1616 }
 0x7a3   :  { %v1639_v55 = vsub.f32 %v1584_v1, %v1617_v12 }
 0x7a4   :  { %v1620_v58 = vpop.xlane.xlu1 %1619 }
 0x7a5   :  { %v1647_v9 = vmul.f32 1.442695, %v1639_v55  ;;  %v1640_v34 = vsub.f32 %v1587_v18, %v1620_v58 }
 0x7a6   :  { %v1623_v42 = vpop.xlane.xlu0 %1622 }
 0x7a7   :  { %v1641_v56 = vsub.f32 %v6474_v61, %v1623_v42  ;;  %v1649_v13 = vmul.f32 1.442695, %v1640_v34 }
 0x7a9   :  { %v1651_v60 = vmul.f32 1.442695, %v1641_v56 }
 0x7aa   :  { %v1626_v30 = vpop.xlane.xlu0 %1625 }
 0x7ab   :  { %7047 = vpow2.f32 %v1651_v60  ;;  %v1642_v11 = vsub.f32 %v6475_v49, %v1626_v30  ;;  %v2007_v30 = vsel %vm847_vm1, %v8266_v50, -inf }
 0x7ac   :  { %7049 = vpow2.f32 %v1647_v9 }
 0x7ad   :  { %v1653_v8 = vmul.f32 1.442695, %v1642_v11 }
 0x7ae   :  { %v1629_v59 = vpop.xlane.xlu0 %1628 }
 0x7af   :  { %7051 = vpow2.f32 %v1653_v8  ;;  %v1643_v10 = vsub.f32 %v1600_v23, %v1629_v59  ;;  %v1632_v23 = vpop.xlane.xlu1 %1631 }
 0x7b0   :  { %7053 = vpow2.f32 %v1649_v13  ;;  %v1644_v42 = vsub.f32 %v8256_v17, %v1632_v23 }
 0x7b1   :  { %v1655_v1 = vmul.f32 1.442695, %v1643_v10 }
 0x7b2   :  { %v1635_v32 = vpop.xlane.xlu0 %1634  ;;  %v1657_v9 = vmul.f32 1.442695, %v1644_v42 }
 0x7b3   :  { %v1645_v26 = vsub.f32 %v6478_v0, %v1635_v32  ;;  %v1638_v55 = vpop.xlane.xlu1 %1637 }
 0x7b4   :  { %v1646_v58 = vsub.f32 %v8253_v4, %v1638_v55  ;;  %v2028_v55 = vsel %vm847_vm1, %v8276_v28, -inf }
 0x7b5   :  { %v8296_v5 = vpop.eup %7047  ;;  %v1659_v12 = vmul.f32 1.442695, %v1645_v26 }
 0x7b6   :  { %v1669_v61 = vsel %vm847_vm1, %v8296_v5, 0.0  ;;  %v8300_v18 = vpop.eup %7049  ;;  %v1661_v56 = vmul.f32 1.442695, %v1646_v58 }
 0x7b7   :  { %7055 = vpow2.f32 %v1659_v12  ;;  %1670 = vadd.xlane.f32.xlu0 %v1669_v61  ;;  %v1663_v8 = vsel %vm847_vm1, %v8300_v18, 0.0  ;;  %v2016_v12 = vsel %vm847_vm1, %v8268_v53, -inf  ;;  %v2019_v61 = vsel %vm847_vm1, %v8274_v31, -inf }
 0x7b8   :  { %7057 = vpow2.f32 %v1655_v1  ;;  %v2013_v1 = vsel %vm847_vm1, %v8264_v33, -inf }
 0x7b9   :  { %v8302_v49 = vpop.eup %7051  ;;  %7059 = vpow2.f32 %v1661_v56 }
 0x7ba   :  { %v1672_v11 = vsel %vm847_vm1, %v8302_v49, 0.0  ;;  %v8308_v32 = vpop.eup %7053  ;;  %7061 = vpow2.f32 %v1657_v9 }
 0x7bb   :  { %1664 = vadd.xlane.f32.xlu0 %v1663_v8  ;;  %1673 = vadd.xlane.f32.xlu1 %v1672_v11  ;;  %v1666_v10 = vsel %vm847_vm1, %v8308_v32, 0.0  ;;  %v2025_v8 = vsel %vm847_vm1, %v8272_v52, -inf  ;;  %v2010_v11 = vsel %vm847_vm1, %v8270_v63, -inf }
 0x7bf   :  { %1667 = vadd.xlane.f32.xlu1 %v1666_v10 }
 0x7c1   :  { %v8312_v26 = vpop.eup %7055 }
 0x7c2   :  { %v1681_v59 = vsel %vm847_vm1, %v8312_v26, 0.0  ;;  %v8316_v13 = vpop.eup %7057 }
 0x7c3   :  { %1682 = vadd.xlane.f32.xlu0 %v1681_v59  ;;  %v1675_v0 = vsel %vm847_vm1, %v8316_v13, 0.0  ;;  %v8336_v34 = vpop.eup %7059  ;;  %v2022_v59 = vsel %vm847_vm1, %v8278_v51, -inf }
 0x7c4   :  { %v1684_v4 = vsel %vm847_vm1, %v8336_v34, 0.0  ;;  %v8340_v60 = vpop.eup %7061 }
 0x7c5   :  { %v1678_v17 = vsel %vm847_vm1, %v8340_v60, 0.0 }
 0x7c7   :  { %1676 = vadd.xlane.f32.xlu0 %v1675_v0 }
 0x7d0   :  { %1709 = vrot.lane.b32.xlu1 %v7894_v20, %s7546_s8 }
 0x7d4   :  { %1711 = vrot.lane.b32.xlu1 %v7912_v21, %s7546_s8 }
 0x7dd   :  { %1707 = vrot.lane.b32.xlu0 %v7896_v24, %s7546_s8 }
 0x7e1   :  { %2650 = vrot.lane.b32.xlu0 %v7968_v25, %s7551_s1 }
 0x7e5   :  { %2654 = vrot.lane.b32.xlu0 %v7984_v27, %s7551_s1 }
 0x7e9   :  { %2638 = vrot.lane.b32.xlu0 %v7966_v19, %s7551_s1 }
 0x7ed   :  { %2642 = vrot.lane.b32.xlu0 %v7982_v62, %s7551_s1 }
 0x7f8   :  { %1685 = vadd.xlane.f32.xlu1 %v1684_v4 }
 0x7fc   :  { %1679 = vadd.xlane.f32.xlu1 %v1678_v17 }
 0x80c   :  { %2008 = vmax.xlane.f32.xlu0 %v2007_v30 }
 0x80d   :  { %1713 = vrot.lane.b32.xlu1 %v7910_v40, %s7546_s8 }
 0x810   :  { %2014 = vmax.xlane.f32.xlu0 %v2013_v1 }
 0x811   :  { %2652 = vrot.lane.b32.xlu1 %v7976_v48, %s7551_s1 }
 0x814   :  { %2017 = vmax.xlane.f32.xlu0 %v2016_v12 }
 0x815   :  { %2656 = vrot.lane.b32.xlu1 %v7988_v37, %s7551_s1 }
 0x818   :  { %2020 = vmax.xlane.f32.xlu0 %v2019_v61 }
 0x819   :  { %2640 = vrot.lane.b32.xlu1 %v7974_v43, %s7551_s1 }
 0x81c   :  { %2026 = vmax.xlane.f32.xlu0 %v2025_v8 }
 0x81d   :  { %2644 = vrot.lane.b32.xlu1 %v7986_v7, %s7551_s1 }
 0x841   :  { %2011 = vmax.xlane.f32.xlu1 %v2010_v11 }
 0x844   :  { %v1671_v10 = vpop.xlane.xlu0 %1670 }
 0x845   :  { %2023 = vmax.xlane.f32.xlu1 %v2022_v59 }
 0x848   :  { %v1674_v0 = vpop.xlane.xlu1 %1673  ;;  %v1665_v23 = vpop.xlane.xlu0 %1664 }
 0x849   :  { %2029 = vmax.xlane.f32.xlu1 %v2028_v55  ;;  %7063 = vrcp.f32 %v1665_v23 }
 0x84c   :  { %v1668_v58 = vpop.xlane.xlu1 %1667 }
 0x84d   :  { %7065 = vrcp.f32 %v1668_v58 }
 0x84e   :  { %7067 = vrcp.f32 %v1674_v0 }
 0x84f   :  { %7069 = vrcp.f32 %v1671_v10 }
 0x850   :  { %v1683_v42 = vpop.xlane.xlu0 %1682  ;;  %v1710_v17 = vpop.permute.xlu1 %1709 }
 0x853   :  { %v7064_v9 = vpop.eup %7063 }
 0x854   :  { %v1677_v56 = vpop.xlane.xlu0 %1676  ;;  %v1695_v1 = vmul.f32 %v7064_v9, %v8300_v18  ;;  %v1712_v59 = vpop.permute.xlu1 %1711 }
 0x857   :  { %v7066_v4 = vpop.eup %7065 }
 0x858   :  { %v1708_v30 = vpop.permute.xlu0 %1707  ;;  %v1696_v12 = vmul.f32 %v7066_v4, %v8308_v32  ;;  %v7068_v55 = vpop.eup %7067 }
 0x859   :  { %6480 = vmatprep.subr.bf16.mxu0 %v1708_v30  ;;  %v7070_v9 = vpop.eup %7069  ;;  %v1698_v4 = vmul.f32 %v7068_v55, %v8302_v49 }
 0x85a   :  { %6481 = vmatpush3.bf16.msra.mxu0 %v1708_v30  ;;  %v1703_v61 = vpack.c.bf16 %v1696_v12, %v1695_v1  ;;  %v1697_v30 = vmul.f32 %v7070_v9, %v8296_v5 }
 0x85b   :  { %6482 = vmatprep.subr.bf16.mxu0 %v1710_v17 }
 0x85c   :  { %6488 = vmatprep.mubr.msk.bf16.mxu0 %vm847_vm1, %v1703_v61  ;;  %v2651_v8 = vpop.permute.xlu0 %2650  ;;  %v1704_v1 = vpack.c.bf16 %v1698_v4, %v1697_v30 }
 0x85d   :  { %6796 = vmatprep.subr.msk.bf16.mxu1 %vm757_vm0, %v2651_v8  ;;  %v2671_v11 = vsel %vm757_vm0, %v2651_v8, 0 }
 0x85e   :  { %6483 = vmatpush3.bf16.msra.mxu0 %v1710_v17  ;;  %6585 = vmatpush3.bf16.xpose.msra.mxu1 %v2671_v11 }
 0x85f   :  { %6484 = vmatprep.subr.bf16.mxu0 %v1712_v59 }
 0x860   :  { %v2655_v23 = vpop.permute.xlu0 %2654 }
 0x862   :  { %6485 = vmatpush3.bf16.msra.mxu0 %v1712_v59 }
 0x864   :  { %v2639_v18 = vpop.permute.xlu0 %2638 }
 0x865   :  { %6592 = vmatprep.mubr.msk.bf16.mxu1 %vm757_vm0, %v2639_v18 }
 0x868   :  { %v2643_v5 = vpop.permute.xlu0 %2642 }
 0x885   :  { %v1686_v32 = vpop.xlane.xlu1 %1685 }
 0x886   :  { %7071 = vrcp.f32 %v1686_v32 }
 0x887   :  { %7073 = vrcp.f32 %v1677_v56 }
 0x888   :  { %7075 = vrcp.f32 %v1683_v42 }
 0x889   :  { %v1680_v58 = vpop.xlane.xlu1 %1679 }
 0x88a   :  { %7077 = vrcp.f32 %v1680_v58  ;;  %v2677_v58 = vsel %vm757_vm0, %v2655_v23, 0 }
 0x88d   :  { %v1714_v17 = vpop.permute.xlu1 %1713 }
 0x88e   :  { %6486 = vmatprep.subr.bf16.mxu0 %v1714_v17 }
 0x88f   :  { %6487 = vmatpush3.bf16.msra.mxu0 %v1714_v17 }
 0x890   :  { %v7072_v12 = vpop.eup %7071 }
 0x891   :  { %v2653_v61 = vpop.permute.xlu1 %2652  ;;  %v7074_v0 = vpop.eup %7073  ;;  %v1702_v49 = vmul.f32 %v7072_v12, %v8336_v34 }
 0x892   :  { %6489 = vmatmul.mubr.msk.bf16.vlgmr.msra.gmra.mrb[48].mxu0 %vm847_vm1, %v1704_v1  ;;  %6797 = vmatprep.subr.msk.bf16.mxu1 %vm757_vm0, %v2653_v61  ;;  %v2674_v10 = vsel %vm757_vm0, %v2653_v61, 0  ;;  %v7076_v42 = vpop.eup %7075  ;;  %v1699_v8 = vmul.f32 %v7074_v0, %v8316_v13 }
 0x893   :  { %6587 = vmatpush3.bf16.xpose.msra.mxu1 %v2674_v10  ;;  %v1701_v59 = vmul.f32 %v7076_v42, %v8312_v26 }
 0x894   :  { %v7078_v56 = vpop.eup %7077  ;;  %6798 = vmatprep.subr.msk.bf16.mxu1 %vm757_vm0, %v2655_v23 }
 0x895   :  { %v1700_v11 = vmul.f32 %v7078_v56, %v8340_v60  ;;  %v1706_v32 = vpack.c.bf16 %v1702_v49, %v1701_v59  ;;  %v2657_v9 = vpop.permute.xlu1 %2656 }
 0x896   :  { %v2680_v1 = vsel %vm757_vm0, %v2657_v9, 0 }
 0x897   :  { %v1705_v18 = vpack.c.bf16 %v1700_v11, %v1699_v8 }
 0x899   :  { %6492 = vmatprep.mubr.msk.bf16.mxu0 %vm847_vm1, %v1705_v18  ;;  %v2009_v55 = vpop.xlane.xlu0 %2008  ;;  %v2641_v61 = vpop.permute.xlu1 %2640 }
 0x89a   :  { %6493 = vmatmul.mubr.msk.bf16.gmra.mrb[52].mxu0 %vm847_vm1, %v1706_v32  ;;  %v2031_v34 = vsub.f32 %v8266_v50, %v2009_v55  ;;  %v6859_v55 = vld [vmem:[#allocation7 + $0x20] sm:$0xff]  }
 0x89b   :  { %6589 = vmatpush3.bf16.xpose.msra.mxu1 %v2677_v58  ;;  %6496 = vmatprep.subr.bf16.mxu0 %v6859_v55 }
 0x89c   :  { %6799 = vmatprep.subr.msk.bf16.mxu1 %vm757_vm0, %v2657_v9  ;;  %v2039_v4 = vmul.f32 1.442695, %v2031_v34  ;;  %6497 = vmatpush3.bf16.msra.mxu0 %v6859_v55  ;;  %v6860_v9 = vld [vmem:[#allocation7 + $0x28] sm:$0xff]  }
 0x89d   :  { %v2015_v13 = vpop.xlane.xlu0 %2014  ;;  %v2645_v8 = vpop.permute.xlu1 %2644  ;;  %6498 = vmatprep.subr.bf16.mxu0 %v6860_v9 }
 0x89e   :  { %v2033_v60 = vsub.f32 %v8264_v33, %v2015_v13 }
 0x8a0   :  { %v2043_v26 = vmul.f32 1.442695, %v2033_v60  ;;  %6499 = vmatpush3.bf16.msra.mxu0 %v6860_v9 }
 0x8a1   :  { %v2018_v17 = vpop.xlane.xlu0 %2017 }
 0x8a2   :  { %7079 = vpow2.f32 %v2043_v26  ;;  %v2034_v30 = vsub.f32 %v8268_v53, %v2018_v17  ;;  %v2460_v17 = vsel %vm847_vm1, %v8286_v15, -inf }
 0x8a3   :  { %6591 = vmatpush3.bf16.xpose.msra.mxu1 %v2680_v1  ;;  %7081 = vpow2.f32 %v2039_v4 }
 0x8a4   :  { %v2045_v23 = vmul.f32 1.442695, %v2034_v30 }
 0x8a5   :  { %v2021_v12 = vpop.xlane.xlu0 %2020 }
 0x8a6   :  { %7083 = vpow2.f32 %v2045_v23  ;;  %v2035_v50 = vsub.f32 %v8274_v31, %v2021_v12 }
 0x8a8   :  { %v2047_v53 = vmul.f32 1.442695, %v2035_v50 }
 0x8a9   :  { %v2027_v0 = vpop.xlane.xlu0 %2026 }
 0x8aa   :  { %v2037_v10 = vsub.f32 %v8272_v52, %v2027_v0  ;;  %6593 = vmatmul.mubr.msk.bf16.vlgmr.msra.gmra.mrb[72].mxu1 %vm757_vm0, %v2641_v61 }
 0x8ab   :  { %6596 = vmatprep.mubr.msk.bf16.mxu1 %vm757_vm0, %v2643_v5 }
 0x8ac   :  { %v8398_v33 = vpop.eup %7079  ;;  %v2051_v42 = vmul.f32 1.442695, %v2037_v10 }
 0x8ad   :  { %v2061_v56 = vsel %vm847_vm1, %v8398_v33, 0.0  ;;  %v8402_v49 = vpop.eup %7081 }
 0x8ae   :  { %7085 = vpow2.f32 %v2051_v42  ;;  %2062 = vadd.xlane.f32.xlu0 %v2061_v56  ;;  %v2055_v52 = vsel %vm847_vm1, %v8402_v49, 0.0 }
 0x8af   :  { %7087 = vpow2.f32 %v2047_v53 }
 0x8b0   :  { %v8404_v31 = vpop.eup %7083 }
 0x8b1   :  { %v2064_v5 = vsel %vm847_vm1, %v8404_v31, 0.0 }
 0x8b2   :  { %6597 = vmatmul.mubr.msk.bf16.gmra.mrb[76].mxu1 %vm757_vm0, %v2645_v8  ;;  %2056 = vadd.xlane.f32.xlu0 %v2055_v52  ;;  %v2457_v52 = vsel %vm847_vm1, %v8282_v44, -inf }
 0x8b3   :  { %2065 = vadd.xlane.f32.xlu1 %v2064_v5  ;;  %v2463_v5 = vsel %vm847_vm1, %v8280_v46, -inf }
 0x8b8   :  { %v8411_v11 = vpop.eup %7085 }
 0x8b9   :  { %v2073_v59 = vsel %vm847_vm1, %v8411_v11, 0.0  ;;  %v8415_v18 = vpop.eup %7087 }
 0x8ba   :  { %2074 = vadd.xlane.f32.xlu0 %v2073_v59  ;;  %v2067_v32 = vsel %vm847_vm1, %v8415_v18, 0.0  ;;  %v2466_v59 = vsel %vm847_vm1, %v8284_v35, -inf }
 0x8be   :  { %2068 = vadd.xlane.f32.xlu0 %v2067_v32 }
 0x8ce   :  { %v2012_v58 = vpop.xlane.xlu1 %2011 }
 0x8cf   :  { %v2032_v34 = vsub.f32 %v8270_v63, %v2012_v58 }
 0x8d1   :  { %v2041_v13 = vmul.f32 1.442695, %v2032_v34 }
 0x8d3   :  { %7089 = vpow2.f32 %v2041_v13 }
 0x8d4   :  { %2099 = vrot.lane.b32.xlu0 %v7896_v24, %s7552_s2  ;;  %v2024_v24 = vpop.xlane.xlu1 %2023 }
 0x8d5   :  { %v2036_v30 = vsub.f32 %v8278_v51, %v2024_v24  ;;  %v2478_v51 = vsel %vm847_vm1, %v8292_v38, -inf }
 0x8d7   :  { %v2049_v23 = vmul.f32 1.442695, %v2036_v30 }
 0x8d8   :  { %3126 = vrot.lane.b32.xlu0 %v7968_v25, %s7546_s8  ;;  %v2030_v63 = vpop.xlane.xlu1 %2029 }
 0x8d9   :  { %v2038_v26 = vsub.f32 %v8276_v28, %v2030_v63 }
 0x8db   :  { %v2053_v1 = vmul.f32 1.442695, %v2038_v26  ;;  %v2472_v26 = vsel %vm847_vm1, %v8294_v16, -inf }
 0x8dc   :  { %3130 = vrot.lane.b32.xlu0 %v7984_v27, %s7546_s8 }
 0x8dd   :  { %v8426_v60 = vpop.eup %7089  ;;  %7091 = vpow2.f32 %v2053_v1 }
 0x8de   :  { %v2058_v4 = vsel %vm847_vm1, %v8426_v60, 0.0  ;;  %7093 = vpow2.f32 %v2049_v23 }
 0x8df   :  { %2059 = vadd.xlane.f32.xlu1 %v2058_v4  ;;  %v2469_v4 = vsel %vm847_vm1, %v8290_v57, -inf }
 0x8e0   :  { %3118 = vrot.lane.b32.xlu0 %v7966_v19, %s7546_s8 }
 0x8e4   :  { %3122 = vrot.lane.b32.xlu0 %v7982_v62, %s7546_s8 }
 0x8e7   :  { %v8442_v12 = vpop.eup %7091 }
 0x8f0   :  { %2101 = vrot.lane.b32.xlu1 %v7894_v20, %s7552_s2  ;;  %v2076_v20 = vsel %vm847_vm1, %v8442_v12, 0.0 }
 0x8f4   :  { %2103 = vrot.lane.b32.xlu1 %v7912_v21, %s7552_s2  ;;  %v8446_v21 = vpop.eup %7093 }
 0x8f5   :  { %v2070_v28 = vsel %vm847_vm1, %v8446_v21, 0.0 }
 0x903   :  { %2461 = vmax.xlane.f32.xlu0 %v2460_v17 }
 0x918   :  { %2077 = vadd.xlane.f32.xlu1 %v2076_v20 }
 0x919   :  { %3124 = vrot.lane.b32.xlu0 %v7986_v7, %s7546_s8 }
 0x91c   :  { %2071 = vadd.xlane.f32.xlu1 %v2070_v28 }
 0x92d   :  { %2105 = vrot.lane.b32.xlu1 %v7910_v40, %s7552_s2 }
 0x931   :  { %3128 = vrot.lane.b32.xlu1 %v7976_v48, %s7546_s8 }
 0x935   :  { %3132 = vrot.lane.b32.xlu1 %v7988_v37, %s7546_s8 }
 0x938   :  { %2479 = vmax.xlane.f32.xlu0 %v2478_v51  ;;  %v2475_v51 = vsel %vm847_vm1, %v8288_v36, -inf }
 0x939   :  { %3120 = vrot.lane.b32.xlu1 %v7974_v43, %s7546_s8 }
 0x93b   :  { %v8462_v50 = vpop.xlane.xlu0 %2062 }
 0x93f   :  { %v2057_v61 = vpop.xlane.xlu0 %2056 }
 0x940   :  { %v2066_v9 = vpop.xlane.xlu1 %2065  ;;  %7095 = vrcp.f32 %v2057_v61 }
 0x947   :  { %v8464_v0 = vpop.xlane.xlu0 %2074 }
 0x94b   :  { %v8466_v10 = vpop.xlane.xlu0 %2068 }
 0x94e   :  { %2843 = vrot.lane.b32.xlu0 %v7972_v41, %s7551_s1 }
 0x94f   :  { %v2100_v40 = vpop.permute.xlu0 %2099 }
 0x950   :  { %6524 = vmatprep.subr.bf16.mxu0 %v2100_v40 }
 0x953   :  { %v3127_v53 = vpop.permute.xlu0 %3126 }
 0x954   :  { %6800 = vmatprep.subr.msk.bf16.mxu1 %vm757_vm0, %v3127_v53  ;;  %v3147_v42 = vsel %vm757_vm0, %v3127_v53, 0 }
 0x955   :  { %6641 = vmatpush3.bf16.xpose.msra.mxu1 %v3147_v42 }
 0x957   :  { %v8472_v56 = vpop.permute.xlu0 %3130 }
 0x95b   :  { %v3119_v8 = vpop.permute.xlu0 %3118 }
 0x95c   :  { %6648 = vmatprep.mubr.msk.bf16.mxu1 %vm757_vm0, %v3119_v8 }
 0x95d   :  { %2458 = vmax.xlane.f32.xlu1 %v2457_v52 }
 0x961   :  { %2464 = vmax.xlane.f32.xlu1 %v2463_v5 }
 0x965   :  { %v6490_v32 = vpop.f32.mrb[48].mxu0  ;;  %2467 = vmax.xlane.f32.xlu1 %v2466_v59 }
 0x966   :  { %v1765_v55 = vpop.f32.mrb[49].mxu0 }
 0x967   :  { %v6491_v58 = vpop.f32.mrb[50].mxu0 }
 0x968   :  { %v1797_v34 = vpack.c.bf16 %v6491_v58, %v6490_v32  ;;  %v1768_v13 = vpop.f32.mrb[51].mxu0 }
 0x969   :  { %v1796_v24 = vpack.c.bf16 %v1768_v13, %v1765_v55  ;;  %2470 = vmax.xlane.f32.xlu1 %v2469_v4 }
 0x96b   :  { %6500 = vmatprep.mubr.msk.bf16.mxu0 %vm757_vm0, %v1796_v24 }
 0x96c   :  { %6501 = vmatmul.mubr.msk.bf16.vlgmr.msra.gmra.mrb[40].mxu0 %vm757_vm0, %v1797_v34  ;;  %v2060_v63 = vpop.xlane.xlu1 %2059 }
 0x96d   :  { %7097 = vrcp.f32 %v2060_v63  ;;  %6525 = vmatpush3.bf16.msra.mxu0 %v2100_v40  ;;  %v6494_v17 = vpop.f32.mrb[52].mxu0  ;;  %2473 = vmax.xlane.f32.xlu1 %v2472_v26  ;;  %v7096_v40 = vpop.eup %7095 }
 0x96e   :  { %v1781_v30 = vpop.f32.mrb[53].mxu0  ;;  %v2087_v8 = vmul.f32 %v7096_v40, %v8402_v49  ;;  %7099 = vrcp.f32 %v2066_v9  ;;  %v6861_v40 = vld [vmem:[#allocation7 + $0x30] sm:$0xff]  }
 0x96f   :  { %v6495_v1 = vpop.f32.mrb[54].mxu0  ;;  %7101 = vrcp.f32 %v8462_v50 }
 0x970   :  { %v1799_v23 = vpack.c.bf16 %v6495_v1, %v6494_v17  ;;  %v1784_v20 = vpop.f32.mrb[55].mxu0  ;;  %v2102_v28 = vpop.permute.xlu1 %2101 }
 0x971   :  { %v1798_v61 = vpack.c.bf16 %v1784_v20, %v1781_v30  ;;  %2476 = vmax.xlane.f32.xlu1 %v2475_v51  ;;  %6526 = vmatprep.subr.bf16.mxu0 %v2102_v28 }
 0x972   :  { %6527 = vmatpush3.bf16.msra.mxu0 %v2102_v28 }
 0x973   :  { %6504 = vmatprep.mubr.msk.bf16.mxu0 %vm757_vm0, %v1798_v61 }
 0x974   :  { %6505 = vmatmul.mubr.msk.bf16.gmra.mrb[44].mxu0 %vm757_vm0, %v1799_v23  ;;  %v2104_v53 = vpop.permute.xlu1 %2103 }
 0x975   :  { %6528 = vmatprep.subr.bf16.mxu0 %v2104_v53 }
 0x976   :  { %6529 = vmatpush3.bf16.msra.mxu0 %v2104_v53 }
 0x977   :  { %v7098_v42 = vpop.eup %7097 }
 0x978   :  { %v2088_v52 = vmul.f32 %v7098_v42, %v8426_v60  ;;  %v7100_v28 = vpop.eup %7099 }
 0x979   :  { %v7102_v61 = vpop.eup %7101  ;;  %v2090_v53 = vmul.f32 %v7100_v28, %v8404_v31 }
 0x97a   :  { %v2095_v5 = vpack.c.bf16 %v2088_v52, %v2087_v8  ;;  %v2089_v9 = vmul.f32 %v7102_v61, %v8398_v33 }
 0x97c   :  { %6532 = vmatprep.mubr.msk.bf16.mxu0 %vm847_vm1, %v2095_v5  ;;  %v2096_v50 = vpack.c.bf16 %v2090_v53, %v2089_v9 }
 0x97d   :  { %v8494_v59 = vpop.f32.mrb[72].mxu1 }
 0x97e   :  { %v8496_v32 = vpop.f32.mrb[73].mxu1  ;;  %v2753_v24 = vsel %vm847_vm1, %v8494_v59, -inf }
 0x97f   :  { %v8498_v55 = vpop.f32.mrb[74].mxu1  ;;  %v2747_v58 = vsel %vm847_vm1, %v8496_v32, -inf }
 0x980   :  { %v8502_v34 = vpop.f32.mrb[75].mxu1  ;;  %2748 = vmax.xlane.f32.xlu1 %v2747_v58  ;;  %v2756_v26 = vsel %vm847_vm1, %v8498_v55, -inf }
 0x981   :  { %v2750_v49 = vsel %vm847_vm1, %v8502_v34, -inf }
 0x984   :  { %2751 = vmax.xlane.f32.xlu1 %v2750_v49 }
 0x985   :  { %v8506_v60 = vpop.f32.mrb[76].mxu1 }
 0x986   :  { %v8508_v13 = vpop.f32.mrb[77].mxu1  ;;  %v2765_v1 = vsel %vm847_vm1, %v8506_v60, -inf }
 0x987   :  { %v8510_v4 = vpop.f32.mrb[78].mxu1  ;;  %v2759_v17 = vsel %vm847_vm1, %v8508_v13, -inf }
 0x988   :  { %v8514_v63 = vpop.f32.mrb[79].mxu1  ;;  %2754 = vmax.xlane.f32.xlu1 %v2753_v24  ;;  %v2768_v23 = vsel %vm847_vm1, %v8510_v4, -inf }
 0x989   :  { %v2762_v30 = vsel %vm847_vm1, %v8514_v63, -inf }
 0x98c   :  { %2757 = vmax.xlane.f32.xlu1 %v2756_v26 }
 0x990   :  { %2760 = vmax.xlane.f32.xlu1 %v2759_v17 }
 0x994   :  { %2763 = vmax.xlane.f32.xlu1 %v2762_v30 }
 0x998   :  { %2766 = vmax.xlane.f32.xlu1 %v2765_v1  ;;  %v3153_v1 = vsel %vm757_vm0, %v8472_v56, 0 }
 0x99c   :  { %2769 = vmax.xlane.f32.xlu1 %v2768_v23 }
 0x9a5   :  { %v2078_v20 = vpop.xlane.xlu1 %2077 }
 0x9a6   :  { %7103 = vrcp.f32 %v2078_v20 }
 0x9a7   :  { %7105 = vrcp.f32 %v8466_v10  ;;  %v6862_v10 = vld [vmem:[#allocation7 + $0x38] sm:$0xff]  }
 0x9a8   :  { %7107 = vrcp.f32 %v8464_v0 }
 0x9a9   :  { %v2072_v51 = vpop.xlane.xlu1 %2071 }
 0x9aa   :  { %7109 = vrcp.f32 %v2072_v51 }
 0x9ad   :  { %2845 = vrot.lane.b32.xlu1 %v7970_v45, %s7551_s1  ;;  %v2106_v42 = vpop.permute.xlu1 %2105 }
 0x9ae   :  { %6530 = vmatprep.subr.bf16.mxu0 %v2106_v42 }
 0x9af   :  { %6531 = vmatpush3.bf16.msra.mxu0 %v2106_v42 }
 0x9b0   :  { %6540 = vmatprep.subr.bf16.mxu0 %v6861_v40  ;;  %v7104_v8 = vpop.eup %7103 }
 0x9b1   :  { %v3129_v52 = vpop.permute.xlu1 %3128  ;;  %v7106_v0 = vpop.eup %7105  ;;  %v2094_v33 = vmul.f32 %v7104_v8, %v8442_v12 }
 0x9b2   :  { %6533 = vmatmul.mubr.msk.bf16.vlgmr.msra.gmra.mrb[56].mxu0 %vm847_vm1, %v2096_v50  ;;  %6801 = vmatprep.subr.msk.bf16.mxu1 %vm757_vm0, %v3129_v52  ;;  %v3150_v31 = vsel %vm757_vm0, %v3129_v52, 0  ;;  %v7108_v5 = vpop.eup %7107  ;;  %v2091_v49 = vmul.f32 %v7106_v0, %v8415_v18 }
 0x9b3   :  { %6541 = vmatpush3.bf16.msra.mxu0 %v6861_v40  ;;  %6643 = vmatpush3.bf16.xpose.msra.mxu1 %v3150_v31  ;;  %v2093_v26 = vmul.f32 %v7108_v5, %v8411_v11  ;;  %v3123_v11 = vpop.permute.xlu0 %3122 }
 0x9b4   :  { %v7110_v58 = vpop.eup %7109  ;;  %6802 = vmatprep.subr.msk.bf16.mxu1 %vm757_vm0, %v8472_v56  ;;  %6542 = vmatprep.subr.bf16.mxu0 %v6862_v10 }
 0x9b5   :  { %v2092_v24 = vmul.f32 %v7110_v58, %v8446_v21  ;;  %v2098_v30 = vpack.c.bf16 %v2094_v33, %v2093_v26  ;;  %v3133_v23 = vpop.permute.xlu1 %3132 }
 0x9b6   :  { %v3156_v18 = vsel %vm757_vm0, %v3133_v23, 0 }
 0x9b7   :  { %6543 = vmatpush3.bf16.msra.mxu0 %v6862_v10  ;;  %v2097_v17 = vpack.c.bf16 %v2092_v24, %v2091_v49  ;;  %v2462_v21 = vpop.xlane.xlu0 %2461 }
 0x9b8   :  { %6568 = vmatprep.subr.bf16.mxu0 %v7972_v41  ;;  %v2482_v53 = vsub.f32 %v8286_v15, %v2462_v21 }
 0x9b9   :  { %6536 = vmatprep.mubr.msk.bf16.mxu0 %vm847_vm1, %v2097_v17  ;;  %v3121_v12 = vpop.permute.xlu1 %3120 }
 0x9ba   :  { %6537 = vmatmul.mubr.msk.bf16.gmra.mrb[60].mxu0 %vm847_vm1, %v2098_v30  ;;  %v2491_v8 = vmul.f32 1.442695, %v2482_v53 }
 0x9bb   :  { %6645 = vmatpush3.bf16.xpose.msra.mxu1 %v3153_v1  ;;  %v3125_v20 = vpop.permute.xlu0 %3124 }
 0x9bc   :  { %6803 = vmatprep.subr.msk.bf16.mxu1 %vm757_vm0, %v3133_v23 }
 0x9c3   :  { %6647 = vmatpush3.bf16.xpose.msra.mxu1 %v3156_v18 }
 0x9c5   :  { %v2480_v9 = vpop.xlane.xlu0 %2479 }
 0x9c6   :  { %v2488_v52 = vsub.f32 %v8292_v38, %v2480_v9 }
 0x9ca   :  { %6649 = vmatmul.mubr.msk.bf16.vlgmr.msra.gmra.mrb[80].mxu1 %vm757_vm0, %v3121_v12 }
 0x9cb   :  { %6652 = vmatprep.mubr.msk.bf16.mxu1 %vm757_vm0, %v3123_v11 }
 0x9d2   :  { %6653 = vmatmul.mubr.msk.bf16.gmra.mrb[84].mxu1 %vm757_vm0, %v3125_v20 }
 0x9ea   :  { %v2459_v28 = vpop.xlane.xlu1 %2458 }
 0x9eb   :  { %v2481_v56 = vsub.f32 %v8282_v44, %v2459_v28  ;;  %v2503_v44 = vmul.f32 1.442695, %v2488_v52 }
 0x9ed   :  { %v2489_v40 = vmul.f32 1.442695, %v2481_v56 }
 0x9ee   :  { %v2465_v51 = vpop.xlane.xlu1 %2464 }
 0x9ef   :  { %v2483_v61 = vsub.f32 %v8280_v46, %v2465_v51 }
 0x9f1   :  { %v2493_v42 = vmul.f32 1.442695, %v2483_v61 }
 0x9f2   :  { %v2468_v50 = vpop.xlane.xlu1 %2467 }
 0x9f3   :  { %7111 = vpow2.f32 %v2493_v42  ;;  %v2484_v10 = vsub.f32 %v8284_v35, %v2468_v50 }
 0x9f4   :  { %7113 = vpow2.f32 %v2489_v40 }
 0x9f5   :  { %v2495_v0 = vmul.f32 1.442695, %v2484_v10 }
 0x9f6   :  { %v2471_v31 = vpop.xlane.xlu1 %2470 }
 0x9f7   :  { %7115 = vpow2.f32 %v2495_v0  ;;  %v2485_v58 = vsub.f32 %v8290_v57, %v2471_v31 }
 0x9f8   :  { %7117 = vpow2.f32 %v2491_v8 }
 0x9f9   :  { %7119 = vpow2.f32 %v2503_v44  ;;  %v2497_v17 = vmul.f32 1.442695, %v2485_v58 }
 0x9fa   :  { %v2474_v5 = vpop.xlane.xlu1 %2473 }
 0x9fb   :  { %v2486_v46 = vsub.f32 %v8294_v16, %v2474_v5 }
 0x9fd   :  { %v8558_v15 = vpop.eup %7111  ;;  %v2499_v33 = vmul.f32 1.442695, %v2486_v46 }
 0x9fe   :  { %v2477_v49 = vpop.xlane.xlu1 %2476  ;;  %v2511_v35 = vsel %vm847_vm1, %v8558_v15, 0.0  ;;  %v8563_v38 = vpop.eup %7113 }
 0x9ff   :  { %v2487_v24 = vsub.f32 %v8288_v36, %v2477_v49  ;;  %2512 = vadd.xlane.f32.xlu0 %v2511_v35  ;;  %7121 = vpow2.f32 %v2499_v33  ;;  %v2505_v57 = vsel %vm847_vm1, %v8563_v38, 0.0 }
 0xa01   :  { %v8566_v26 = vpop.eup %7115  ;;  %v2501_v16 = vmul.f32 1.442695, %v2487_v24 }
 0xa02   :  { %v2514_v30 = vsel %vm847_vm1, %v8566_v26, 0.0  ;;  %v8572_v1 = vpop.eup %7117 }
 0xa03   :  { %7123 = vpow2.f32 %v2501_v16  ;;  %2515 = vadd.xlane.f32.xlu1 %v2514_v30  ;;  %2506 = vadd.xlane.f32.xlu0 %v2505_v57  ;;  %v2508_v36 = vsel %vm847_vm1, %v8572_v1, 0.0  ;;  %v8576_v23 = vpop.eup %7119 }
 0xa04   :  { %7125 = vpow2.f32 %v2497_v17  ;;  %v2526_v18 = vsel %vm847_vm1, %v8576_v23, 0.0 }
 0xa07   :  { %2509 = vadd.xlane.f32.xlu1 %v2508_v36 }
 0xa09   :  { %v8580_v11 = vpop.eup %7121 }
 0xa0a   :  { %v2520_v28 = vsel %vm847_vm1, %v8580_v11, 0.0 }
 0xa0b   :  { %2527 = vadd.xlane.f32.xlu1 %v2526_v18 }
 0xa0d   :  { %v8582_v12 = vpop.eup %7123  ;;  %v2749_v21 = vpop.xlane.xlu1 %2748 }
 0xa0e   :  { %v2523_v20 = vsel %vm847_vm1, %v8582_v12, 0.0  ;;  %v8588_v56 = vpop.eup %7125  ;;  %v2771_v53 = vsub.f32 %v8496_v32, %v2749_v21 }
 0xa0f   :  { %2524 = vadd.xlane.f32.xlu0 %v2523_v20  ;;  %2521 = vadd.xlane.f32.xlu1 %v2520_v28  ;;  %v2517_v61 = vsel %vm847_vm1, %v8588_v56, 0.0 }
 0xa10   :  { %v2779_v9 = vmul.f32 1.442695, %v2771_v53 }
 0xa11   :  { %v2752_v51 = vpop.xlane.xlu1 %2751 }
 0xa12   :  { %v2772_v50 = vsub.f32 %v8502_v34, %v2752_v51 }
 0xa13   :  { %2518 = vadd.xlane.f32.xlu0 %v2517_v61 }
 0xa14   :  { %v2781_v0 = vmul.f32 1.442695, %v2772_v50 }
 0xa15   :  { %v2755_v40 = vpop.xlane.xlu1 %2754 }
 0xa16   :  { %v2773_v42 = vsub.f32 %v8494_v59, %v2755_v40 }
 0xa18   :  { %v2783_v10 = vmul.f32 1.442695, %v2773_v42  ;;  %v8652_v42 = vpop.permute.xlu0 %2843 }
 0xa19   :  { %v2758_v8 = vpop.xlane.xlu1 %2757 }
 0xa1a   :  { %7127 = vpow2.f32 %v2783_v10  ;;  %v2774_v52 = vsub.f32 %v8498_v55, %v2758_v8 }
 0xa1b   :  { %7129 = vpow2.f32 %v2779_v9 }
 0xa1c   :  { %v2785_v31 = vmul.f32 1.442695, %v2774_v52 }
 0xa1d   :  { %v2761_v44 = vpop.xlane.xlu1 %2760 }
 0xa1e   :  { %7131 = vpow2.f32 %v2785_v31  ;;  %v2775_v32 = vsub.f32 %v8508_v13, %v2761_v44 }
 0xa1f   :  { %7133 = vpow2.f32 %v2781_v0 }
 0xa20   :  { %v2787_v49 = vmul.f32 1.442695, %v2775_v32 }
 0xa21   :  { %v2764_v5 = vpop.xlane.xlu1 %2763 }
 0xa22   :  { %v2776_v35 = vsub.f32 %v8514_v63, %v2764_v5 }
 0xa24   :  { %v8596_v46 = vpop.eup %7127 }
 0xa25   :  { %v2767_v59 = vpop.xlane.xlu1 %2766  ;;  %v2801_v34 = vsel %vm847_vm1, %v8596_v46, 0.0  ;;  %v8601_v58 = vpop.eup %7129 }
 0xa26   :  { %v2777_v33 = vsub.f32 %v8506_v60, %v2767_v59  ;;  %2802 = vadd.xlane.f32.xlu0 %v2801_v34  ;;  %v2795_v16 = vsel %vm847_vm1, %v8601_v58, 0.0  ;;  %v2789_v60 = vmul.f32 1.442695, %v2776_v35 }
 0xa28   :  { %v8604_v55 = vpop.eup %7131  ;;  %v2791_v24 = vmul.f32 1.442695, %v2777_v33 }
 0xa29   :  { %v2770_v17 = vpop.xlane.xlu1 %2769  ;;  %v2804_v13 = vsel %vm847_vm1, %v8604_v55, 0.0  ;;  %v8611_v30 = vpop.eup %7133 }
 0xa2a   :  { %7135 = vpow2.f32 %v2791_v24  ;;  %v2778_v57 = vsub.f32 %v8510_v4, %v2770_v17  ;;  %2796 = vadd.xlane.f32.xlu0 %v2795_v16  ;;  %2805 = vadd.xlane.f32.xlu1 %v2804_v13  ;;  %v2798_v63 = vsel %vm847_vm1, %v8611_v30, 0.0 }
 0xa2b   :  { %7137 = vpow2.f32 %v2787_v49 }
 0xa2c   :  { %v2793_v36 = vmul.f32 1.442695, %v2778_v57 }
 0xa2e   :  { %7139 = vpow2.f32 %v2793_v36  ;;  %2799 = vadd.xlane.f32.xlu1 %v2798_v63 }
 0xa2f   :  { %7141 = vpow2.f32 %v2789_v60 }
 0xa34   :  { %v8616_v18 = vpop.eup %7135 }
 0xa35   :  { %v2813_v21 = vsel %vm847_vm1, %v8616_v18, 0.0  ;;  %v8620_v20 = vpop.eup %7137 }
 0xa36   :  { %2814 = vadd.xlane.f32.xlu0 %v2813_v21  ;;  %v2807_v28 = vsel %vm847_vm1, %v8620_v20, 0.0 }
 0xa38   :  { %v8622_v4 = vpop.eup %7139 }
 0xa39   :  { %v2816_v51 = vsel %vm847_vm1, %v8622_v4, 0.0  ;;  %v8628_v61 = vpop.eup %7141 }
 0xa3a   :  { %2808 = vadd.xlane.f32.xlu0 %v2807_v28  ;;  %2817 = vadd.xlane.f32.xlu1 %v2816_v51  ;;  %v2810_v53 = vsel %vm847_vm1, %v8628_v61, 0.0 }
 0xa3e   :  { %2811 = vadd.xlane.f32.xlu1 %v2810_v53 }
 0xa4f   :  { %2847 = vrot.lane.b32.xlu1 %v7980_v22, %s7551_s1 }
 0xa50   :  { %2849 = vrot.lane.b32.xlu0 %v7978_v29, %s7551_s1 }
 0xa53   :  { %3517 = vrot.lane.b32.xlu1 %v7968_v25, %s7552_s2 }
 0xa54   :  { %3519 = vrot.lane.b32.xlu0 %v7976_v48, %s7552_s2 }
 0xa57   :  { %3521 = vrot.lane.b32.xlu1 %v7984_v27, %s7552_s2 }
 0xa58   :  { %3523 = vrot.lane.b32.xlu0 %v7988_v37, %s7552_s2 }
 0xa5b   :  { %3509 = vrot.lane.b32.xlu1 %v7966_v19, %s7552_s2  ;;  %v8655_v19 = vpop.permute.xlu1 %2845 }
 0xa5c   :  { %3511 = vrot.lane.b32.xlu0 %v7974_v43, %s7552_s2 }
 0xa5f   :  { %3513 = vrot.lane.b32.xlu1 %v7982_v62, %s7552_s2 }
 0xa60   :  { %3515 = vrot.lane.b32.xlu0 %v7986_v7, %s7552_s2 }
 0xa85   :  { %v6534_v25 = vpop.f32.mrb[56].mxu0 }
 0xa86   :  { %v2157_v48 = vpop.f32.mrb[57].mxu0 }
 0xa87   :  { %v6535_v40 = vpop.f32.mrb[58].mxu0 }
 0xa88   :  { %v2189_v27 = vpack.c.bf16 %v6535_v40, %v6534_v25  ;;  %v2160_v9 = vpop.f32.mrb[59].mxu0 }
 0xa89   :  { %v2188_v37 = vpack.c.bf16 %v2160_v9, %v2157_v48 }
 0xa8b   :  { %6544 = vmatprep.mubr.msk.bf16.mxu0 %vm757_vm0, %v2188_v37 }
 0xa8c   :  { %6545 = vmatmul.mubr.msk.bf16.vlgmr.msra.gmra.mrb[40].mxu0 %vm757_vm0, %v2189_v27  ;;  %v2513_v43 = vpop.xlane.xlu0 %2512 }
 0xa8d   :  { %6569 = vmatpush3.bf16.msra.mxu0 %v7972_v41  ;;  %v6538_v62 = vpop.f32.mrb[60].mxu0 }
 0xa8e   :  { %6570 = vmatprep.subr.bf16.mxu0 %v7970_v45  ;;  %v2173_v7 = vpop.f32.mrb[61].mxu0 }
 0xa8f   :  { %v6539_v50 = vpop.f32.mrb[62].mxu0 }
 0xa90   :  { %v2191_v10 = vpack.c.bf16 %v6539_v50, %v6538_v62  ;;  %v2516_v8 = vpop.xlane.xlu1 %2515  ;;  %v2176_v52 = vpop.f32.mrb[63].mxu0 }
 0xa91   :  { %v2190_v0 = vpack.c.bf16 %v2176_v52, %v2173_v7  ;;  %6571 = vmatpush3.bf16.msra.mxu0 %v7970_v45  ;;  %v2507_v31 = vpop.xlane.xlu0 %2506  ;;  %7143 = vrcp.f32 %v2516_v8 }
 0xa92   :  { %6572 = vmatprep.subr.bf16.mxu0 %v7980_v22  ;;  %7145 = vrcp.f32 %v2507_v31 }
 0xa93   :  { %6548 = vmatprep.mubr.msk.bf16.mxu0 %vm757_vm0, %v2190_v0  ;;  %7147 = vrcp.f32 %v2513_v43 }
 0xa94   :  { %6549 = vmatmul.mubr.msk.bf16.gmra.mrb[44].mxu0 %vm757_vm0, %v2191_v10  ;;  %v2510_v44 = vpop.xlane.xlu1 %2509 }
 0xa95   :  { %6573 = vmatpush3.bf16.msra.mxu0 %v7980_v22  ;;  %7149 = vrcp.f32 %v2510_v44 }
 0xa96   :  { %6574 = vmatprep.subr.bf16.mxu0 %v7978_v29 }
 0xa98   :  { %v2528_v5 = vpop.xlane.xlu1 %2527 }
 0xa99   :  { %6575 = vmatpush3.bf16.msra.mxu0 %v7978_v29 }
 0xa9a   :  { %6600 = vmatprep.subr.bf16.mxu0 %v8652_v42 }
 0xa9b   :  { %v7144_v32 = vpop.eup %7143 }
 0xa9c   :  { %v2522_v59 = vpop.xlane.xlu1 %2521  ;;  %v2525_v34 = vpop.xlane.xlu0 %2524  ;;  %v2540_v16 = vmul.f32 %v7144_v32, %v8566_v26 }
 0xa9d   :  { %v7146_v33 = vpop.eup %7145  ;;  %v8668_v49 = vpop.f32.mrb[80].mxu1  ;;  %7151 = vrcp.f32 %v2525_v34 }
 0xa9e   :  { %v7148_v35 = vpop.eup %7147  ;;  %v8670_v24 = vpop.f32.mrb[81].mxu1  ;;  %7153 = vrcp.f32 %v2522_v59  ;;  %v2537_v63 = vmul.f32 %v7146_v33, %v8563_v38 }
 0xa9f   :  { %v7150_v17 = vpop.eup %7149  ;;  %v8673_v13 = vpop.f32.mrb[82].mxu1  ;;  %v3223_v57 = vsel %vm847_vm1, %v8670_v24, -inf  ;;  %7155 = vrcp.f32 %v2528_v5  ;;  %v2539_v28 = vmul.f32 %v7148_v35, %v8558_v15  ;;  %v3229_v15 = vsel %vm847_vm1, %v8668_v49, -inf }
 0xaa0   :  { %v8677_v60 = vpop.f32.mrb[83].mxu1  ;;  %3224 = vmax.xlane.f32.xlu1 %v3223_v57  ;;  %v2519_v36 = vpop.xlane.xlu0 %2518  ;;  %v2538_v21 = vmul.f32 %v7150_v17, %v8572_v1  ;;  %v3232_v25 = vsel %vm847_vm1, %v8673_v13, -inf }
 0xaa1   :  { %7157 = vrcp.f32 %v2519_v36  ;;  %v3226_v26 = vsel %vm847_vm1, %v8677_v60, -inf  ;;  %v2546_v53 = vpack.c.bf16 %v2540_v16, %v2539_v28 }
 0xaa2   :  { %3227 = vmax.xlane.f32.xlu0 %v3226_v26  ;;  %v2545_v51 = vpack.c.bf16 %v2538_v21, %v2537_v63 }
 0xaa4   :  { %3233 = vmax.xlane.f32.xlu1 %v3232_v25  ;;  %6576 = vmatprep.mubr.msk.bf16.mxu0 %vm847_vm1, %v2545_v51 }
 0xaa5   :  { %6577 = vmatmul.mubr.msk.bf16.vlgmr.msra.gmra.mrb[64].mxu0 %vm847_vm1, %v2546_v53  ;;  %v8688_v38 = vpop.f32.mrb[84].mxu1 }
 0xaa6   :  { %6601 = vmatpush3.bf16.msra.mxu0 %v8652_v42  ;;  %3230 = vmax.xlane.f32.xlu0 %v3229_v15  ;;  %v8693_v1 = vpop.f32.mrb[85].mxu1  ;;  %v3241_v8 = vsel %vm847_vm1, %v8688_v38, -inf }
 0xaa7   :  { %6602 = vmatprep.subr.bf16.mxu0 %v8655_v19  ;;  %v8696_v48 = vpop.f32.mrb[86].mxu1  ;;  %v7152_v40 = vpop.eup %7151  ;;  %v3235_v37 = vsel %vm847_vm1, %v8693_v1, -inf }
 0xaa8   :  { %v8698_v27 = vpop.f32.mrb[87].mxu1  ;;  %v7154_v9 = vpop.eup %7153  ;;  %v2543_v7 = vmul.f32 %v7152_v40, %v8582_v12  ;;  %v3244_v0 = vsel %vm847_vm1, %v8696_v48, -inf }
 0xaa9   :  { %v3238_v43 = vsel %vm847_vm1, %v8698_v27, -inf  ;;  %v7156_v62 = vpop.eup %7155  ;;  %v2542_v10 = vmul.f32 %v7154_v9, %v8580_v11 }
 0xaaa   :  { %6603 = vmatpush3.bf16.msra.mxu0 %v8655_v19  ;;  %3236 = vmax.xlane.f32.xlu0 %v3235_v37  ;;  %v2544_v52 = vmul.f32 %v7156_v62, %v8576_v23 }
 0xaab   :  { %v7158_v42 = vpop.eup %7157  ;;  %3239 = vmax.xlane.f32.xlu1 %v3238_v43 }
 0xaac   :  { %v2541_v50 = vmul.f32 %v7158_v42, %v8588_v56  ;;  %v2548_v19 = vpack.c.bf16 %v2544_v52, %v2543_v7 }
 0xaae   :  { %3242 = vmax.xlane.f32.xlu0 %v3241_v8  ;;  %v2547_v31 = vpack.c.bf16 %v2542_v10, %v2541_v50 }
 0xaaf   :  { %3245 = vmax.xlane.f32.xlu1 %v3244_v0  ;;  %v9595_v0 = vmov 0  }
 0xab0   :  { %6580 = vmatprep.mubr.msk.bf16.mxu0 %vm847_vm1, %v2547_v31  ;;  %v6863_v31 = vld [vmem:[#allocation7 + $0x10] sm:$0xff]  }
 0xab1   :  { %6581 = vmatmul.mubr.msk.bf16.gmra.mrb[68].mxu0 %vm847_vm1, %v2548_v19 }
 0xab3   :  { %v2803_v12 = vpop.xlane.xlu0 %2802 }
 0xab7   :  { %v2806_v56 = vpop.xlane.xlu1 %2805  ;;  %v2797_v44 = vpop.xlane.xlu0 %2796 }
 0xab8   :  { %7159 = vrcp.f32 %v2797_v44 }
 0xabb   :  { %v2800_v11 = vpop.xlane.xlu1 %2799 }
 0xabc   :  { %7161 = vrcp.f32 %v2800_v11 }
 0xabd   :  { %7163 = vrcp.f32 %v2806_v56 }
 0xabe   :  { %7165 = vrcp.f32 %v2803_v12  ;;  %v6864_v12 = vld [vmem:[#allocation7 + $0x18] sm:$0xff]  }
 0xac0   :  { %3317 = vrot.lane.b32.xlu1 %v7970_v45, %s7546_s8 }
 0xac2   :  { %v7160_v5 = vpop.eup %7159 }
 0xac3   :  { %v2815_v23 = vpop.xlane.xlu0 %2814  ;;  %v2827_v33 = vmul.f32 %v7160_v5, %v8601_v58 }
 0xac4   :  { %3315 = vrot.lane.b32.xlu0 %v7972_v41, %s7546_s8 }
 0xac6   :  { %v7162_v32 = vpop.eup %7161 }
 0xac7   :  { %v2818_v59 = vpop.xlane.xlu1 %2817  ;;  %v2809_v34 = vpop.xlane.xlu0 %2808  ;;  %v2828_v35 = vmul.f32 %v7162_v32, %v8611_v30 }
 0xac8   :  { %7167 = vrcp.f32 %v2809_v34  ;;  %v7164_v57 = vpop.eup %7163 }
 0xac9   :  { %v2835_v17 = vpack.c.bf16 %v2828_v35, %v2827_v33  ;;  %v7166_v21 = vpop.eup %7165  ;;  %v2830_v28 = vmul.f32 %v7164_v57, %v8604_v55 }
 0xaca   :  { %v2829_v30 = vmul.f32 %v7166_v21, %v8596_v46 }
 0xacb   :  { %v2812_v16 = vpop.xlane.xlu1 %2811  ;;  %6608 = vmatprep.mubr.msk.bf16.mxu0 %vm847_vm1, %v2835_v17  ;;  %v2850_v36 = vpop.permute.xlu0 %2849 }
 0xacc   :  { %7169 = vrcp.f32 %v2812_v16  ;;  %v2836_v15 = vpack.c.bf16 %v2830_v28, %v2829_v30 }
 0xacd   :  { %7171 = vrcp.f32 %v2818_v59 }
 0xace   :  { %7173 = vrcp.f32 %v2815_v23  ;;  %v8745_v23 = vld [vmem:[#allocation7] sm:$0xff]  }
 0xacf   :  { %v2848_v63 = vpop.permute.xlu1 %2847  ;;  %v3520_v53 = vpop.permute.xlu0 %3519 }
 0xad0   :  { %6604 = vmatprep.subr.bf16.mxu0 %v2848_v63  ;;  %v3541_v7 = vsel %vm757_vm0, %v3520_v53, 0 }
 0xad1   :  { %6605 = vmatpush3.bf16.msra.mxu0 %v2848_v63 }
 0xad2   :  { %6606 = vmatprep.subr.bf16.mxu0 %v2850_v36  ;;  %v7168_v26 = vpop.eup %7167 }
 0xad3   :  { %v3518_v58 = vpop.permute.xlu1 %3517  ;;  %v2831_v55 = vmul.f32 %v7168_v26, %v8620_v20  ;;  %v3524_v10 = vpop.permute.xlu0 %3523 }
 0xad4   :  { %v3538_v51 = vsel %vm757_vm0, %v3518_v58, 0  ;;  %6804 = vmatprep.subr.msk.bf16.mxu1 %vm757_vm0, %v3518_v58 }
 0xad5   :  { %6607 = vmatpush3.bf16.msra.mxu0 %v2850_v36  ;;  %6685 = vmatpush3.bf16.xpose.msra.mxu1 %v3538_v51 }
 0xad6   :  { %v7170_v25 = vpop.eup %7169  ;;  %6805 = vmatprep.subr.msk.bf16.mxu1 %vm757_vm0, %v3520_v53  ;;  %6616 = vmatprep.subr.bf16.mxu0 %v6863_v31 }
 0xad7   :  { %v7172_v40 = vpop.eup %7171  ;;  %v3522_v9 = vpop.permute.xlu1 %3521  ;;  %v2832_v37 = vmul.f32 %v7170_v25, %v8628_v61 }
 0xad8   :  { %6609 = vmatmul.mubr.msk.bf16.vlgmr.msra.gmra.mrb[72].mxu0 %vm847_vm1, %v2836_v15  ;;  %v7174_v46 = vpop.eup %7173  ;;  %v2834_v62 = vmul.f32 %v7172_v40, %v8622_v4  ;;  %v3544_v61 = vsel %vm757_vm0, %v3522_v9, 0  ;;  %v3547_v4 = vsel %vm757_vm0, %v3524_v10, 0  ;;  %v3512_v8 = vpop.permute.xlu0 %3511 }
 0xad9   :  { %v2837_v43 = vpack.c.bf16 %v2832_v37, %v2831_v55  ;;  %v2833_v50 = vmul.f32 %v7174_v46, %v8616_v18  ;;  %6617 = vmatpush3.bf16.msra.mxu0 %v6863_v31 }
 0xada   :  { %6618 = vmatprep.subr.bf16.mxu0 %v6864_v12 }
 0xadb   :  { %v3510_v42 = vpop.permute.xlu1 %3509  ;;  %6612 = vmatprep.mubr.msk.bf16.mxu0 %vm847_vm1, %v2837_v43  ;;  %v2838_v20 = vpack.c.bf16 %v2834_v62, %v2833_v50 }
 0xadc   :  { %6692 = vmatprep.mubr.msk.bf16.mxu1 %vm757_vm0, %v3510_v42  ;;  %v3516_v18 = vpop.permute.xlu0 %3515 }
 0xadd   :  { %6687 = vmatpush3.bf16.xpose.msra.mxu1 %v3541_v7  ;;  %6619 = vmatpush3.bf16.msra.mxu0 %v6864_v12 }
 0xade   :  { %6806 = vmatprep.subr.msk.bf16.mxu1 %vm757_vm0, %v3522_v9  ;;  %6628 = vmatprep.subr.bf16.mxu0 %v8745_v23 }
 0xadf   :  { %v3514_v52 = vpop.permute.xlu1 %3513 }
 0xae0   :  { %6613 = vmatmul.mubr.msk.bf16.gmra.mrb[76].mxu0 %vm847_vm1, %v2838_v20 }
 0xae5   :  { %6689 = vmatpush3.bf16.xpose.msra.mxu1 %v3544_v61 }
 0xae6   :  { %6807 = vmatprep.subr.msk.bf16.mxu1 %vm757_vm0, %v3524_v10 }
 0xaed   :  { %6691 = vmatpush3.bf16.xpose.msra.mxu1 %v3547_v4 }
 0xaf4   :  { %6693 = vmatmul.mubr.msk.bf16.vlgmr.msra.gmra.mrb[88].mxu1 %vm757_vm0, %v3512_v8 }
 0xaf5   :  { %6696 = vmatprep.mubr.msk.bf16.mxu1 %vm757_vm0, %v3514_v52 }
 0xafc   :  { %6697 = vmatmul.mubr.msk.bf16.gmra.mrb[92].mxu1 %vm757_vm0, %v3516_v18  ;;  %v8796_v18 = vld [vmem:[%s9547_s5] ss:$0 sm:$0xff] }
 0xafd   :  { %4465 = vmatprep.mubr.bf16.mxu1 %v9595_v0 }
 0xb2d   :  { %v3225_v19 = vpop.xlane.xlu1 %3224 }
 0xb2e   :  { %v3247_v5 = vsub.f32 %v8670_v24, %v3225_v19  ;;  %v9596_v19 = vld [vmem:[#allocation16_spill] sm:$0xff] }
 0xb2f   :  { %v3228_v56 = vpop.xlane.xlu0 %3227 }
 0xb30   :  { %v3248_v44 = vsub.f32 %v8677_v60, %v3228_v56  ;;  %v3255_v17 = vmul.f32 1.442695, %v3247_v5 }
 0xb31   :  { %v3234_v11 = vpop.xlane.xlu1 %3233 }
 0xb32   :  { %v3250_v32 = vsub.f32 %v8673_v13, %v3234_v11  ;;  %v3257_v59 = vmul.f32 1.442695, %v3248_v44 }
 0xb33   :  { %v3231_v34 = vpop.xlane.xlu0 %3230 }
 0xb34   :  { %v3261_v33 = vmul.f32 1.442695, %v3250_v32  ;;  %v3249_v35 = vsub.f32 %v8668_v49, %v3231_v34 }
 0xb36   :  { %7175 = vpow2.f32 %v3261_v33  ;;  %v3259_v16 = vmul.f32 1.442695, %v3249_v35  ;;  %v9599_v35 = vld [vmem:[#allocation19_spill] sm:$0xff] }
 0xb37   :  { %7177 = vpow2.f32 %v3257_v59  ;;  %v3237_v60 = vpop.xlane.xlu0 %3236  ;;  %v9598_v59 = vld [vmem:[#allocation30_spill] sm:$0xff] }
 0xb38   :  { %7179 = vpow2.f32 %v3259_v16  ;;  %v3240_v57 = vpop.xlane.xlu1 %3239  ;;  %v3251_v36 = vsub.f32 %v8693_v1, %v3237_v60  ;;  %v9600_v16 = vld [vmem:[#allocation31_spill] sm:$0xff] }
 0xb39   :  { %7181 = vpow2.f32 %v3255_v17  ;;  %v3252_v24 = vsub.f32 %v8698_v27, %v3240_v57 }
 0xb3a   :  { %v3263_v58 = vmul.f32 1.442695, %v3251_v36  ;;  %v9601_v36 = vld [vmem:[#allocation17_spill] sm:$0xff] }
 0xb3b   :  { %v3243_v13 = vpop.xlane.xlu0 %3242  ;;  %v3265_v26 = vmul.f32 1.442695, %v3252_v24 }
 0xb3c   :  { %v3246_v63 = vpop.xlane.xlu1 %3245  ;;  %v3253_v21 = vsub.f32 %v8688_v38, %v3243_v13  ;;  %v9602_v13 = vld [vmem:[#allocation32_spill] sm:$0xff] }
 0xb3d   :  { %v3254_v28 = vsub.f32 %v8696_v48, %v3246_v63 }
 0xb3e   :  { %v3267_v49 = vmul.f32 1.442695, %v3253_v21  ;;  %v9603_v21 = vld [vmem:[#allocation20_spill] sm:$0xff] }
 0xb3f   :  { %v3269_v30 = vmul.f32 1.442695, %v3254_v28 }
 0xb40   :  { %v8755_v51 = vpop.eup %7175  ;;  %7183 = vpow2.f32 %v3267_v49 }
 0xb41   :  { %v8757_v53 = vpop.eup %7177  ;;  %7185 = vpow2.f32 %v3269_v30  ;;  %v3280_v1 = vsel %vm847_vm1, %v8755_v51, 0.0 }
 0xb42   :  { %v8761_v27 = vpop.eup %7179  ;;  %7187 = vpow2.f32 %v3263_v58  ;;  %3281 = vadd.xlane.f32.xlu1 %v3280_v1  ;;  %v3274_v25 = vsel %vm847_vm1, %v8757_v53, 0.0  ;;  %v9604_v58 = vld [vmem:[#allocation18_spill] sm:$0xff] }
 0xb43   :  { %7189 = vpow2.f32 %v3265_v26  ;;  %v3277_v38 = vsel %vm847_vm1, %v8761_v27, 0.0  ;;  %v8765_v48 = vpop.eup %7181 }
 0xb44   :  { %3278 = vadd.xlane.f32.xlu0 %v3277_v38  ;;  %v3271_v15 = vsel %vm847_vm1, %v8765_v48, 0.0 }
 0xb46   :  { %3275 = vadd.xlane.f32.xlu1 %v3274_v25 }
 0xb48   :  { %3272 = vadd.xlane.f32.xlu0 %v3271_v15 }
 0xb4a   :  { %v8771_v40 = vpop.eup %7183 }
 0xb4b   :  { %v8773_v9 = vpop.eup %7185  ;;  %v3289_v55 = vsel %vm847_vm1, %v8771_v40, 0.0 }
 0xb4c   :  { %v8777_v37 = vpop.eup %7187  ;;  %v3292_v46 = vsel %vm847_vm1, %v8773_v9, 0.0  ;;  %3290 = vadd.xlane.f32.xlu0 %v3289_v55 }
 0xb4d   :  { %v8781_v43 = vpop.eup %7189  ;;  %3293 = vadd.xlane.f32.xlu1 %v3292_v46  ;;  %v3283_v62 = vsel %vm847_vm1, %v8777_v37, 0.0 }
 0xb4e   :  { %v3286_v42 = vsel %vm847_vm1, %v8781_v43, 0.0 }
 0xb50   :  { %3284 = vadd.xlane.f32.xlu0 %v3283_v62 }
 0xb51   :  { %3287 = vadd.xlane.f32.xlu1 %v3286_v42 }
 0xb5f   :  { %v6546_v7 = vpop.f32.mrb[40].mxu0 }
 0xb60   :  { %v6728_v50 = vadd.f32 %v6546_v7, %v8234_v54  ;;  %v2255_v20 = vpop.f32.mrb[41].mxu0 }
 0xb61   :  { %v6729_v61 = vadd.f32 %v2255_v20, %v8236_v47  ;;  %v6547_v10 = vpop.f32.mrb[42].mxu0 }
 0xb62   :  { %v2296_v4 = vadd.f32 %v6728_v50, %v7690_v3  ;;  %v6730_v8 = vadd.f32 %v6547_v10, %v8238_v39  ;;  %3319 = vrot.lane.b32.xlu1 %v7980_v22, %s7546_s8  ;;  %v2258_v52 = vpop.f32.mrb[43].mxu0 }
 0xb63   :  { %v2294_v31 = vadd.f32 %v6729_v61, %v7688_v2  ;;  %v6731_v54 = vadd.f32 %v2258_v52, %v8240_v14  ;;  %v9597_v2 = vld [vmem:[#allocation29_spill] sm:$0xff] }
 0xb64   :  { %v2297_v47 = vadd.f32 %v6730_v8, %v7696_v6  ;;  %v2310_v3 = vadd.f32 %v8796_v18, %v2296_v4 }
 0xb65   :  { %v2295_v12 = vadd.f32 %v6731_v54, %v9596_v19  ;;  %v2308_v56 = vadd.f32 %v8796_v18, %v2294_v31 }
 0xb66   :  { %v2311_v39 = vadd.f32 %v8796_v18, %v2297_v47  ;;  %3321 = vrot.lane.b32.xlu0 %v7978_v29, %s7546_s8 }
 0xb67   :  { %v2309_v44 = vadd.f32 %v8796_v18, %v2295_v12  ;;  %v6550_v11 = vpop.f32.mrb[44].mxu0 }
 0xb68   :  { %v8808_v5 = vpack.c.bf16 %v2311_v39, %v2310_v3  ;;  %v6732_v14 = vadd.f32 %v6550_v11, %v9597_v2  ;;  %v2271_v32 = vpop.f32.mrb[45].mxu0  ;;  %v6866_v39 = vld [vmem:[#allocation7 + $0x8] sm:$0xff]  }
 0xb69   :  { %v8811_v6 = vpack.c.bf16 %v2309_v44, %v2308_v56  ;;  %v6733_v34 = vadd.f32 %v2271_v32, %v9598_v59  ;;  %v6551_v33 = vpop.f32.mrb[46].mxu0  ;;  %v3316_v32 = vpop.permute.xlu0 %3315 }
 0xb6a   :  { %v2300_v17 = vadd.f32 %v6732_v14, %v9599_v35  ;;  %v6734_v60 = vadd.f32 %v6551_v33, %v9600_v16  ;;  %v2274_v57 = vpop.f32.mrb[47].mxu0 }
 0xb6b   :  { %v2298_v24 = vadd.f32 %v6733_v34, %v9601_v36  ;;  %v6735_v63 = vadd.f32 %v2274_v57, %v9602_v13  ;;  %v3318_v34 = vpop.permute.xlu1 %3317 }
 0xb6c   :  { %v2301_v28 = vadd.f32 %v6734_v60, %v9603_v21  ;;  %v2314_v26 = vadd.f32 %v8796_v18, %v2300_v17 }
 0xb6d   :  { %v2299_v49 = vadd.f32 %v6735_v63, %v9604_v58  ;;  %v2312_v1 = vadd.f32 %v8796_v18, %v2298_v24 }
 0xb6e   :  { %v2315_v30 = vadd.f32 %v8796_v18, %v2301_v28 }
 0xb6f   :  { %v2313_v38 = vadd.f32 %v8796_v18, %v2299_v49 }
 0xb70   :  { %v8824_v25 = vpack.c.bf16 %v2315_v30, %v2314_v26 }
 0xb71   :  { %v8826_v15 = vpack.c.bf16 %v2313_v38, %v2312_v1 }
 0xb78   :  { %v6578_v55 = vpop.f32.mrb[64].mxu0 }
 0xb79   :  { %v2595_v46 = vpop.f32.mrb[65].mxu0 }
 0xb7a   :  { %v6579_v62 = vpop.f32.mrb[66].mxu0 }
 0xb7b   :  { %v2627_v42 = vpack.c.bf16 %v6579_v62, %v6578_v55  ;;  %v2598_v7 = vpop.f32.mrb[67].mxu0 }
 0xb7c   :  { %v2626_v50 = vpack.c.bf16 %v2598_v7, %v2595_v46 }
 0xb84   :  { %v6582_v20 = vpop.f32.mrb[68].mxu0 }
 0xb85   :  { %v2611_v61 = vpop.f32.mrb[69].mxu0 }
 0xb86   :  { %v6583_v10 = vpop.f32.mrb[70].mxu0 }
 0xb87   :  { %v2629_v4 = vpack.c.bf16 %v6583_v10, %v6582_v20  ;;  %v2614_v8 = vpop.f32.mrb[71].mxu0 }
 0xb88   :  { %v2628_v52 = vpack.c.bf16 %v2614_v8, %v2611_v61 }
 0xbab   :  { %v6610_v31 = vpop.f32.mrb[72].mxu0 }
 0xbac   :  { %v2901_v54 = vpop.f32.mrb[73].mxu0 }
 0xbad   :  { %v6611_v47 = vpop.f32.mrb[74].mxu0 }
 0xbae   :  { %v2933_v19 = vpack.c.bf16 %v6611_v47, %v6610_v31  ;;  %v2904_v12 = vpop.f32.mrb[75].mxu0 }
 0xbaf   :  { %v2932_v3 = vpack.c.bf16 %v2904_v12, %v2901_v54 }
 0xbb1   :  { %6620 = vmatprep.mubr.msk.bf16.mxu0 %vm757_vm0, %v2932_v3 }
 0xbb2   :  { %6621 = vmatmul.mubr.msk.bf16.vlgmr.msra.gmra.mrb[80].mxu0 %vm757_vm0, %v2933_v19  ;;  %v6867_v19 = vld [vmem:[#allocation7 + $0x20] sm:$0xff]  }
 0xbb3   :  { %6629 = vmatpush3.bf16.msra.mxu0 %v8745_v23  ;;  %v6614_v56 = vpop.f32.mrb[76].mxu0 }
 0xbb4   :  { %v2917_v44 = vpop.f32.mrb[77].mxu0  ;;  %6630 = vmatprep.subr.bf16.mxu0 %v6866_v39 }
 0xbb5   :  { %v6615_v11 = vpop.f32.mrb[78].mxu0 }
 0xbb6   :  { %v2935_v2 = vpack.c.bf16 %v6615_v11, %v6614_v56  ;;  %v2920_v14 = vpop.f32.mrb[79].mxu0 }
 0xbb7   :  { %v2934_v59 = vpack.c.bf16 %v2920_v14, %v2917_v44  ;;  %6631 = vmatpush3.bf16.msra.mxu0 %v6866_v39  ;;  %v6868_v44 = vld [vmem:[#allocation7 + $0x28] sm:$0xff]  }
 0xbb8   :  { %6656 = vmatprep.subr.bf16.mxu0 %v3316_v32 }
 0xbb9   :  { %6624 = vmatprep.mubr.msk.bf16.mxu0 %vm757_vm0, %v2934_v59 }
 0xbba   :  { %6625 = vmatmul.mubr.msk.bf16.gmra.mrb[84].mxu0 %vm757_vm0, %v2935_v2 }
 0xbbb   :  { %6632 = vmatprep.mubr.msk.bf16.mxu0 %vm757_vm0, %v2626_v50 }
 0xbc2   :  { %6633 = vmatmul.mubr.msk.bf16.vlgmr.msra.gmra.mrb[80].mxu0 %vm757_vm0, %v2627_v42 }
 0xbc3   :  { %6657 = vmatpush3.bf16.msra.mxu0 %v3316_v32  ;;  %6636 = vmatprep.mubr.msk.bf16.mxu0 %vm757_vm0, %v2628_v52 }
 0xbc4   :  { %6658 = vmatprep.subr.bf16.mxu0 %v3318_v34 }
 0xbc7   :  { %6659 = vmatpush3.bf16.msra.mxu0 %v3318_v34  ;;  %v8836_v23 = vpop.f32.mrb[88].mxu1 }
 0xbc8   :  { %v8838_v33 = vpop.f32.mrb[89].mxu1  ;;  %v3620_v13 = vsel %vm847_vm1, %v8836_v23, -inf }
 0xbc9   :  { %v8840_v35 = vpop.f32.mrb[90].mxu1  ;;  %v3614_v17 = vsel %vm847_vm1, %v8838_v33, -inf }
 0xbca   :  { %6637 = vmatmul.mubr.msk.bf16.gmra.mrb[84].mxu0 %vm757_vm0, %v2629_v4  ;;  %v8845_v16 = vpop.f32.mrb[91].mxu1  ;;  %3615 = vmax.xlane.f32.xlu1 %v3614_v17  ;;  %v3623_v57 = vsel %vm847_vm1, %v8840_v35, -inf }
 0xbcb   :  { %v3617_v60 = vsel %vm847_vm1, %v8845_v16, -inf }
 0xbcc   :  { %3618 = vmax.xlane.f32.xlu0 %v3617_v60 }
 0xbce   :  { %3624 = vmax.xlane.f32.xlu1 %v3623_v57 }
 0xbcf   :  { %v3282_v36 = vpop.xlane.xlu1 %3281  ;;  %v8851_v24 = vpop.f32.mrb[92].mxu1 }
 0xbd0   :  { %v8855_v63 = vpop.f32.mrb[93].mxu1  ;;  %3621 = vmax.xlane.f32.xlu0 %v3620_v13  ;;  %v3632_v55 = vsel %vm847_vm1, %v8851_v24, -inf }
 0xbd1   :  { %v8857_v21 = vpop.f32.mrb[94].mxu1  ;;  %v3279_v28 = vpop.xlane.xlu0 %3278  ;;  %v3626_v30 = vsel %vm847_vm1, %v8855_v63, -inf }
 0xbd2   :  { %v8859_v58 = vpop.f32.mrb[95].mxu1  ;;  %v3635_v38 = vsel %vm847_vm1, %v8857_v21, -inf }
 0xbd3   :  { %v3276_v49 = vpop.xlane.xlu1 %3275  ;;  %v3629_v26 = vsel %vm847_vm1, %v8859_v58, -inf }
 0xbd4   :  { %7191 = vrcp.f32 %v3276_v49  ;;  %3630 = vmax.xlane.f32.xlu1 %v3629_v26  ;;  %3627 = vmax.xlane.f32.xlu0 %v3626_v30 }
 0xbd5   :  { %v3273_v1 = vpop.xlane.xlu0 %3272 }
 0xbd6   :  { %7193 = vrcp.f32 %v3273_v1 }
 0xbd7   :  { %7195 = vrcp.f32 %v3279_v28 }
 0xbd8   :  { %3636 = vmax.xlane.f32.xlu1 %v3635_v38  ;;  %3633 = vmax.xlane.f32.xlu0 %v3632_v55  ;;  %7197 = vrcp.f32 %v3282_v36 }
 0xbd9   :  { %v3291_v46 = vpop.xlane.xlu0 %3290 }
 0xbda   :  { %v3294_v62 = vpop.xlane.xlu1 %3293  ;;  %7199 = vrcp.f32 %v3291_v46 }
 0xbdd   :  { %v3285_v42 = vpop.xlane.xlu0 %3284 }
 0xbde   :  { %v7192_v7 = vpop.eup %7191  ;;  %v3288_v50 = vpop.xlane.xlu1 %3287  ;;  %7201 = vrcp.f32 %v3285_v42 }
 0xbdf   :  { %7203 = vrcp.f32 %v3288_v50  ;;  %v3304_v10 = vmul.f32 %v7192_v7, %v8757_v53 }
 0xbe0   :  { %v7194_v20 = vpop.eup %7193  ;;  %7205 = vrcp.f32 %v3294_v62 }
 0xbe1   :  { %v3303_v61 = vmul.f32 %v7194_v20, %v8765_v48  ;;  %v7196_v4 = vpop.eup %7195  ;;  %v3322_v54 = vpop.permute.xlu0 %3321 }
 0xbe2   :  { %v3320_v8 = vpop.permute.xlu1 %3319  ;;  %v7198_v31 = vpop.eup %7197  ;;  %v3305_v47 = vmul.f32 %v7196_v4, %v8761_v27 }
 0xbe3   :  { %6660 = vmatprep.subr.bf16.mxu0 %v3320_v8  ;;  %v3311_v52 = vpack.c.bf16 %v3304_v10, %v3303_v61  ;;  %v3306_v3 = vmul.f32 %v7198_v31, %v8755_v51 }
 0xbe4   :  { %6661 = vmatpush3.bf16.msra.mxu0 %v3320_v8  ;;  %v7200_v12 = vpop.eup %7199 }
 0xbe5   :  { %6662 = vmatprep.subr.bf16.mxu0 %v3322_v54  ;;  %6664 = vmatprep.mubr.msk.bf16.mxu0 %vm847_vm1, %v3311_v52  ;;  %v3312_v53 = vpack.c.bf16 %v3306_v3, %v3305_v47  ;;  %v3309_v14 = vmul.f32 %v7200_v12, %v8771_v40  ;;  %v8934_v12 = vunpack.c.l.bf16 %v8808_v5  ;;  %v8938_v3 = vunpack.c.h.bf16 %v8808_v5 }
 0xbe8   :  { %v7202_v39 = vpop.eup %7201  ;;  %6663 = vmatpush3.bf16.msra.mxu0 %v3322_v54 }
 0xbe9   :  { %v7204_v48 = vpop.eup %7203  ;;  %v3307_v56 = vmul.f32 %v7202_v39, %v8777_v37  ;;  %6672 = vmatprep.subr.bf16.mxu0 %v6867_v19  ;;  %v8953_v39 = vunpack.c.h.bf16 %v8826_v15 }
 0xbea   :  { %v7206_v11 = vpop.eup %7205  ;;  %v3308_v2 = vmul.f32 %v7204_v48, %v8781_v43  ;;  %v8958_v48 = vunpack.c.h.bf16 %v8824_v25 }
 0xbeb   :  { %6665 = vmatmul.mubr.msk.bf16.vlgmr.msra.gmra.mrb[88].mxu0 %vm847_vm1, %v3312_v53  ;;  %v3310_v32 = vmul.f32 %v7206_v11, %v8773_v9 }
 0xbec   :  { %v3313_v27 = vpack.c.bf16 %v3308_v2, %v3307_v56  ;;  %6673 = vmatpush3.bf16.msra.mxu0 %v6867_v19  ;;  %v8930_v19 = vunpack.c.l.bf16 %v8811_v6 }
 0xbed   :  { %6674 = vmatprep.subr.bf16.mxu0 %v6868_v44  ;;  %v3314_v51 = vpack.c.bf16 %v3310_v32, %v3309_v14 }
 0xbee   :  { %6668 = vmatprep.mubr.msk.bf16.mxu0 %vm847_vm1, %v3313_v27  ;;  %3706 = vrot.lane.b32.xlu0 %v7972_v41, %s7552_s2 }
 0xbf0   :  { %6675 = vmatpush3.bf16.msra.mxu0 %v6868_v44 }
 0xbf3   :  { %6669 = vmatmul.mubr.msk.bf16.gmra.mrb[92].mxu0 %vm847_vm1, %v3314_v51 }
 0xc57   :  { %v3616_v37 = vpop.xlane.xlu1 %3615 }
 0xc58   :  { %v3638_v17 = vsub.f32 %v8838_v33, %v3616_v37 }
 0xc59   :  { %v3619_v43 = vpop.xlane.xlu0 %3618 }
 0xc5a   :  { %v3639_v59 = vsub.f32 %v8845_v16, %v3619_v43  ;;  %v3646_v13 = vmul.f32 1.442695, %v3638_v17 }
 0xc5b   :  { %v3625_v34 = vpop.xlane.xlu1 %3624 }
 0xc5c   :  { %v3641_v40 = vsub.f32 %v8840_v35, %v3625_v34  ;;  %v3648_v9 = vmul.f32 1.442695, %v3639_v59 }
 0xc5d   :  { %v3622_v60 = vpop.xlane.xlu0 %3621 }
 0xc5e   :  { %v3652_v57 = vmul.f32 1.442695, %v3641_v40  ;;  %v3640_v36 = vsub.f32 %v8836_v23, %v3622_v60 }
 0xc60   :  { %7207 = vpow2.f32 %v3652_v57  ;;  %v3650_v41 = vmul.f32 1.442695, %v3640_v36 }
 0xc61   :  { %7209 = vpow2.f32 %v3648_v9  ;;  %v3631_v28 = vpop.xlane.xlu1 %3630  ;;  %v3628_v49 = vpop.xlane.xlu0 %3627 }
 0xc62   :  { %7211 = vpow2.f32 %v3650_v41  ;;  %v3642_v16 = vsub.f32 %v8855_v63, %v3628_v49  ;;  %v3643_v63 = vsub.f32 %v8859_v58, %v3631_v28 }
 0xc63   :  { %7213 = vpow2.f32 %v3646_v13 }
 0xc64   :  { %v3654_v1 = vmul.f32 1.442695, %v3642_v16  ;;  %v3656_v20 = vmul.f32 1.442695, %v3643_v63 }
 0xc65   :  { %v3634_v26 = vpop.xlane.xlu0 %3633  ;;  %v3637_v30 = vpop.xlane.xlu1 %3636 }
 0xc66   :  { %v3644_v33 = vsub.f32 %v8851_v24, %v3634_v26  ;;  %v3645_v38 = vsub.f32 %v8857_v21, %v3637_v30 }
 0xc68   :  { %v3658_v35 = vmul.f32 1.442695, %v3644_v33  ;;  %v3660_v24 = vmul.f32 1.442695, %v3645_v38  ;;  %v6869_v38 = vld [vmem:[#allocation7 + $0x30] sm:$0xff]  }
 0xc69   :  { %v3707_v55 = vpop.permute.xlu0 %3706 }
 0xc6a   :  { %v8890_v23 = vpop.eup %7207  ;;  %6700 = vmatprep.subr.bf16.mxu0 %v3707_v55  ;;  %7215 = vpow2.f32 %v3658_v35 }
 0xc6b   :  { %v8892_v46 = vpop.eup %7209  ;;  %v3671_v62 = vsel %vm847_vm1, %v8890_v23, 0.0  ;;  %7217 = vpow2.f32 %v3654_v1 }
 0xc6c   :  { %v8896_v42 = vpop.eup %7211  ;;  %3672 = vadd.xlane.f32.xlu1 %v3671_v62  ;;  %v3665_v50 = vsel %vm847_vm1, %v8892_v46, 0.0  ;;  %7219 = vpow2.f32 %v3660_v24 }
 0xc6d   :  { %v3668_v21 = vsel %vm847_vm1, %v8896_v42, 0.0  ;;  %v8901_v7 = vpop.eup %7213  ;;  %7221 = vpow2.f32 %v3656_v20 }
 0xc6e   :  { %3669 = vadd.xlane.f32.xlu0 %v3668_v21  ;;  %v3662_v61 = vsel %vm847_vm1, %v8901_v7, 0.0 }
 0xc70   :  { %3666 = vadd.xlane.f32.xlu1 %v3665_v50 }
 0xc72   :  { %3663 = vadd.xlane.f32.xlu0 %v3662_v61 }
 0xc74   :  { %v8907_v10 = vpop.eup %7215 }
 0xc75   :  { %v3680_v58 = vsel %vm847_vm1, %v8907_v10, 0.0  ;;  %v8911_v4 = vpop.eup %7217 }
 0xc76   :  { %3681 = vadd.xlane.f32.xlu1 %v3680_v58  ;;  %v3674_v8 = vsel %vm847_vm1, %v8911_v4, 0.0  ;;  %v8915_v52 = vpop.eup %7219 }
 0xc77   :  { %v3683_v31 = vsel %vm847_vm1, %v8915_v52, 0.0  ;;  %v8919_v54 = vpop.eup %7221 }
 0xc78   :  { %v3677_v47 = vsel %vm847_vm1, %v8919_v54, 0.0 }
 0xc7a   :  { %3675 = vadd.xlane.f32.xlu1 %v3674_v8 }
 0xc7e   :  { %3684 = vadd.xlane.f32.xlu1 %v3683_v31 }
 0xc82   :  { %3678 = vadd.xlane.f32.xlu1 %v3677_v47 }
 0xc88   :  { %3710 = vrot.lane.b32.xlu0 %v7980_v22, %s7552_s2  ;;  %v8950_v22 = vunpack.c.l.bf16 %v8824_v25 }
 0xc8c   :  { %3712 = vrot.lane.b32.xlu0 %v7978_v29, %s7552_s2  ;;  %v8942_v29 = vunpack.c.l.bf16 %v8826_v15 }
 0xc93   :  { %3708 = vrot.lane.b32.xlu1 %v7970_v45, %s7552_s2  ;;  %v8945_v45 = vunpack.c.h.bf16 %v8811_v6 }
 0xcab   :  { %3992 = vadd.xlane.f32.xlu0 %v8930_v19 }
 0xcaf   :  { %3996 = vadd.xlane.f32.xlu0 %v8934_v12 }
 0xcb3   :  { %3998 = vadd.xlane.f32.xlu0 %v8938_v3 }
 0xcb7   :  { %4000 = vadd.xlane.f32.xlu0 %v8942_v29  ;;  %3994 = vadd.xlane.f32.xlu1 %v8945_v45 }
 0xcbb   :  { %4004 = vadd.xlane.f32.xlu0 %v8950_v22  ;;  %4002 = vadd.xlane.f32.xlu1 %v8953_v39 }
 0xcbe   :  { %v6666_v5 = vpop.f32.mrb[88].mxu0 }
 0xcbf   :  { %v3373_v6 = vpop.f32.mrb[89].mxu0  ;;  %4006 = vadd.xlane.f32.xlu1 %v8958_v48 }
 0xcc0   :  { %v6667_v53 = vpop.f32.mrb[90].mxu0 }
 0xcc1   :  { %v3405_v56 = vpack.c.bf16 %v6667_v53, %v6666_v5  ;;  %v3376_v44 = vpop.f32.mrb[91].mxu0 }
 0xcc2   :  { %v3404_v11 = vpack.c.bf16 %v3376_v44, %v3373_v6  ;;  %v9605_v44 = vld [vmem:[#allocation23_spill] sm:$0xff] }
 0xcc4   :  { %6676 = vmatprep.mubr.msk.bf16.mxu0 %vm757_vm0, %v3404_v11 }
 0xcc5   :  { %6677 = vmatmul.mubr.msk.bf16.vlgmr.msra.gmra.mrb[80].mxu0 %vm757_vm0, %v3405_v56 }
 0xcc6   :  { %6701 = vmatpush3.bf16.msra.mxu0 %v3707_v55  ;;  %v6670_v15 = vpop.f32.mrb[92].mxu0 }
 0xcc7   :  { %v3389_v2 = vpop.f32.mrb[93].mxu0 }
 0xcc8   :  { %v6671_v27 = vpop.f32.mrb[94].mxu0 }
 0xcc9   :  { %v3407_v14 = vpack.c.bf16 %v6671_v27, %v6670_v15  ;;  %v3392_v32 = vpop.f32.mrb[95].mxu0 }
 0xcca   :  { %v3406_v51 = vpack.c.bf16 %v3392_v32, %v3389_v2  ;;  %v9606_v2 = vld [vmem:[#allocation21_spill] sm:$0xff] }
 0xccc   :  { %6680 = vmatprep.mubr.msk.bf16.mxu0 %vm757_vm0, %v3406_v51  ;;  %v9607_v51 = vld [vmem:[#allocation24_spill] sm:$0xff] }
 0xccd   :  { %6681 = vmatmul.mubr.msk.bf16.gmra.mrb[84].mxu0 %vm757_vm0, %v3407_v14 }
 0xcf9   :  { %v3673_v25 = vpop.xlane.xlu1 %3672 }
 0xcfb   :  { %v3670_v37 = vpop.xlane.xlu0 %3669 }
 0xcfd   :  { %v3667_v43 = vpop.xlane.xlu1 %3666 }
 0xcfe   :  { %7223 = vrcp.f32 %v3667_v43  ;;  %v9608_v43 = vld [vmem:[#allocation22_spill] sm:$0xff] }
 0xcff   :  { %v3664_v59 = vpop.xlane.xlu0 %3663 }
 0xd00   :  { %7225 = vrcp.f32 %v3664_v59 }
 0xd01   :  { %7227 = vrcp.f32 %v3670_v37 }
 0xd02   :  { %7229 = vrcp.f32 %v3673_v25 }
 0xd03   :  { %v3682_v34 = vpop.xlane.xlu1 %3681  ;;  %v3711_v28 = vpop.permute.xlu0 %3710 }
 0xd07   :  { %v3676_v40 = vpop.xlane.xlu1 %3675  ;;  %v3713_v33 = vpop.permute.xlu0 %3712 }
 0xd08   :  { %v7224_v17 = vpop.eup %7223  ;;  %7231 = vrcp.f32 %v3676_v40 }
 0xd09   :  { %v3695_v57 = vmul.f32 %v7224_v17, %v8892_v46 }
 0xd0a   :  { %v7226_v9 = vpop.eup %7225 }
 0xd0b   :  { %v3694_v60 = vmul.f32 %v7226_v9, %v8901_v7  ;;  %v3685_v36 = vpop.xlane.xlu1 %3684  ;;  %v7228_v16 = vpop.eup %7227 }
 0xd0c   :  { %v7230_v26 = vpop.eup %7229  ;;  %v3696_v1 = vmul.f32 %v7228_v16, %v8896_v42  ;;  %v9610_v16 = vld [vmem:[#allocation25_spill] sm:$0xff] }
 0xd0d   :  { %v3702_v13 = vpack.c.bf16 %v3695_v57, %v3694_v60  ;;  %v3697_v46 = vmul.f32 %v7230_v26, %v8890_v23  ;;  %v6870_v23 = vld [vmem:[#allocation7 + $0x38] sm:$0xff]  }
 0xd0f   :  { %6708 = vmatprep.mubr.msk.bf16.mxu0 %vm847_vm1, %v3702_v13  ;;  %v3679_v41 = vpop.xlane.xlu1 %3678  ;;  %v3703_v63 = vpack.c.bf16 %v3697_v46, %v3696_v1  ;;  %v9613_v1 = vld [vmem:[#allocation28_spill] sm:$0xff]  ;;  %v9614_v46 = vld [vmem:[#allocation26_spill] sm:$0xff] }
 0xd10   :  { %7233 = vrcp.f32 %v3679_v41  ;;  %v9609_v41 = vld [vmem:[#allocation27_spill] sm:$0xff] }
 0xd11   :  { %7235 = vrcp.f32 %v3685_v36 }
 0xd12   :  { %7237 = vrcp.f32 %v3682_v34  ;;  %v7232_v30 = vpop.eup %7231 }
 0xd13   :  { %v3709_v49 = vpop.permute.xlu1 %3708  ;;  %v3698_v62 = vmul.f32 %v7232_v30, %v8911_v4 }
 0xd14   :  { %6702 = vmatprep.subr.bf16.mxu0 %v3709_v49 }
 0xd15   :  { %6703 = vmatpush3.bf16.msra.mxu0 %v3709_v49 }
 0xd16   :  { %6704 = vmatprep.subr.bf16.mxu0 %v3711_v28 }
 0xd19   :  { %6705 = vmatpush3.bf16.msra.mxu0 %v3711_v28 }
 0xd1a   :  { %v7234_v35 = vpop.eup %7233  ;;  %6706 = vmatprep.subr.bf16.mxu0 %v3713_v33 }
 0xd1b   :  { %v3699_v55 = vmul.f32 %v7234_v35, %v8919_v54  ;;  %v7236_v24 = vpop.eup %7235 }
 0xd1c   :  { %v7238_v7 = vpop.eup %7237  ;;  %v3701_v42 = vmul.f32 %v7236_v24, %v8915_v52 }
 0xd1d   :  { %6707 = vmatpush3.bf16.msra.mxu0 %v3713_v33  ;;  %v3704_v21 = vpack.c.bf16 %v3699_v55, %v3698_v62  ;;  %v3700_v50 = vmul.f32 %v7238_v7, %v8907_v10 }
 0xd1e   :  { %6716 = vmatprep.subr.bf16.mxu0 %v6869_v38 }
 0xd1f   :  { %v3705_v20 = vpack.c.bf16 %v3701_v42, %v3700_v50 }
 0xd20   :  { %6709 = vmatmul.mubr.msk.bf16.vlgmr.msra.gmra.mrb[96].mxu0 %vm847_vm1, %v3703_v63 }
 0xd21   :  { %6712 = vmatprep.mubr.msk.bf16.mxu0 %vm847_vm1, %v3704_v21  ;;  %6717 = vmatpush3.bf16.msra.mxu0 %v6869_v38 }
 0xd22   :  { %6718 = vmatprep.subr.bf16.mxu0 %v6870_v23 }
 0xd25   :  { %6719 = vmatpush3.bf16.msra.mxu0 %v6870_v23 }
 0xd28   :  { %6713 = vmatmul.mubr.msk.bf16.gmra.mrb[100].mxu0 %vm847_vm1, %v3705_v20 }
 0xd38   :  { %v3993_v32 = vpop.xlane.xlu0 %3992 }
 0xd3c   :  { %v3997_v13 = vpop.xlane.xlu0 %3996 }
 0xd40   :  { %v3999_v20 = vpop.xlane.xlu0 %3998 }
 0xd44   :  { %v3995_v23 = vpop.xlane.xlu1 %3994 }
 0xdf3   :  { %v6710_v61 = vpop.f32.mrb[96].mxu0 }
 0xdf4   :  { %v3764_v58 = vpop.f32.mrb[97].mxu0 }
 0xdf5   :  { %v6711_v4 = vpop.f32.mrb[98].mxu0 }
 0xdf6   :  { %v3796_v8 = vpack.c.bf16 %v6711_v4, %v6710_v61  ;;  %v3767_v31 = vpop.f32.mrb[99].mxu0  ;;  %v4024_v4 = vmul.f32 0.0078125, %v3993_v32 }
 0xdf7   :  { %v3795_v54 = vpack.c.bf16 %v3767_v31, %v3764_v58 }
 0xdf9   :  { %6720 = vmatprep.mubr.msk.bf16.mxu0 %vm757_vm0, %v3795_v54 }
 0xdfa   :  { %6721 = vmatmul.mubr.msk.bf16.vlgmr.msra.gmra.mrb[80].mxu0 %vm757_vm0, %v3796_v8  ;;  %v4025_v8 = vmul.f32 0.0078125, %v3995_v23  ;;  %v6897_v23 = vld [vmem:[#allocation8 + $0x84] ss:$16 sps:$4 sm:$0xff]  }
 0xdfb   :  { %v6714_v47 = vpop.f32.mrb[100].mxu0 }
 0xdfc   :  { %v3780_v52 = vpop.f32.mrb[101].mxu0 }
 0xdfd   :  { %v6715_v5 = vpop.f32.mrb[102].mxu0 }
 0xdfe   :  { %v3798_v10 = vpack.c.bf16 %v6715_v5, %v6714_v47  ;;  %v3783_v6 = vpop.f32.mrb[103].mxu0  ;;  %v4027_v47 = vmul.f32 0.0078125, %v3999_v20  ;;  %v4003_v5 = vpop.xlane.xlu1 %4002  ;;  %v6892_v20 = vld [vmem:[#allocation8 + $0x68] ss:$16 sps:$4 sm:$0xff]  }
 0xdff   :  { %v3797_v53 = vpack.c.bf16 %v3783_v6, %v3780_v52  ;;  %v4001_v52 = vpop.xlane.xlu0 %4000  ;;  %v9020_v6 = vsub.f32 %v8945_v45, %v4025_v8  ;;  %v6903_v8 = vld [vmem:[#allocation8 + $0xa4] ss:$16 sps:$4 sm:$0xff]  }
 0xe01   :  { %6724 = vmatprep.mubr.msk.bf16.mxu0 %vm757_vm0, %v3797_v53 }
 0xe02   :  { %6725 = vmatmul.mubr.msk.bf16.gmra.mrb[84].mxu0 %vm757_vm0, %v3798_v10  ;;  %v9017_v10 = vsub.f32 %v8930_v19, %v4024_v4  ;;  %v6898_v4 = vld [vmem:[#allocation8 + $0x88] ss:$16 sps:$4 sm:$0xff]  }
 0xe03   :  { %4578 = vmatprep.mubr.bf16.mxu0 %v9595_v0  ;;  %v4005_v32 = vpop.xlane.xlu0 %4004 }
 0xecd   :  { %v6722_v56 = vpop.f32.mrb[80].mxu0 }
 0xece   :  { %v3902_v11 = vadd.f32 %v6722_v56, %v9605_v44  ;;  %v3861_v15 = vpop.f32.mrb[81].mxu0 }
 0xecf   :  { %v3900_v27 = vadd.f32 %v9606_v2, %v3861_v15  ;;  %v6723_v14 = vpop.f32.mrb[82].mxu0  ;;  %v4028_v15 = vmul.f32 0.0078125, %v4001_v52  ;;  %v4029_v2 = vmul.f32 0.0078125, %v4003_v5  ;;  %v6904_v52 = vld [vmem:[#allocation8 + $0xa8] ss:$16 sps:$4 sm:$0xff]  }
 0xed0   :  { %v3903_v25 = vadd.f32 %v6723_v14, %v9607_v51  ;;  %v3864_v37 = vpop.f32.mrb[83].mxu0  ;;  %v3910_v34 = vadd.f32 %v8796_v18, %v3902_v11  ;;  %v9032_v11 = vsub.f32 %v8938_v3, %v4027_v47  ;;  %v4056_v14 = vmul.f32 %v9017_v10, %v9017_v10  ;;  %v4007_v51 = vpop.xlane.xlu1 %4006  ;;  %v6901_v47 = vld [vmem:[#allocation8 + $0xa0] ss:$16 sps:$4 sm:$0xff]   ;;  %v6909_v5 = vld [vmem:[#allocation8 + $0xc4] ss:$16 sps:$4 sm:$0xff]  }
 0xed1   :  { %v3901_v59 = vadd.f32 %v9608_v43, %v3864_v37  ;;  %v3908_v40 = vadd.f32 %v8796_v18, %v3900_v27  ;;  %v4057_v27 = vmul.f32 %v9020_v6, %v9020_v6  ;;  %v9043_v43 = vsub.f32 %v8942_v29, %v4028_v15  ;;  %v6912_v15 = vld [vmem:[#allocation8 + $0xcc] ss:$16 sps:$4 sm:$0xff]  }
 0xed2   :  { %v3911_v17 = vadd.f32 %v8796_v18, %v3903_v25  ;;  %v4059_v37 = vmul.f32 %v9032_v11, %v9032_v11 }
 0xed3   :  { %v3909_v9 = vadd.f32 %v8796_v18, %v3901_v59  ;;  %v9046_v59 = vsub.f32 %v8953_v39, %v4029_v2  ;;  %v6907_v2 = vld [vmem:[#allocation8 + $0xc0] ss:$16 sps:$4 sm:$0xff]  }
 0xed4   :  { %v5912_v60 = vpack.c.bf16 %v3911_v17, %v3910_v34  ;;  %v4030_v34 = vmul.f32 0.0078125, %v4005_v32  ;;  %v4031_v17 = vmul.f32 0.0078125, %v4007_v51  ;;  %v6915_v32 = vld [vmem:[#allocation8 + $0xe4] ss:$16 sps:$4 sm:$0xff]   ;;  %v6916_v51 = vld [vmem:[#allocation8 + $0xe8] ss:$16 sps:$4 sm:$0xff]  }
 0xed5   :  { %v5907_v57 = vpack.c.bf16 %v3909_v9, %v3908_v40  ;;  %v6726_v36 = vpop.f32.mrb[84].mxu0  ;;  %v6871_v40 = vld [vmem:[#allocation8] ss:$16 sps:$4 sm:$0xff]   ;;  %v6873_v9 = vld [vmem:[#allocation8 + $0x4] ss:$16 sps:$4 sm:$0xff]  }
 0xed6   :  { %v3906_v28 = vadd.f32 %v6726_v36, %v9609_v41  ;;  %v3877_v49 = vpop.f32.mrb[85].mxu0  ;;  %v9004_v42 = vunpack.c.h.bf16 %v5912_v60  ;;  %v9006_v50 = vunpack.c.l.bf16 %v5912_v60  ;;  %v6874_v60 = vld [vmem:[#allocation8 + $0x8] ss:$16 sps:$4 sm:$0xff]   ;;  %v9049_v36 = vsub.f32 %v8950_v22, %v4030_v34  ;;  %4433 = vmatprep.subr.bf16.mxu1 %v6873_v9 }
 0xed7   :  { %v3904_v26 = vadd.f32 %v9610_v16, %v3877_v49  ;;  %v6727_v30 = vpop.f32.mrb[86].mxu0  ;;  %v8992_v33 = vunpack.c.h.bf16 %v5907_v57  ;;  %v8994_v35 = vunpack.c.l.bf16 %v5907_v57  ;;  %v6876_v57 = vld [vmem:[#allocation8 + $0xc] ss:$16 sps:$4 sm:$0xff]   ;;  %v4061_v41 = vmul.f32 %v9046_v59, %v9046_v59  ;;  %4434 = vmatpush1.bf16.msra.mxu1 %v6871_v40  ;;  %v6877_v49 = vld [vmem:[#allocation8 + $0x20] ss:$16 sps:$4 sm:$0xff]  }
 0xed8   :  { %v3907_v38 = vadd.f32 %v6727_v30, %v9613_v1  ;;  %v3880_v55 = vpop.f32.mrb[87].mxu0  ;;  %v3914_v63 = vadd.f32 %v8796_v18, %v3906_v28  ;;  %9615 = vst [vmem:[#allocation30_spill] sm:$0xff] %v9004_v42  ;;  %9616 = vst [vmem:[#allocation19_spill] sm:$0xff] %v9006_v50  ;;  %v4060_v28 = vmul.f32 %v9043_v43, %v9043_v43  ;;  %4546 = vmatprep.subr.bf16.mxu0 %v6876_v57  ;;  %v6879_v16 = vld [vmem:[#allocation8 + $0x24] ss:$16 sps:$4 sm:$0xff]  }
 0xed9   :  { %9611 = vst [vmem:[#allocation16_spill] sm:$0xff] %v8992_v33  ;;  %9612 = vst [vmem:[#allocation29_spill] sm:$0xff] %v8994_v35  ;;  %v3905_v62 = vadd.f32 %v9614_v46, %v3880_v55  ;;  %4010 = vadd.xlane.f32.xlu1 %v8992_v33  ;;  %4008 = vadd.xlane.f32.xlu0 %v8994_v35  ;;  %v3912_v21 = vadd.f32 %v8796_v18, %v3904_v26  ;;  %v6880_v26 = vld [vmem:[#allocation8 + $0x28] ss:$16 sps:$4 sm:$0xff]   ;;  %v6882_v30 = vld [vmem:[#allocation8 + $0x2c] ss:$16 sps:$4 sm:$0xff]  }
 0xeda   :  { %v3915_v24 = vadd.f32 %v8796_v18, %v3907_v38  ;;  %4547 = vmatpush1.bf16.msra.mxu0 %v6874_v60  ;;  %v4062_v38 = vmul.f32 %v9049_v36, %v9049_v36  ;;  %4435 = vmatprep.subr.bf16.mxu1 %v6879_v16  ;;  %v6883_v55 = vld [vmem:[#allocation8 + $0x40] ss:$16 sps:$4 sm:$0xff]   ;;  %v6885_v46 = vld [vmem:[#allocation8 + $0x44] ss:$16 sps:$4 sm:$0xff]  }
 0xedb   :  { %v3913_v7 = vadd.f32 %v8796_v18, %v3905_v62  ;;  %v4026_v18 = vmul.f32 0.0078125, %v3997_v13  ;;  %v9052_v13 = vsub.f32 %v8958_v48, %v4031_v17  ;;  %4548 = vmatprep.subr.bf16.mxu0 %v6882_v30  ;;  %4436 = vmatpush1.bf16.msra.mxu1 %v6877_v49  ;;  %v6886_v62 = vld [vmem:[#allocation8 + $0x48] ss:$16 sps:$4 sm:$0xff]  }
 0xedc   :  { %v5922_v61 = vpack.c.bf16 %v3915_v24, %v3914_v63  ;;  %v6888_v63 = vld [vmem:[#allocation8 + $0x4c] ss:$16 sps:$4 sm:$0xff]   ;;  %4437 = vmatprep.subr.bf16.mxu1 %v6885_v46  ;;  %v6891_v24 = vld [vmem:[#allocation8 + $0x64] ss:$16 sps:$4 sm:$0xff]  }
 0xedd   :  { %v5917_v58 = vpack.c.bf16 %v3913_v7, %v3912_v21  ;;  %4014 = vadd.xlane.f32.xlu1 %v9004_v42  ;;  %4012 = vadd.xlane.f32.xlu0 %v9006_v50  ;;  %v9029_v44 = vsub.f32 %v8934_v12, %v4026_v18  ;;  %v4063_v1 = vmul.f32 %v9052_v13, %v9052_v13  ;;  %v6894_v21 = vld [vmem:[#allocation8 + $0x6c] ss:$16 sps:$4 sm:$0xff]   ;;  %v6889_v7 = vld [vmem:[#allocation8 + $0x60] ss:$16 sps:$4 sm:$0xff]  }
 0xede   :  { %v9022_v53 = vunpack.c.h.bf16 %v5922_v61  ;;  %v9024_v56 = vunpack.c.l.bf16 %v5922_v61  ;;  %4549 = vmatpush1.bf16.msra.mxu0 %v6880_v26  ;;  %v6900_v61 = vld [vmem:[#allocation8 + $0x8c] ss:$16 sps:$4 sm:$0xff]  }
 0xedf   :  { %v9010_v31 = vunpack.c.h.bf16 %v5917_v58  ;;  %v9012_v54 = vunpack.c.l.bf16 %v5917_v58  ;;  %v4058_v25 = vmul.f32 %v9029_v44, %v9029_v44  ;;  %4550 = vmatprep.subr.bf16.mxu0 %v6888_v63  ;;  %4438 = vmatpush1.bf16.msra.mxu1 %v6883_v55  ;;  %v6895_v58 = vld [vmem:[#allocation8 + $0x80] ss:$16 sps:$4 sm:$0xff]   ;;  %v6906_v18 = vld [vmem:[#allocation8 + $0xac] ss:$16 sps:$4 sm:$0xff]  }
 0xee0   :  { %9619 = vst [vmem:[#allocation32_spill] sm:$0xff] %v9022_v53  ;;  %9620 = vst [vmem:[#allocation20_spill] sm:$0xff] %v9024_v56  ;;  %4439 = vmatprep.subr.bf16.mxu1 %v6891_v24 }
 0xee1   :  { %9617 = vst [vmem:[#allocation31_spill] sm:$0xff] %v9010_v31  ;;  %9618 = vst [vmem:[#allocation17_spill] sm:$0xff] %v9012_v54  ;;  %4018 = vadd.xlane.f32.xlu1 %v9010_v31  ;;  %4016 = vadd.xlane.f32.xlu0 %v9012_v54 }
 0xee2   :  { %4551 = vmatpush1.bf16.msra.mxu0 %v6886_v62 }
 0xee3   :  { %4552 = vmatprep.subr.bf16.mxu0 %v6894_v21  ;;  %4440 = vmatpush1.bf16.msra.mxu1 %v6889_v7 }
 0xee4   :  { %4441 = vmatprep.subr.bf16.mxu1 %v6897_v23 }
 0xee5   :  { %4022 = vadd.xlane.f32.xlu1 %v9022_v53  ;;  %4020 = vadd.xlane.f32.xlu0 %v9024_v56 }
 0xee6   :  { %4553 = vmatpush1.bf16.msra.mxu0 %v6892_v20 }
 0xee7   :  { %4554 = vmatprep.subr.bf16.mxu0 %v6900_v61  ;;  %4442 = vmatpush1.bf16.msra.mxu1 %v6895_v58 }
 0xee8   :  { %4443 = vmatprep.subr.bf16.mxu1 %v6903_v8 }
 0xee9   :  { %4074 = vadd.xlane.f32.xlu1 %v4057_v27  ;;  %4072 = vadd.xlane.f32.xlu0 %v4056_v14  ;;  %v6910_v27 = vld [vmem:[#allocation8 + $0xc8] ss:$16 sps:$4 sm:$0xff]   ;;  %v6913_v14 = vld [vmem:[#allocation8 + $0xe0] ss:$16 sps:$4 sm:$0xff]  }
 0xeea   :  { %4555 = vmatpush1.bf16.msra.mxu0 %v6898_v4 }
 0xeeb   :  { %4556 = vmatprep.subr.bf16.mxu0 %v6906_v18  ;;  %4444 = vmatpush1.bf16.msra.mxu1 %v6901_v47 }
 0xeec   :  { %4445 = vmatprep.subr.bf16.mxu1 %v6909_v5 }
 0xeed   :  { %4076 = vadd.xlane.f32.xlu0 %v4058_v25  ;;  %4078 = vadd.xlane.f32.xlu1 %v4059_v37  ;;  %v6918_v25 = vld [vmem:[#allocation8 + $0xec] ss:$16 sps:$4 sm:$0xff]  }
 0xeee   :  { %4557 = vmatpush1.bf16.msra.mxu0 %v6904_v52 }
 0xeef   :  { %4558 = vmatprep.subr.bf16.mxu0 %v6912_v15  ;;  %4446 = vmatpush1.bf16.msra.mxu1 %v6907_v2 }
 0xef0   :  { %4447 = vmatprep.subr.bf16.mxu1 %v6915_v32 }
 0xef1   :  { %4082 = vadd.xlane.f32.xlu1 %v4061_v41  ;;  %4080 = vadd.xlane.f32.xlu0 %v4060_v28 }
 0xef2   :  { %4559 = vmatpush1.bf16.msra.mxu0 %v6910_v27 }
 0xef3   :  { %4560 = vmatprep.subr.bf16.mxu0 %v6918_v25  ;;  %4448 = vmatpush1.bf16.msra.mxu1 %v6913_v14 }
 0xef5   :  { %4086 = vadd.xlane.f32.xlu1 %v4063_v1  ;;  %4084 = vadd.xlane.f32.xlu0 %v4062_v38 }
 0xef6   :  { %4561 = vmatpush1.bf16.msra.mxu0 %v6916_v51 }
 0xf66   :  { %v4011_v37 = vpop.xlane.xlu1 %4010  ;;  %v4009_v34 = vpop.xlane.xlu0 %4008 }
 0xf67   :  { %v4033_v17 = vmul.f32 0.0078125, %v4011_v37  ;;  %v4032_v40 = vmul.f32 0.0078125, %v4009_v34 }
 0xf69   :  { %v9063_v9 = vsub.f32 %v8992_v33, %v4033_v17  ;;  %v9066_v60 = vsub.f32 %v8994_v35, %v4032_v40 }
 0xf6a   :  { %v4015_v57 = vpop.xlane.xlu1 %4014  ;;  %v4013_v41 = vpop.xlane.xlu0 %4012 }
 0xf6b   :  { %v4035_v28 = vmul.f32 0.0078125, %v4015_v57  ;;  %v4034_v49 = vmul.f32 0.0078125, %v4013_v41  ;;  %v4065_v16 = vmul.f32 %v9063_v9, %v9063_v9  ;;  %v4064_v26 = vmul.f32 %v9066_v60, %v9066_v60 }
 0xf6d   :  { %v9073_v30 = vsub.f32 %v9004_v42, %v4035_v28  ;;  %v9076_v1 = vsub.f32 %v9006_v50, %v4034_v49  ;;  %4090 = vadd.xlane.f32.xlu1 %v4065_v16  ;;  %4088 = vadd.xlane.f32.xlu0 %v4064_v26 }
 0xf6e   :  { %v4019_v38 = vpop.xlane.xlu1 %4018  ;;  %v4017_v55 = vpop.xlane.xlu0 %4016 }
 0xf6f   :  { %v4037_v46 = vmul.f32 0.0078125, %v4019_v38  ;;  %v4036_v62 = vmul.f32 0.0078125, %v4017_v55  ;;  %v4067_v63 = vmul.f32 %v9073_v30, %v9073_v30  ;;  %v4066_v24 = vmul.f32 %v9076_v1, %v9076_v1 }
 0xf71   :  { %v9083_v21 = vsub.f32 %v9010_v31, %v4037_v46  ;;  %v9086_v7 = vsub.f32 %v9012_v54, %v4036_v62  ;;  %4094 = vadd.xlane.f32.xlu1 %v4067_v63  ;;  %4092 = vadd.xlane.f32.xlu0 %v4066_v24 }
 0xf72   :  { %v4023_v20 = vpop.xlane.xlu1 %4022  ;;  %v4021_v23 = vpop.xlane.xlu0 %4020 }
 0xf73   :  { %v4039_v61 = vmul.f32 0.0078125, %v4023_v20  ;;  %v4038_v58 = vmul.f32 0.0078125, %v4021_v23  ;;  %v4069_v4 = vmul.f32 %v9083_v21, %v9083_v21  ;;  %v4068_v8 = vmul.f32 %v9086_v7, %v9086_v7  ;;  %v9105_v20 = vld [vmem:[%s9548_s6] ss:$0 sm:$0xff] }
 0xf75   :  { %v9093_v18 = vsub.f32 %v9022_v53, %v4039_v61  ;;  %v9096_v47 = vsub.f32 %v9024_v56, %v4038_v58  ;;  %4098 = vadd.xlane.f32.xlu1 %v4069_v4  ;;  %4096 = vadd.xlane.f32.xlu0 %v4068_v8  ;;  %v9112_v8 = vld [vmem:[%s9549_s7] ss:$0 sm:$0xff] }
 0xf76   :  { %v4075_v52 = vpop.xlane.xlu1 %4074  ;;  %v4073_v5 = vpop.xlane.xlu0 %4072 }
 0xf77   :  { %v4105_v15 = vmul.f32 0.0078125, %v4075_v52  ;;  %v4104_v2 = vmul.f32 0.0078125, %v4073_v5  ;;  %v4071_v27 = vmul.f32 %v9093_v18, %v9093_v18  ;;  %v4070_v14 = vmul.f32 %v9096_v47, %v9096_v47 }
 0xf79   :  { %v4121_v32 = vadd.f32 1e-05, %v4105_v15  ;;  %v4120_v51 = vadd.f32 1e-05, %v4104_v2  ;;  %4102 = vadd.xlane.f32.xlu1 %v4071_v27  ;;  %4100 = vadd.xlane.f32.xlu0 %v4070_v14 }
 0xf7a   :  { %v4079_v25 = vpop.xlane.xlu1 %4078  ;;  %v4077_v37 = vpop.xlane.xlu0 %4076 }
 0xf7b   :  { %7239 = vrsqrt.f32 %v4121_v32  ;;  %v4107_v34 = vmul.f32 0.0078125, %v4079_v25  ;;  %v4106_v17 = vmul.f32 0.0078125, %v4077_v37 }
 0xf7c   :  { %7241 = vrsqrt.f32 %v4120_v51 }
 0xf7d   :  { %v4123_v40 = vadd.f32 1e-05, %v4107_v34  ;;  %v4122_v57 = vadd.f32 1e-05, %v4106_v17 }
 0xf7e   :  { %v4083_v41 = vpop.xlane.xlu1 %4082  ;;  %v4081_v28 = vpop.xlane.xlu0 %4080 }
 0xf7f   :  { %7243 = vrsqrt.f32 %v4123_v40  ;;  %v4109_v49 = vmul.f32 0.0078125, %v4083_v41  ;;  %v4108_v16 = vmul.f32 0.0078125, %v4081_v28 }
 0xf80   :  { %7245 = vrsqrt.f32 %v4122_v57 }
 0xf81   :  { %v4125_v26 = vadd.f32 1e-05, %v4109_v49  ;;  %v4124_v38 = vadd.f32 1e-05, %v4108_v16 }
 0xf82   :  { %v4087_v55 = vpop.xlane.xlu1 %4086  ;;  %v4085_v46 = vpop.xlane.xlu0 %4084 }
 0xf83   :  { %7247 = vrsqrt.f32 %v4125_v26  ;;  %v4111_v62 = vmul.f32 0.0078125, %v4087_v55  ;;  %v4110_v63 = vmul.f32 0.0078125, %v4085_v46 }
 0xf84   :  { %7249 = vrsqrt.f32 %v4124_v38 }
 0xf85   :  { %v7240_v24 = vpop.eup %7239  ;;  %v4127_v4 = vadd.f32 1e-05, %v4111_v62  ;;  %v4126_v5 = vadd.f32 1e-05, %v4110_v63 }
 0xf86   :  { %v7242_v23 = vpop.eup %7241  ;;  %v4153_v61 = vmul.f32 %v7240_v24, %v9020_v6 }
 0xf87   :  { %v4152_v58 = vmul.f32 %v7242_v23, %v9017_v10  ;;  %7251 = vrsqrt.f32 %v4127_v4  ;;  %v6922_v4 = vld [vmem:[#allocation10 + $0x80] sm:$0xff]  }
 0xf88   :  { %v4175_v52 = vmul.f32 %v9105_v20, %v4153_v61  ;;  %7253 = vrsqrt.f32 %v4126_v5  ;;  %v6924_v5 = vld [vmem:[#allocation10 + $0xc8] sm:$0xff]  }
 0xf89   :  { %v7244_v15 = vpop.eup %7243  ;;  %v4174_v2 = vmul.f32 %v9105_v20, %v4152_v58  ;;  %v6921_v58 = vld [vmem:[#allocation10] sm:$0xff]  }
 0xf8a   :  { %v7246_v27 = vpop.eup %7245  ;;  %v4197_v14 = vadd.f32 %v9112_v8, %v4175_v52  ;;  %v4155_v32 = vmul.f32 %v7244_v15, %v9032_v11  ;;  %v6923_v52 = vld [vmem:[#allocation10 + $0x48] sm:$0xff]  }
 0xf8b   :  { %v4196_v10 = vadd.f32 %v9112_v8, %v4174_v2  ;;  %v4154_v6 = vmul.f32 %v7246_v27, %v9029_v44  ;;  %v6925_v15 = vld [vmem:[#allocation10 + $0x8] sm:$0xff]   ;;  %v6927_v27 = vld [vmem:[#allocation10 + $0x50] sm:$0xff]  }
 0xf8c   :  { %v4177_v34 = vmul.f32 %v9105_v20, %v4155_v32  ;;  %v6926_v2 = vld [vmem:[#allocation10 + $0x88] sm:$0xff]   ;;  %v6929_v32 = vld [vmem:[#allocation10 + $0x10] sm:$0xff]  }
 0xf8d   :  { %v7248_v51 = vpop.eup %7247  ;;  %v4212_v25 = vpack.c.bf16 %v4197_v14, %v4196_v10  ;;  %v4176_v37 = vmul.f32 %v9105_v20, %v4154_v6  ;;  %v6928_v14 = vld [vmem:[#allocation10 + $0xd0] sm:$0xff]   ;;  %v6931_v6 = vld [vmem:[#allocation10 + $0x58] sm:$0xff]  }
 0xf8e   :  { %v7250_v17 = vpop.eup %7249  ;;  %v4199_v40 = vadd.f32 %v9112_v8, %v4177_v34  ;;  %v4157_v57 = vmul.f32 %v7248_v51, %v9046_v59  ;;  %v6930_v10 = vld [vmem:[#allocation10 + $0x90] sm:$0xff]   ;;  %v6932_v51 = vld [vmem:[#allocation10 + $0xd8] sm:$0xff]   ;;  %v6935_v34 = vld [vmem:[#allocation10 + $0x60] sm:$0xff]  }
 0xf8f   :  { %4466 = vmatmul.mubr.bf16.vlgmr.msra.gmra.mrb[96].mxu1 %v4212_v25  ;;  %4579 = vmatmul.mubr.bf16.vlgmr.msra.gmra.mrb[104].mxu0 %v4212_v25  ;;  %v4198_v11 = vadd.f32 %v9112_v8, %v4176_v37  ;;  %v4156_v44 = vmul.f32 %v7250_v17, %v9043_v43  ;;  %v6933_v25 = vld [vmem:[#allocation10 + $0x18] sm:$0xff]   ;;  %v6936_v17 = vld [vmem:[#allocation10 + $0xe0] sm:$0xff]  }
 0xf90   :  { %4475 = vmatprep.mubr.bf16.mxu1 %v9595_v0  ;;  %4588 = vmatprep.mubr.bf16.mxu0 %v9595_v0  ;;  %v4179_v16 = vmul.f32 %v9105_v20, %v4157_v57  ;;  %v6934_v37 = vld [vmem:[#allocation10 + $0x98] sm:$0xff]   ;;  %v6940_v57 = vld [vmem:[#allocation10 + $0xe8] sm:$0xff]  }
 0xf91   :  { %v7252_v41 = vpop.eup %7251  ;;  %v4213_v28 = vpack.c.bf16 %v4199_v40, %v4198_v11  ;;  %v4178_v49 = vmul.f32 %v9105_v20, %v4156_v44  ;;  %v6937_v11 = vld [vmem:[#allocation10 + $0x20] sm:$0xff]   ;;  %v6939_v44 = vld [vmem:[#allocation10 + $0x68] sm:$0xff]  }
 0xf92   :  { %v7254_v26 = vpop.eup %7253  ;;  %v4201_v55 = vadd.f32 %v9112_v8, %v4179_v16  ;;  %v4159_v59 = vmul.f32 %v7252_v41, %v9052_v13  ;;  %v6920_v13 = vld [vmem:[#allocation10 + $0xc0] sm:$0xff]   ;;  %v6941_v41 = vld [vmem:[#allocation10 + $0x28] sm:$0xff]  }
 0xf93   :  { %v4200_v38 = vadd.f32 %v9112_v8, %v4178_v49  ;;  %v4158_v43 = vmul.f32 %v7254_v26, %v9049_v36  ;;  %v6919_v36 = vld [vmem:[#allocation10 + $0x40] sm:$0xff]   ;;  %6280 = vmatprep.subr.bf16.mxu0 %v6920_v13 }
 0xf94   :  { %v4181_v63 = vmul.f32 %v9105_v20, %v4159_v59  ;;  %6216 = vmatprep.subr.bf16.mxu1 %v6919_v36  ;;  %6281 = vmatpush3.bf16.msra.mxu0 %v6922_v4  ;;  %v6938_v40 = vld [vmem:[#allocation10 + $0xa0] sm:$0xff]   ;;  %v6943_v59 = vld [vmem:[#allocation10 + $0x70] sm:$0xff]  }
 0xf95   :  { %v4214_v46 = vpack.c.bf16 %v4201_v55, %v4200_v38  ;;  %v4180_v62 = vmul.f32 %v9105_v20, %v4158_v43  ;;  %6217 = vmatpush3.bf16.msra.mxu1 %v6921_v58  ;;  %6282 = vmatprep.subr.bf16.mxu0 %v6924_v5  ;;  %v6946_v36 = vld [vmem:[#allocation10 + $0xb0] sm:$0xff]  }
 0xf96   :  { %v4203_v23 = vadd.f32 %v9112_v8, %v4181_v63  ;;  %6218 = vmatprep.subr.bf16.mxu1 %v6923_v52 }
 0xf97   :  { %4476 = vmatmul.mubr.bf16.gmra.mrb[100].mxu1 %v4213_v28  ;;  %4589 = vmatmul.mubr.bf16.gmra.mrb[108].mxu0 %v4213_v28  ;;  %v4202_v24 = vadd.f32 %v9112_v8, %v4180_v62  ;;  %v6942_v28 = vld [vmem:[#allocation10 + $0xa8] sm:$0xff]  }
 0xf98   :  { %4485 = vmatprep.mubr.bf16.mxu1 %v9595_v0  ;;  %4598 = vmatprep.mubr.bf16.mxu0 %v9595_v0 }
 0xf99   :  { %v4215_v61 = vpack.c.bf16 %v4203_v23, %v4202_v24  ;;  %6219 = vmatpush3.bf16.msra.mxu1 %v6925_v15  ;;  %6283 = vmatpush3.bf16.msra.mxu0 %v6926_v2  ;;  %v6947_v2 = vld [vmem:[#allocation10 + $0x78] sm:$0xff]  }
 0xf9a   :  { %6220 = vmatprep.subr.bf16.mxu1 %v6927_v27  ;;  %6284 = vmatprep.subr.bf16.mxu0 %v6928_v14  ;;  %v6948_v27 = vld [vmem:[#allocation10 + $0xf8] sm:$0xff]  }
 0xf9b   :  { %v6949_v14 = vld [vmem:[#allocation10 + $0x38] sm:$0xff]  }
 0xf9d   :  { %6221 = vmatpush3.bf16.msra.mxu1 %v6929_v32  ;;  %6285 = vmatpush3.bf16.msra.mxu0 %v6930_v10  ;;  %v6950_v32 = vld [vmem:[#allocation10 + $0xb8] sm:$0xff]  }
 0xf9e   :  { %6222 = vmatprep.subr.bf16.mxu1 %v6931_v6  ;;  %6286 = vmatprep.subr.bf16.mxu0 %v6932_v51 }
 0xf9f   :  { %4486 = vmatmul.mubr.bf16.gmra.mrb[104].mxu1 %v4214_v46  ;;  %4599 = vmatmul.mubr.bf16.gmra.mrb[112].mxu0 %v4214_v46  ;;  %v6944_v46 = vld [vmem:[#allocation10 + $0xf0] sm:$0xff]  }
 0xfa0   :  { %4495 = vmatprep.mubr.bf16.mxu1 %v9595_v0  ;;  %4608 = vmatprep.mubr.bf16.mxu0 %v9595_v0 }
 0xfa1   :  { %6223 = vmatpush3.bf16.msra.mxu1 %v6933_v25  ;;  %6287 = vmatpush3.bf16.msra.mxu0 %v6934_v37 }
 0xfa2   :  { %6224 = vmatprep.subr.bf16.mxu1 %v6935_v34  ;;  %6288 = vmatprep.subr.bf16.mxu0 %v6936_v17 }
 0xfa5   :  { %6225 = vmatpush3.bf16.msra.mxu1 %v6937_v11  ;;  %6289 = vmatpush3.bf16.msra.mxu0 %v6938_v40 }
 0xfa6   :  { %6226 = vmatprep.subr.bf16.mxu1 %v6939_v44  ;;  %6290 = vmatprep.subr.bf16.mxu0 %v6940_v57 }
 0xfa7   :  { %4496 = vmatmul.mubr.bf16.gmra.mrb[108].mxu1 %v4215_v61  ;;  %4609 = vmatmul.mubr.bf16.gmra.mrb[116].mxu0 %v4215_v61  ;;  %v6945_v61 = vld [vmem:[#allocation10 + $0x30] sm:$0xff]  }
 0xfa8   :  { %4505 = vmatprep.mubr.bf16.mxu1 %v9595_v0  ;;  %4618 = vmatprep.mubr.bf16.mxu0 %v9595_v0 }
 0xfa9   :  { %6227 = vmatpush3.bf16.msra.mxu1 %v6941_v41  ;;  %6291 = vmatpush3.bf16.msra.mxu0 %v6942_v28 }
 0xfaa   :  { %6228 = vmatprep.subr.bf16.mxu1 %v6943_v59  ;;  %6292 = vmatprep.subr.bf16.mxu0 %v6944_v46 }
 0xfad   :  { %6229 = vmatpush3.bf16.msra.mxu1 %v6945_v61  ;;  %6293 = vmatpush3.bf16.msra.mxu0 %v6946_v36 }
 0xfae   :  { %6230 = vmatprep.subr.bf16.mxu1 %v6947_v2  ;;  %6294 = vmatprep.subr.bf16.mxu0 %v6948_v27 }
 0xfb1   :  { %6231 = vmatpush3.bf16.msra.mxu1 %v6949_v14  ;;  %6295 = vmatpush3.bf16.msra.mxu0 %v6950_v32 }
 0xffa   :  { %v4091_v49 = vpop.xlane.xlu1 %4090  ;;  %v4089_v16 = vpop.xlane.xlu0 %4088 }
 0xffb   :  { %v4113_v26 = vmul.f32 0.0078125, %v4091_v49  ;;  %v4112_v38 = vmul.f32 0.0078125, %v4089_v16 }
 0xffd   :  { %v4129_v55 = vadd.f32 1e-05, %v4113_v26  ;;  %v4128_v43 = vadd.f32 1e-05, %v4112_v38 }
 0xffe   :  { %v4095_v62 = vpop.xlane.xlu1 %4094  ;;  %v4093_v63 = vpop.xlane.xlu0 %4092 }
 0xfff   :  { %7255 = vrsqrt.f32 %v4129_v55  ;;  %v4115_v24 = vmul.f32 0.0078125, %v4095_v62  ;;  %v4114_v23 = vmul.f32 0.0078125, %v4093_v63 }
0x1000   :  { %7257 = vrsqrt.f32 %v4128_v43 }
0x1001   :  { %v4131_v13 = vadd.f32 1e-05, %v4115_v24  ;;  %v4130_v58 = vadd.f32 1e-05, %v4114_v23 }
0x1002   :  { %v4099_v4 = vpop.xlane.xlu1 %4098  ;;  %v4097_v52 = vpop.xlane.xlu0 %4096 }
0x1003   :  { %7259 = vrsqrt.f32 %v4131_v13  ;;  %v4117_v5 = vmul.f32 0.0078125, %v4099_v4  ;;  %v4116_v15 = vmul.f32 0.0078125, %v4097_v52 }
0x1004   :  { %7261 = vrsqrt.f32 %v4130_v58 }
0x1005   :  { %v4133_v10 = vadd.f32 1e-05, %v4117_v5  ;;  %v4132_v6 = vadd.f32 1e-05, %v4116_v15 }
0x1006   :  { %v4103_v51 = vpop.xlane.xlu1 %4102  ;;  %v4101_v25 = vpop.xlane.xlu0 %4100 }
0x1007   :  { %7263 = vrsqrt.f32 %v4133_v10  ;;  %v4119_v37 = vmul.f32 0.0078125, %v4103_v51  ;;  %v4118_v34 = vmul.f32 0.0078125, %v4101_v25 }
0x1008   :  { %7265 = vrsqrt.f32 %v4132_v6 }
0x1009   :  { %v7256_v17 = vpop.eup %7255  ;;  %v4135_v44 = vadd.f32 1e-05, %v4119_v37  ;;  %v4134_v41 = vadd.f32 1e-05, %v4118_v34 }
0x100a   :  { %v7258_v11 = vpop.eup %7257  ;;  %v4161_v40 = vmul.f32 %v7256_v17, %v9063_v9 }
0x100b   :  { %v4160_v57 = vmul.f32 %v7258_v11, %v9066_v60  ;;  %7267 = vrsqrt.f32 %v4135_v44 }
0x100c   :  { %v4183_v28 = vmul.f32 %v9105_v20, %v4161_v40  ;;  %7269 = vrsqrt.f32 %v4134_v41 }
0x100d   :  { %v7260_v49 = vpop.eup %7259  ;;  %v4182_v16 = vmul.f32 %v9105_v20, %v4160_v57 }
0x100e   :  { %v7262_v26 = vpop.eup %7261  ;;  %v4205_v38 = vadd.f32 %v9112_v8, %v4183_v28  ;;  %v4163_v55 = vmul.f32 %v7260_v49, %v9073_v30 }
0x100f   :  { %v4204_v43 = vadd.f32 %v9112_v8, %v4182_v16  ;;  %v4162_v59 = vmul.f32 %v7262_v26, %v9076_v1 }
0x1010   :  { %v4185_v62 = vmul.f32 %v9105_v20, %v4163_v55 }
0x1011   :  { %v7264_v9 = vpop.eup %7263  ;;  %v4216_v46 = vpack.c.bf16 %v4205_v38, %v4204_v43  ;;  %v4184_v60 = vmul.f32 %v9105_v20, %v4162_v59 }
0x1012   :  { %v7266_v63 = vpop.eup %7265  ;;  %v4207_v24 = vadd.f32 %v9112_v8, %v4185_v62  ;;  %v4165_v23 = vmul.f32 %v7264_v9, %v9083_v21 }
0x1013   :  { %4506 = vmatmul.mubr.bf16.gmra.mrb[112].mxu1 %v4216_v46  ;;  %4619 = vmatmul.mubr.bf16.gmra.mrb[120].mxu0 %v4216_v46  ;;  %v4206_v30 = vadd.f32 %v9112_v8, %v4184_v60  ;;  %v4164_v1 = vmul.f32 %v7266_v63, %v9086_v7 }
0x1014   :  { %4515 = vmatprep.mubr.bf16.mxu1 %v9595_v0  ;;  %4628 = vmatprep.mubr.bf16.mxu0 %v9595_v0  ;;  %v4187_v58 = vmul.f32 %v9105_v20, %v4165_v23 }
0x1015   :  { %v7268_v61 = vpop.eup %7267  ;;  %v4217_v36 = vpack.c.bf16 %v4207_v24, %v4206_v30  ;;  %v4186_v13 = vmul.f32 %v9105_v20, %v4164_v1 }
0x1016   :  { %v7270_v4 = vpop.eup %7269  ;;  %v4209_v5 = vadd.f32 %v9112_v8, %v4187_v58  ;;  %v4167_v21 = vmul.f32 %v7268_v61, %v9093_v18 }
0x1017   :  { %v4208_v52 = vadd.f32 %v9112_v8, %v4186_v13  ;;  %v4166_v7 = vmul.f32 %v7270_v4, %v9096_v47  ;;  %v4253_v47 = vlaneseq }
0x1018   :  { %v4189_v27 = vmul.f32 %v9105_v20, %v4167_v21 }
0x1019   :  { %v4218_v15 = vpack.c.bf16 %v4209_v5, %v4208_v52  ;;  %v4188_v2 = vmul.f32 %v9105_v20, %v4166_v7  ;;  %v4254_v18 = vshrl.u32 %v4253_v47, 7  ;;  %v3958_v20 = vld [vmem:[%s9551_s9] sm:$0xf] }
0x101a   :  { %v4211_v32 = vadd.f32 %v9112_v8, %v4189_v27 }
0x101b   :  { %4516 = vmatmul.mubr.bf16.gmra.mrb[116].mxu1 %v4217_v36  ;;  %4629 = vmatmul.mubr.bf16.gmra.mrb[124].mxu0 %v4217_v36  ;;  %v4210_v14 = vadd.f32 %v9112_v8, %v4188_v2  ;;  %v4255_v6 = vsub.s32 0, %v4254_v18  ;;  %v4263_v51 = vsub.s32 2, %v4254_v18  ;;  %v4259_v25 = vsub.s32 1, %v4254_v18 }
0x101c   :  { %4525 = vmatprep.mubr.bf16.mxu1 %v9595_v0  ;;  %4638 = vmatprep.mubr.bf16.mxu0 %v9595_v0  ;;  %v4267_v37 = vsub.s32 3, %v4254_v18 }
0x101d   :  { %v4219_v10 = vpack.c.bf16 %v4211_v32, %v4210_v14  ;;  %v9177_v34 = vrot.slane %v3958_v20, %v4255_v6  ;;  %v9181_v17 = vrot.slane %v3958_v20, %v4259_v25 }
0x101e   :  { %v9183_v8 = vrot.slane %v3958_v20, %v4267_v37 }
0x1023   :  { %4526 = vmatmul.mubr.bf16.gmra.mrb[120].mxu1 %v4218_v15  ;;  %4639 = vmatmul.mubr.bf16.gmra.mrb[128].mxu0 %v4218_v15 }
0x1024   :  { %4535 = vmatprep.mubr.bf16.mxu1 %v9595_v0  ;;  %4648 = vmatprep.mubr.bf16.mxu0 %v9595_v0  ;;  %v9179_v0 = vrot.slane %v3958_v20, %v4263_v51 }
0x102b   :  { %4536 = vmatmul.mubr.bf16.gmra.mrb[124].mxu1 %v4219_v10  ;;  %4649 = vmatmul.mubr.bf16.gmra.mrb[132].mxu0 %v4219_v10 }
0x1062   :  { %v4467_v11 = vpop.f32.mrb[96].mxu1  ;;  %v4580_v40 = vpop.f32.mrb[104].mxu0 }
0x1063   :  { %v4468_v44 = vadd.f32 %v4467_v11, %v9177_v34  ;;  %v4581_v57 = vadd.f32 %v4580_v40, %v9179_v0  ;;  %v4469_v41 = vpop.f32.mrb[97].mxu1  ;;  %v4582_v28 = vpop.f32.mrb[105].mxu0 }
0x1064   :  { %v4470_v49 = vadd.f32 %v4469_v41, %v9181_v17  ;;  %v4583_v16 = vadd.f32 %v4582_v28, %v9183_v8  ;;  %v4471_v26 = vpop.f32.mrb[98].mxu1  ;;  %v4584_v38 = vpop.f32.mrb[106].mxu0 }
0x1065   :  { %v4723_v55 = vmul.f32 0.70710677, %v4468_v44  ;;  %v4725_v43 = vmul.f32 0.70710677, %v4581_v57  ;;  %v4472_v46 = vadd.f32 %v4471_v26, %v9177_v34  ;;  %v4585_v60 = vadd.f32 %v4584_v38, %v9179_v0  ;;  %v4473_v62 = vpop.f32.mrb[99].mxu1  ;;  %v4586_v63 = vpop.f32.mrb[107].mxu0 }
0x1066   :  { %v4724_v59 = vmul.f32 0.70710677, %v4470_v49  ;;  %v4726_v9 = vmul.f32 0.70710677, %v4583_v16  ;;  %v4474_v30 = vadd.f32 %v4473_v62, %v9181_v17  ;;  %v4587_v24 = vadd.f32 %v4586_v63, %v9183_v8 }
0x1067   :  { %7271 = verf.f32 %v4723_v55  ;;  %v4727_v1 = vmul.f32 0.70710677, %v4472_v46  ;;  %v4729_v23 = vmul.f32 0.70710677, %v4585_v60  ;;  %v4659_v18 = vmul.f32 0.5, %v4468_v44 }
0x1068   :  { %7273 = verf.f32 %v4725_v43  ;;  %v4728_v61 = vmul.f32 0.70710677, %v4474_v30  ;;  %v4730_v13 = vmul.f32 0.70710677, %v4587_v24  ;;  %v4661_v40 = vmul.f32 0.5, %v4581_v57 }
0x1069   :  { %7275 = verf.f32 %v4724_v59  ;;  %v9200_v41 = vmul.f32 0.5, %v4470_v49  ;;  %v9202_v28 = vmul.f32 0.5, %v4583_v16  ;;  %v4663_v44 = vmul.f32 0.5, %v4472_v46 }
0x106a   :  { %7277 = verf.f32 %v4726_v9  ;;  %v4477_v36 = vpop.f32.mrb[100].mxu1  ;;  %v4590_v4 = vpop.f32.mrb[108].mxu0  ;;  %v4665_v62 = vmul.f32 0.5, %v4585_v60  ;;  %v9204_v63 = vmul.f32 0.5, %v4474_v30 }
0x106b   :  { %7279 = verf.f32 %v4727_v1  ;;  %v4478_v58 = vadd.f32 %v4477_v36, %v9177_v34  ;;  %v4479_v52 = vpop.f32.mrb[101].mxu1  ;;  %v4591_v5 = vadd.f32 %v4590_v4, %v9179_v0  ;;  %v4592_v21 = vpop.f32.mrb[109].mxu0 }
0x106c   :  { %7281 = verf.f32 %v4729_v23  ;;  %v4480_v7 = vadd.f32 %v4479_v52, %v9181_v17  ;;  %v4481_v15 = vpop.f32.mrb[102].mxu1  ;;  %v4593_v27 = vadd.f32 %v4592_v21, %v9183_v8  ;;  %v4594_v14 = vpop.f32.mrb[110].mxu0 }
0x106d   :  { %7283 = verf.f32 %v4728_v61  ;;  %v4731_v2 = vmul.f32 0.70710677, %v4478_v58  ;;  %v4483_v32 = vpop.f32.mrb[103].mxu1  ;;  %v4733_v10 = vmul.f32 0.70710677, %v4591_v5  ;;  %v4596_v47 = vpop.f32.mrb[111].mxu0  ;;  %v4482_v20 = vadd.f32 %v4481_v15, %v9177_v34 }
0x106e   :  { %7285 = verf.f32 %v4730_v13  ;;  %v4732_v6 = vmul.f32 0.70710677, %v4480_v7  ;;  %v4734_v51 = vmul.f32 0.70710677, %v4593_v27  ;;  %v4595_v25 = vadd.f32 %v4594_v14, %v9179_v0 }
0x106f   :  { %7287 = verf.f32 %v4731_v2  ;;  %v4484_v37 = vadd.f32 %v4483_v32, %v9181_v17  ;;  %v4735_v55 = vmul.f32 0.70710677, %v4482_v20  ;;  %v4597_v23 = vadd.f32 %v4596_v47, %v9183_v8 }
0x1070   :  { %7289 = verf.f32 %v4733_v10  ;;  %v4737_v1 = vmul.f32 0.70710677, %v4595_v25  ;;  %v9207_v61 = vmul.f32 0.5, %v4587_v24  ;;  %v9209_v16 = vmul.f32 0.5, %v4478_v58 }
0x1071   :  { %v7272_v11 = vpop.eup %7271  ;;  %7291 = verf.f32 %v4732_v6  ;;  %v4736_v36 = vmul.f32 0.70710677, %v4484_v37  ;;  %v9211_v21 = vmul.f32 0.5, %v4591_v5  ;;  %v9213_v15 = vmul.f32 0.5, %v4480_v7 }
0x1072   :  { %v7274_v26 = vpop.eup %7273  ;;  %v4851_v38 = vadd.f32 1.0, %v7272_v11  ;;  %7293 = verf.f32 %v4734_v51  ;;  %v4487_v43 = vpop.f32.mrb[104].mxu1  ;;  %v9215_v60 = vmul.f32 0.5, %v4593_v27  ;;  %v4738_v5 = vmul.f32 0.70710677, %v4597_v23 }
0x1073   :  { %v4600_v59 = vpop.f32.mrb[112].mxu0  ;;  %v7276_v9 = vpop.eup %7275  ;;  %v4853_v52 = vadd.f32 1.0, %v7274_v26  ;;  %7295 = verf.f32 %v4735_v55  ;;  %v4488_v7 = vadd.f32 %v4487_v43, %v9177_v34  ;;  %v9234_v43 = vmul.f32 0.5, %v4482_v20 }
0x1074   :  { %v4489_v57 = vpop.f32.mrb[105].mxu1  ;;  %v7278_v49 = vpop.eup %7277  ;;  %v9219_v32 = vmul.f32 %v4851_v38, %v4659_v18  ;;  %v4852_v24 = vadd.f32 1.0, %v7276_v9  ;;  %7297 = verf.f32 %v4737_v1  ;;  %v4601_v26 = vadd.f32 %v4600_v59, %v9179_v0 }
0x1075   :  { %v4602_v13 = vpop.f32.mrb[113].mxu0  ;;  %v4491_v46 = vpop.f32.mrb[106].mxu1  ;;  %v4854_v27 = vadd.f32 1.0, %v7278_v49  ;;  %7299 = verf.f32 %v4736_v36  ;;  %v9227_v38 = vmul.f32 %v4853_v52, %v4661_v40  ;;  %v4739_v55 = vmul.f32 0.70710677, %v4488_v7 }
0x1076   :  { %v7280_v4 = vpop.eup %7279  ;;  %v4604_v30 = vpop.f32.mrb[114].mxu0  ;;  %v9236_v49 = vmul.f32 0.5, %v4595_v25  ;;  %v9242_v52 = vmul.f32 0.5, %v4597_v23  ;;  %7301 = verf.f32 %v4738_v5  ;;  %v9245_v20 = vmul.f32 %v4852_v24, %v9200_v41 }
0x1077   :  { %v9217_v2 = vpop.f32.mrb[107].mxu1  ;;  %v7282_v14 = vpop.eup %7281  ;;  %v4855_v58 = vadd.f32 1.0, %v7280_v4  ;;  %v4490_v4 = vadd.f32 %v4489_v57, %v9181_v17  ;;  %v9248_v25 = vmul.f32 %v4854_v27, %v9202_v28  ;;  %7303 = verf.f32 %v4739_v55 }
0x1078   :  { %v9221_v10 = vpop.f32.mrb[115].mxu0  ;;  %v7284_v47 = vpop.eup %7283  ;;  %v4857_v6 = vadd.f32 1.0, %v7282_v14  ;;  %v4603_v5 = vadd.f32 %v4602_v13, %v9183_v8  ;;  %v4492_v28 = vadd.f32 %v4491_v46, %v9177_v34  ;;  %v4605_v24 = vadd.f32 %v4604_v30, %v9179_v0 }
0x1079   :  { %v7286_v51 = vpop.eup %7285  ;;  %v9224_v11 = vmul.f32 %v4855_v58, %v4663_v44  ;;  %v9238_v44 = vmul.f32 0.5, %v4484_v37  ;;  %v4741_v37 = vmul.f32 0.70710677, %v4601_v26  ;;  %v4740_v23 = vmul.f32 0.70710677, %v4490_v4 }
0x107a   :  { %v7288_v18 = vpop.eup %7287  ;;  %v9229_v9 = vmul.f32 %v4857_v6, %v4665_v62  ;;  %v4497_v36 = vpop.f32.mrb[108].mxu1  ;;  %v4856_v62 = vadd.f32 1.0, %v7284_v47  ;;  %v4858_v40 = vadd.f32 1.0, %v7286_v51  ;;  %v9262_v50 = vmul.f32 0.5, %v4488_v7 }
0x107b   :  { %v7290_v14 = vpop.eup %7289  ;;  %v4610_v59 = vpop.f32.mrb[116].mxu0  ;;  %v4859_v47 = vadd.f32 1.0, %v7288_v18  ;;  %7305 = verf.f32 %v4741_v37  ;;  %v9264_v18 = vmul.f32 0.5, %v4601_v26  ;;  %v4742_v13 = vmul.f32 0.70710677, %v4603_v5 }
0x107c   :  { %v7292_v58 = vpop.eup %7291  ;;  %v4499_v57 = vpop.f32.mrb[109].mxu1  ;;  %v4861_v41 = vadd.f32 1.0, %v7290_v14  ;;  %v4920_v27 = vmul.f32 %v4856_v62, %v9204_v63  ;;  %7307 = verf.f32 %v4740_v23  ;;  %v4743_v33 = vmul.f32 0.70710677, %v4492_v28 }
0x107d   :  { %v4612_v6 = vpop.f32.mrb[117].mxu0  ;;  %v7294_v53 = vpop.eup %7293  ;;  %v4860_v55 = vadd.f32 1.0, %v7292_v58  ;;  %v4922_v14 = vmul.f32 %v4858_v40, %v9207_v61  ;;  %v9268_v37 = vmul.f32 %v4859_v47, %v9209_v16  ;;  %v9270_v46 = vmul.f32 0.5, %v4490_v4 }
0x107e   :  { %v9250_v1 = vpop.f32.mrb[110].mxu1  ;;  %v9252_v56 = vpop.f32.mrb[118].mxu0  ;;  %v4862_v42 = vadd.f32 1.0, %v7294_v53  ;;  %v4745_v30 = vmul.f32 0.70710677, %v4605_v24  ;;  %v9273_v53 = vmul.f32 %v4861_v41, %v9211_v21  ;;  %7309 = verf.f32 %v4742_v13 }
0x107f   :  { %v9255_v31 = vpop.f32.mrb[111].mxu1  ;;  %v9257_v54 = vpop.f32.mrb[119].mxu0  ;;  %v4494_v7 = vadd.f32 %v9217_v2, %v9181_v17  ;;  %v4607_v26 = vadd.f32 %v9221_v10, %v9183_v8  ;;  %v9280_v58 = vmul.f32 %v4860_v55, %v9213_v15  ;;  %7311 = verf.f32 %v4743_v33 }
0x1080   :  { %v7296_v51 = vpop.eup %7295  ;;  %v9283_v61 = vmul.f32 %v4862_v42, %v9215_v60  ;;  %v9286_v16 = vadd.f32 %v4497_v36, %v9177_v34  ;;  %v9288_v21 = vmul.f32 0.5, %v4603_v5  ;;  %7313 = verf.f32 %v4745_v30 }
0x1081   :  { %v7298_v35 = vpop.eup %7297  ;;  %v4863_v4 = vadd.f32 1.0, %v7296_v51  ;;  %v4744_v40 = vmul.f32 0.70710677, %v4494_v7  ;;  %v4679_v23 = vmul.f32 0.5, %v4492_v28  ;;  %v4746_v10 = vmul.f32 0.70710677, %v4607_v26 }
0x1082   :  { %v7300_v63 = vpop.eup %7299  ;;  %v4865_v2 = vadd.f32 1.0, %v7298_v35  ;;  %v4747_v15 = vmul.f32 0.70710677, %v9286_v16  ;;  %v9292_v42 = vadd.f32 %v4610_v59, %v9179_v0  ;;  %v9295_v33 = vadd.f32 %v4499_v57, %v9181_v17 }
0x1083   :  { %v7302_v62 = vpop.eup %7301  ;;  %v4864_v47 = vadd.f32 1.0, %v7300_v63  ;;  %7315 = verf.f32 %v4744_v40  ;;  %v9298_v60 = vadd.f32 %v4612_v6, %v9183_v8  ;;  %v4980_v36 = vpack.c.bf16 %v4920_v27, %v9245_v20 }
0x1084   :  { %v7304_v41 = vpop.eup %7303  ;;  %7317 = verf.f32 %v4746_v10  ;;  %v4982_v35 = vpack.c.bf16 %v4922_v14, %v9248_v25  ;;  %v4927_v28 = vmul.f32 %v4863_v4, %v9234_v43  ;;  %v4866_v55 = vadd.f32 1.0, %v7302_v62 }
0x1085   :  { %v7306_v5 = vpop.eup %7305  ;;  %v4681_v51 = vmul.f32 0.5, %v4605_v24  ;;  %v4749_v13 = vmul.f32 0.70710677, %v9292_v42  ;;  %v4929_v59 = vmul.f32 %v4865_v2, %v9236_v49  ;;  %v4928_v57 = vmul.f32 %v4864_v47, %v9238_v44  ;;  %5305 = vmatprep.mubr.bf16.mxu1 %v4980_v36 }
0x1086   :  { %v4867_v30 = vadd.f32 1.0, %v7304_v41  ;;  %v4748_v63 = vmul.f32 0.70710677, %v9295_v33  ;;  %5402 = vmatprep.mubr.bf16.mxu0 %v4982_v35  ;;  %v7308_v6 = vpop.eup %7307  ;;  %v4680_v20 = vmul.f32 0.5, %v4494_v7  ;;  %7319 = verf.f32 %v4747_v15 }
0x1087   :  { %v4750_v25 = vmul.f32 0.70710677, %v9298_v60  ;;  %v9310_v43 = vadd.f32 %v9250_v1, %v9177_v34  ;;  %v9621_v24 = vpack.c.bf16 %v9224_v11, %v9219_v32  ;;  %v9622_v49 = vpack.c.bf16 %v9229_v9, %v9227_v38 }
0x1088   :  { %v4869_v44 = vadd.f32 1.0, %v7306_v5  ;;  %7321 = verf.f32 %v4749_v13  ;;  %v4615_v27 = vadd.f32 %v9252_v56, %v9179_v0  ;;  %v9322_v14 = vadd.f32 %v9255_v31, %v9181_v17  ;;  %v7310_v7 = vpop.eup %7309 }
0x1089   :  { %5306 = vmatmul.mubr.bf16.vlgmr.msra.gmra.mrb[128].mxu1 %v9621_v24  ;;  %5403 = vmatmul.mubr.bf16.vlgmr.msra.gmra.mrb[136].mxu0 %v9622_v49  ;;  %v4930_v1 = vmul.f32 %v4866_v55, %v9242_v52  ;;  %v4682_v4 = vmul.f32 0.5, %v4607_v26  ;;  %7323 = verf.f32 %v4748_v63  ;;  %v4751_v32 = vmul.f32 0.70710677, %v9310_v43  ;;  %v7312_v11 = vpop.eup %7311 }
0x108a   :  { %v4931_v38 = vmul.f32 %v4867_v30, %v9262_v50  ;;  %v4868_v9 = vadd.f32 1.0, %v7308_v6  ;;  %7325 = verf.f32 %v4750_v25  ;;  %v4753_v40 = vmul.f32 0.70710677, %v4615_v27  ;;  %v7314_v62 = vpop.eup %7313 }
0x108b   :  { %v4871_v2 = vadd.f32 1.0, %v7312_v11  ;;  %7327 = verf.f32 %v4751_v32  ;;  %v4752_v56 = vmul.f32 0.70710677, %v9322_v14  ;;  %v4617_v31 = vadd.f32 %v9257_v54, %v9183_v8 }
0x108c   :  { %v4933_v52 = vmul.f32 %v4869_v44, %v9264_v18  ;;  %v4873_v26 = vadd.f32 1.0, %v7314_v62  ;;  %7329 = verf.f32 %v4753_v40  ;;  %v4984_v47 = vpack.c.bf16 %v4928_v57, %v9280_v58 }
0x108d   :  { %v7316_v10 = vpop.eup %7315  ;;  %v4870_v41 = vadd.f32 1.0, %v7310_v7  ;;  %v4935_v50 = vmul.f32 %v4871_v2, %v4679_v23  ;;  %7331 = verf.f32 %v4752_v56  ;;  %v4754_v15 = vmul.f32 0.70710677, %v4617_v31 }
0x108e   :  { %v7318_v36 = vpop.eup %7317  ;;  %v4937_v35 = vmul.f32 %v4873_v26, %v4681_v51  ;;  %v4872_v5 = vadd.f32 1.0, %v7316_v10  ;;  %5313 = vmatprep.mubr.bf16.mxu1 %v4984_v47  ;;  %v4986_v55 = vpack.c.bf16 %v4930_v1, %v9283_v61  ;;  %v4983_v13 = vpack.c.bf16 %v4927_v28, %v9268_v37 }
0x108f   :  { %v4874_v54 = vadd.f32 1.0, %v7318_v36  ;;  %7333 = verf.f32 %v4754_v15  ;;  %v4985_v18 = vpack.c.bf16 %v4929_v59, %v9273_v53  ;;  %v4987_v30 = vpack.c.bf16 %v4935_v50, %v4931_v38 }
0x1090   :  { %v4932_v58 = vmul.f32 %v4868_v9, %v9270_v46  ;;  %v4936_v57 = vmul.f32 %v4872_v5, %v4680_v20  ;;  %5410 = vmatprep.mubr.bf16.mxu0 %v4986_v55  ;;  %v4989_v23 = vpack.c.bf16 %v4937_v35, %v4933_v52  ;;  %v7320_v63 = vpop.eup %7319  ;;  %v4934_v51 = vmul.f32 %v4870_v41, %v9288_v21 }
0x1091   :  { %5314 = vmatmul.mubr.bf16.gmra.mrb[132].mxu1 %v4983_v13  ;;  %v4938_v6 = vmul.f32 %v4874_v54, %v4682_v4  ;;  %5411 = vmatmul.mubr.bf16.gmra.mrb[140].mxu0 %v4985_v18  ;;  %v4875_v49 = vadd.f32 1.0, %v7320_v63  ;;  %v4683_v59 = vmul.f32 0.5, %v9286_v16  ;;  %v4685_v44 = vmul.f32 0.5, %v9292_v42 }
0x1092   :  { %v7322_v25 = vpop.eup %7321  ;;  %v4988_v61 = vpack.c.bf16 %v4936_v57, %v4932_v58  ;;  %v4687_v21 = vmul.f32 0.5, %v9310_v43  ;;  %v4684_v32 = vmul.f32 0.5, %v9295_v33  ;;  %v4689_v11 = vmul.f32 0.5, %v4615_v27 }
0x1093   :  { %v7324_v24 = vpop.eup %7323  ;;  %v4990_v37 = vpack.c.bf16 %v4938_v6, %v4934_v51  ;;  %v4877_v46 = vadd.f32 1.0, %v7322_v25  ;;  %v4688_v9 = vmul.f32 0.5, %v9322_v14  ;;  %v4939_v40 = vmul.f32 %v4875_v49, %v4683_v59 }
0x1094   :  { %v7326_v28 = vpop.eup %7325  ;;  %5321 = vmatprep.mubr.bf16.mxu1 %v4988_v61  ;;  %v4876_v7 = vadd.f32 1.0, %v7324_v24  ;;  %v4686_v42 = vmul.f32 0.5, %v9298_v60  ;;  %v4690_v47 = vmul.f32 0.5, %v4617_v31 }
0x1095   :  { %v7328_v53 = vpop.eup %7327  ;;  %5418 = vmatprep.mubr.bf16.mxu0 %v4990_v37  ;;  %v4878_v62 = vadd.f32 1.0, %v7326_v28  ;;  %v4941_v52 = vmul.f32 %v4877_v46, %v4685_v44 }
0x1096   :  { %v7330_v20 = vpop.eup %7329  ;;  %v4879_v1 = vadd.f32 1.0, %v7328_v53  ;;  %v4940_v43 = vmul.f32 %v4876_v7, %v4684_v32 }
0x1097   :  { %v7332_v4 = vpop.eup %7331  ;;  %v4881_v38 = vadd.f32 1.0, %v7330_v20  ;;  %v4942_v50 = vmul.f32 %v4878_v62, %v4686_v42 }
0x1098   :  { %v4943_v2 = vmul.f32 %v4879_v1, %v4687_v21  ;;  %v4880_v16 = vadd.f32 1.0, %v7332_v4 }
0x1099   :  { %5322 = vmatmul.mubr.bf16.gmra.mrb[136].mxu1 %v4987_v30  ;;  %v7334_v56 = vpop.eup %7333  ;;  %v4945_v26 = vmul.f32 %v4881_v38, %v4689_v11  ;;  %5419 = vmatmul.mubr.bf16.gmra.mrb[144].mxu0 %v4989_v23 }
0x109a   :  { %v4944_v10 = vmul.f32 %v4880_v16, %v4688_v9  ;;  %v4882_v41 = vadd.f32 1.0, %v7334_v56  ;;  %v4991_v33 = vpack.c.bf16 %v4943_v2, %v4939_v40 }
0x109b   :  { %v4993_v27 = vpack.c.bf16 %v4945_v26, %v4941_v52 }
0x109c   :  { %v4946_v15 = vmul.f32 %v4882_v41, %v4690_v47  ;;  %v4992_v14 = vpack.c.bf16 %v4944_v10, %v4940_v43 }
0x109e   :  { %5329 = vmatprep.mubr.bf16.mxu1 %v4992_v14  ;;  %v4994_v36 = vpack.c.bf16 %v4946_v15, %v4942_v50 }
0x10a0   :  { %5426 = vmatprep.mubr.bf16.mxu0 %v4994_v36 }
0x10a1   :  { %5330 = vmatmul.mubr.bf16.gmra.mrb[140].mxu1 %v4991_v33  ;;  %5427 = vmatmul.mubr.bf16.gmra.mrb[148].mxu0 %v4993_v27 }
0x10e6   :  { %v4507_v35 = vpop.f32.mrb[112].mxu1  ;;  %v4620_v5 = vpop.f32.mrb[120].mxu0 }
0x10e7   :  { %v4508_v60 = vadd.f32 %v4507_v35, %v9177_v34  ;;  %v4621_v31 = vadd.f32 %v4620_v5, %v9179_v0  ;;  %v4509_v55 = vpop.f32.mrb[113].mxu1  ;;  %v4622_v13 = vpop.f32.mrb[121].mxu0 }
0x10e8   :  { %v4510_v54 = vadd.f32 %v4509_v55, %v9181_v17  ;;  %v4623_v18 = vadd.f32 %v4622_v13, %v9183_v8  ;;  %v4511_v30 = vpop.f32.mrb[114].mxu1  ;;  %v4624_v58 = vpop.f32.mrb[122].mxu0 }
0x10e9   :  { %v4755_v57 = vmul.f32 0.70710677, %v4508_v60  ;;  %v4757_v23 = vmul.f32 0.70710677, %v4621_v31  ;;  %v4512_v6 = vadd.f32 %v4511_v30, %v9177_v34  ;;  %v4625_v25 = vadd.f32 %v4624_v58, %v9179_v0  ;;  %v4513_v61 = vpop.f32.mrb[115].mxu1  ;;  %v4626_v24 = vpop.f32.mrb[123].mxu0 }
0x10ea   :  { %v4756_v63 = vmul.f32 0.70710677, %v4510_v54  ;;  %v4758_v51 = vmul.f32 0.70710677, %v4623_v18  ;;  %v4514_v37 = vadd.f32 %v4513_v61, %v9181_v17  ;;  %v4627_v28 = vadd.f32 %v4626_v24, %v9183_v8 }
0x10eb   :  { %7335 = verf.f32 %v4755_v57  ;;  %v4759_v49 = vmul.f32 0.70710677, %v4512_v6  ;;  %v4761_v53 = vmul.f32 0.70710677, %v4625_v25  ;;  %v4691_v56 = vmul.f32 0.5, %v4508_v60 }
0x10ec   :  { %7337 = verf.f32 %v4757_v23  ;;  %v4760_v59 = vmul.f32 0.70710677, %v4514_v37  ;;  %v4762_v20 = vmul.f32 0.70710677, %v4627_v28  ;;  %v4693_v41 = vmul.f32 0.5, %v4621_v31 }
0x10ed   :  { %7339 = verf.f32 %v4756_v63  ;;  %v4692_v33 = vmul.f32 0.5, %v4510_v54  ;;  %v4694_v27 = vmul.f32 0.5, %v4623_v18  ;;  %v4695_v15 = vmul.f32 0.5, %v4512_v6 }
0x10ee   :  { %7341 = verf.f32 %v4758_v51  ;;  %v4517_v46 = vpop.f32.mrb[116].mxu1  ;;  %v4630_v7 = vpop.f32.mrb[124].mxu0  ;;  %v9358_v14 = vmul.f32 0.5, %v4625_v25  ;;  %v9361_v13 = vmul.f32 0.5, %v4514_v37  ;;  %v9363_v30 = vmul.f32 0.5, %v4627_v28 }
0x10ef   :  { %7343 = verf.f32 %v4759_v49  ;;  %v4518_v44 = vadd.f32 %v4517_v46, %v9177_v34  ;;  %v4519_v21 = vpop.f32.mrb[117].mxu1  ;;  %v4631_v1 = vadd.f32 %v4630_v7, %v9179_v0  ;;  %v4632_v32 = vpop.f32.mrb[125].mxu0 }
0x10f0   :  { %7345 = verf.f32 %v4761_v53  ;;  %v4520_v4 = vadd.f32 %v4519_v21, %v9181_v17  ;;  %v4521_v11 = vpop.f32.mrb[118].mxu1  ;;  %v4633_v9 = vadd.f32 %v4632_v32, %v9183_v8  ;;  %v4634_v40 = vpop.f32.mrb[126].mxu0 }
0x10f1   :  { %7347 = verf.f32 %v4760_v59  ;;  %v4763_v38 = vmul.f32 0.70710677, %v4518_v44  ;;  %v4523_v62 = vpop.f32.mrb[119].mxu1  ;;  %v4765_v2 = vmul.f32 0.70710677, %v4631_v1  ;;  %v4636_v16 = vpop.f32.mrb[127].mxu0  ;;  %v4522_v26 = vadd.f32 %v4521_v11, %v9177_v34 }
0x10f2   :  { %7349 = verf.f32 %v4762_v20  ;;  %v4764_v52 = vmul.f32 0.70710677, %v4520_v4  ;;  %v4766_v42 = vmul.f32 0.70710677, %v4633_v9  ;;  %v4635_v47 = vadd.f32 %v4634_v40, %v9179_v0 }
0x10f3   :  { %7351 = verf.f32 %v4763_v38  ;;  %v4524_v43 = vadd.f32 %v4523_v62, %v9181_v17  ;;  %v4767_v36 = vmul.f32 0.70710677, %v4522_v26  ;;  %v4637_v35 = vadd.f32 %v4636_v16, %v9183_v8 }
0x10f4   :  { %7353 = verf.f32 %v4765_v2  ;;  %v4769_v58 = vmul.f32 0.70710677, %v4635_v47  ;;  %v9365_v18 = vmul.f32 0.5, %v4518_v44  ;;  %v9367_v57 = vmul.f32 0.5, %v4631_v1 }
0x10f5   :  { %v7336_v10 = vpop.eup %7335  ;;  %7355 = verf.f32 %v4764_v52  ;;  %v4768_v23 = vmul.f32 0.70710677, %v4524_v43  ;;  %v9369_v61 = vmul.f32 0.5, %v4520_v4  ;;  %v9371_v24 = vmul.f32 0.5, %v4633_v9 }
0x10f6   :  { %v7338_v50 = vpop.eup %7337  ;;  %v4527_v5 = vpop.f32.mrb[120].mxu1  ;;  %7357 = verf.f32 %v4766_v42  ;;  %v4883_v25 = vadd.f32 1.0, %v7336_v10  ;;  %v4770_v46 = vmul.f32 0.70710677, %v4637_v35  ;;  %v9377_v11 = vmul.f32 0.5, %v4522_v26 }
0x10f7   :  { %v4640_v60 = vpop.f32.mrb[128].mxu0  ;;  %v7340_v55 = vpop.eup %7339  ;;  %7359 = verf.f32 %v4767_v36  ;;  %v4885_v53 = vadd.f32 1.0, %v7338_v50  ;;  %v4528_v1 = vadd.f32 %v4527_v5, %v9177_v34  ;;  %v9379_v38 = vmul.f32 0.5, %v4635_v47 }
0x10f8   :  { %v4529_v31 = vpop.f32.mrb[121].mxu1  ;;  %v7342_v54 = vpop.eup %7341  ;;  %7361 = verf.f32 %v4769_v58  ;;  %v4884_v59 = vadd.f32 1.0, %v7340_v55  ;;  %v4641_v4 = vadd.f32 %v4640_v60, %v9179_v0  ;;  %v9382_v62 = vmul.f32 %v4883_v25, %v4691_v56 }
0x10f9   :  { %v4642_v63 = vpop.f32.mrb[129].mxu0  ;;  %v4531_v51 = vpop.f32.mrb[122].mxu1  ;;  %7363 = verf.f32 %v4768_v23  ;;  %v4886_v7 = vadd.f32 1.0, %v7342_v54  ;;  %v4530_v9 = vadd.f32 %v4529_v31, %v9181_v17  ;;  %v9384_v16 = vmul.f32 0.5, %v4524_v43 }
0x10fa   :  { %v7344_v6 = vpop.eup %7343  ;;  %v4644_v37 = vpop.f32.mrb[130].mxu0  ;;  %7365 = verf.f32 %v4770_v46  ;;  %v4771_v52 = vmul.f32 0.70710677, %v4528_v1  ;;  %v9386_v10 = vmul.f32 %v4885_v53, %v4693_v41  ;;  %v9388_v50 = vmul.f32 %v4884_v59, %v4692_v33 }
0x10fb   :  { %v4533_v28 = vpop.f32.mrb[123].mxu1  ;;  %v7346_v49 = vpop.eup %7345  ;;  %v4887_v21 = vadd.f32 1.0, %v7344_v6  ;;  %v9390_v36 = vmul.f32 0.5, %v4637_v35  ;;  %v4773_v26 = vmul.f32 0.70710677, %v4641_v4  ;;  %v9392_v55 = vmul.f32 %v4886_v7, %v4694_v27 }
0x10fc   :  { %v9373_v20 = vpop.f32.mrb[131].mxu0  ;;  %v7348_v44 = vpop.eup %7347  ;;  %v4889_v2 = vadd.f32 1.0, %v7346_v49  ;;  %7367 = verf.f32 %v4771_v52  ;;  %v4772_v41 = vmul.f32 0.70710677, %v4530_v9  ;;  %v4532_v49 = vadd.f32 %v4531_v51, %v9177_v34 }
0x10fd   :  { %v7350_v32 = vpop.eup %7349  ;;  %v9394_v58 = vmul.f32 %v4887_v21, %v4695_v15  ;;  %v4888_v56 = vadd.f32 1.0, %v7348_v44  ;;  %7369 = verf.f32 %v4773_v26  ;;  %v4643_v15 = vadd.f32 %v4642_v63, %v9183_v8 }
0x10fe   :  { %v7352_v40 = vpop.eup %7351  ;;  %v4537_v47 = vpop.f32.mrb[124].mxu1  ;;  %v4890_v54 = vadd.f32 1.0, %v7350_v32  ;;  %v9401_v25 = vmul.f32 %v4889_v2, %v9358_v14  ;;  %7371 = verf.f32 %v4772_v41  ;;  %v4645_v7 = vadd.f32 %v4644_v37, %v9179_v0 }
0x10ff   :  { %v7354_v42 = vpop.eup %7353  ;;  %v4650_v5 = vpop.f32.mrb[132].mxu0  ;;  %v4891_v23 = vadd.f32 1.0, %v7352_v40  ;;  %v4534_v21 = vadd.f32 %v4533_v28, %v9181_v17  ;;  %v4952_v14 = vmul.f32 %v4888_v56, %v9361_v13  ;;  %v4707_v40 = vmul.f32 0.5, %v4528_v1 }
0x1100   :  { %v7356_v60 = vpop.eup %7355  ;;  %v4539_v43 = vpop.f32.mrb[125].mxu1  ;;  %v4893_v27 = vadd.f32 1.0, %v7354_v42  ;;  %v9412_v2 = vmul.f32 0.5, %v4641_v4  ;;  %v4774_v63 = vmul.f32 0.70710677, %v4643_v15  ;;  %v4954_v51 = vmul.f32 %v4890_v54, %v9363_v30 }
0x1101   :  { %v4652_v31 = vpop.f32.mrb[133].mxu0  ;;  %v9396_v33 = vpop.f32.mrb[126].mxu1  ;;  %v4892_v44 = vadd.f32 1.0, %v7356_v60  ;;  %v9416_v42 = vmul.f32 %v4891_v23, %v9365_v18  ;;  %v9418_v26 = vmul.f32 0.5, %v4530_v9  ;;  %v4775_v60 = vmul.f32 0.70710677, %v4532_v49 }
0x1102   :  { %v9398_v35 = vpop.f32.mrb[134].mxu0  ;;  %v7358_v6 = vpop.eup %7357  ;;  %v9421_v37 = vmul.f32 %v4893_v27, %v9367_v57  ;;  %7373 = verf.f32 %v4774_v63  ;;  %v4777_v41 = vmul.f32 0.70710677, %v4645_v7  ;;  %v4776_v56 = vmul.f32 0.70710677, %v4534_v21 }
0x1103   :  { %v9405_v53 = vpop.f32.mrb[127].mxu1  ;;  %v9407_v59 = vpop.f32.mrb[135].mxu0  ;;  %v4894_v28 = vadd.f32 1.0, %v7358_v6  ;;  %v9424_v1 = vmul.f32 %v4892_v44, %v9369_v61  ;;  %7375 = verf.f32 %v4775_v60  ;;  %v4647_v18 = vadd.f32 %v9373_v20, %v9183_v8 }
0x1104   :  { %v7360_v46 = vpop.eup %7359  ;;  %7377 = verf.f32 %v4777_v41  ;;  %v9429_v57 = vadd.f32 %v4537_v47, %v9177_v34  ;;  %v9432_v9 = vadd.f32 %v4650_v5, %v9179_v0  ;;  %v9435_v23 = vadd.f32 %v4539_v43, %v9181_v17 }
0x1105   :  { %v7362_v32 = vpop.eup %7361  ;;  %v4895_v4 = vadd.f32 1.0, %v7360_v46  ;;  %7379 = verf.f32 %v4776_v56  ;;  %v9438_v6 = vmul.f32 %v4894_v28, %v9371_v24  ;;  %v4778_v46 = vmul.f32 0.70710677, %v4647_v18 }
0x1106   :  { %v7364_v52 = vpop.eup %7363  ;;  %v4897_v30 = vadd.f32 1.0, %v7362_v32  ;;  %v9441_v44 = vadd.f32 %v4652_v31, %v9183_v8  ;;  %v9443_v32 = vmul.f32 0.5, %v4643_v15  ;;  %v4711_v47 = vmul.f32 0.5, %v4532_v49 }
0x1107   :  { %v7366_v13 = vpop.eup %7365  ;;  %v4896_v54 = vadd.f32 1.0, %v7364_v52  ;;  %v4713_v63 = vmul.f32 0.5, %v4645_v7  ;;  %v4779_v5 = vmul.f32 0.70710677, %v9429_v57  ;;  %v9447_v52 = vmul.f32 %v4895_v4, %v9377_v11 }
0x1108   :  { %v7368_v61 = vpop.eup %7367  ;;  %v4898_v27 = vadd.f32 1.0, %v7366_v13  ;;  %v9450_v43 = vmul.f32 %v4897_v30, %v9379_v38  ;;  %7381 = verf.f32 %v4778_v46  ;;  %v4781_v24 = vmul.f32 0.70710677, %v9432_v9 }
0x1109   :  { %v7370_v20 = vpop.eup %7369  ;;  %v4960_v31 = vmul.f32 %v4896_v54, %v9384_v16  ;;  %v4899_v28 = vadd.f32 1.0, %v7368_v61  ;;  %v4712_v41 = vmul.f32 0.5, %v4534_v21  ;;  %v4780_v15 = vmul.f32 0.70710677, %v9435_v23 }
0x110a   :  { %v7372_v60 = vpop.eup %7371  ;;  %v4962_v49 = vmul.f32 %v4898_v27, %v9390_v36  ;;  %v4901_v7 = vadd.f32 1.0, %v7370_v20  ;;  %v4714_v13 = vmul.f32 0.5, %v4647_v18  ;;  %v4782_v11 = vmul.f32 0.70710677, %v9441_v44 }
0x110b   :  { %7383 = verf.f32 %v4779_v5  ;;  %v4996_v38 = vpack.c.bf16 %v4952_v14, %v9388_v50  ;;  %v4998_v4 = vpack.c.bf16 %v4954_v51, %v9392_v55  ;;  %v4542_v56 = vadd.f32 %v9396_v33, %v9177_v34 }
0x110c   :  { %v7374_v30 = vpop.eup %7373  ;;  %v4900_v16 = vadd.f32 1.0, %v7372_v60  ;;  %7385 = verf.f32 %v4781_v24  ;;  %v4655_v21 = vadd.f32 %v9398_v35, %v9179_v0  ;;  %v4995_v36 = vpack.c.bf16 %v9394_v58, %v9382_v62 }
0x110d   :  { %v7376_v54 = vpop.eup %7375  ;;  %v9465_v18 = vmul.f32 %v4899_v28, %v4707_v40  ;;  %7387 = verf.f32 %v4780_v15  ;;  %5337 = vmatprep.mubr.bf16.mxu1 %v4996_v38  ;;  %5434 = vmatprep.mubr.bf16.mxu0 %v4998_v4  ;;  %v4783_v50 = vmul.f32 0.70710677, %v4542_v56  ;;  %v4997_v55 = vpack.c.bf16 %v9401_v25, %v9386_v10 }
0x110e   :  { %v7378_v34 = vpop.eup %7377  ;;  %v4903_v33 = vadd.f32 1.0, %v7376_v54  ;;  %7389 = verf.f32 %v4782_v11  ;;  %v4785_v14 = vmul.f32 0.70710677, %v4655_v21  ;;  %5338 = vmatmul.mubr.bf16.gmra.mrb[144].mxu1 %v4995_v36  ;;  %v4544_v0 = vadd.f32 %v9405_v53, %v9181_v17 }
0x110f   :  { %v7380_v35 = vpop.eup %7379  ;;  %v9472_v62 = vmul.f32 %v4901_v7, %v9412_v2  ;;  %v4905_v58 = vadd.f32 1.0, %v7378_v34  ;;  %7391 = verf.f32 %v4783_v50  ;;  %5435 = vmatmul.mubr.bf16.gmra.mrb[152].mxu0 %v4997_v55  ;;  %v4657_v40 = vadd.f32 %v9407_v59, %v9183_v8 }
0x1110   :  { %v4964_v10 = vmul.f32 %v4900_v16, %v9418_v26  ;;  %v4967_v25 = vmul.f32 %v4903_v33, %v4711_v47  ;;  %v4904_v51 = vadd.f32 1.0, %v7380_v35  ;;  %7393 = verf.f32 %v4785_v14 }
0x1111   :  { %v4902_v61 = vadd.f32 1.0, %v7374_v30  ;;  %v4969_v27 = vmul.f32 %v4905_v58, %v4713_v63  ;;  %v4784_v46 = vmul.f32 0.70710677, %v4544_v0  ;;  %v4786_v20 = vmul.f32 0.70710677, %v4657_v40 }
0x1112   :  { %v7382_v17 = vpop.eup %7381  ;;  %v4968_v53 = vmul.f32 %v4904_v51, %v4712_v41  ;;  %v5000_v2 = vpack.c.bf16 %v4960_v31, %v9424_v1  ;;  %v5002_v5 = vpack.c.bf16 %v4962_v49, %v9438_v6  ;;  %v4999_v24 = vpack.c.bf16 %v9447_v52, %v9416_v42 }
0x1113   :  { %v4906_v60 = vadd.f32 1.0, %v7382_v17  ;;  %7395 = verf.f32 %v4784_v46  ;;  %v5001_v8 = vpack.c.bf16 %v9450_v43, %v9421_v37  ;;  %v5003_v59 = vpack.c.bf16 %v4967_v25, %v9465_v18 }
0x1114   :  { %7397 = verf.f32 %v4786_v20  ;;  %5345 = vmatprep.mubr.bf16.mxu1 %v5000_v2  ;;  %5442 = vmatprep.mubr.bf16.mxu0 %v5002_v5  ;;  %v5004_v26 = vpack.c.bf16 %v4968_v53, %v4964_v10  ;;  %v5005_v47 = vpack.c.bf16 %v4969_v27, %v9472_v62  ;;  %v4966_v1 = vmul.f32 %v4902_v61, %v9443_v32 }
0x1115   :  { %v7384_v63 = vpop.eup %7383  ;;  %v4970_v6 = vmul.f32 %v4906_v60, %v4714_v13  ;;  %v4715_v49 = vmul.f32 0.5, %v9429_v57  ;;  %v4719_v7 = vmul.f32 0.5, %v4542_v56  ;;  %v4717_v38 = vmul.f32 0.5, %v9432_v9 }
0x1116   :  { %v7386_v31 = vpop.eup %7385  ;;  %5346 = vmatmul.mubr.bf16.gmra.mrb[148].mxu1 %v4999_v24  ;;  %v4907_v37 = vadd.f32 1.0, %v7384_v63  ;;  %v4721_v32 = vmul.f32 0.5, %v4655_v21  ;;  %v4716_v34 = vmul.f32 0.5, %v9435_v23  ;;  %v4720_v33 = vmul.f32 0.5, %v4544_v0 }
0x1117   :  { %v7388_v42 = vpop.eup %7387  ;;  %5443 = vmatmul.mubr.bf16.gmra.mrb[156].mxu0 %v5001_v8  ;;  %5353 = vmatprep.mubr.bf16.mxu1 %v5004_v26  ;;  %v5006_v52 = vpack.c.bf16 %v4970_v6, %v4966_v1  ;;  %v4909_v41 = vadd.f32 1.0, %v7386_v31  ;;  %v4718_v56 = vmul.f32 0.5, %v9441_v44  ;;  %v4722_v35 = vmul.f32 0.5, %v4657_v40  ;;  %v9493_v44 = vld [vmem:[%s9553_s11] ss:$0 sm:$0xff]  ;;  %s7553_s11 = smov [#allocation11]  }
0x1118   :  { %v7390_v28 = vpop.eup %7389  ;;  %v4971_v4 = vmul.f32 %v4907_v37, %v4715_v49  ;;  %v4908_v30 = vadd.f32 1.0, %v7388_v42  ;;  %s5568_s19 = sshll.u32 %s7553_s11, 4  ;;  %s5569_s19 = int_to_ptr.vmem [resolvable:$true] %s5568_s19 }
0x1119   :  { %v7392_v43 = vpop.eup %7391  ;;  %5450 = vmatprep.mubr.bf16.mxu0 %v5006_v52  ;;  %v4973_v54 = vmul.f32 %v4909_v41, %v4717_v38  ;;  %v4910_v18 = vadd.f32 1.0, %v7390_v28  ;;  %s7509_s20 = scalar_lea.vmem %s5569_s19, 1024  ;;  %p7514_p13 = scmp.lt.s32.totalorder %s5569_s19, %s5569_s19 }
0x111a   :  { %v7394_v15 = vpop.eup %7393  ;;  %v4911_v11 = vadd.f32 1.0, %v7392_v43  ;;  %v4972_v62 = vmul.f32 %v4908_v30, %v4716_v34  ;;  %p7510_p12 = scmp.ne.s32.totalorder %s5569_s19, %s7509_s20  ;;  %p7515_p0 = scmp.lt.s32.totalorder %s7509_s20, %s7509_s20 }
0x111b   :  { %v4913_v13 = vadd.f32 1.0, %v7394_v15  ;;  %v4974_v10 = vmul.f32 %v4910_v18, %v4718_v56 }
0x111c   :  { %v4975_v16 = vmul.f32 %v4911_v11, %v4719_v7  ;;  %p7516_p1 = por %p7515_p0, %p7514_p13 }
0x111d   :  { %v7396_v36 = vpop.eup %7395  ;;  %v4977_v50 = vmul.f32 %v4913_v13, %v4721_v32 }
0x111e   :  { %v7398_v55 = vpop.eup %7397  ;;  %v4912_v14 = vadd.f32 1.0, %v7396_v36  ;;  %5354 = vmatmul.mubr.bf16.gmra.mrb[152].mxu1 %v5003_v59  ;;  %v5007_v57 = vpack.c.bf16 %v4975_v16, %v4971_v4  ;;  %p7517_p2 = pnand %p7516_p1, %p7510_p12 }
0x111f   :  { %v4914_v9 = vadd.f32 1.0, %v7398_v55  ;;  %5451 = vmatmul.mubr.bf16.gmra.mrb[160].mxu0 %v5005_v47  ;;  %v5009_v21 = vpack.c.bf16 %v4977_v50, %v4973_v54 }
0x1120   :  { %v4976_v58 = vmul.f32 %v4912_v14, %v4720_v33 }
0x1121   :  { %v4978_v25 = vmul.f32 %v4914_v9, %v4722_v35 }
0x1122   :  { %v5008_v51 = vpack.c.bf16 %v4976_v58, %v4972_v62 }
0x1123   :  { %v5010_v61 = vpack.c.bf16 %v4978_v25, %v4974_v10 }
0x1124   :  { %5361 = vmatprep.mubr.bf16.mxu1 %v5008_v51 }
0x1125   :  { %5458 = vmatprep.mubr.bf16.mxu0 %v5010_v61 }
0x1126   :  { %5362 = vmatmul.mubr.bf16.gmra.mrb[156].mxu1 %v5007_v57 }
0x1127   :  { %5459 = vmatmul.mubr.bf16.gmra.mrb[164].mxu0 %v5009_v21 }
0x115c   :  { %v6232_v23 = vpop.f32.mrb[128].mxu1  ;;  %v6296_v0 = vpop.f32.mrb[136].mxu0 }
0x115d   :  { %v6233_v40 = vpop.f32.mrb[129].mxu1  ;;  %v6297_v27 = vpop.f32.mrb[137].mxu0 }
0x115e   :  { %v6234_v46 = vadd.f32 %v6233_v40, %v6232_v23  ;;  %v6298_v20 = vadd.f32 %v6297_v27, %v6296_v0  ;;  %v6235_v17 = vpop.f32.mrb[130].mxu1  ;;  %v6299_v53 = vpop.f32.mrb[138].mxu0 }
0x115f   :  { %v6236_v2 = vpop.f32.mrb[131].mxu1  ;;  %v6300_v5 = vpop.f32.mrb[139].mxu0 }
0x1160   :  { %v5308_v24 = vadd.f32 %v6234_v46, %v9493_v44  ;;  %v6237_v60 = vadd.f32 %v6236_v2, %v6235_v17  ;;  %v6301_v8 = vadd.f32 %v6300_v5, %v6299_v53 }
0x1162   :  { %v5405_v59 = vadd.f32 %v6298_v20, %v5308_v24  ;;  %v5311_v26 = vadd.f32 %v6237_v60, %v9493_v44 }
0x1164   :  { %v5408_v47 = vadd.f32 %v6301_v8, %v5311_v26  ;;  %v6238_v63 = vpop.f32.mrb[132].mxu1  ;;  %v5467_v1 = vadd.f32 %v8930_v19, %v5405_v59  ;;  %v6302_v31 = vpop.f32.mrb[140].mxu0 }
0x1165   :  { %v6239_v42 = vpop.f32.mrb[133].mxu1  ;;  %v6303_v28 = vpop.f32.mrb[141].mxu0 }
0x1166   :  { %v5468_v6 = vadd.f32 %v8945_v45, %v5408_v47  ;;  %v6240_v52 = vadd.f32 %v6239_v42, %v6238_v63  ;;  %v6241_v37 = vpop.f32.mrb[134].mxu1  ;;  %v6304_v41 = vadd.f32 %v6303_v28, %v6302_v31  ;;  %v6305_v15 = vpop.f32.mrb[142].mxu0 }
0x1167   :  { %v6242_v49 = vpop.f32.mrb[135].mxu1  ;;  %v6306_v38 = vpop.f32.mrb[143].mxu0 }
0x1168   :  { %v5959_v43 = vpack.c.bf16 %v5468_v6, %v5467_v1  ;;  %v5316_v7 = vadd.f32 %v6240_v52, %v9493_v44  ;;  %v6243_v11 = vadd.f32 %v6242_v49, %v6241_v37  ;;  %v6307_v32 = vadd.f32 %v6306_v38, %v6305_v15 }
0x116a   :  { %5960 = vst [vmem:[#allocation11] sm:$0xff] %v5959_v43   ;;  %v5413_v13 = vadd.f32 %v6304_v41, %v5316_v7  ;;  %v5319_v19 = vadd.f32 %v6243_v11, %v9493_v44 }
0x116c   :  { %v5416_v4 = vadd.f32 %v6307_v32, %v5319_v19  ;;  %v6244_v45 = vpop.f32.mrb[136].mxu1  ;;  %v6308_v30 = vpop.f32.mrb[144].mxu0  ;;  %v5469_v36 = vadd.f32 %v8934_v12, %v5413_v13  ;;  %v9623_v13 = vld [vmem:[#allocation29_spill] sm:$0xff] }
0x116d   :  { %v6245_v16 = vpop.f32.mrb[137].mxu1  ;;  %v6309_v50 = vpop.f32.mrb[145].mxu0 }
0x116e   :  { %v5470_v54 = vadd.f32 %v8938_v3, %v5416_v4  ;;  %v6246_v18 = vadd.f32 %v6245_v16, %v6244_v45  ;;  %v6247_v55 = vpop.f32.mrb[138].mxu1  ;;  %v6310_v34 = vadd.f32 %v6309_v50, %v6308_v30  ;;  %v6311_v33 = vpop.f32.mrb[146].mxu0  ;;  %v9624_v4 = vld [vmem:[#allocation16_spill] sm:$0xff] }
0x116f   :  { %v6248_v14 = vpop.f32.mrb[139].mxu1  ;;  %v6312_v9 = vpop.f32.mrb[147].mxu0 }
0x1170   :  { %v5964_v57 = vpack.c.bf16 %v5470_v54, %v5469_v36  ;;  %v5324_v56 = vadd.f32 %v6246_v18, %v9493_v44  ;;  %v6249_v35 = vadd.f32 %v6248_v14, %v6247_v55  ;;  %v6313_v21 = vadd.f32 %v6312_v9, %v6311_v33 }
0x1172   :  { %6017 = vst [vmem:[#allocation11 + $0x8] sm:$0xff] %v5964_v57   ;;  %v5421_v62 = vadd.f32 %v6310_v34, %v5324_v56  ;;  %v5327_v58 = vadd.f32 %v6249_v35, %v9493_v44 }
0x1174   :  { %v5424_v10 = vadd.f32 %v6313_v21, %v5327_v58  ;;  %v6250_v12 = vpop.f32.mrb[140].mxu1  ;;  %v6314_v25 = vpop.f32.mrb[148].mxu0  ;;  %v5471_v51 = vadd.f32 %v8942_v29, %v5421_v62 }
0x1175   :  { %v6251_v3 = vpop.f32.mrb[141].mxu1  ;;  %v6315_v0 = vpop.f32.mrb[149].mxu0 }
0x1176   :  { %v5472_v61 = vadd.f32 %v8953_v39, %v5424_v10  ;;  %v6252_v23 = vadd.f32 %v6251_v3, %v6250_v12  ;;  %v6253_v40 = vpop.f32.mrb[142].mxu1  ;;  %v6316_v27 = vadd.f32 %v6315_v0, %v6314_v25  ;;  %v6317_v46 = vpop.f32.mrb[150].mxu0  ;;  %v9625_v10 = vld [vmem:[#allocation19_spill] sm:$0xff]  ;;  %v9626_v25 = vld [vmem:[#allocation30_spill] sm:$0xff] }
0x1177   :  { %v6254_v20 = vpop.f32.mrb[143].mxu1  ;;  %v6318_v5 = vpop.f32.mrb[151].mxu0 }
0x1178   :  { %v5969_v17 = vpack.c.bf16 %v5472_v61, %v5471_v51  ;;  %v5332_v53 = vadd.f32 %v6252_v23, %v9493_v44  ;;  %v6255_v2 = vadd.f32 %v6254_v20, %v6253_v40  ;;  %v6319_v24 = vadd.f32 %v6318_v5, %v6317_v46 }
0x117a   :  { %6018 = vst [vmem:[#allocation11 + $0x10] sm:$0xff] %v5969_v17   ;;  %v5429_v60 = vadd.f32 %v6316_v27, %v5332_v53  ;;  %v5335_v8 = vadd.f32 %v6255_v2, %v9493_v44 }
0x117c   :  { %v5432_v59 = vadd.f32 %v6319_v24, %v5335_v8  ;;  %v5473_v29 = vadd.f32 %v8950_v22, %v5429_v60 }
0x117e   :  { %v5474_v39 = vadd.f32 %v8958_v48, %v5432_v59 }
0x1180   :  { %v5974_v26 = vpack.c.bf16 %v5474_v39, %v5473_v29  ;;  %v9627_v39 = vld [vmem:[#allocation17_spill] sm:$0xff] }
0x1182   :  { %6019 = vst [vmem:[#allocation11 + $0x18] sm:$0xff] %v5974_v26  }
0x11e1   :  { %v6256_v47 = vpop.f32.mrb[144].mxu1 }
0x11e2   :  { %v6320_v63 = vpop.f32.mrb[152].mxu0  ;;  %v6257_v1 = vpop.f32.mrb[145].mxu1 }
0x11e3   :  { %v6258_v6 = vadd.f32 %v6257_v1, %v6256_v47  ;;  %v6321_v31 = vpop.f32.mrb[153].mxu0  ;;  %v6259_v42 = vpop.f32.mrb[146].mxu1  ;;  %v9628_v47 = vld [vmem:[#allocation31_spill] sm:$0xff] }
0x11e4   :  { %v6322_v52 = vadd.f32 %v6321_v31, %v6320_v63  ;;  %v6323_v28 = vpop.f32.mrb[154].mxu0  ;;  %v6260_v37 = vpop.f32.mrb[147].mxu1 }
0x11e5   :  { %v5340_v43 = vadd.f32 %v6258_v6, %v9493_v44  ;;  %v6261_v41 = vadd.f32 %v6260_v37, %v6259_v42  ;;  %v6324_v15 = vpop.f32.mrb[155].mxu0 }
0x11e6   :  { %v6325_v49 = vadd.f32 %v6324_v15, %v6323_v28 }
0x11e7   :  { %v5437_v7 = vadd.f32 %v6322_v52, %v5340_v43  ;;  %v5343_v22 = vadd.f32 %v6261_v41, %v9493_v44 }
0x11e9   :  { %v5440_v48 = vadd.f32 %v6325_v49, %v5343_v22  ;;  %v6262_v11 = vpop.f32.mrb[148].mxu1  ;;  %v5475_v19 = vadd.f32 %v9623_v13, %v5437_v7 }
0x11ea   :  { %v6326_v38 = vpop.f32.mrb[156].mxu0  ;;  %v6263_v32 = vpop.f32.mrb[149].mxu1 }
0x11eb   :  { %v5476_v45 = vadd.f32 %v9624_v4, %v5440_v48  ;;  %v6264_v30 = vadd.f32 %v6263_v32, %v6262_v11  ;;  %v6327_v16 = vpop.f32.mrb[157].mxu0  ;;  %v6265_v36 = vpop.f32.mrb[150].mxu1  ;;  %v9629_v11 = vld [vmem:[#allocation20_spill] sm:$0xff] }
0x11ec   :  { %v6328_v54 = vadd.f32 %v6327_v16, %v6326_v38  ;;  %v6329_v18 = vpop.f32.mrb[158].mxu0  ;;  %v6266_v50 = vpop.f32.mrb[151].mxu1  ;;  %v9630_v32 = vld [vmem:[#allocation32_spill] sm:$0xff] }
0x11ed   :  { %v5979_v55 = vpack.c.bf16 %v5476_v45, %v5475_v19  ;;  %v5348_v34 = vadd.f32 %v6264_v30, %v9493_v44  ;;  %v6267_v33 = vadd.f32 %v6266_v50, %v6265_v36  ;;  %v6330_v14 = vpop.f32.mrb[159].mxu0 }
0x11ee   :  { %v6331_v57 = vadd.f32 %v6330_v14, %v6329_v18 }
0x11ef   :  { %6020 = vst [vmem:[#allocation11 + $0x20] sm:$0xff] %v5979_v55   ;;  %v5445_v56 = vadd.f32 %v6328_v54, %v5348_v34  ;;  %v5351_v35 = vadd.f32 %v6267_v33, %v9493_v44 }
0x11f1   :  { %v5448_v9 = vadd.f32 %v6331_v57, %v5351_v35  ;;  %v6268_v21 = vpop.f32.mrb[152].mxu1  ;;  %v5477_v12 = vadd.f32 %v9625_v10, %v5445_v56 }
0x11f2   :  { %v6332_v62 = vpop.f32.mrb[160].mxu0  ;;  %v6269_v58 = vpop.f32.mrb[153].mxu1 }
0x11f3   :  { %v5478_v3 = vadd.f32 %v9626_v25, %v5448_v9  ;;  %v6270_v51 = vadd.f32 %v6269_v58, %v6268_v21  ;;  %v6333_v61 = vpop.f32.mrb[161].mxu0  ;;  %v6271_v23 = vpop.f32.mrb[154].mxu1 }
0x11f4   :  { %v6334_v0 = vadd.f32 %v6333_v61, %v6332_v62  ;;  %v6335_v40 = vpop.f32.mrb[162].mxu0  ;;  %v6272_v27 = vpop.f32.mrb[155].mxu1 }
0x11f5   :  { %v5984_v46 = vpack.c.bf16 %v5478_v3, %v5477_v12  ;;  %v5356_v20 = vadd.f32 %v6270_v51, %v9493_v44  ;;  %v6273_v17 = vadd.f32 %v6272_v27, %v6271_v23  ;;  %v6336_v53 = vpop.f32.mrb[163].mxu0 }
0x11f6   :  { %v6337_v2 = vadd.f32 %v6336_v53, %v6335_v40 }
0x11f7   :  { %6021 = vst [vmem:[#allocation11 + $0x28] sm:$0xff] %v5984_v46   ;;  %v5453_v5 = vadd.f32 %v6334_v0, %v5356_v20  ;;  %v5359_v24 = vadd.f32 %v6273_v17, %v9493_v44 }
0x11f9   :  { %v5456_v60 = vadd.f32 %v6337_v2, %v5359_v24  ;;  %v6274_v8 = vpop.f32.mrb[156].mxu1  ;;  %v5479_v26 = vadd.f32 %v9627_v39, %v5453_v5 }
0x11fa   :  { %v6338_v59 = vpop.f32.mrb[164].mxu0  ;;  %v6275_v29 = vpop.f32.mrb[157].mxu1 }
0x11fb   :  { %v5480_v63 = vadd.f32 %v9628_v47, %v5456_v60  ;;  %v6276_v1 = vadd.f32 %v6275_v29, %v6274_v8  ;;  %v6339_v6 = vpop.f32.mrb[165].mxu0  ;;  %v6277_v31 = vpop.f32.mrb[158].mxu1 }
0x11fc   :  { %v6340_v42 = vadd.f32 %v6339_v6, %v6338_v59  ;;  %v6341_v52 = vpop.f32.mrb[166].mxu0  ;;  %v6278_v28 = vpop.f32.mrb[159].mxu1 }
0x11fd   :  { %v5989_v37 = vpack.c.bf16 %v5480_v63, %v5479_v26  ;;  %v5364_v43 = vadd.f32 %v6276_v1, %v9493_v44  ;;  %v6279_v41 = vadd.f32 %v6278_v28, %v6277_v31  ;;  %v6342_v15 = vpop.f32.mrb[167].mxu0 }
0x11fe   :  { %v6343_v49 = vadd.f32 %v6342_v15, %v6341_v52 }
0x11ff   :  { %6022 = vst [vmem:[#allocation11 + $0x30] sm:$0xff] %v5989_v37   ;;  %v5461_v7 = vadd.f32 %v6340_v42, %v5364_v43  ;;  %v5367_v22 = vadd.f32 %v6279_v41, %v9493_v44 }
0x1201   :  { %v5464_v48 = vadd.f32 %v6343_v49, %v5367_v22  ;;  %v5481_v38 = vadd.f32 %v9629_v11, %v5461_v7 }
0x1203   :  { %v5482_v13 = vadd.f32 %v9630_v32, %v5464_v48 }
0x1205   :  { %v5994_v19 = vpack.c.bf16 %v5482_v13, %v5481_v38 }
0x1207   :  { %6023 = vst [vmem:[#allocation11 + $0x38] sm:$0xff] %v5994_v19  }
0x1208   :  { %7520 = shalt.err (!%p7517_p2)
}
0x1209   :  { %s7521_s24 = scalar_lea.hbm %s9554_s12, 1024 }
0x120a   :  { %p7522_p3 = scmp.ne.s32.totalorder %s9554_s12, %s7521_s24  ;;  %p7525_p4 = scmp.lt.u32.totalorder %s7521_s24, %s9554_s12 }
0x120c   :  { %p7527_p5 = pnand %p7525_p4, %p7522_p3 }
0x120e   :  { %7530 = shalt.err (!%p7527_p5)
}
0x120f   :  { %5574 = dma.vmem_to_hbm [thread:$0]  %s5569_s19, 1024, %s9554_s12, [#allocation4], %s7546_s8, %s7546_s8, %s7547_s18  }
0x1210   :  { %7537 = dma.done.wait [#allocation4], 1024  }
0x1211   :  { %7538 = vsyncadd [#allocation4], 4294966272 }
0x1212   :  { %5578 = vsyncpa [#allocation3], 1 }
0x1213   :  { %5579 = vsyncpa [#allocation6], 1 }
0x1214   :  { %5580 = vsyncpa [#allocation9], 1 }
0x1215   :  { %5581 = vsyncpa [#allocation4], 1 }

</bundles_post_ra>
